<compile_context>
chip_gen: v7x
topology: tpu7x:2x2x1
jax: 0.10.0
libtpu: 0.0.40
codegen_flags: <defaults>
</compile_context>

<pallas_src>
import functools
import math

import jax
import jax.numpy as jnp
from jax.experimental import pallas as pl
from jax.experimental.pallas import tpu as pltpu


def _round_up(a, b):
    return (a + b - 1) // b * b


def _transformer_layer_kernel(
    x_ref, kv_ref,
    wq_ref, bq_ref, wk_ref, bk_ref, wv_ref, bv_ref, wo_ref, bo_ref,
    g1_ref, be1_ref, w1_ref, b1_ref, w2_ref, b2_ref, g2_ref, be2_ref,
    out_ref, usage_ref,
    kh_scr, vh_scr,
    *, num_heads, head_dim, s_valid, t_valid, t_padded, eps,
):
    H, hd = num_heads, head_dim
    tq, E = x_ref.shape
    S = kv_ref.shape[0]                      # lane-padded kv length
    bf16 = jnp.bfloat16
    f32 = jnp.float32

    # ---- Once per batch element (first q block): project K/V into a bf16 VMEM
    #      cache in (H, S, hd) layout, and zero the usage accumulator.
    @pl.when(pl.program_id(1) == 0)
    def _():
        kvb = kv_ref[...].astype(bf16)
        k = jnp.dot(kvb, wk_ref[...], preferred_element_type=f32) + bk_ref[...]
        v = jnp.dot(kvb, wv_ref[...], preferred_element_type=f32) + bv_ref[...]
        kh_scr[...] = jnp.transpose(k.reshape(S, H, hd), (1, 0, 2)).astype(bf16)
        vh_scr[...] = jnp.transpose(v.reshape(S, H, hd), (1, 0, 2)).astype(bf16)
        usage_ref[...] = jnp.zeros_like(usage_ref)

    x = x_ref[...]                           # (tq, E) f32 residual path
    xb = x.astype(bf16)

    # Q projection (1/sqrt(head_dim) folded into wq/bq by the wrapper).
    q = jnp.dot(xb, wq_ref[...], preferred_element_type=f32) + bq_ref[...]
    qh = jnp.transpose(q.reshape(tq, H, hd), (1, 0, 2))          # (H, tq, hd)

    # Head-batched attention scores: (H, tq, hd) x (H, S, hd) -> (H, tq, S)
    scores = jnp.einsum('hqd,hkd->hqk', qh.astype(bf16), kh_scr[...],
                        preferred_element_type=f32)
    if s_valid < S:                          # mask lane-padding key columns
        kmask = jax.lax.broadcasted_iota(jnp.int32, (1, 1, S), 2) < s_valid
        scores = jnp.where(kmask, scores, -1e30)

    m = jnp.max(scores, axis=-1, keepdims=True)
    e = jnp.exp(scores - m)
    denom = jnp.sum(e, axis=-1, keepdims=True)
    # Exact reciprocal: the attention weights feed usage-based eviction.
    w = e * pl.reciprocal(denom)             # (H, tq, S) f32
    wb = w.astype(bf16)

    # ---- usage: sum over heads and (valid) queries, as an MXU ones-row matmul
    #      in f32, accumulated across q blocks.
    if t_valid == t_padded:
        ones_row = jnp.ones((1, H * tq), dtype=f32)
    else:
        q0 = pl.program_id(1) * tq
        q_idx = jax.lax.broadcasted_iota(jnp.int32, (1, H * tq), 1) % tq
        ones_row = ((q_idx + q0) < t_valid).astype(f32)
    usage_ref[...] += jnp.dot(ones_row, w.reshape(H * tq, S),
                              preferred_element_type=f32)

    # Context + output projection.
    ctx_h = jnp.einsum('hqk,hkd->hqd', wb, vh_scr[...],
                       preferred_element_type=f32)               # (H, tq, hd)
    # NOTE: one relayout + a single E-contraction matmul beats H per-head
    # hd-contraction matmuls on the MXU (hd << 128/256).
    ctx = jnp.transpose(ctx_h, (1, 0, 2)).reshape(tq, E)
    attn_out = jnp.dot(ctx.astype(bf16), wo_ref[...],
                       preferred_element_type=f32) + bo_ref[...]

    # Residual + LayerNorm 1 (f32).
    y = x + attn_out
    mu = jnp.mean(y, axis=-1, keepdims=True)
    var = jnp.mean((y - mu) ** 2, axis=-1, keepdims=True)
    x2 = (y - mu) * jax.lax.rsqrt(var + eps) * g1_ref[...] + be1_ref[...]

    # Feed-forward: Linear(E,4E) -> ReLU -> Linear(4E,E).
    # TODO(synk): for E >= ~1k on v7x (64 MiB VMEM) tile the 4E hidden dim over an
    # extra "arbitrary" grid axis / emit_pipeline so w1T/w2T need not stay resident.
    h1 = jnp.maximum(
        jnp.dot(x2.astype(bf16), w1_ref[...], preferred_element_type=f32)
        + b1_ref[...], 0.0)
    ff = jnp.dot(h1.astype(bf16), w2_ref[...], preferred_element_type=f32) + b2_ref[...]

    # Residual + LayerNorm 2.
    z = x2 + ff
    mu2 = jnp.mean(z, axis=-1, keepdims=True)
    var2 = jnp.mean((z - mu2) ** 2, axis=-1, keepdims=True)
    out_ref[...] = ((z - mu2) * jax.lax.rsqrt(var2 + eps)
                    * g2_ref[...] + be2_ref[...]).astype(out_ref.dtype)


def transformer_layer_forward(params, x, kv, num_heads):
    """Runs the Pallas kernel over a (batch, q-block) grid.

    Returns (out (B,T,E), usage_sum (B,S)) where usage_sum[b,k] =
    sum_{h,q} softmax_weights[b,h,q,k]  (per-head, un-averaged — matches
    average_attn_weights=False in the reference module).
    """
    B, T, E = x.shape
    S = kv.shape[1]
    H = num_heads
    hd = E // H

    # Lane-pad the kv length so scores / usage stores are lane-dense.
    S_pad = _round_up(S, 128)

    # q-block heuristic: bound the simultaneous f32 softmax intermediates
    # (scores, e, w ~ 3*H*qb*S_pad*4 bytes) so the kernel stays out of the
    # spill-bound regime and fits v7x's 64 MiB VMEM.
    budget = 24 << 20
    qb = 512
    while qb > 8 and 3 * H * qb * S_pad * 4 > budget:
        qb //= 2
    q_block = min(qb, _round_up(T, 8))
    T_pad = _round_up(T, q_block)
    nqb = T_pad // q_block

    x_p = x if T_pad == T else jnp.pad(x, ((0, 0), (0, T_pad - T), (0, 0)))
    kv_p = kv if S_pad == S else jnp.pad(kv, ((0, 0), (0, S_pad - S), (0, 0)))

    weight_order = [
        "wqT", "bq", "wkT", "bk", "wvT", "bv", "woT", "bo",
        "g1", "be1", "w1T", "b1", "w2T", "b2", "g2", "be2",
    ]
    weight_args = [params[name] for name in weight_order]

    kernel = functools.partial(
        _transformer_layer_kernel, num_heads=H, head_dim=hd,
        s_valid=S, t_valid=T, t_padded=T_pad, eps=1e-5)

    # Explicit VMEM budget: weights (+double-buffer slack) + io blocks + K/V
    # cache + f32 softmax / FFN intermediates, clamped to the local chip.
    weight_bytes = sum(int(w.size) * w.dtype.itemsize for w in weight_args)
    step_bytes = (2 * 2 * q_block * E * 4          # x + out blocks (double buffered)
                  + 2 * S_pad * E * 4              # kv block
                  + 2 * H * S_pad * hd * 2         # kh / vh scratch (bf16)
                  + 3 * H * q_block * S_pad * 4    # scores / e / w (f32)
                  + q_block * 4 * E * 4            # FFN hidden
                  + 4 * H * q_block * hd * 4)      # q / ctx head intermediates
    vmem_limit = int(1.3 * (2 * weight_bytes + step_bytes)) + (4 << 20)
    try:
        phys_vmem = int(pltpu.get_tpu_info().vmem_capacity_bytes)
    except Exception:
        phys_vmem = 64 << 20
    vmem_limit = max(32 << 20, min(vmem_limit, int(phys_vmem * 0.9)))

    def _run(single_buffer_weights):
        def wspec(shape):
            nd = len(shape)
            idx = lambda b, j, _nd=nd: (0,) * _nd
            if single_buffer_weights:
                # Constant-index weight blocks: single buffer halves resident
                # weight footprint (critical on v7x's 64 MiB VMEM).
                return pl.BlockSpec(shape, idx, pipeline_mode=pl.Buffered(1))
            return pl.BlockSpec(shape, idx)

        in_specs = [
            pl.BlockSpec((None, q_block, E), lambda b, j: (b, j, 0)),   # x
            pl.BlockSpec((None, S_pad, E), lambda b, j: (b, 0, 0)),     # kv
        ] + [wspec(w.shape) for w in weight_args]

        out_specs = [
            pl.BlockSpec((None, q_block, E), lambda b, j: (b, j, 0)),   # layer out
            pl.BlockSpec((None, 1, S_pad), lambda b, j: (b, 0, 0)),     # usage acc
        ]
        out_shape = [
            jax.ShapeDtypeStruct((B, T_pad, E), jnp.float32),
            jax.ShapeDtypeStruct((B, 1, S_pad), jnp.float32),
        ]

        fn = pl.pallas_call(
            kernel,
            grid=(B, nqb),
            in_specs=in_specs,
            out_specs=out_specs,
            out_shape=out_shape,
            scratch_shapes=[pltpu.VMEM((H, S_pad, hd), jnp.bfloat16),   # K cache
                            pltpu.VMEM((H, S_pad, hd), jnp.bfloat16)],  # V cache
            compiler_params=pltpu.CompilerParams(
                # q-block axis carries the K/V cache + usage accumulator ->
                # "arbitrary"; batch axis shards across megacore TCs.
                dimension_semantics=("parallel", "arbitrary"),
                vmem_limit_bytes=vmem_limit),
        )
        res = fn(x_p, kv_p, *weight_args)
        jax.block_until_ready(res)
        return res

    try:
        out_p, usage_p = _run(True)
    except Exception:
        # Fallback if single-buffered pipeline_mode is not supported here.
        out_p, usage_p = _run(False)

    out = out_p[:, :T, :]
    usage_sum = usage_p[:, 0, :S]
    return out, usage_sum


def usage_memory_layer_forward(params, x, mem_x, mem_usage, mem_size, num_heads):
    """Full UsageMemoryTransformerLayer.forward semantics."""
    B, T, E = x.shape

    if mem_x is None:
        kv = x
        prev_slots = 0
    else:
        prev_slots = mem_x.shape[0]
        mem = jnp.broadcast_to(mem_x[None], (B,) + mem_x.shape)
        kv = jnp.concatenate([mem, x], axis=1)

    out, usage_sum = transformer_layer_forward(params, x, kv, num_heads)

    x_det = jax.lax.stop_gradient(x)[0]      # x.detach()[0]

    if mem_x is None:
        mem_x_new = x_det
        mem_usage_new = jnp.zeros((T,), jnp.float32)
        ratio = 1.0
    else:
        # usage_delta = attn_w[0][:, :, :prev_slots].sum(dim=(0,1)) — in-kernel.
        usage_delta = usage_sum[0, :prev_slots]
        new_usage_existing = mem_usage + usage_delta
        mem_x_concat = jnp.concatenate([mem_x, x_det], axis=0)
        usage_concat = jnp.concatenate(
            [new_usage_existing, jnp.zeros((T,), jnp.float32)], axis=0)
        mem_concat_size = mem_x_concat.shape[0]
        if mem_concat_size > mem_size:
            # TODO(synk): top-k slot eviction is a tiny data-dependent gather; kept in plain JAX.
            vals, idx = jax.lax.top_k(usage_concat, mem_size)
            mem_x_new = mem_x_concat[idx]
            mem_usage_new = vals
        else:
            mem_x_new = mem_x_concat
            mem_usage_new = usage_concat
        ratio = float(mem_x_new.shape[0]) / float(mem_concat_size)

    return out, mem_x_new, mem_usage_new, ratio


def init_raw_params(key, E):
    """Deterministic synthetic parameters matching the PyTorch module's shapes."""
    ks = jax.random.split(key, 8)
    s = 0.1

    def rn(k, shape):
        return (jax.random.normal(k, shape) * s).astype(jnp.float32)

    return dict(
        in_proj_w=rn(ks[0], (3 * E, E)),        # MultiheadAttention packed in_proj
        in_proj_b=rn(ks[1], (3 * E,)),
        out_proj_w=rn(ks[2], (E, E)),
        out_proj_b=rn(ks[3], (E,)),
        w1=rn(ks[4], (4 * E, E)),               # ff[0]: Linear(E, 4E)
        b1=rn(ks[5], (4 * E,)),
        w2=rn(ks[6], (E, 4 * E)),               # ff[2]: Linear(4E, E)
        b2=rn(ks[7], (E,)),
        ln1_g=jnp.ones((E,), jnp.float32), ln1_b=jnp.zeros((E,), jnp.float32),
        ln2_g=jnp.ones((E,), jnp.float32), ln2_b=jnp.zeros((E,), jnp.float32),
    )


def prepare_kernel_params(raw, num_heads):
    """Pre-transpose, fold 1/sqrt(head_dim) into Wq/bq, cast matmul weights to bf16."""
    E = raw["out_proj_w"].shape[0]
    hd = E // num_heads
    scale = 1.0 / math.sqrt(hd)
    bf16 = jnp.bfloat16
    f32 = jnp.float32
    in_w, in_b = raw["in_proj_w"], raw["in_proj_b"]
    wq, wk, wv = in_w[:E], in_w[E:2 * E], in_w[2 * E:]
    bq, bk, bv = in_b[:E], in_b[E:2 * E], in_b[2 * E:]
    return dict(
        wqT=(wq.T * scale).astype(bf16), bq=(bq * scale)[None, :].astype(f32),
        wkT=wk.T.astype(bf16), bk=bk[None, :].astype(f32),
        wvT=wv.T.astype(bf16), bv=bv[None, :].astype(f32),
        woT=raw["out_proj_w"].T.astype(bf16), bo=raw["out_proj_b"][None, :].astype(f32),
        g1=raw["ln1_g"][None, :].astype(f32), be1=raw["ln1_b"][None, :].astype(f32),
        w1T=raw["w1"].T.astype(bf16), b1=raw["b1"][None, :].astype(f32),
        w2T=raw["w2"].T.astype(bf16), b2=raw["b2"][None, :].astype(f32),
        g2=raw["ln2_g"][None, :].astype(f32), be2=raw["ln2_b"][None, :].astype(f32),
    )


def _reference_layer(raw, x, kv, H):
    """Pure-JAX f32 reference of the transformer layer + usage sums."""
    B, T, E = x.shape
    S = kv.shape[1]
    hd = E // H
    scale = 1.0 / math.sqrt(hd)
    in_w, in_b = raw["in_proj_w"], raw["in_proj_b"]
    wq, wk, wv = in_w[:E], in_w[E:2 * E], in_w[2 * E:]
    bq, bk, bv = in_b[:E], in_b[E:2 * E], in_b[2 * E:]
    q = jnp.einsum('bte,fe->btf', x, wq) + bq
    k = jnp.einsum('bse,fe->bsf', kv, wk) + bk
    v = jnp.einsum('bse,fe->bsf', kv, wv) + bv
    qh = q.reshape(B, T, H, hd).transpose(0, 2, 1, 3) * scale
    kh = k.reshape(B, S, H, hd).transpose(0, 2, 1, 3)
    vh = v.reshape(B, S, H, hd).transpose(0, 2, 1, 3)
    w = jax.nn.softmax(jnp.einsum('bhqd,bhkd->bhqk', qh, kh), axis=-1)
    ctx = jnp.einsum('bhqk,bhkd->bhqd', w, vh).transpose(0, 2, 1, 3).reshape(B, T, E)
    attn = jnp.einsum('bte,fe->btf', ctx, raw["out_proj_w"]) + raw["out_proj_b"]

    def ln(u, g, b):
        mu = u.mean(-1, keepdims=True)
        var = ((u - mu) ** 2).mean(-1, keepdims=True)
        return (u - mu) * jax.lax.rsqrt(var + 1e-5) * g + b

    x2 = ln(x + attn, raw["ln1_g"], raw["ln1_b"])
    h = jnp.maximum(jnp.einsum('bte,fe->btf', x2, raw["w1"]) + raw["b1"], 0.0)
    ff = jnp.einsum('btf,ef->bte', h, raw["w2"]) + raw["b2"]
    out = ln(x2 + ff, raw["ln2_g"], raw["ln2_b"])
    usage = w[0].sum(axis=(0, 1))            # (S,)
    return out, usage


if __name__ == "__main__":
    B, T, E, H = 2, 8, 32, 4
    M, mem_size = 8, 12

    key = jax.random.PRNGKey(0)
    k1, k2, k3, kp = jax.random.split(key, 4)
    x = jax.random.normal(k1, (B, T, E), dtype=jnp.float32)
    mem_x = jax.random.normal(k2, (M, E), dtype=jnp.float32)
    mem_usage = jnp.abs(jax.random.normal(k3, (M,), dtype=jnp.float32))
    raw = init_raw_params(kp, E)
    params = prepare_kernel_params(raw, H)

    # Numerical sanity vs. a pure-JAX f32 reference (loose tol: bf16 matmuls).
    kv_ref_in = jnp.concatenate(
        [jnp.broadcast_to(mem_x[None], (B, M, E)), x], axis=1)
    out_k, usage_k = transformer_layer_forward(params, x, kv_ref_in, H)
    out_r, usage_r = _reference_layer(raw, x, kv_ref_in, H)
    jax.block_until_ready((out_k, usage_k))
    assert float(jnp.max(jnp.abs(out_k - out_r))) < 0.2
    assert float(jnp.max(jnp.abs(usage_k[0] - usage_r))) < 0.1

    # Case 1: memory present (concat + top-k eviction branch, M + T = 16 > mem_size = 12).
    out, mem_x_new, mem_usage_new, ratio = usage_memory_layer_forward(
        params, x, mem_x, mem_usage, mem_size, H)
    jax.block_until_ready((out, mem_x_new, mem_usage_new))
    assert out.shape == (B, T, E)
    assert mem_x_new.shape == (mem_size, E)
    assert mem_usage_new.shape == (mem_size,)
    assert bool(jnp.all(jnp.isfinite(out)))

    # Case 2: mem_x is None branch.
    out0, mem_x0, mem_usage0, ratio0 = usage_memory_layer_forward(
        params, x, None, None, mem_size, H)
    jax.block_until_ready((out0, mem_x0, mem_usage0))
    assert out0.shape == (B, T, E)
    assert mem_x0.shape == (T, E)
    assert mem_usage0.shape == (T,)

    print("KERNEL_OK")
</pallas_src>

<mosaic_0001>
module attributes {stable_mosaic.version = 11 : i64} {
  func.func @_transformer_layer_kernel(%arg0: i32, %arg1: i32, %arg2: memref<1x8x32xf32, #tpu.memory_space<vmem>>, %arg3: memref<1x128x32xf32, #tpu.memory_space<vmem>>, %arg4: memref<32x32xbf16, #tpu.memory_space<vmem>>, %arg5: memref<1x32xf32, #tpu.memory_space<vmem>>, %arg6: memref<32x32xbf16, #tpu.memory_space<vmem>>, %arg7: memref<1x32xf32, #tpu.memory_space<vmem>>, %arg8: memref<32x32xbf16, #tpu.memory_space<vmem>>, %arg9: memref<1x32xf32, #tpu.memory_space<vmem>>, %arg10: memref<32x32xbf16, #tpu.memory_space<vmem>>, %arg11: memref<1x32xf32, #tpu.memory_space<vmem>>, %arg12: memref<1x32xf32, #tpu.memory_space<vmem>>, %arg13: memref<1x32xf32, #tpu.memory_space<vmem>>, %arg14: memref<32x128xbf16, #tpu.memory_space<vmem>>, %arg15: memref<1x128xf32, #tpu.memory_space<vmem>>, %arg16: memref<128x32xbf16, #tpu.memory_space<vmem>>, %arg17: memref<1x32xf32, #tpu.memory_space<vmem>>, %arg18: memref<1x32xf32, #tpu.memory_space<vmem>>, %arg19: memref<1x32xf32, #tpu.memory_space<vmem>>, %arg20: memref<1x8x32xf32, #tpu.memory_space<vmem>>, %arg21: memref<1x1x128xf32, #tpu.memory_space<vmem>>, %arg22: memref<4x128x8xbf16, #tpu.memory_space<vmem>>, %arg23: memref<4x128x8xbf16, #tpu.memory_space<vmem>>) attributes {dimension_semantics = [#tpu.dimension_semantics<parallel>, #tpu.dimension_semantics<arbitrary>], iteration_bounds = array<i64: 2, 1>, scalar_prefetch = 0 : i64, scratch_operands = 2 : i64, tpu.core_type = #tpu.core_type<tc>, window_params = [{transform_indices = @transform_0, window_bounds = array<i64: 1, 8, 32>}, {transform_indices = @transform_1, window_bounds = array<i64: 1, 128, 32>}, {pipeline_mode = #tpu.pipeline_mode<synchronous>, transform_indices = @transform_2, window_bounds = array<i64: 32, 32>}, {pipeline_mode = #tpu.pipeline_mode<synchronous>, transform_indices = @transform_3, window_bounds = array<i64: 1, 32>}, {pipeline_mode = #tpu.pipeline_mode<synchronous>, transform_indices = @transform_4, window_bounds = array<i64: 32, 32>}, {pipeline_mode = #tpu.pipeline_mode<synchronous>, transform_indices = @transform_5, window_bounds = array<i64: 1, 32>}, {pipeline_mode = #tpu.pipeline_mode<synchronous>, transform_indices = @transform_6, window_bounds = array<i64: 32, 32>}, {pipeline_mode = #tpu.pipeline_mode<synchronous>, transform_indices = @transform_7, window_bounds = array<i64: 1, 32>}, {pipeline_mode = #tpu.pipeline_mode<synchronous>, transform_indices = @transform_8, window_bounds = array<i64: 32, 32>}, {pipeline_mode = #tpu.pipeline_mode<synchronous>, transform_indices = @transform_9, window_bounds = array<i64: 1, 32>}, {pipeline_mode = #tpu.pipeline_mode<synchronous>, transform_indices = @transform_10, window_bounds = array<i64: 1, 32>}, {pipeline_mode = #tpu.pipeline_mode<synchronous>, transform_indices = @transform_11, window_bounds = array<i64: 1, 32>}, {pipeline_mode = #tpu.pipeline_mode<synchronous>, transform_indices = @transform_12, window_bounds = array<i64: 32, 128>}, {pipeline_mode = #tpu.pipeline_mode<synchronous>, transform_indices = @transform_13, window_bounds = array<i64: 1, 128>}, {pipeline_mode = #tpu.pipeline_mode<synchronous>, transform_indices = @transform_14, window_bounds = array<i64: 128, 32>}, {pipeline_mode = #tpu.pipeline_mode<synchronous>, transform_indices = @transform_15, window_bounds = array<i64: 1, 32>}, {pipeline_mode = #tpu.pipeline_mode<synchronous>, transform_indices = @transform_16, window_bounds = array<i64: 1, 32>}, {pipeline_mode = #tpu.pipeline_mode<synchronous>, transform_indices = @transform_17, window_bounds = array<i64: 1, 32>}, {transform_indices = @transform_18, window_bounds = array<i64: 1, 8, 32>}, {transform_indices = @transform_19, window_bounds = array<i64: 1, 1, 128>}]} {
    %c0_i32 = arith.constant 0 : i32
    %0 = arith.cmpi eq, %arg1, %c0_i32 : i32
    %1 = arith.extui %0 : i1 to i32
    %c0_i32_0 = arith.constant 0 : i32
    %2 = arith.cmpi ne, %1, %c0_i32_0 : i32
    scf.if %2 {
      %c0_63 = arith.constant 0 : index
      %c0_64 = arith.constant 0 : index
      %c0_65 = arith.constant 0 : index
      %120 = vector.load %arg3[%c0_63, %c0_64, %c0_65] : memref<1x128x32xf32, #tpu.memory_space<vmem>>, vector<1x128x32xf32>
      %121 = vector.shape_cast %120 : vector<1x128x32xf32> to vector<128x32xf32>
      %122 = arith.truncf %121 : vector<128x32xf32> to vector<128x32xbf16>
      %c0_66 = arith.constant 0 : index
      %c0_67 = arith.constant 0 : index
      %123 = vector.load %arg6[%c0_66, %c0_67] : memref<32x32xbf16, #tpu.memory_space<vmem>>, vector<32x32xbf16>
      %cst_68 = arith.constant dense<0.000000e+00> : vector<128x32xf32>
      %124 = tpu.matmul %122, %123, %cst_68 {dimension_numbers = #tpu.dot_dimension_numbers<[1], [0], [0], [1], [0, 0, 1, 1], [], []>} : vector<128x32xbf16>, vector<32x32xbf16>, vector<128x32xf32> -> vector<128x32xf32>
      %c0_69 = arith.constant 0 : index
      %c0_70 = arith.constant 0 : index
      %125 = vector.load %arg7[%c0_69, %c0_70] : memref<1x32xf32, #tpu.memory_space<vmem>>, vector<1x32xf32>
      %126 = vector.broadcast %125 : vector<1x32xf32> to vector<128x32xf32>
      %127 = arith.addf %124, %126 : vector<128x32xf32>
      %c0_71 = arith.constant 0 : index
      %c0_72 = arith.constant 0 : index
      %128 = vector.load %arg8[%c0_71, %c0_72] : memref<32x32xbf16, #tpu.memory_space<vmem>>, vector<32x32xbf16>
      %cst_73 = arith.constant dense<0.000000e+00> : vector<128x32xf32>
      %129 = tpu.matmul %122, %128, %cst_73 {dimension_numbers = #tpu.dot_dimension_numbers<[1], [0], [0], [1], [0, 0, 1, 1], [], []>} : vector<128x32xbf16>, vector<32x32xbf16>, vector<128x32xf32> -> vector<128x32xf32>
      %c0_74 = arith.constant 0 : index
      %c0_75 = arith.constant 0 : index
      %130 = vector.load %arg9[%c0_74, %c0_75] : memref<1x32xf32, #tpu.memory_space<vmem>>, vector<1x32xf32>
      %131 = vector.broadcast %130 : vector<1x32xf32> to vector<128x32xf32>
      %132 = arith.addf %129, %131 : vector<128x32xf32>
      %133 = vector.shape_cast %127 : vector<128x32xf32> to vector<128x4x8xf32>
      %134 = tpu.transpose %133, [1, 0, 2] : vector<128x4x8xf32> -> vector<4x128x8xf32>
      %135 = arith.truncf %134 : vector<4x128x8xf32> to vector<4x128x8xbf16>
      %c0_76 = arith.constant 0 : index
      %c0_77 = arith.constant 0 : index
      %c0_78 = arith.constant 0 : index
      %136 = vector.load %arg22[%c0_76, %c0_77, %c0_78] : memref<4x128x8xbf16, #tpu.memory_space<vmem>>, vector<4x128x8xbf16>
      tpu.vector_store %arg22[%c0_76, %c0_77, %c0_78], %135 {strides = array<i32>} : memref<4x128x8xbf16, #tpu.memory_space<vmem>>, vector<4x128x8xbf16>,
      %137 = vector.shape_cast %132 : vector<128x32xf32> to vector<128x4x8xf32>
      %138 = tpu.transpose %137, [1, 0, 2] : vector<128x4x8xf32> -> vector<4x128x8xf32>
      %139 = arith.truncf %138 : vector<4x128x8xf32> to vector<4x128x8xbf16>
      %c0_79 = arith.constant 0 : index
      %c0_80 = arith.constant 0 : index
      %c0_81 = arith.constant 0 : index
      %140 = vector.load %arg23[%c0_79, %c0_80, %c0_81] : memref<4x128x8xbf16, #tpu.memory_space<vmem>>, vector<4x128x8xbf16>
      tpu.vector_store %arg23[%c0_79, %c0_80, %c0_81], %139 {strides = array<i32>} : memref<4x128x8xbf16, #tpu.memory_space<vmem>>, vector<4x128x8xbf16>,
      %cst_82 = arith.constant 0.000000e+00 : f32
      %141 = vector.broadcast %cst_82 : f32 to vector<1x128xf32>
      %c0_83 = arith.constant 0 : index
      %c0_84 = arith.constant 0 : index
      %c0_85 = arith.constant 0 : index
      %142 = vector.load %arg21[%c0_83, %c0_84, %c0_85] : memref<1x1x128xf32, #tpu.memory_space<vmem>>, vector<1x1x128xf32>
      %143 = vector.shape_cast %142 : vector<1x1x128xf32> to vector<1x128xf32>
      %144 = vector.shape_cast %141 : vector<1x128xf32> to vector<1x1x128xf32>
      tpu.vector_store %arg21[%c0_83, %c0_84, %c0_85], %144 {strides = array<i32>} : memref<1x1x128xf32, #tpu.memory_space<vmem>>, vector<1x1x128xf32>,
    } else {
    }
    %c0 = arith.constant 0 : index
    %c0_1 = arith.constant 0 : index
    %c0_2 = arith.constant 0 : index
    %3 = vector.load %arg2[%c0, %c0_1, %c0_2] : memref<1x8x32xf32, #tpu.memory_space<vmem>>, vector<1x8x32xf32>
    %4 = vector.shape_cast %3 : vector<1x8x32xf32> to vector<8x32xf32>
    %5 = arith.truncf %4 : vector<8x32xf32> to vector<8x32xbf16>
    %c0_3 = arith.constant 0 : index
    %c0_4 = arith.constant 0 : index
    %6 = vector.load %arg4[%c0_3, %c0_4] : memref<32x32xbf16, #tpu.memory_space<vmem>>, vector<32x32xbf16>
    %cst = arith.constant dense<0.000000e+00> : vector<8x32xf32>
    %7 = tpu.matmul %5, %6, %cst {dimension_numbers = #tpu.dot_dimension_numbers<[1], [0], [0], [1], [0, 0, 1, 1], [], []>} : vector<8x32xbf16>, vector<32x32xbf16>, vector<8x32xf32> -> vector<8x32xf32>
    %c0_5 = arith.constant 0 : index
    %c0_6 = arith.constant 0 : index
    %8 = vector.load %arg5[%c0_5, %c0_6] : memref<1x32xf32, #tpu.memory_space<vmem>>, vector<1x32xf32>
    %9 = vector.broadcast %8 : vector<1x32xf32> to vector<8x32xf32>
    %10 = arith.addf %7, %9 : vector<8x32xf32>
    %11 = vector.shape_cast %10 : vector<8x32xf32> to vector<8x4x8xf32>
    %12 = tpu.transpose %11, [1, 0, 2] : vector<8x4x8xf32> -> vector<4x8x8xf32>
    %13 = arith.truncf %12 : vector<4x8x8xf32> to vector<4x8x8xbf16>
    %c0_7 = arith.constant 0 : index
    %c0_8 = arith.constant 0 : index
    %c0_9 = arith.constant 0 : index
    %14 = vector.load %arg22[%c0_7, %c0_8, %c0_9] : memref<4x128x8xbf16, #tpu.memory_space<vmem>>, vector<4x128x8xbf16>
    "tpu.trace_start"() <{level = 10 : i32, message = "hqd,hkd->hqk"}> : () -> ()
    %cst_10 = arith.constant dense<0.000000e+00> : vector<4x8x128xf32>
    %15 = tpu.matmul %13, %14, %cst_10 {dimension_numbers = #tpu.dot_dimension_numbers<[2], [2], [1], [1], [0, 0, 0, 1, 1, 1], [0], [0]>} : vector<4x8x8xbf16>, vector<4x128x8xbf16>, vector<4x8x128xf32> -> vector<4x8x128xf32>
    "tpu.trace_stop"() : () -> ()
    %16 = tpu.iota {dimensions = array<i32: 2>} : vector<1x1x128xi32>
    %c16_i32 = arith.constant 16 : i32
    %17 = vector.broadcast %c16_i32 : i32 to vector<1x1x128xi32>
    %18 = arith.cmpi slt, %16, %17 : vector<1x1x128xi32>
    %cst_11 = arith.constant -1.000000e+30 : f32
    %19 = vector.shape_cast %18 : vector<1x1x128xi1> to vector<1x1x128xi1>
    %20 = vector.broadcast %19 : vector<1x1x128xi1> to vector<4x8x128xi1>
    %21 = vector.broadcast %cst_11 : f32 to vector<4x8x128xf32>
    %22 = arith.select %20, %15, %21 : vector<4x8x128xi1>, vector<4x8x128xf32>
    %cst_12 = arith.constant dense<0xFF800000> : vector<4x8xf32>
    %23 = vector.multi_reduction <maximumf>, %22, %cst_12 [2] : vector<4x8x128xf32> to vector<4x8xf32>
    %24 = vector.shape_cast %23 : vector<4x8xf32> to vector<4x8x1xf32>
    %25 = vector.broadcast %24 : vector<4x8x1xf32> to vector<4x8x128xf32>
    %26 = arith.subf %22, %25 : vector<4x8x128xf32>
    %27 = math.exp %26 : vector<4x8x128xf32>
    %cst_13 = arith.constant dense<0.000000e+00> : vector<4x8xf32>
    %28 = vector.multi_reduction <add>, %27, %cst_13 [2] : vector<4x8x128xf32> to vector<4x8xf32>
    %29 = vector.shape_cast %28 : vector<4x8xf32> to vector<4x8x1xf32>
    %30 = tpu.reciprocal %29 : vector<4x8x1xf32> -> vector<4x8x1xf32>
    %31 = vector.broadcast %30 : vector<4x8x1xf32> to vector<4x8x128xf32>
    %32 = arith.mulf %27, %31 : vector<4x8x128xf32>
    %33 = arith.truncf %32 : vector<4x8x128xf32> to vector<4x8x128xbf16>
    %cst_14 = arith.constant 1.000000e+00 : f32
    %34 = vector.broadcast %cst_14 : f32 to vector<1x32xf32>
    %c0_15 = arith.constant 0 : index
    %c0_16 = arith.constant 0 : index
    %c0_17 = arith.constant 0 : index
    %35 = vector.load %arg21[%c0_15, %c0_16, %c0_17] : memref<1x1x128xf32, #tpu.memory_space<vmem>>, vector<1x1x128xf32>
    %36 = vector.shape_cast %35 : vector<1x1x128xf32> to vector<1x128xf32>
    %37 = vector.shape_cast %32 : vector<4x8x128xf32> to vector<32x128xf32>
    %cst_18 = arith.constant dense<0.000000e+00> : vector<1x128xf32>
    %38 = tpu.matmul %34, %37, %cst_18 {dimension_numbers = #tpu.dot_dimension_numbers<[1], [0], [0], [1], [0, 0, 1, 1], [], []>} : vector<1x32xf32>, vector<32x128xf32>, vector<1x128xf32> -> vector<1x128xf32>
    %39 = arith.addf %36, %38 : vector<1x128xf32>
    %c0_19 = arith.constant 0 : index
    %c0_20 = arith.constant 0 : index
    %c0_21 = arith.constant 0 : index
    %40 = vector.load %arg21[%c0_19, %c0_20, %c0_21] : memref<1x1x128xf32, #tpu.memory_space<vmem>>, vector<1x1x128xf32>
    %41 = vector.shape_cast %40 : vector<1x1x128xf32> to vector<1x128xf32>
    %42 = vector.shape_cast %39 : vector<1x128xf32> to vector<1x1x128xf32>
    tpu.vector_store %arg21[%c0_19, %c0_20, %c0_21], %42 {strides = array<i32>} : memref<1x1x128xf32, #tpu.memory_space<vmem>>, vector<1x1x128xf32>,
    %c0_22 = arith.constant 0 : index
    %c0_23 = arith.constant 0 : index
    %c0_24 = arith.constant 0 : index
    %43 = vector.load %arg23[%c0_22, %c0_23, %c0_24] : memref<4x128x8xbf16, #tpu.memory_space<vmem>>, vector<4x128x8xbf16>
    "tpu.trace_start"() <{level = 10 : i32, message = "hqk,hkd->hqd"}> : () -> ()
    %cst_25 = arith.constant dense<0.000000e+00> : vector<4x8x8xf32>
    %44 = tpu.matmul %33, %43, %cst_25 {dimension_numbers = #tpu.dot_dimension_numbers<[2], [1], [1], [2], [0, 0, 0, 1, 1, 2], [0], [0]>} : vector<4x8x128xbf16>, vector<4x128x8xbf16>, vector<4x8x8xf32> -> vector<4x8x8xf32>
    "tpu.trace_stop"() : () -> ()
    %45 = tpu.transpose %44, [1, 0, 2] : vector<4x8x8xf32> -> vector<8x4x8xf32>
    %46 = vector.shape_cast %45 : vector<8x4x8xf32> to vector<8x32xf32>
    %47 = arith.truncf %46 : vector<8x32xf32> to vector<8x32xbf16>
    %c0_26 = arith.constant 0 : index
    %c0_27 = arith.constant 0 : index
    %48 = vector.load %arg10[%c0_26, %c0_27] : memref<32x32xbf16, #tpu.memory_space<vmem>>, vector<32x32xbf16>
    %cst_28 = arith.constant dense<0.000000e+00> : vector<8x32xf32>
    %49 = tpu.matmul %47, %48, %cst_28 {dimension_numbers = #tpu.dot_dimension_numbers<[1], [0], [0], [1], [0, 0, 1, 1], [], []>} : vector<8x32xbf16>, vector<32x32xbf16>, vector<8x32xf32> -> vector<8x32xf32>
    %c0_29 = arith.constant 0 : index
    %c0_30 = arith.constant 0 : index
    %50 = vector.load %arg11[%c0_29, %c0_30] : memref<1x32xf32, #tpu.memory_space<vmem>>, vector<1x32xf32>
    %51 = vector.broadcast %50 : vector<1x32xf32> to vector<8x32xf32>
    %52 = arith.addf %49, %51 : vector<8x32xf32>
    %53 = arith.addf %4, %52 : vector<8x32xf32>
    %cst_31 = arith.constant dense<0.000000e+00> : vector<8xf32>
    %54 = vector.multi_reduction <add>, %53, %cst_31 [1] : vector<8x32xf32> to vector<8xf32>
    %55 = vector.shape_cast %54 : vector<8xf32> to vector<8x1xf32>
    %cst_32 = arith.constant 3.200000e+01 : f32
    %56 = vector.broadcast %cst_32 : f32 to vector<8x1xf32>
    %57 = arith.divf %55, %56 : vector<8x1xf32>
    %58 = vector.broadcast %57 : vector<8x1xf32> to vector<8x32xf32>
    %59 = arith.subf %53, %58 : vector<8x32xf32>
    %60 = arith.mulf %59, %59 : vector<8x32xf32>
    %cst_33 = arith.constant dense<0.000000e+00> : vector<8xf32>
    %61 = vector.multi_reduction <add>, %60, %cst_33 [1] : vector<8x32xf32> to vector<8xf32>
    %62 = vector.shape_cast %61 : vector<8xf32> to vector<8x1xf32>
    %cst_34 = arith.constant 3.200000e+01 : f32
    %63 = vector.broadcast %cst_34 : f32 to vector<8x1xf32>
    %64 = arith.divf %62, %63 : vector<8x1xf32>
    %65 = vector.broadcast %57 : vector<8x1xf32> to vector<8x32xf32>
    %66 = arith.subf %53, %65 : vector<8x32xf32>
    %cst_35 = arith.constant 9.99999974E-6 : f32
    %67 = vector.broadcast %cst_35 : f32 to vector<8x1xf32>
    %68 = arith.addf %64, %67 : vector<8x1xf32>
    %69 = math.rsqrt %68 : vector<8x1xf32>
    %70 = vector.broadcast %69 : vector<8x1xf32> to vector<8x32xf32>
    %71 = arith.mulf %66, %70 : vector<8x32xf32>
    %c0_36 = arith.constant 0 : index
    %c0_37 = arith.constant 0 : index
    %72 = vector.load %arg12[%c0_36, %c0_37] : memref<1x32xf32, #tpu.memory_space<vmem>>, vector<1x32xf32>
    %73 = vector.broadcast %72 : vector<1x32xf32> to vector<8x32xf32>
    %74 = arith.mulf %71, %73 : vector<8x32xf32>
    %c0_38 = arith.constant 0 : index
    %c0_39 = arith.constant 0 : index
    %75 = vector.load %arg13[%c0_38, %c0_39] : memref<1x32xf32, #tpu.memory_space<vmem>>, vector<1x32xf32>
    %76 = vector.broadcast %75 : vector<1x32xf32> to vector<8x32xf32>
    %77 = arith.addf %74, %76 : vector<8x32xf32>
    %78 = arith.truncf %77 : vector<8x32xf32> to vector<8x32xbf16>
    %c0_40 = arith.constant 0 : index
    %c0_41 = arith.constant 0 : index
    %79 = vector.load %arg14[%c0_40, %c0_41] : memref<32x128xbf16, #tpu.memory_space<vmem>>, vector<32x128xbf16>
    %cst_42 = arith.constant dense<0.000000e+00> : vector<8x128xf32>
    %80 = tpu.matmul %78, %79, %cst_42 {dimension_numbers = #tpu.dot_dimension_numbers<[1], [0], [0], [1], [0, 0, 1, 1], [], []>} : vector<8x32xbf16>, vector<32x128xbf16>, vector<8x128xf32> -> vector<8x128xf32>
    %c0_43 = arith.constant 0 : index
    %c0_44 = arith.constant 0 : index
    %81 = vector.load %arg15[%c0_43, %c0_44] : memref<1x128xf32, #tpu.memory_space<vmem>>, vector<1x128xf32>
    %82 = vector.broadcast %81 : vector<1x128xf32> to vector<8x128xf32>
    %83 = arith.addf %80, %82 : vector<8x128xf32>
    %cst_45 = arith.constant 0.000000e+00 : f32
    %84 = vector.broadcast %cst_45 : f32 to vector<8x128xf32>
    %85 = arith.maximumf %83, %84 : vector<8x128xf32>
    %86 = arith.truncf %85 : vector<8x128xf32> to vector<8x128xbf16>
    %c0_46 = arith.constant 0 : index
    %c0_47 = arith.constant 0 : index
    %87 = vector.load %arg16[%c0_46, %c0_47] : memref<128x32xbf16, #tpu.memory_space<vmem>>, vector<128x32xbf16>
    %cst_48 = arith.constant dense<0.000000e+00> : vector<8x32xf32>
    %88 = tpu.matmul %86, %87, %cst_48 {dimension_numbers = #tpu.dot_dimension_numbers<[1], [0], [0], [1], [0, 0, 1, 1], [], []>} : vector<8x128xbf16>, vector<128x32xbf16>, vector<8x32xf32> -> vector<8x32xf32>
    %c0_49 = arith.constant 0 : index
    %c0_50 = arith.constant 0 : index
    %89 = vector.load %arg17[%c0_49, %c0_50] : memref<1x32xf32, #tpu.memory_space<vmem>>, vector<1x32xf32>
    %90 = vector.broadcast %89 : vector<1x32xf32> to vector<8x32xf32>
    %91 = arith.addf %88, %90 : vector<8x32xf32>
    %92 = arith.addf %77, %91 : vector<8x32xf32>
    %cst_51 = arith.constant dense<0.000000e+00> : vector<8xf32>
    %93 = vector.multi_reduction <add>, %92, %cst_51 [1] : vector<8x32xf32> to vector<8xf32>
    %94 = vector.shape_cast %93 : vector<8xf32> to vector<8x1xf32>
    %cst_52 = arith.constant 3.200000e+01 : f32
    %95 = vector.broadcast %cst_52 : f32 to vector<8x1xf32>
    %96 = arith.divf %94, %95 : vector<8x1xf32>
    %97 = vector.broadcast %96 : vector<8x1xf32> to vector<8x32xf32>
    %98 = arith.subf %92, %97 : vector<8x32xf32>
    %99 = arith.mulf %98, %98 : vector<8x32xf32>
    %cst_53 = arith.constant dense<0.000000e+00> : vector<8xf32>
    %100 = vector.multi_reduction <add>, %99, %cst_53 [1] : vector<8x32xf32> to vector<8xf32>
    %101 = vector.shape_cast %100 : vector<8xf32> to vector<8x1xf32>
    %cst_54 = arith.constant 3.200000e+01 : f32
    %102 = vector.broadcast %cst_54 : f32 to vector<8x1xf32>
    %103 = arith.divf %101, %102 : vector<8x1xf32>
    %104 = vector.broadcast %96 : vector<8x1xf32> to vector<8x32xf32>
    %105 = arith.subf %92, %104 : vector<8x32xf32>
    %cst_55 = arith.constant 9.99999974E-6 : f32
    %106 = vector.broadcast %cst_55 : f32 to vector<8x1xf32>
    %107 = arith.addf %103, %106 : vector<8x1xf32>
    %108 = math.rsqrt %107 : vector<8x1xf32>
    %109 = vector.broadcast %108 : vector<8x1xf32> to vector<8x32xf32>
    %110 = arith.mulf %105, %109 : vector<8x32xf32>
    %c0_56 = arith.constant 0 : index
    %c0_57 = arith.constant 0 : index
    %111 = vector.load %arg18[%c0_56, %c0_57] : memref<1x32xf32, #tpu.memory_space<vmem>>, vector<1x32xf32>
    %112 = vector.broadcast %111 : vector<1x32xf32> to vector<8x32xf32>
    %113 = arith.mulf %110, %112 : vector<8x32xf32>
    %c0_58 = arith.constant 0 : index
    %c0_59 = arith.constant 0 : index
    %114 = vector.load %arg19[%c0_58, %c0_59] : memref<1x32xf32, #tpu.memory_space<vmem>>, vector<1x32xf32>
    %115 = vector.broadcast %114 : vector<1x32xf32> to vector<8x32xf32>
    %116 = arith.addf %113, %115 : vector<8x32xf32>
    %c0_60 = arith.constant 0 : index
    %c0_61 = arith.constant 0 : index
    %c0_62 = arith.constant 0 : index
    %117 = vector.load %arg20[%c0_60, %c0_61, %c0_62] : memref<1x8x32xf32, #tpu.memory_space<vmem>>, vector<1x8x32xf32>
    %118 = vector.shape_cast %117 : vector<1x8x32xf32> to vector<8x32xf32>
    %119 = vector.shape_cast %116 : vector<8x32xf32> to vector<1x8x32xf32>
    tpu.vector_store %arg20[%c0_60, %c0_61, %c0_62], %119 {strides = array<i32>} : memref<1x8x32xf32, #tpu.memory_space<vmem>>, vector<1x8x32xf32>,
    return
  }
  func.func @transform_0(%arg0: i32, %arg1: i32) -> (i32, i32, i32) {
    %c0_i32 = arith.constant 0 : i32
    %c0_i32_0 = arith.constant 0 : i32
    return %arg0, %arg1, %c0_i32 : i32, i32, i32
  }
  func.func @transform_1(%arg0: i32, %arg1: i32) -> (i32, i32, i32) {
    %c0_i32 = arith.constant 0 : i32
    %c0_i32_0 = arith.constant 0 : i32
    %c0_i32_1 = arith.constant 0 : i32
    return %arg0, %c0_i32, %c0_i32_0 : i32, i32, i32
  }
  func.func @transform_2(%arg0: i32, %arg1: i32) -> (i32, i32) {
    %c0_i32 = arith.constant 0 : i32
    %c0_i32_0 = arith.constant 0 : i32
    %c0_i32_1 = arith.constant 0 : i32
    return %c0_i32, %c0_i32_0 : i32, i32
  }
  func.func @transform_3(%arg0: i32, %arg1: i32) -> (i32, i32) {
    %c0_i32 = arith.constant 0 : i32
    %c0_i32_0 = arith.constant 0 : i32
    %c0_i32_1 = arith.constant 0 : i32
    return %c0_i32, %c0_i32_0 : i32, i32
  }
  func.func @transform_4(%arg0: i32, %arg1: i32) -> (i32, i32) {
    %c0_i32 = arith.constant 0 : i32
    %c0_i32_0 = arith.constant 0 : i32
    %c0_i32_1 = arith.constant 0 : i32
    return %c0_i32, %c0_i32_0 : i32, i32
  }
  func.func @transform_5(%arg0: i32, %arg1: i32) -> (i32, i32) {
    %c0_i32 = arith.constant 0 : i32
    %c0_i32_0 = arith.constant 0 : i32
    %c0_i32_1 = arith.constant 0 : i32
    return %c0_i32, %c0_i32_0 : i32, i32
  }
  func.func @transform_6(%arg0: i32, %arg1: i32) -> (i32, i32) {
    %c0_i32 = arith.constant 0 : i32
    %c0_i32_0 = arith.constant 0 : i32
    %c0_i32_1 = arith.constant 0 : i32
    return %c0_i32, %c0_i32_0 : i32, i32
  }
  func.func @transform_7(%arg0: i32, %arg1: i32) -> (i32, i32) {
    %c0_i32 = arith.constant 0 : i32
    %c0_i32_0 = arith.constant 0 : i32
    %c0_i32_1 = arith.constant 0 : i32
    return %c0_i32, %c0_i32_0 : i32, i32
  }
  func.func @transform_8(%arg0: i32, %arg1: i32) -> (i32, i32) {
    %c0_i32 = arith.constant 0 : i32
    %c0_i32_0 = arith.constant 0 : i32
    %c0_i32_1 = arith.constant 0 : i32
    return %c0_i32, %c0_i32_0 : i32, i32
  }
  func.func @transform_9(%arg0: i32, %arg1: i32) -> (i32, i32) {
    %c0_i32 = arith.constant 0 : i32
    %c0_i32_0 = arith.constant 0 : i32
    %c0_i32_1 = arith.constant 0 : i32
    return %c0_i32, %c0_i32_0 : i32, i32
  }
  func.func @transform_10(%arg0: i32, %arg1: i32) -> (i32, i32) {
    %c0_i32 = arith.constant 0 : i32
    %c0_i32_0 = arith.constant 0 : i32
    %c0_i32_1 = arith.constant 0 : i32
    return %c0_i32, %c0_i32_0 : i32, i32
  }
  func.func @transform_11(%arg0: i32, %arg1: i32) -> (i32, i32) {
    %c0_i32 = arith.constant 0 : i32
    %c0_i32_0 = arith.constant 0 : i32
    %c0_i32_1 = arith.constant 0 : i32
    return %c0_i32, %c0_i32_0 : i32, i32
  }
  func.func @transform_12(%arg0: i32, %arg1: i32) -> (i32, i32) {
    %c0_i32 = arith.constant 0 : i32
    %c0_i32_0 = arith.constant 0 : i32
    %c0_i32_1 = arith.constant 0 : i32
    return %c0_i32, %c0_i32_0 : i32, i32
  }
  func.func @transform_13(%arg0: i32, %arg1: i32) -> (i32, i32) {
    %c0_i32 = arith.constant 0 : i32
    %c0_i32_0 = arith.constant 0 : i32
    %c0_i32_1 = arith.constant 0 : i32
    return %c0_i32, %c0_i32_0 : i32, i32
  }
  func.func @transform_14(%arg0: i32, %arg1: i32) -> (i32, i32) {
    %c0_i32 = arith.constant 0 : i32
    %c0_i32_0 = arith.constant 0 : i32
    %c0_i32_1 = arith.constant 0 : i32
    return %c0_i32, %c0_i32_0 : i32, i32
  }
  func.func @transform_15(%arg0: i32, %arg1: i32) -> (i32, i32) {
    %c0_i32 = arith.constant 0 : i32
    %c0_i32_0 = arith.constant 0 : i32
    %c0_i32_1 = arith.constant 0 : i32
    return %c0_i32, %c0_i32_0 : i32, i32
  }
  func.func @transform_16(%arg0: i32, %arg1: i32) -> (i32, i32) {
    %c0_i32 = arith.constant 0 : i32
    %c0_i32_0 = arith.constant 0 : i32
    %c0_i32_1 = arith.constant 0 : i32
    return %c0_i32, %c0_i32_0 : i32, i32
  }
  func.func @transform_17(%arg0: i32, %arg1: i32) -> (i32, i32) {
    %c0_i32 = arith.constant 0 : i32
    %c0_i32_0 = arith.constant 0 : i32
    %c0_i32_1 = arith.constant 0 : i32
    return %c0_i32, %c0_i32_0 : i32, i32
  }
  func.func @transform_18(%arg0: i32, %arg1: i32) -> (i32, i32, i32) {
    %c0_i32 = arith.constant 0 : i32
    %c0_i32_0 = arith.constant 0 : i32
    return %arg0, %arg1, %c0_i32 : i32, i32, i32
  }
  func.func @transform_19(%arg0: i32, %arg1: i32) -> (i32, i32, i32) {
    %c0_i32 = arith.constant 0 : i32
    %c0_i32_0 = arith.constant 0 : i32
    %c0_i32_1 = arith.constant 0 : i32
    return %arg0, %c0_i32, %c0_i32_0 : i32, i32, i32
  }
}

module attributes {stable_mosaic.version = 11 : i64} {
  func.func @_transformer_layer_kernel(%arg0: i32, %arg1: i32, %arg2: memref<1x8x32xf32, #tpu.memory_space<vmem>>, %arg3: memref<1x128x32xf32, #tpu.memory_space<vmem>>, %arg4: memref<32x32xbf16, #tpu.memory_space<vmem>>, %arg5: memref<1x32xf32, #tpu.memory_space<vmem>>, %arg6: memref<32x32xbf16, #tpu.memory_space<vmem>>, %arg7: memref<1x32xf32, #tpu.memory_space<vmem>>, %arg8: memref<32x32xbf16, #tpu.memory_space<vmem>>, %arg9: memref<1x32xf32, #tpu.memory_space<vmem>>, %arg10: memref<32x32xbf16, #tpu.memory_space<vmem>>, %arg11: memref<1x32xf32, #tpu.memory_space<vmem>>, %arg12: memref<1x32xf32, #tpu.memory_space<vmem>>, %arg13: memref<1x32xf32, #tpu.memory_space<vmem>>, %arg14: memref<32x128xbf16, #tpu.memory_space<vmem>>, %arg15: memref<1x128xf32, #tpu.memory_space<vmem>>, %arg16: memref<128x32xbf16, #tpu.memory_space<vmem>>, %arg17: memref<1x32xf32, #tpu.memory_space<vmem>>, %arg18: memref<1x32xf32, #tpu.memory_space<vmem>>, %arg19: memref<1x32xf32, #tpu.memory_space<vmem>>, %arg20: memref<1x8x32xf32, #tpu.memory_space<vmem>>, %arg21: memref<1x1x128xf32, #tpu.memory_space<vmem>>, %arg22: memref<4x128x8xbf16, #tpu.memory_space<vmem>>, %arg23: memref<4x128x8xbf16, #tpu.memory_space<vmem>>) attributes {dimension_semantics = [#tpu.dimension_semantics<parallel>, #tpu.dimension_semantics<arbitrary>], iteration_bounds = array<i64: 2, 1>, scalar_prefetch = 0 : i64, scratch_operands = 2 : i64, tpu.core_type = #tpu.core_type<tc>, window_params = [{transform_indices = @transform_0, window_bounds = array<i64: 1, 8, 32>}, {transform_indices = @transform_1, window_bounds = array<i64: 1, 128, 32>}, {pipeline_mode = #tpu.pipeline_mode<synchronous>, transform_indices = @transform_2, window_bounds = array<i64: 32, 32>}, {pipeline_mode = #tpu.pipeline_mode<synchronous>, transform_indices = @transform_3, window_bounds = array<i64: 1, 32>}, {pipeline_mode = #tpu.pipeline_mode<synchronous>, transform_indices = @transform_4, window_bounds = array<i64: 32, 32>}, {pipeline_mode = #tpu.pipeline_mode<synchronous>, transform_indices = @transform_5, window_bounds = array<i64: 1, 32>}, {pipeline_mode = #tpu.pipeline_mode<synchronous>, transform_indices = @transform_6, window_bounds = array<i64: 32, 32>}, {pipeline_mode = #tpu.pipeline_mode<synchronous>, transform_indices = @transform_7, window_bounds = array<i64: 1, 32>}, {pipeline_mode = #tpu.pipeline_mode<synchronous>, transform_indices = @transform_8, window_bounds = array<i64: 32, 32>}, {pipeline_mode = #tpu.pipeline_mode<synchronous>, transform_indices = @transform_9, window_bounds = array<i64: 1, 32>}, {pipeline_mode = #tpu.pipeline_mode<synchronous>, transform_indices = @transform_10, window_bounds = array<i64: 1, 32>}, {pipeline_mode = #tpu.pipeline_mode<synchronous>, transform_indices = @transform_11, window_bounds = array<i64: 1, 32>}, {pipeline_mode = #tpu.pipeline_mode<synchronous>, transform_indices = @transform_12, window_bounds = array<i64: 32, 128>}, {pipeline_mode = #tpu.pipeline_mode<synchronous>, transform_indices = @transform_13, window_bounds = array<i64: 1, 128>}, {pipeline_mode = #tpu.pipeline_mode<synchronous>, transform_indices = @transform_14, window_bounds = array<i64: 128, 32>}, {pipeline_mode = #tpu.pipeline_mode<synchronous>, transform_indices = @transform_15, window_bounds = array<i64: 1, 32>}, {pipeline_mode = #tpu.pipeline_mode<synchronous>, transform_indices = @transform_16, window_bounds = array<i64: 1, 32>}, {pipeline_mode = #tpu.pipeline_mode<synchronous>, transform_indices = @transform_17, window_bounds = array<i64: 1, 32>}, {transform_indices = @transform_18, window_bounds = array<i64: 1, 8, 32>}, {transform_indices = @transform_19, window_bounds = array<i64: 1, 1, 128>}]} {
    %c0_i32 = arith.constant 0 : i32
    %0 = arith.cmpi eq, %arg1, %c0_i32 : i32
    %1 = arith.extui %0 : i1 to i32
    %c0_i32_0 = arith.constant 0 : i32
    %2 = arith.cmpi ne, %1, %c0_i32_0 : i32
    scf.if %2 {
      %c0_63 = arith.constant 0 : index
      %c0_64 = arith.constant 0 : index
      %c0_65 = arith.constant 0 : index
      %120 = vector.load %arg3[%c0_63, %c0_64, %c0_65] : memref<1x128x32xf32, #tpu.memory_space<vmem>>, vector<1x128x32xf32>
      %121 = vector.shape_cast %120 : vector<1x128x32xf32> to vector<128x32xf32>
      %122 = arith.truncf %121 : vector<128x32xf32> to vector<128x32xbf16>
      %c0_66 = arith.constant 0 : index
      %c0_67 = arith.constant 0 : index
      %123 = vector.load %arg6[%c0_66, %c0_67] : memref<32x32xbf16, #tpu.memory_space<vmem>>, vector<32x32xbf16>
      %cst_68 = arith.constant dense<0.000000e+00> : vector<128x32xf32>
      %124 = tpu.matmul %122, %123, %cst_68 {dimension_numbers = #tpu.dot_dimension_numbers<[1], [0], [0], [1], [0, 0, 1, 1], [], []>} : vector<128x32xbf16>, vector<32x32xbf16>, vector<128x32xf32> -> vector<128x32xf32>
      %c0_69 = arith.constant 0 : index
      %c0_70 = arith.constant 0 : index
      %125 = vector.load %arg7[%c0_69, %c0_70] : memref<1x32xf32, #tpu.memory_space<vmem>>, vector<1x32xf32>
      %126 = vector.broadcast %125 : vector<1x32xf32> to vector<128x32xf32>
      %127 = arith.addf %124, %126 : vector<128x32xf32>
      %c0_71 = arith.constant 0 : index
      %c0_72 = arith.constant 0 : index
      %128 = vector.load %arg8[%c0_71, %c0_72] : memref<32x32xbf16, #tpu.memory_space<vmem>>, vector<32x32xbf16>
      %cst_73 = arith.constant dense<0.000000e+00> : vector<128x32xf32>
      %129 = tpu.matmul %122, %128, %cst_73 {dimension_numbers = #tpu.dot_dimension_numbers<[1], [0], [0], [1], [0, 0, 1, 1], [], []>} : vector<128x32xbf16>, vector<32x32xbf16>, vector<128x32xf32> -> vector<128x32xf32>
      %c0_74 = arith.constant 0 : index
      %c0_75 = arith.constant 0 : index
      %130 = vector.load %arg9[%c0_74, %c0_75] : memref<1x32xf32, #tpu.memory_space<vmem>>, vector<1x32xf32>
      %131 = vector.broadcast %130 : vector<1x32xf32> to vector<128x32xf32>
      %132 = arith.addf %129, %131 : vector<128x32xf32>
      %133 = vector.shape_cast %127 : vector<128x32xf32> to vector<128x4x8xf32>
      %134 = tpu.transpose %133, [1, 0, 2] : vector<128x4x8xf32> -> vector<4x128x8xf32>
      %135 = arith.truncf %134 : vector<4x128x8xf32> to vector<4x128x8xbf16>
      %c0_76 = arith.constant 0 : index
      %c0_77 = arith.constant 0 : index
      %c0_78 = arith.constant 0 : index
      %136 = vector.load %arg22[%c0_76, %c0_77, %c0_78] : memref<4x128x8xbf16, #tpu.memory_space<vmem>>, vector<4x128x8xbf16>
      tpu.vector_store %arg22[%c0_76, %c0_77, %c0_78], %135 {strides = array<i32>} : memref<4x128x8xbf16, #tpu.memory_space<vmem>>, vector<4x128x8xbf16>,
      %137 = vector.shape_cast %132 : vector<128x32xf32> to vector<128x4x8xf32>
      %138 = tpu.transpose %137, [1, 0, 2] : vector<128x4x8xf32> -> vector<4x128x8xf32>
      %139 = arith.truncf %138 : vector<4x128x8xf32> to vector<4x128x8xbf16>
      %c0_79 = arith.constant 0 : index
      %c0_80 = arith.constant 0 : index
      %c0_81 = arith.constant 0 : index
      %140 = vector.load %arg23[%c0_79, %c0_80, %c0_81] : memref<4x128x8xbf16, #tpu.memory_space<vmem>>, vector<4x128x8xbf16>
      tpu.vector_store %arg23[%c0_79, %c0_80, %c0_81], %139 {strides = array<i32>} : memref<4x128x8xbf16, #tpu.memory_space<vmem>>, vector<4x128x8xbf16>,
      %cst_82 = arith.constant 0.000000e+00 : f32
      %141 = vector.broadcast %cst_82 : f32 to vector<1x128xf32>
      %c0_83 = arith.constant 0 : index
      %c0_84 = arith.constant 0 : index
      %c0_85 = arith.constant 0 : index
      %142 = vector.load %arg21[%c0_83, %c0_84, %c0_85] : memref<1x1x128xf32, #tpu.memory_space<vmem>>, vector<1x1x128xf32>
      %143 = vector.shape_cast %142 : vector<1x1x128xf32> to vector<1x128xf32>
      %144 = vector.shape_cast %141 : vector<1x128xf32> to vector<1x1x128xf32>
      tpu.vector_store %arg21[%c0_83, %c0_84, %c0_85], %144 {strides = array<i32>} : memref<1x1x128xf32, #tpu.memory_space<vmem>>, vector<1x1x128xf32>,
    } else {
    }
    %c0 = arith.constant 0 : index
    %c0_1 = arith.constant 0 : index
    %c0_2 = arith.constant 0 : index
    %3 = vector.load %arg2[%c0, %c0_1, %c0_2] : memref<1x8x32xf32, #tpu.memory_space<vmem>>, vector<1x8x32xf32>
    %4 = vector.shape_cast %3 : vector<1x8x32xf32> to vector<8x32xf32>
    %5 = arith.truncf %4 : vector<8x32xf32> to vector<8x32xbf16>
    %c0_3 = arith.constant 0 : index
    %c0_4 = arith.constant 0 : index
    %6 = vector.load %arg4[%c0_3, %c0_4] : memref<32x32xbf16, #tpu.memory_space<vmem>>, vector<32x32xbf16>
    %cst = arith.constant dense<0.000000e+00> : vector<8x32xf32>
    %7 = tpu.matmul %5, %6, %cst {dimension_numbers = #tpu.dot_dimension_numbers<[1], [0], [0], [1], [0, 0, 1, 1], [], []>} : vector<8x32xbf16>, vector<32x32xbf16>, vector<8x32xf32> -> vector<8x32xf32>
    %c0_5 = arith.constant 0 : index
    %c0_6 = arith.constant 0 : index
    %8 = vector.load %arg5[%c0_5, %c0_6] : memref<1x32xf32, #tpu.memory_space<vmem>>, vector<1x32xf32>
    %9 = vector.broadcast %8 : vector<1x32xf32> to vector<8x32xf32>
    %10 = arith.addf %7, %9 : vector<8x32xf32>
    %11 = vector.shape_cast %10 : vector<8x32xf32> to vector<8x4x8xf32>
    %12 = tpu.transpose %11, [1, 0, 2] : vector<8x4x8xf32> -> vector<4x8x8xf32>
    %13 = arith.truncf %12 : vector<4x8x8xf32> to vector<4x8x8xbf16>
    %c0_7 = arith.constant 0 : index
    %c0_8 = arith.constant 0 : index
    %c0_9 = arith.constant 0 : index
    %14 = vector.load %arg22[%c0_7, %c0_8, %c0_9] : memref<4x128x8xbf16, #tpu.memory_space<vmem>>, vector<4x128x8xbf16>
    "tpu.trace_start"() <{level = 10 : i32, message = "hqd,hkd->hqk"}> : () -> ()
    %cst_10 = arith.constant dense<0.000000e+00> : vector<4x8x128xf32>
    %15 = tpu.matmul %13, %14, %cst_10 {dimension_numbers = #tpu.dot_dimension_numbers<[2], [2], [1], [1], [0, 0, 0, 1, 1, 1], [0], [0]>} : vector<4x8x8xbf16>, vector<4x128x8xbf16>, vector<4x8x128xf32> -> vector<4x8x128xf32>
    "tpu.trace_stop"() : () -> ()
    %16 = tpu.iota {dimensions = array<i32: 2>} : vector<1x1x128xi32>
    %c16_i32 = arith.constant 16 : i32
    %17 = vector.broadcast %c16_i32 : i32 to vector<1x1x128xi32>
    %18 = arith.cmpi slt, %16, %17 : vector<1x1x128xi32>
    %cst_11 = arith.constant -1.000000e+30 : f32
    %19 = vector.shape_cast %18 : vector<1x1x128xi1> to vector<1x1x128xi1>
    %20 = vector.broadcast %19 : vector<1x1x128xi1> to vector<4x8x128xi1>
    %21 = vector.broadcast %cst_11 : f32 to vector<4x8x128xf32>
    %22 = arith.select %20, %15, %21 : vector<4x8x128xi1>, vector<4x8x128xf32>
    %cst_12 = arith.constant dense<0xFF800000> : vector<4x8xf32>
    %23 = vector.multi_reduction <maximumf>, %22, %cst_12 [2] : vector<4x8x128xf32> to vector<4x8xf32>
    %24 = vector.shape_cast %23 : vector<4x8xf32> to vector<4x8x1xf32>
    %25 = vector.broadcast %24 : vector<4x8x1xf32> to vector<4x8x128xf32>
    %26 = arith.subf %22, %25 : vector<4x8x128xf32>
    %27 = math.exp %26 : vector<4x8x128xf32>
    %cst_13 = arith.constant dense<0.000000e+00> : vector<4x8xf32>
    %28 = vector.multi_reduction <add>, %27, %cst_13 [2] : vector<4x8x128xf32> to vector<4x8xf32>
    %29 = vector.shape_cast %28 : vector<4x8xf32> to vector<4x8x1xf32>
    %30 = tpu.reciprocal %29 : vector<4x8x1xf32> -> vector<4x8x1xf32>
    %31 = vector.broadcast %30 : vector<4x8x1xf32> to vector<4x8x128xf32>
    %32 = arith.mulf %27, %31 : vector<4x8x128xf32>
    %33 = arith.truncf %32 : vector<4x8x128xf32> to vector<4x8x128xbf16>
    %cst_14 = arith.constant 1.000000e+00 : f32
    %34 = vector.broadcast %cst_14 : f32 to vector<1x32xf32>
    %c0_15 = arith.constant 0 : index
    %c0_16 = arith.constant 0 : index
    %c0_17 = arith.constant 0 : index
    %35 = vector.load %arg21[%c0_15, %c0_16, %c0_17] : memref<1x1x128xf32, #tpu.memory_space<vmem>>, vector<1x1x128xf32>
    %36 = vector.shape_cast %35 : vector<1x1x128xf32> to vector<1x128xf32>
    %37 = vector.shape_cast %32 : vector<4x8x128xf32> to vector<32x128xf32>
    %cst_18 = arith.constant dense<0.000000e+00> : vector<1x128xf32>
    %38 = tpu.matmul %34, %37, %cst_18 {dimension_numbers = #tpu.dot_dimension_numbers<[1], [0], [0], [1], [0, 0, 1, 1], [], []>} : vector<1x32xf32>, vector<32x128xf32>, vector<1x128xf32> -> vector<1x128xf32>
    %39 = arith.addf %36, %38 : vector<1x128xf32>
    %c0_19 = arith.constant 0 : index
    %c0_20 = arith.constant 0 : index
    %c0_21 = arith.constant 0 : index
    %40 = vector.load %arg21[%c0_19, %c0_20, %c0_21] : memref<1x1x128xf32, #tpu.memory_space<vmem>>, vector<1x1x128xf32>
    %41 = vector.shape_cast %40 : vector<1x1x128xf32> to vector<1x128xf32>
    %42 = vector.shape_cast %39 : vector<1x128xf32> to vector<1x1x128xf32>
    tpu.vector_store %arg21[%c0_19, %c0_20, %c0_21], %42 {strides = array<i32>} : memref<1x1x128xf32, #tpu.memory_space<vmem>>, vector<1x1x128xf32>,
    %c0_22 = arith.constant 0 : index
    %c0_23 = arith.constant 0 : index
    %c0_24 = arith.constant 0 : index
    %43 = vector.load %arg23[%c0_22, %c0_23, %c0_24] : memref<4x128x8xbf16, #tpu.memory_space<vmem>>, vector<4x128x8xbf16>
    "tpu.trace_start"() <{level = 10 : i32, message = "hqk,hkd->hqd"}> : () -> ()
    %cst_25 = arith.constant dense<0.000000e+00> : vector<4x8x8xf32>
    %44 = tpu.matmul %33, %43, %cst_25 {dimension_numbers = #tpu.dot_dimension_numbers<[2], [1], [1], [2], [0, 0, 0, 1, 1, 2], [0], [0]>} : vector<4x8x128xbf16>, vector<4x128x8xbf16>, vector<4x8x8xf32> -> vector<4x8x8xf32>
    "tpu.trace_stop"() : () -> ()
    %45 = tpu.transpose %44, [1, 0, 2] : vector<4x8x8xf32> -> vector<8x4x8xf32>
    %46 = vector.shape_cast %45 : vector<8x4x8xf32> to vector<8x32xf32>
    %47 = arith.truncf %46 : vector<8x32xf32> to vector<8x32xbf16>
    %c0_26 = arith.constant 0 : index
    %c0_27 = arith.constant 0 : index
    %48 = vector.load %arg10[%c0_26, %c0_27] : memref<32x32xbf16, #tpu.memory_space<vmem>>, vector<32x32xbf16>
    %cst_28 = arith.constant dense<0.000000e+00> : vector<8x32xf32>
    %49 = tpu.matmul %47, %48, %cst_28 {dimension_numbers = #tpu.dot_dimension_numbers<[1], [0], [0], [1], [0, 0, 1, 1], [], []>} : vector<8x32xbf16>, vector<32x32xbf16>, vector<8x32xf32> -> vector<8x32xf32>
    %c0_29 = arith.constant 0 : index
    %c0_30 = arith.constant 0 : index
    %50 = vector.load %arg11[%c0_29, %c0_30] : memref<1x32xf32, #tpu.memory_space<vmem>>, vector<1x32xf32>
    %51 = vector.broadcast %50 : vector<1x32xf32> to vector<8x32xf32>
    %52 = arith.addf %49, %51 : vector<8x32xf32>
    %53 = arith.addf %4, %52 : vector<8x32xf32>
    %cst_31 = arith.constant dense<0.000000e+00> : vector<8xf32>
    %54 = vector.multi_reduction <add>, %53, %cst_31 [1] : vector<8x32xf32> to vector<8xf32>
    %55 = vector.shape_cast %54 : vector<8xf32> to vector<8x1xf32>
    %cst_32 = arith.constant 3.200000e+01 : f32
    %56 = vector.broadcast %cst_32 : f32 to vector<8x1xf32>
    %57 = arith.divf %55, %56 : vector<8x1xf32>
    %58 = vector.broadcast %57 : vector<8x1xf32> to vector<8x32xf32>
    %59 = arith.subf %53, %58 : vector<8x32xf32>
    %60 = arith.mulf %59, %59 : vector<8x32xf32>
    %cst_33 = arith.constant dense<0.000000e+00> : vector<8xf32>
    %61 = vector.multi_reduction <add>, %60, %cst_33 [1] : vector<8x32xf32> to vector<8xf32>
    %62 = vector.shape_cast %61 : vector<8xf32> to vector<8x1xf32>
    %cst_34 = arith.constant 3.200000e+01 : f32
    %63 = vector.broadcast %cst_34 : f32 to vector<8x1xf32>
    %64 = arith.divf %62, %63 : vector<8x1xf32>
    %65 = vector.broadcast %57 : vector<8x1xf32> to vector<8x32xf32>
    %66 = arith.subf %53, %65 : vector<8x32xf32>
    %cst_35 = arith.constant 9.99999974E-6 : f32
    %67 = vector.broadcast %cst_35 : f32 to vector<8x1xf32>
    %68 = arith.addf %64, %67 : vector<8x1xf32>
    %69 = math.rsqrt %68 : vector<8x1xf32>
    %70 = vector.broadcast %69 : vector<8x1xf32> to vector<8x32xf32>
    %71 = arith.mulf %66, %70 : vector<8x32xf32>
    %c0_36 = arith.constant 0 : index
    %c0_37 = arith.constant 0 : index
    %72 = vector.load %arg12[%c0_36, %c0_37] : memref<1x32xf32, #tpu.memory_space<vmem>>, vector<1x32xf32>
    %73 = vector.broadcast %72 : vector<1x32xf32> to vector<8x32xf32>
    %74 = arith.mulf %71, %73 : vector<8x32xf32>
    %c0_38 = arith.constant 0 : index
    %c0_39 = arith.constant 0 : index
    %75 = vector.load %arg13[%c0_38, %c0_39] : memref<1x32xf32, #tpu.memory_space<vmem>>, vector<1x32xf32>
    %76 = vector.broadcast %75 : vector<1x32xf32> to vector<8x32xf32>
    %77 = arith.addf %74, %76 : vector<8x32xf32>
    %78 = arith.truncf %77 : vector<8x32xf32> to vector<8x32xbf16>
    %c0_40 = arith.constant 0 : index
    %c0_41 = arith.constant 0 : index
    %79 = vector.load %arg14[%c0_40, %c0_41] : memref<32x128xbf16, #tpu.memory_space<vmem>>, vector<32x128xbf16>
    %cst_42 = arith.constant dense<0.000000e+00> : vector<8x128xf32>
    %80 = tpu.matmul %78, %79, %cst_42 {dimension_numbers = #tpu.dot_dimension_numbers<[1], [0], [0], [1], [0, 0, 1, 1], [], []>} : vector<8x32xbf16>, vector<32x128xbf16>, vector<8x128xf32> -> vector<8x128xf32>
    %c0_43 = arith.constant 0 : index
    %c0_44 = arith.constant 0 : index
    %81 = vector.load %arg15[%c0_43, %c0_44] : memref<1x128xf32, #tpu.memory_space<vmem>>, vector<1x128xf32>
    %82 = vector.broadcast %81 : vector<1x128xf32> to vector<8x128xf32>
    %83 = arith.addf %80, %82 : vector<8x128xf32>
    %cst_45 = arith.constant 0.000000e+00 : f32
    %84 = vector.broadcast %cst_45 : f32 to vector<8x128xf32>
    %85 = arith.maximumf %83, %84 : vector<8x128xf32>
    %86 = arith.truncf %85 : vector<8x128xf32> to vector<8x128xbf16>
    %c0_46 = arith.constant 0 : index
    %c0_47 = arith.constant 0 : index
    %87 = vector.load %arg16[%c0_46, %c0_47] : memref<128x32xbf16, #tpu.memory_space<vmem>>, vector<128x32xbf16>
    %cst_48 = arith.constant dense<0.000000e+00> : vector<8x32xf32>
    %88 = tpu.matmul %86, %87, %cst_48 {dimension_numbers = #tpu.dot_dimension_numbers<[1], [0], [0], [1], [0, 0, 1, 1], [], []>} : vector<8x128xbf16>, vector<128x32xbf16>, vector<8x32xf32> -> vector<8x32xf32>
    %c0_49 = arith.constant 0 : index
    %c0_50 = arith.constant 0 : index
    %89 = vector.load %arg17[%c0_49, %c0_50] : memref<1x32xf32, #tpu.memory_space<vmem>>, vector<1x32xf32>
    %90 = vector.broadcast %89 : vector<1x32xf32> to vector<8x32xf32>
    %91 = arith.addf %88, %90 : vector<8x32xf32>
    %92 = arith.addf %77, %91 : vector<8x32xf32>
    %cst_51 = arith.constant dense<0.000000e+00> : vector<8xf32>
    %93 = vector.multi_reduction <add>, %92, %cst_51 [1] : vector<8x32xf32> to vector<8xf32>
    %94 = vector.shape_cast %93 : vector<8xf32> to vector<8x1xf32>
    %cst_52 = arith.constant 3.200000e+01 : f32
    %95 = vector.broadcast %cst_52 : f32 to vector<8x1xf32>
    %96 = arith.divf %94, %95 : vector<8x1xf32>
    %97 = vector.broadcast %96 : vector<8x1xf32> to vector<8x32xf32>
    %98 = arith.subf %92, %97 : vector<8x32xf32>
    %99 = arith.mulf %98, %98 : vector<8x32xf32>
    %cst_53 = arith.constant dense<0.000000e+00> : vector<8xf32>
    %100 = vector.multi_reduction <add>, %99, %cst_53 [1] : vector<8x32xf32> to vector<8xf32>
    %101 = vector.shape_cast %100 : vector<8xf32> to vector<8x1xf32>
    %cst_54 = arith.constant 3.200000e+01 : f32
    %102 = vector.broadcast %cst_54 : f32 to vector<8x1xf32>
    %103 = arith.divf %101, %102 : vector<8x1xf32>
    %104 = vector.broadcast %96 : vector<8x1xf32> to vector<8x32xf32>
    %105 = arith.subf %92, %104 : vector<8x32xf32>
    %cst_55 = arith.constant 9.99999974E-6 : f32
    %106 = vector.broadcast %cst_55 : f32 to vector<8x1xf32>
    %107 = arith.addf %103, %106 : vector<8x1xf32>
    %108 = math.rsqrt %107 : vector<8x1xf32>
    %109 = vector.broadcast %108 : vector<8x1xf32> to vector<8x32xf32>
    %110 = arith.mulf %105, %109 : vector<8x32xf32>
    %c0_56 = arith.constant 0 : index
    %c0_57 = arith.constant 0 : index
    %111 = vector.load %arg18[%c0_56, %c0_57] : memref<1x32xf32, #tpu.memory_space<vmem>>, vector<1x32xf32>
    %112 = vector.broadcast %111 : vector<1x32xf32> to vector<8x32xf32>
    %113 = arith.mulf %110, %112 : vector<8x32xf32>
    %c0_58 = arith.constant 0 : index
    %c0_59 = arith.constant 0 : index
    %114 = vector.load %arg19[%c0_58, %c0_59] : memref<1x32xf32, #tpu.memory_space<vmem>>, vector<1x32xf32>
    %115 = vector.broadcast %114 : vector<1x32xf32> to vector<8x32xf32>
    %116 = arith.addf %113, %115 : vector<8x32xf32>
    %c0_60 = arith.constant 0 : index
    %c0_61 = arith.constant 0 : index
    %c0_62 = arith.constant 0 : index
    %117 = vector.load %arg20[%c0_60, %c0_61, %c0_62] : memref<1x8x32xf32, #tpu.memory_space<vmem>>, vector<1x8x32xf32>
    %118 = vector.shape_cast %117 : vector<1x8x32xf32> to vector<8x32xf32>
    %119 = vector.shape_cast %116 : vector<8x32xf32> to vector<1x8x32xf32>
    tpu.vector_store %arg20[%c0_60, %c0_61, %c0_62], %119 {strides = array<i32>} : memref<1x8x32xf32, #tpu.memory_space<vmem>>, vector<1x8x32xf32>,
    return
  }
  func.func @transform_0(%arg0: i32, %arg1: i32) -> (i32, i32, i32) {
    %c0_i32 = arith.constant 0 : i32
    %c0_i32_0 = arith.constant 0 : i32
    return %arg0, %arg1, %c0_i32 : i32, i32, i32
  }
  func.func @transform_1(%arg0: i32, %arg1: i32) -> (i32, i32, i32) {
    %c0_i32 = arith.constant 0 : i32
    %c0_i32_0 = arith.constant 0 : i32
    %c0_i32_1 = arith.constant 0 : i32
    return %arg0, %c0_i32, %c0_i32_0 : i32, i32, i32
  }
  func.func @transform_2(%arg0: i32, %arg1: i32) -> (i32, i32) {
    %c0_i32 = arith.constant 0 : i32
    %c0_i32_0 = arith.constant 0 : i32
    %c0_i32_1 = arith.constant 0 : i32
    return %c0_i32, %c0_i32_0 : i32, i32
  }
  func.func @transform_3(%arg0: i32, %arg1: i32) -> (i32, i32) {
    %c0_i32 = arith.constant 0 : i32
    %c0_i32_0 = arith.constant 0 : i32
    %c0_i32_1 = arith.constant 0 : i32
    return %c0_i32, %c0_i32_0 : i32, i32
  }
  func.func @transform_4(%arg0: i32, %arg1: i32) -> (i32, i32) {
    %c0_i32 = arith.constant 0 : i32
    %c0_i32_0 = arith.constant 0 : i32
    %c0_i32_1 = arith.constant 0 : i32
    return %c0_i32, %c0_i32_0 : i32, i32
  }
  func.func @transform_5(%arg0: i32, %arg1: i32) -> (i32, i32) {
    %c0_i32 = arith.constant 0 : i32
    %c0_i32_0 = arith.constant 0 : i32
    %c0_i32_1 = arith.constant 0 : i32
    return %c0_i32, %c0_i32_0 : i32, i32
  }
  func.func @transform_6(%arg0: i32, %arg1: i32) -> (i32, i32) {
    %c0_i32 = arith.constant 0 : i32
    %c0_i32_0 = arith.constant 0 : i32
    %c0_i32_1 = arith.constant 0 : i32
    return %c0_i32, %c0_i32_0 : i32, i32
  }
  func.func @transform_7(%arg0: i32, %arg1: i32) -> (i32, i32) {
    %c0_i32 = arith.constant 0 : i32
    %c0_i32_0 = arith.constant 0 : i32
    %c0_i32_1 = arith.constant 0 : i32
    return %c0_i32, %c0_i32_0 : i32, i32
  }
  func.func @transform_8(%arg0: i32, %arg1: i32) -> (i32, i32) {
    %c0_i32 = arith.constant 0 : i32
    %c0_i32_0 = arith.constant 0 : i32
    %c0_i32_1 = arith.constant 0 : i32
    return %c0_i32, %c0_i32_0 : i32, i32
  }
  func.func @transform_9(%arg0: i32, %arg1: i32) -> (i32, i32) {
    %c0_i32 = arith.constant 0 : i32
    %c0_i32_0 = arith.constant 0 : i32
    %c0_i32_1 = arith.constant 0 : i32
    return %c0_i32, %c0_i32_0 : i32, i32
  }
  func.func @transform_10(%arg0: i32, %arg1: i32) -> (i32, i32) {
    %c0_i32 = arith.constant 0 : i32
    %c0_i32_0 = arith.constant 0 : i32
    %c0_i32_1 = arith.constant 0 : i32
    return %c0_i32, %c0_i32_0 : i32, i32
  }
  func.func @transform_11(%arg0: i32, %arg1: i32) -> (i32, i32) {
    %c0_i32 = arith.constant 0 : i32
    %c0_i32_0 = arith.constant 0 : i32
    %c0_i32_1 = arith.constant 0 : i32
    return %c0_i32, %c0_i32_0 : i32, i32
  }
  func.func @transform_12(%arg0: i32, %arg1: i32) -> (i32, i32) {
    %c0_i32 = arith.constant 0 : i32
    %c0_i32_0 = arith.constant 0 : i32
    %c0_i32_1 = arith.constant 0 : i32
    return %c0_i32, %c0_i32_0 : i32, i32
  }
  func.func @transform_13(%arg0: i32, %arg1: i32) -> (i32, i32) {
    %c0_i32 = arith.constant 0 : i32
    %c0_i32_0 = arith.constant 0 : i32
    %c0_i32_1 = arith.constant 0 : i32
    return %c0_i32, %c0_i32_0 : i32, i32
  }
  func.func @transform_14(%arg0: i32, %arg1: i32) -> (i32, i32) {
    %c0_i32 = arith.constant 0 : i32
    %c0_i32_0 = arith.constant 0 : i32
    %c0_i32_1 = arith.constant 0 : i32
    return %c0_i32, %c0_i32_0 : i32, i32
  }
  func.func @transform_15(%arg0: i32, %arg1: i32) -> (i32, i32) {
    %c0_i32 = arith.constant 0 : i32
    %c0_i32_0 = arith.constant 0 : i32
    %c0_i32_1 = arith.constant 0 : i32
    return %c0_i32, %c0_i32_0 : i32, i32
  }
  func.func @transform_16(%arg0: i32, %arg1: i32) -> (i32, i32) {
    %c0_i32 = arith.constant 0 : i32
    %c0_i32_0 = arith.constant 0 : i32
    %c0_i32_1 = arith.constant 0 : i32
    return %c0_i32, %c0_i32_0 : i32, i32
  }
  func.func @transform_17(%arg0: i32, %arg1: i32) -> (i32, i32) {
    %c0_i32 = arith.constant 0 : i32
    %c0_i32_0 = arith.constant 0 : i32
    %c0_i32_1 = arith.constant 0 : i32
    return %c0_i32, %c0_i32_0 : i32, i32
  }
  func.func @transform_18(%arg0: i32, %arg1: i32) -> (i32, i32, i32) {
    %c0_i32 = arith.constant 0 : i32
    %c0_i32_0 = arith.constant 0 : i32
    return %arg0, %arg1, %c0_i32 : i32, i32, i32
  }
  func.func @transform_19(%arg0: i32, %arg1: i32) -> (i32, i32, i32) {
    %c0_i32 = arith.constant 0 : i32
    %c0_i32_0 = arith.constant 0 : i32
    %c0_i32_1 = arith.constant 0 : i32
    return %arg0, %c0_i32, %c0_i32_0 : i32, i32, i32
  }
}

</mosaic_0001>

<bundles_post_ra>
// kernel: tpu_custom_call.1
= control target key start
LH: loop header
LB: loop body
LE: loop exit
PB: predicated region body
PF: predicated region fallthrough
CT: control target
= control target key end

     0   :  { %s9794_s0 = inlined_call_operand.vmem [shape: f32[2,8,32], index: 0, kind: input, shape index: {}]   ;;  %s9795_s1 = inlined_call_operand.vmem [shape: f32[2,128,32], index: 1, kind: input, shape index: {}]   ;;  %s9796_s2 = inlined_call_operand.vmem [shape: bf16[32,32], index: 2, kind: input, shape index: {}]   ;;  %s9797_s3 = inlined_call_operand.vmem [shape: f32[1,32], index: 3, kind: input, shape index: {}]   ;;  %s9798_s4 = inlined_call_operand.vmem [shape: bf16[32,32], index: 4, kind: input, shape index: {}]   ;;  %s9799_s5 = inlined_call_operand.vmem [shape: f32[1,32], index: 5, kind: input, shape index: {}]   ;;  %s9800_s6 = inlined_call_operand.vmem [shape: bf16[32,32], index: 6, kind: input, shape index: {}]   ;;  %s9801_s7 = inlined_call_operand.vmem [shape: f32[1,32], index: 7, kind: input, shape index: {}]   ;;  %s9802_s8 = inlined_call_operand.vmem [shape: bf16[32,32], index: 8, kind: input, shape index: {}]   ;;  %s9803_s9 = inlined_call_operand.vmem [shape: f32[1,32], index: 9, kind: input, shape index: {}]   ;;  %s9804_s10 = inlined_call_operand.vmem [shape: f32[1,32], index: 10, kind: input, shape index: {}]   ;;  %s9805_s11 = inlined_call_operand.vmem [shape: f32[1,32], index: 11, kind: input, shape index: {}]   ;;  %s9806_s12 = inlined_call_operand.vmem [shape: bf16[32,128], index: 12, kind: input, shape index: {}]   ;;  %s9807_s13 = inlined_call_operand.vmem [shape: f32[1,128], index: 13, kind: input, shape index: {}]   ;;  %s9808_s14 = inlined_call_operand.vmem [shape: bf16[128,32], index: 14, kind: input, shape index: {}]   ;;  %s9809_s15 = inlined_call_operand.vmem [shape: f32[1,32], index: 15, kind: input, shape index: {}]   ;;  %s9810_s16 = inlined_call_operand.vmem [shape: f32[1,32], index: 16, kind: input, shape index: {}]   ;;  %s9811_s17 = inlined_call_operand.vmem [shape: f32[1,32], index: 17, kind: input, shape index: {}]   ;;  %s9812_s18 = inlined_call_operand.hbm [shape: f32[2,8,32], index: 18, kind: output, shape index: {0}]   ;;  %s9813_s19 = inlined_call_operand.hbm [shape: f32[2,1,128], index: 19, kind: output, shape index: {1}]  }
   0x1   :  { %9821 = sst [smem:[#allocation16_spill]] %s9794_s0 }
   0x2   :  { %9822 = sst [smem:[#allocation17_spill]] %s9795_s1 }
   0x3   :  { %9823 = sst [smem:[#allocation18_spill]] %s9796_s2 }
   0x4   :  { %9824 = sst [smem:[#allocation19_spill]] %s9797_s3 }
   0x5   :  { %9825 = sst [smem:[#allocation20_spill]] %s9798_s4 }
   0x6   :  { %9826 = sst [smem:[#allocation21_spill]] %s9799_s5 }
   0x7   :  { %9827 = sst [smem:[#allocation22_spill]] %s9812_s18 }
   0x8   :  { %25 = vsyncpa [#allocation5], 0 }
   0x9   :  { %27 = vsyncpa [#allocation5 + $0x1], 0 }
   0xa   :  { %28 = vsyncpa [#allocation7], 0 }
   0xb   :  { %30 = vsyncpa [#allocation7 + $0x1], 0  ;;  %s8040_s0 = smov 0   ;;  %s8042_s30 = smov 0  }
   0xc   :  { %s8044_s20 = smov 0   ;;  %s8046_s21 = smov 0  }
   0xd   :  { %s8048_s1 = smov 0   ;;  %s8050_s22 = smov 0  }
   0xe LB: > { %9828 = sst [smem:[#allocation10_spill]] %s7904_s0  ;;  %s7191_s2 = sadd.s32 4294967295, %s7924_s22   ;;  %s7924_s22 = sphi %s8050_s22, %s36_s22   ;;  %s7920_s1 = sphi %s8048_s1, %s9849_s1   ;;  %s7916_s21 = sphi %s8046_s21, %s9848_s21   ;;  %s7912_s20 = sphi %s8044_s20, %s9847_s20   ;;  %s7908_s30 = sphi %s8042_s30, %s9851_s30   ;;  %s7904_s0 = sphi %s8040_s0, %s9850_s0  }
   0xf   : > { %9829 = sst [smem:[#allocation11_spill]] %s7912_s20  ;;  %s7192_s23 = sadd.s32 4294967294, %s7924_s22  }
  0x10   : > { %9830 = sst [smem:[#allocation12_spill]] %s7920_s1  ;;  %s48_s24 = sadd.s32 1, %s7920_s1 }
  0x11   : > { %s447_s25 = sadd.s32 1, %s7912_s20  ;;  %p50_p0 = scmp.ge.s32.totalorder %s48_s24, 2 }
  0x12   : > { %p457_p1 = scmp.ne.s32.totalorder %s7912_s20, %s7908_s30  ;;  %p458_p2 = scmp.eq.s32.totalorder %s7191_s2, 1 }
  0x13   : > { %p463_p3 = scmp.ne.s32.totalorder %s7908_s30, %s7904_s0  ;;  %s9853_s24 = smov (%p50_p0, %s48_s24), 0 }
  0x14   : > { %9831 = sst [smem:[#allocation13_spill]] %s9853_s24  ;;  %p8080_p4 = por %p458_p2, %p457_p1 }
  0x15   : > { %p464_p5 = scmp.eq.s32.totalorder %s7192_s23, 1  ;;  %s442_s26 = ssub.s32 %s7920_s1, %s9853_s24 }
  0x16   : > { %p7195_p6 = scmp.ge.s32.totalorder %s7924_s22, 1  ;;  %p445_p7 = scmp.eq.s32.totalorder %s442_s26, 0 }
  0x17   : > { %p8087_p8 = por %p464_p5, %p463_p3  ;;  %p574_p9 = scmp.lt.s32.totalorder %s7924_s22, 3 }
  0x18   : > { %s8093_s28 = scalar_select %p445_p7, %s7912_s20, %s447_s25  }
  0x19   : > { %s9833_s27 = scalar_select %p8087_p8, 1, 0 }
  0x1a   : > { %9835 = sst [smem:[#allocation15_spill]] %s8093_s28  ;;  %p575_p10 = pnand %p7195_p6, %p574_p9 }
  0x1b   : > { %9834 = sst [smem:[#allocation14_spill]] %s9833_s27  ;;  %p641_p11 = scmp.lt.s32.totalorder (!%p575_p10), %s7916_s21, 1  ;;  %vm705_vm0 = vcmask (!%p575_p10), 261120   ;;  %v7926_v12 = vmov (!%p575_p10), 0.0   ;;  %vm7927_vm1 = vmmov (!%p575_p10), 0   ;;  %v7778_v31 = vld [vmem:[%s9800_s6] sm:$0xff] (!%p575_p10)  }
  0x1c   : > { %578 = sbr.rel (%p575_p10) target bundleno = 2879 (0xb3f), region = 92  ;;  %s9836_s4 = sld [smem:[#allocation20_spill]] (!%p575_p10)  ;;  %7461 = vmatprep.subr.bf16.mxu1 (!%p575_p10), %v7778_v31  ;;  %v7779_v32 = vld [vmem:[%s9800_s6 + $0x8] sm:$0xff] (!%p575_p10)   ;;  %vm3315_vm2 = vcmask (!%p575_p10), 64512   ;;  %vm6735_vm4 = vcmask (!%p575_p10), 130048   ;;  %vm6737_vm5 = vcmask (!%p575_p10), 195584  }
  0x1d   : > { %s9837_s20 = sld [smem:[#allocation17_spill]] (!%p575_p10)  ;;  %s9838_s0 = sld [smem:[#allocation18_spill]] (!%p575_p10)  ;;  %7462 = vmatpush3.bf16.msra.mxu1 (!%p575_p10), %v7778_v31 }
  0x1e   : > { %s9840_s23 = sld [smem:[#allocation16_spill]] (!%p575_p10)  ;;  %7463 = vmatprep.subr.bf16.mxu1 (!%p575_p10), %v7779_v32  ;;  %s9841_s5 = sld [smem:[#allocation21_spill]] (!%p575_p10) }
  0x1f   : > { %s7929_s24 = smov (!%p575_p10), 112   ;;  %s7930_s28 = smov (!%p575_p10), 104  }
  0x20   : > { %s7935_s29 = smov (!%p575_p10), 16   ;;  %s7936_s2 = smov (!%p575_p10), 8  }
  0x21   : > { %7464 = vmatpush3.bf16.msra.mxu1 (!%p575_p10), %v7779_v32 }
  0x22   : > { %v7774_v0 = vld [vmem:[%s9836_s4] sm:$0xff] (!%p575_p10)   ;;  %v7775_v1 = vld [vmem:[%s9836_s4 + $0x8] sm:$0xff] (!%p575_p10)   ;;  %7489 = vmatprep.subr.bf16.mxu1 (!%p575_p10), %v7926_v12 }
  0x23   : > { %7441 = vmatprep.subr.bf16.mxu0 %v7774_v0  ;;  %s8103_s26 = scalar_select %p641_p11, %s7916_s21, 1  ;;  %v7776_v2 = vld [vmem:[%s9838_s0] sm:$0xff]  }
  0x24   : > { %7442 = vmatpush3.bf16.msra.mxu0 %v7774_v0  ;;  %s9839_s18 = smov %s9838_s0  ;;  %v8176_v33 = vld [vmem:[%s9841_s5] ss:$0 sm:$0xff]  ;;  %s7937_s0 = smov 24  }
  0x25   : > { %7443 = vmatprep.subr.bf16.mxu0 %v7775_v1  ;;  %s7325_s25 = sshll.u32 %s8103_s26, 7  ;;  %v7777_v15 = vld [vmem:[%s9839_s18 + $0x8] sm:$0xff]   ;;  %s7197_s1 = sshll.u32 %s8103_s26, 3 }
  0x26   : > { %s8109_s27 = scalar_lea.vmem %s9837_s20, %s7325_s25  ;;  %s8148_s25 = scalar_lea.vmem %s9840_s23, %s7197_s1 }
  0x27   : > { %v658_v3 = vld [vmem:[%s8109_s27] sm:$0xff]  ;;  %v659_v4 = vld [vmem:[%s8109_s27 + $0x8] sm:$0xff]  ;;  %v660_v5 = vld [vmem:[%s8109_s27 + $0x10] sm:$0xff]  ;;  %s7928_s1 = smov 120   ;;  %s9842_s26 = sld [smem:[#allocation19_spill]] }
  0x28   : > { %7444 = vmatpush3.bf16.msra.mxu0 %v7775_v1  ;;  %v674_v6 = vpack.c.bf16 %v659_v4, %v658_v3  ;;  %v661_v7 = vld [vmem:[%s8109_s27 + $0x18] sm:$0xff]  ;;  %v662_v8 = vld [vmem:[%s8109_s27 + $0x20] sm:$0xff]  ;;  %v663_v9 = vld [vmem:[%s8109_s27 + $0x28] sm:$0xff] }
  0x29   : > { %v675_v10 = vpack.c.bf16 %v661_v7, %v660_v5  ;;  %v676_v11 = vpack.c.bf16 %v663_v9, %v662_v8  ;;  %7481 = vmatprep.subr.bf16.mxu0 %v7926_v12  ;;  %v664_v13 = vld [vmem:[%s8109_s27 + $0x30] sm:$0xff]  ;;  %v665_v14 = vld [vmem:[%s8109_s27 + $0x38] sm:$0xff]  ;;  %v666_v16 = vld [vmem:[%s8109_s27 + $0x40] sm:$0xff]  ;;  %v7931_v9 = vmov 1983009808  }
  0x2a   : > { %7445 = vmatprep.mubr.msk.bf16.mxu0 %vm705_vm0, %v674_v6  ;;  %7465 = vmatprep.mubr.msk.bf16.mxu1 %vm705_vm0, %v674_v6  ;;  %v667_v17 = vld [vmem:[%s8109_s27 + $0x48] sm:$0xff]  ;;  %v677_v18 = vpack.c.bf16 %v665_v14, %v664_v13  ;;  %v668_v20 = vld [vmem:[%s8109_s27 + $0x50] sm:$0xff]  ;;  %v669_v21 = vld [vmem:[%s8109_s27 + $0x58] sm:$0xff]  ;;  %v7932_v14 = vmov 1934713408  }
  0x2b   : > { %7446 = vmatmul.mubr.msk.bf16.vlgmr.msra.gmra.mrb[0].mxu0 %vm705_vm0, %v675_v10  ;;  %v678_v19 = vpack.c.bf16 %v667_v17, %v666_v16  ;;  %v670_v22 = vld [vmem:[%s8109_s27 + $0x60] sm:$0xff]  ;;  %v671_v23 = vld [vmem:[%s8109_s27 + $0x68] sm:$0xff]  ;;  %v679_v24 = vpack.c.bf16 %v669_v21, %v668_v20  ;;  %v672_v26 = vld [vmem:[%s8109_s27 + $0x70] sm:$0xff]  ;;  %7466 = vmatmul.mubr.msk.bf16.vlgmr.msra.gmra.mrb[0].mxu1 %vm705_vm0, %v675_v10  ;;  %v1110_v10 = vunpack.c.l.s4 %v7931_v9 }
  0x2c   : > { %7449 = vmatprep.mubr.msk.bf16.mxu0 %vm705_vm0, %v676_v11  ;;  %7482 = vmatpush3.bf16.msra.mxu0 %v7776_v2  ;;  %v680_v25 = vpack.c.bf16 %v671_v23, %v670_v22  ;;  %v673_v27 = vld [vmem:[%s8109_s27 + $0x78] sm:$0xff]  ;;  %v5749_v29 = vld [vmem:[%s8148_s25] sm:$0xff]  ;;  %s7322_s27 = sshll.u32 %s7916_s21, 4 }
  0x2d   : > { %7483 = vmatprep.subr.bf16.mxu0 %v7926_v12  ;;  %v681_v28 = vpack.c.bf16 %v673_v27, %v672_v26  ;;  %v5750_v30 = vpack.c.bf16 %v5749_v29, %v5749_v29  ;;  %7469 = vmatprep.mubr.msk.bf16.mxu1 %vm705_vm0, %v676_v11  ;;  %v7286_v6 = vld [vmem:[%s9842_s26] ss:$0 sm:$0xff]  ;;  %v1112_v11 = vlaneseq  ;;  %v1111_v17 = vunpack.c.0.s8 %v1110_v10 }
  0x30   : > { %7484 = vmatpush3.bf16.msra.mxu0 %v7777_v15  ;;  %v1142_v15 = vunpack.c.l.s4 %v7932_v14 }
  0x31   : > { %7509 = vmatprep.subr.bf16.mxu0 %v7926_v12 }
  0x32   : > { %v1143_v20 = vunpack.c.0.s8 %v1142_v15 }
  0x33   : > { %7450 = vmatmul.mubr.msk.bf16.gmra.mrb[4].mxu0 %vm705_vm0, %v677_v18  ;;  %7470 = vmatmul.mubr.msk.bf16.gmra.mrb[4].mxu1 %vm705_vm0, %v677_v18  ;;  %v1113_v18 = vshrl.u32 %v1112_v11, 7 }
  0x34   : > { %7453 = vmatprep.mubr.msk.bf16.mxu0 %vm705_vm0, %v678_v19  ;;  %7473 = vmatprep.mubr.msk.bf16.mxu1 %vm705_vm0, %v678_v19 }
  0x3b   : > { %7454 = vmatmul.mubr.msk.bf16.gmra.mrb[8].mxu0 %vm705_vm0, %v679_v24  ;;  %7474 = vmatmul.mubr.msk.bf16.gmra.mrb[8].mxu1 %vm705_vm0, %v679_v24  ;;  %v8336_v24 = vsub.s32 %v1111_v17, %v1113_v18 }
  0x3c   : > { %7457 = vmatprep.mubr.msk.bf16.mxu0 %vm705_vm0, %v680_v25  ;;  %7477 = vmatprep.mubr.msk.bf16.mxu1 %vm705_vm0, %v680_v25 }
  0x43   : > { %7458 = vmatmul.mubr.msk.bf16.gmra.mrb[12].mxu0 %vm705_vm0, %v681_v28  ;;  %7478 = vmatmul.mubr.msk.bf16.gmra.mrb[12].mxu1 %vm705_vm0, %v681_v28 }
  0x44   : > { %7485 = vmatprep.mubr.msk.bf16.mxu0 %vm7927_vm1, %v7926_v12  ;;  %7505 = vmatprep.mubr.msk.bf16.mxu1 %vm7927_vm1, %v7926_v12 }
  0x4b   : > { %7486 = vmatmul.mubr.msk.bf16.vlgmr.msra.gmra.mrb[16].mxu0 %vm705_vm0, %v5750_v30  ;;  %v8340_v30 = vsub.s32 %v1143_v20, %v1113_v18 }
  0x4c   : > { %7525 = vmatprep.mubr.msk.bf16.mxu0 %vm7927_vm1, %v7926_v12 }
  0xfe   : > { %v7447_v34 = vpop.f32.mrb[0].mxu0 }
  0xff   : > { %v8179_v35 = vadd.f32 %v7447_v34, %v8176_v33  ;;  %v764_v36 = vpop.f32.mrb[1].mxu0 }
 0x100   : > { %v8182_v37 = vadd.f32 %v8176_v33, %v764_v36  ;;  %v7448_v38 = vpop.f32.mrb[2].mxu0 }
 0x101   : > { %967 = vrot.lane.b32.xlu0 %v8179_v35, %s7928_s1  ;;  %v767_v39 = vpop.f32.mrb[3].mxu0  ;;  %v8189_v40 = vadd.f32 %v7448_v38, %v8176_v33 }
 0x102   : > { %1011 = vrot.lane.b32.xlu1 %v8182_v37, %s7929_s24  ;;  %v8204_v47 = vadd.f32 %v8176_v33, %v767_v39 }
 0x105   : > { %1015 = vrot.lane.b32.xlu0 %v8179_v35, %s7929_s24 }
 0x106   : > { %969 = vrot.lane.b32.xlu1 %v8189_v40, %s7928_s1  ;;  %v7451_v41 = vpop.f32.mrb[4].mxu0 }
 0x107   : > { %v780_v42 = vpop.f32.mrb[5].mxu0  ;;  %v8211_v50 = vadd.f32 %v7451_v41, %v8176_v33 }
 0x108   : > { %v7452_v43 = vpop.f32.mrb[6].mxu0  ;;  %v8245_v0 = vadd.f32 %v8176_v33, %v780_v42 }
 0x109   : > { %1063 = vrot.lane.b32.xlu0 %v8179_v35, %s7930_s28  ;;  %v783_v44 = vpop.f32.mrb[7].mxu0  ;;  %v8221_v54 = vadd.f32 %v7452_v43, %v8176_v33 }
 0x10a   : > { %1017 = vrot.lane.b32.xlu1 %v8189_v40, %s7929_s24  ;;  %v8248_v1 = vadd.f32 %v8176_v33, %v783_v44 }
 0x10d   : > { %963 = vrot.lane.b32.xlu0 %v8182_v37, %s7928_s1 }
 0x10e   : > { %1065 = vrot.lane.b32.xlu1 %v8189_v40, %s7930_s28  ;;  %v7455_v45 = vpop.f32.mrb[8].mxu0 }
 0x10f   : > { %v796_v46 = vpop.f32.mrb[9].mxu0  ;;  %v8259_v2 = vadd.f32 %v7455_v45, %v8176_v33 }
 0x110   : > { %v7456_v48 = vpop.f32.mrb[10].mxu0  ;;  %v8281_v4 = vadd.f32 %v8176_v33, %v796_v46 }
 0x111   : > { %1059 = vrot.lane.b32.xlu0 %v8182_v37, %s7930_s28  ;;  %v799_v49 = vpop.f32.mrb[11].mxu0  ;;  %v8266_v3 = vadd.f32 %v7456_v48, %v8176_v33 }
 0x112   : > { %1013 = vrot.lane.b32.xlu1 %v8204_v47, %s7929_s24  ;;  %v8284_v5 = vadd.f32 %v8176_v33, %v799_v49 }
 0x115   : > { %965 = vrot.lane.b32.xlu0 %v8204_v47, %s7928_s1 }
 0x116   : > { %1061 = vrot.lane.b32.xlu1 %v8204_v47, %s7930_s28  ;;  %v7459_v51 = vpop.f32.mrb[12].mxu0 }
 0x117   : > { %v8218_v52 = vadd.f32 %v7459_v51, %v8176_v33  ;;  %v812_v53 = vpop.f32.mrb[13].mxu0 }
 0x118   : > { %v8224_v55 = vadd.f32 %v8176_v33, %v812_v53  ;;  %v7460_v56 = vpop.f32.mrb[14].mxu0 }
 0x119   : > { %975 = vrot.lane.b32.xlu0 %v8211_v50, %s7928_s1  ;;  %v8229_v57 = vadd.f32 %v7460_v56, %v8176_v33  ;;  %v815_v58 = vpop.f32.mrb[15].mxu0 }
 0x11a   : > { %977 = vrot.lane.b32.xlu1 %v8221_v54, %s7928_s1  ;;  %v8234_v59 = vadd.f32 %v8176_v33, %v815_v58 }
 0x11d   : > { %1023 = vrot.lane.b32.xlu0 %v8211_v50, %s7929_s24 }
 0x11e   : > { %1025 = vrot.lane.b32.xlu1 %v8221_v54, %s7929_s24  ;;  %v5812_v60 = vpop.f32.mrb[16].mxu0 }
 0x11f   : > { %v7487_v61 = vpop.f32.mrb[17].mxu0  ;;  %v8323_v7 = vadd.f32 %v7286_v6, %v5812_v60 }
 0x120   : > { %v5815_v62 = vpop.f32.mrb[18].mxu0 }
 0x121   : > { %1071 = vrot.lane.b32.xlu0 %v8211_v50, %s7930_s28  ;;  %v7488_v63 = vpop.f32.mrb[19].mxu0 }
 0x122   : > { %1073 = vrot.lane.b32.xlu1 %v8221_v54, %s7930_s28 }
 0x125   : > { %971 = vrot.lane.b32.xlu0 %v8245_v0, %s7928_s1 }
 0x126   : > { %973 = vrot.lane.b32.xlu1 %v8248_v1, %s7928_s1 }
 0x129   : > { %1019 = vrot.lane.b32.xlu0 %v8245_v0, %s7929_s24 }
 0x12a   : > { %1021 = vrot.lane.b32.xlu1 %v8248_v1, %s7929_s24 }
 0x12d   : > { %1067 = vrot.lane.b32.xlu0 %v8245_v0, %s7930_s28 }
 0x12e   : > { %1069 = vrot.lane.b32.xlu1 %v8248_v1, %s7930_s28 }
 0x131   : > { %983 = vrot.lane.b32.xlu0 %v8259_v2, %s7928_s1 }
 0x132   : > { %985 = vrot.lane.b32.xlu1 %v8266_v3, %s7928_s1 }
 0x135   : > { %1031 = vrot.lane.b32.xlu0 %v8259_v2, %s7929_s24 }
 0x136   : > { %1033 = vrot.lane.b32.xlu1 %v8266_v3, %s7929_s24 }
 0x139   : > { %1079 = vrot.lane.b32.xlu0 %v8259_v2, %s7930_s28 }
 0x13a   : > { %1081 = vrot.lane.b32.xlu1 %v8266_v3, %s7930_s28 }
 0x13d   : > { %979 = vrot.lane.b32.xlu0 %v8281_v4, %s7928_s1 }
 0x13e   : > { %981 = vrot.lane.b32.xlu1 %v8284_v5, %s7928_s1 }
 0x141   : > { %1027 = vrot.lane.b32.xlu0 %v8281_v4, %s7929_s24 }
 0x142   : > { %1029 = vrot.lane.b32.xlu1 %v8284_v5, %s7929_s24 }
 0x145   : > { %1075 = vrot.lane.b32.xlu0 %v8281_v4, %s7930_s28 }
 0x146   : > { %1077 = vrot.lane.b32.xlu1 %v8284_v5, %s7930_s28 }
 0x149   : > { %991 = vrot.lane.b32.xlu0 %v8218_v52, %s7928_s1 }
 0x14a   : > { %993 = vrot.lane.b32.xlu1 %v8229_v57, %s7928_s1 }
 0x14d   : > { %987 = vrot.lane.b32.xlu0 %v8224_v55, %s7928_s1 }
 0x14e   : > { %989 = vrot.lane.b32.xlu1 %v8234_v59, %s7928_s1 }
 0x151   : > { %1035 = vrot.lane.b32.xlu0 %v8224_v55, %s7929_s24 }
 0x152   : > { %1037 = vrot.lane.b32.xlu1 %v8234_v59, %s7929_s24 }
 0x155   : > { %1083 = vrot.lane.b32.xlu0 %v8224_v55, %s7930_s28 }
 0x156   : > { %1085 = vrot.lane.b32.xlu1 %v8234_v59, %s7930_s28 }
 0x159   : > { %1039 = vrot.lane.b32.xlu0 %v8218_v52, %s7929_s24 }
 0x15a   : > { %1041 = vrot.lane.b32.xlu1 %v8229_v57, %s7929_s24 }
 0x15d   : > { %1087 = vrot.lane.b32.xlu0 %v8218_v52, %s7930_s28 }
 0x15e   : > { %1089 = vrot.lane.b32.xlu1 %v8229_v57, %s7930_s28 }
 0x161   : > { %5819 = vrot.lane.b32.xlu0 %v8323_v7, %s7928_s1 }
 0x162   : > { %5822 = vrot.lane.b32.xlu1 %v8323_v7, %s7929_s24 }
 0x165   : > { %5825 = vrot.lane.b32.xlu0 %v8323_v7, %s7930_s28 }
 0x173   : > { %v968_v8 = vpop.permute.xlu0 %967 }
 0x174   : > { %v1012_v13 = vpop.permute.xlu1 %1011 }
 0x175   : > { %v1107_v28 = vcombine.low %v8182_v37, %v1012_v13  ;;  %v1108_v29 = vcombine.high %v8182_v37, %v1012_v13 }
 0x177   : > { %v1016_v16 = vpop.permute.xlu0 %1015  ;;  %v8351_v44 = vrot.slane %v1107_v28, %v8336_v24  ;;  %v8354_v45 = vrot.slane %v1108_v29, %v8336_v24 }
 0x178   : > { %v970_v19 = vpop.permute.xlu1 %969  ;;  %v1243_v21 = vcombine.low %v8179_v35, %v1016_v16  ;;  %v1244_v22 = vcombine.high %v8179_v35, %v1016_v16 }
 0x17a   : > { %v1251_v31 = vrot.slane %v1243_v21, %v8336_v24  ;;  %v1258_v32 = vrot.slane %v1244_v22, %v8336_v24 }
 0x17b   : > { %v1064_v23 = vpop.permute.xlu0 %1063 }
 0x17c   : > { %v1259_v25 = vcombine.low %v968_v8, %v1064_v23  ;;  %v1260_v26 = vcombine.high %v968_v8, %v1064_v23  ;;  %v1018_v27 = vpop.permute.xlu1 %1017 }
 0x17d   : > { %v1311_v35 = vcombine.low %v8189_v40, %v1018_v27  ;;  %v1312_v36 = vcombine.high %v8189_v40, %v1018_v27 }
 0x17e   : > { %v1267_v33 = vrot.slane %v1259_v25, %v8336_v24  ;;  %v1274_v34 = vrot.slane %v1260_v26, %v8336_v24 }
 0x17f   : > { %v8348_v38 = vpop.permute.xlu0 %963  ;;  %v1319_v56 = vrot.slane %v1311_v35, %v8336_v24  ;;  %v1326_v58 = vrot.slane %v1312_v36, %v8336_v24 }
 0x180   : > { %v1275_v39 = vcombine.low %v1251_v31, %v1267_v33  ;;  %v1276_v41 = vcombine.high %v1251_v31, %v1267_v33  ;;  %v1291_v42 = vcombine.low %v1258_v32, %v1274_v34  ;;  %v1292_v37 = vcombine.high %v1258_v32, %v1274_v34  ;;  %v1066_v43 = vpop.permute.xlu1 %1065 }
 0x181   : > { %v1327_v46 = vcombine.low %v970_v19, %v1066_v43  ;;  %v1328_v48 = vcombine.high %v970_v19, %v1066_v43 }
 0x182   : > { %v1283_v49 = vrot.slane %v1275_v39, %v8340_v30  ;;  %v1290_v51 = vrot.slane %v1276_v41, %v8340_v30  ;;  %v1299_v40 = vrot.slane %v1291_v42, %v8340_v30  ;;  %v1306_v53 = vrot.slane %v1292_v37, %v8340_v30 }
 0x183   : > { %v1335_v60 = vrot.slane %v1327_v46, %v8336_v24  ;;  %v1342_v61 = vrot.slane %v1328_v48, %v8336_v24  ;;  %v1060_v62 = vpop.permute.xlu0 %1059 }
 0x184   : > { %v2331_v63 = vcombine.low %v1283_v49, %v1290_v51  ;;  %v7226_v6 = vcombine.high %v1283_v49, %v1290_v51  ;;  %v2347_v8 = vcombine.low %v1299_v40, %v1306_v53  ;;  %v7227_v9 = vcombine.high %v1299_v40, %v1306_v53  ;;  %v1014_v16 = vpop.permute.xlu1 %1013 }
 0x185   : > { %v1343_v10 = vcombine.low %v1319_v56, %v1335_v60  ;;  %v1344_v13 = vcombine.high %v1319_v56, %v1335_v60  ;;  %v1359_v14 = vcombine.low %v1326_v58, %v1342_v61  ;;  %v1360_v15 = vcombine.high %v1326_v58, %v1342_v61 }
 0x186   : > { %v2338_v17 = vrot.slane %v2331_v63, %v8336_v24  ;;  %v2346_v18 = vrot.slane %v7226_v6, %v8336_v24  ;;  %v2354_v19 = vrot.slane %v2347_v8, %v8336_v24  ;;  %v2362_v20 = vrot.slane %v7227_v9, %v8336_v24 }
 0x187   : > { %v1351_v21 = vrot.slane %v1343_v10, %v8340_v30  ;;  %v1358_v22 = vrot.slane %v1344_v13, %v8340_v30  ;;  %v1367_v23 = vrot.slane %v1359_v14, %v8340_v30  ;;  %v1374_v25 = vrot.slane %v1360_v15, %v8340_v30  ;;  %v8372_v26 = vpop.permute.xlu0 %965 }
 0x188   : > { %v2363_v27 = vcombine.low %v2338_v17, %v2346_v18  ;;  %v2364_v28 = vcombine.high %v2338_v17, %v2346_v18  ;;  %v2379_v29 = vcombine.low %v2354_v19, %v2362_v20  ;;  %v2380_v31 = vcombine.high %v2354_v19, %v2362_v20  ;;  %v1062_v49 = vpop.permute.xlu1 %1061 }
 0x189   : > { %v2399_v32 = vcombine.low %v1351_v21, %v1358_v22  ;;  %v7228_v33 = vcombine.high %v1351_v21, %v1358_v22  ;;  %v2415_v34 = vcombine.low %v1367_v23, %v1374_v25  ;;  %v7229_v35 = vcombine.high %v1367_v23, %v1374_v25 }
 0x18a   : > { %v2371_v36 = vrot.slane %v2363_v27, %v8340_v30  ;;  %v2378_v39 = vrot.slane %v2364_v28, %v8340_v30  ;;  %v2387_v41 = vrot.slane %v2379_v29, %v8340_v30  ;;  %v2394_v42 = vrot.slane %v2380_v31, %v8340_v30 }
 0x18b   : > { %v2406_v37 = vrot.slane %v2399_v32, %v8336_v24  ;;  %v2414_v43 = vrot.slane %v7228_v33, %v8336_v24  ;;  %v2422_v46 = vrot.slane %v2415_v34, %v8336_v24  ;;  %v2430_v48 = vrot.slane %v7229_v35, %v8336_v24  ;;  %v8382_v58 = vpop.permute.xlu0 %975 }
 0x18c   : > { %v2395_v51 = vcombine.low %v2371_v36, %v2387_v41  ;;  %v2396_v40 = vcombine.high %v2371_v36, %v2387_v41  ;;  %v2397_v53 = vcombine.low %v2378_v39, %v2394_v42  ;;  %v2398_v56 = vcombine.high %v2378_v39, %v2394_v42 }
 0x18d   : > { %v2431_v60 = vcombine.low %v2406_v37, %v2414_v43  ;;  %v2432_v61 = vcombine.high %v2406_v37, %v2414_v43  ;;  %v2447_v63 = vcombine.low %v2422_v46, %v2430_v48  ;;  %v2448_v6 = vcombine.high %v2422_v46, %v2430_v48 }
 0x18e   : > { %v1123_v8 = vcombine.low %v8348_v38, %v1060_v62  ;;  %v1124_v9 = vcombine.high %v8348_v38, %v1060_v62  ;;  %v1175_v10 = vcombine.low %v8204_v47, %v1014_v16  ;;  %v1176_v13 = vcombine.high %v8204_v47, %v1014_v16  ;;  %v8396_v16 = vpop.permute.xlu1 %977 }
 0x18f   : > { %v2439_v14 = vrot.slane %v2431_v60, %v8340_v30  ;;  %v2446_v15 = vrot.slane %v2432_v61, %v8340_v30  ;;  %v2455_v17 = vrot.slane %v2447_v63, %v8340_v30  ;;  %v2462_v18 = vrot.slane %v2448_v6, %v8340_v30  ;;  %v1024_v31 = vpop.permute.xlu0 %1023 }
 0x190   : > { %v1131_v19 = vrot.slane %v1123_v8, %v8336_v24  ;;  %v1138_v20 = vrot.slane %v1124_v9, %v8336_v24  ;;  %v1183_v21 = vrot.slane %v1175_v10, %v8336_v24  ;;  %v1190_v38 = vrot.slane %v1176_v13, %v8336_v24 }
 0x191   : > { %v2463_v62 = vcombine.low %v2439_v14, %v2455_v17  ;;  %v2464_v22 = vcombine.high %v2439_v14, %v2455_v17  ;;  %v2465_v23 = vcombine.low %v2446_v15, %v2462_v18  ;;  %v2466_v47 = vcombine.high %v2446_v15, %v2462_v18 }
 0x192   : > { %v1139_v25 = vcombine.low %v8351_v44, %v1131_v19  ;;  %v1140_v27 = vcombine.high %v8351_v44, %v1131_v19  ;;  %v1155_v28 = vcombine.low %v8354_v45, %v1138_v20  ;;  %v1156_v29 = vcombine.high %v8354_v45, %v1138_v20  ;;  %v1026_v63 = vpop.permute.xlu1 %1025 }
 0x193   : > { %v3284_v32 = vpack.c.bf16 %v2463_v62, %v2395_v51  ;;  %v3292_v33 = vpack.c.bf16 %v2464_v22, %v2396_v40  ;;  %v3300_v34 = vpack.c.bf16 %v2465_v23, %v2397_v53  ;;  %v3308_v35 = vpack.c.bf16 %v2466_v47, %v2398_v56  ;;  %v1072_v19 = vpop.permute.xlu0 %1071 }
 0x194   : > { %v1147_v36 = vrot.slane %v1139_v25, %v8340_v30  ;;  %v1154_v39 = vrot.slane %v1140_v27, %v8340_v30  ;;  %v1163_v41 = vrot.slane %v1155_v28, %v8340_v30  ;;  %v1170_v42 = vrot.slane %v1156_v29, %v8340_v30 }
 0x195   : > { %3317 = vst.msk [vmem:[#allocation2 + $0x8] sm:$0xff] %vm3315_vm2, %v3284_v32  ;;  %3325 = vst.msk [vmem:[#allocation2 + $0x48] sm:$0xff] %vm3315_vm2, %v3292_v33  ;;  %v1191_v44 = vcombine.low %v8372_v26, %v1062_v49  ;;  %v1192_v45 = vcombine.high %v8372_v26, %v1062_v49  ;;  %v1515_v37 = vcombine.low %v8211_v50, %v1024_v31 }
 0x196   : > { %3333 = vst.msk [vmem:[#allocation2 + $0x88] sm:$0xff] %vm3315_vm2, %v3300_v34  ;;  %3341 = vst.msk [vmem:[#allocation2 + $0xc8] sm:$0xff] %vm3315_vm2, %v3308_v35  ;;  %v1516_v43 = vcombine.high %v8211_v50, %v1024_v31  ;;  %v2195_v46 = vcombine.low %v1147_v36, %v1154_v39  ;;  %v7222_v48 = vcombine.high %v1147_v36, %v1154_v39  ;;  %v8434_v32 = vpop.permute.xlu1 %1073 }
 0x197   : > { %v2211_v51 = vcombine.low %v1163_v41, %v1170_v42  ;;  %v7223_v40 = vcombine.high %v1163_v41, %v1170_v42  ;;  %v1199_v53 = vrot.slane %v1191_v44, %v8336_v24  ;;  %v1206_v56 = vrot.slane %v1192_v45, %v8336_v24 }
 0x198   : > { %v8417_v60 = vrot.slane %v1515_v37, %v8336_v24  ;;  %v8420_v61 = vrot.slane %v1516_v43, %v8336_v24  ;;  %v2202_v26 = vrot.slane %v2195_v46, %v8336_v24  ;;  %v2210_v49 = vrot.slane %v7222_v48, %v8336_v24  ;;  %v8444_v48 = vpop.permute.xlu0 %971 }
 0x199   : > { %v2218_v50 = vrot.slane %v2211_v51, %v8336_v24  ;;  %v2226_v6 = vrot.slane %v7223_v40, %v8336_v24  ;;  %v1207_v8 = vcombine.low %v1183_v21, %v1199_v53  ;;  %v1208_v9 = vcombine.high %v1183_v21, %v1199_v53 }
 0x19a   : > { %v1223_v10 = vcombine.low %v1190_v38, %v1206_v56  ;;  %v1224_v13 = vcombine.high %v1190_v38, %v1206_v56  ;;  %v2227_v14 = vcombine.low %v2202_v26, %v2210_v49  ;;  %v2228_v15 = vcombine.high %v2202_v26, %v2210_v49 }
 0x19b   : > { %v2243_v17 = vcombine.low %v2218_v50, %v2226_v6  ;;  %v2244_v18 = vcombine.high %v2218_v50, %v2226_v6  ;;  %v1215_v20 = vrot.slane %v1207_v8, %v8340_v30  ;;  %v1222_v62 = vrot.slane %v1208_v9, %v8340_v30  ;;  %v8456_v9 = vpop.permute.xlu1 %973 }
 0x19c   : > { %v1231_v22 = vrot.slane %v1223_v10, %v8340_v30  ;;  %v1238_v23 = vrot.slane %v1224_v13, %v8340_v30  ;;  %v2235_v47 = vrot.slane %v2227_v14, %v8340_v30  ;;  %v2242_v25 = vrot.slane %v2228_v15, %v8340_v30 }
 0x19d   : > { %v2251_v21 = vrot.slane %v2243_v17, %v8340_v30  ;;  %v2258_v38 = vrot.slane %v2244_v18, %v8340_v30  ;;  %v2263_v27 = vcombine.low %v1215_v20, %v1222_v62  ;;  %v7224_v28 = vcombine.high %v1215_v20, %v1222_v62 }
 0x19e   : > { %v2279_v29 = vcombine.low %v1231_v22, %v1238_v23  ;;  %v7225_v31 = vcombine.high %v1231_v22, %v1238_v23  ;;  %v1583_v45 = vcombine.low %v8221_v54, %v1026_v63  ;;  %v1584_v37 = vcombine.high %v8221_v54, %v1026_v63 }
 0x19f   : > { %v2259_v33 = vcombine.low %v2235_v47, %v2251_v21  ;;  %v2260_v34 = vcombine.high %v2235_v47, %v2251_v21  ;;  %v2261_v35 = vcombine.low %v2242_v25, %v2258_v38  ;;  %v2262_v36 = vcombine.high %v2242_v25, %v2258_v38  ;;  %v1020_v25 = vpop.permute.xlu0 %1019 }
 0x1a0   : > { %v2270_v39 = vrot.slane %v2263_v27, %v8336_v24  ;;  %v2278_v41 = vrot.slane %v7224_v28, %v8336_v24  ;;  %v2286_v42 = vrot.slane %v2279_v29, %v8336_v24  ;;  %v2294_v44 = vrot.slane %v7225_v31, %v8336_v24 }
 0x1a1   : > { %v1531_v43 = vcombine.low %v8382_v58, %v1072_v19  ;;  %v1532_v46 = vcombine.high %v8382_v58, %v1072_v19  ;;  %v1591_v26 = vrot.slane %v1583_v45, %v8336_v24  ;;  %v8448_v49 = vrot.slane %v1584_v37, %v8336_v24 }
 0x1a2   : > { %v2295_v51 = vcombine.low %v2270_v39, %v2278_v41  ;;  %v2296_v40 = vcombine.high %v2270_v39, %v2278_v41  ;;  %v2311_v53 = vcombine.low %v2286_v42, %v2294_v44  ;;  %v2312_v56 = vcombine.high %v2286_v42, %v2294_v44 }
 0x1a3   : > { %v1539_v50 = vrot.slane %v1531_v43, %v8336_v24  ;;  %v1546_v6 = vrot.slane %v1532_v46, %v8336_v24  ;;  %v1599_v39 = vcombine.low %v8396_v16, %v8434_v32 }
 0x1a4   : > { %v2303_v54 = vrot.slane %v2295_v51, %v8340_v30  ;;  %v2310_v63 = vrot.slane %v2296_v40, %v8340_v30  ;;  %v2319_v58 = vrot.slane %v2311_v53, %v8340_v30  ;;  %v2326_v8 = vrot.slane %v2312_v56, %v8340_v30 }
 0x1a5   : > { %v1547_v10 = vcombine.low %v8417_v60, %v1539_v50  ;;  %v1548_v13 = vcombine.high %v8417_v60, %v1539_v50  ;;  %v1563_v14 = vcombine.low %v8420_v61, %v1546_v6  ;;  %v1564_v15 = vcombine.high %v8420_v61, %v1546_v6 }
 0x1a6   : > { %v2327_v17 = vcombine.low %v2303_v54, %v2319_v58  ;;  %v2328_v18 = vcombine.high %v2303_v54, %v2319_v58  ;;  %v2329_v19 = vcombine.low %v2310_v63, %v2326_v8  ;;  %v2330_v20 = vcombine.high %v2310_v63, %v2326_v8 }
 0x1a7   : > { %v1555_v62 = vrot.slane %v1547_v10, %v8340_v30  ;;  %v1562_v22 = vrot.slane %v1548_v13, %v8340_v30  ;;  %v1571_v23 = vrot.slane %v1563_v14, %v8340_v30  ;;  %v1578_v47 = vrot.slane %v1564_v15, %v8340_v30  ;;  %v1068_v10 = vpop.permute.xlu0 %1067 }
 0x1a8   : > { %v3283_v21 = vpack.c.bf16 %v2327_v17, %v2259_v33  ;;  %v3291_v38 = vpack.c.bf16 %v2328_v18, %v2260_v34  ;;  %v3299_v60 = vpack.c.bf16 %v2329_v19, %v2261_v35  ;;  %v3307_v27 = vpack.c.bf16 %v2330_v20, %v2262_v36  ;;  %v1022_v36 = vpop.permute.xlu1 %1021 }
 0x1a9   : > { %v2603_v28 = vcombine.low %v1555_v62, %v1562_v22  ;;  %v7234_v29 = vcombine.high %v1555_v62, %v1562_v22  ;;  %v2619_v61 = vcombine.low %v1571_v23, %v1578_v47  ;;  %v7235_v31 = vcombine.high %v1571_v23, %v1578_v47 }
 0x1aa   : > { %3316 = vst.msk [vmem:[#allocation2] sm:$0xff] %vm3315_vm2, %v3283_v21  ;;  %3324 = vst.msk [vmem:[#allocation2 + $0x40] sm:$0xff] %vm3315_vm2, %v3291_v38  ;;  %v1600_v33 = vcombine.high %v8396_v16, %v8434_v32  ;;  %v1379_v34 = vcombine.low %v8245_v0, %v1020_v25  ;;  %v1380_v35 = vcombine.high %v8245_v0, %v1020_v25 }
 0x1ab   : > { %3332 = vst.msk [vmem:[#allocation2 + $0x80] sm:$0xff] %vm3315_vm2, %v3299_v60  ;;  %3340 = vst.msk [vmem:[#allocation2 + $0xc0] sm:$0xff] %vm3315_vm2, %v3307_v27  ;;  %v2610_v41 = vrot.slane %v2603_v28, %v8336_v24  ;;  %v2618_v42 = vrot.slane %v7234_v29, %v8336_v24  ;;  %v2626_v44 = vrot.slane %v2619_v61, %v8336_v24 }
 0x1ac   : > { %v2634_v45 = vrot.slane %v7235_v31, %v8336_v24  ;;  %v1607_v37 = vrot.slane %v1599_v39, %v8336_v24  ;;  %v1614_v43 = vrot.slane %v1600_v33, %v8336_v24  ;;  %v1387_v46 = vrot.slane %v1379_v34, %v8336_v24  ;;  %v8496_v17 = vpop.permute.xlu1 %1069  ;;  %v8516_v34 = vpop.permute.xlu0 %983 }
 0x1ad   : > { %v1394_v16 = vrot.slane %v1380_v35, %v8336_v24  ;;  %v2635_v32 = vcombine.low %v2610_v41, %v2618_v42  ;;  %v2636_v51 = vcombine.high %v2610_v41, %v2618_v42  ;;  %v1447_v25 = vcombine.low %v8248_v1, %v1022_v36 }
 0x1ae   : > { %v2651_v0 = vcombine.low %v2626_v44, %v2634_v45  ;;  %v2652_v40 = vcombine.high %v2626_v44, %v2634_v45  ;;  %v1615_v53 = vcombine.low %v1591_v26, %v1607_v37  ;;  %v1616_v56 = vcombine.high %v1591_v26, %v1607_v37 }
 0x1af   : > { %v1631_v50 = vcombine.low %v8448_v49, %v1614_v43  ;;  %v1632_v6 = vcombine.high %v8448_v49, %v1614_v43  ;;  %v2643_v54 = vrot.slane %v2635_v32, %v8340_v30  ;;  %v8488_v63 = vrot.slane %v2636_v51, %v8340_v30 }
 0x1b0   : > { %v2659_v58 = vrot.slane %v2651_v0, %v8340_v30  ;;  %v2666_v8 = vrot.slane %v2652_v40, %v8340_v30  ;;  %v1623_v13 = vrot.slane %v1615_v53, %v8340_v30  ;;  %v1630_v14 = vrot.slane %v1616_v56, %v8340_v30  ;;  %v8518_v42 = vpop.permute.xlu1 %985 }
 0x1b1   : > { %v1639_v26 = vrot.slane %v1631_v50, %v8340_v30  ;;  %v1646_v15 = vrot.slane %v1632_v6, %v8340_v30  ;;  %v1448_v21 = vcombine.high %v8248_v1, %v1022_v36  ;;  %v1395_v38 = vcombine.low %v8444_v48, %v1068_v10 }
 0x1b2   : > { %v2667_v49 = vcombine.low %v2643_v54, %v2659_v58  ;;  %v2668_v18 = vcombine.high %v2643_v54, %v2659_v58  ;;  %v2669_v19 = vcombine.low %v8488_v63, %v2666_v8  ;;  %v2670_v20 = vcombine.high %v8488_v63, %v2666_v8 }
 0x1b3   : > { %v2671_v62 = vcombine.low %v1623_v13, %v1630_v14  ;;  %v7236_v22 = vcombine.high %v1623_v13, %v1630_v14  ;;  %v2687_v23 = vcombine.low %v1639_v26, %v1646_v15  ;;  %v7237_v47 = vcombine.high %v1639_v26, %v1646_v15  ;;  %v5968_v14 = vld [vmem:[#allocation2] sm:$0xff]  ;;  %v1032_v15 = vpop.permute.xlu0 %1031 }
 0x1b4   : > { %v1396_v60 = vcombine.high %v8444_v48, %v1068_v10  ;;  %v8509_v31 = vrot.slane %v1447_v25, %v8336_v24  ;;  %v8512_v39 = vrot.slane %v1448_v21, %v8336_v24  ;;  %v1403_v1 = vrot.slane %v1395_v38, %v8336_v24  ;;  %v5976_v26 = vld [vmem:[#allocation2 + $0x40] sm:$0xff]  ;;  %v1034_v21 = vpop.permute.xlu1 %1033 }
 0x1b5   : > { %v2678_v27 = vrot.slane %v2671_v62, %v8336_v24  ;;  %v2686_v28 = vrot.slane %v7236_v22, %v8336_v24  ;;  %v2694_v29 = vrot.slane %v2687_v23, %v8336_v24  ;;  %v2702_v61 = vrot.slane %v7237_v47, %v8336_v24  ;;  %v8528_v62 = vpop.f32.mrb[0].mxu1 }
 0x1b6   : > { %v1410_v33 = vrot.slane %v1396_v60, %v8336_v24  ;;  %v1411_v44 = vcombine.low %v1387_v46, %v1403_v1  ;;  %v1412_v45 = vcombine.high %v1387_v46, %v1403_v1  ;;  %v8530_v38 = vpop.f32.mrb[1].mxu1 }
 0x1b7   : > { %v2703_v48 = vcombine.low %v2678_v27, %v2686_v28  ;;  %v2704_v35 = vcombine.high %v2678_v27, %v2686_v28  ;;  %v2719_v36 = vcombine.low %v2694_v29, %v2702_v61  ;;  %v2720_v41 = vcombine.high %v2694_v29, %v2702_v61  ;;  %v8536_v61 = vpop.f32.mrb[2].mxu1 }
 0x1b8   : > { %v1427_v37 = vcombine.low %v1394_v16, %v1410_v33  ;;  %v1428_v43 = vcombine.high %v1394_v16, %v1410_v33  ;;  %v1419_v53 = vrot.slane %v1411_v44, %v8340_v30  ;;  %v1426_v56 = vrot.slane %v1412_v45, %v8340_v30  ;;  %v8548_v1 = vpop.f32.mrb[3].mxu1 }
 0x1b9   : > { %v2711_v32 = vrot.slane %v2703_v48, %v8340_v30  ;;  %v2718_v51 = vrot.slane %v2704_v35, %v8340_v30  ;;  %v2727_v0 = vrot.slane %v2719_v36, %v8340_v30  ;;  %v2734_v40 = vrot.slane %v2720_v41, %v8340_v30 }
 0x1ba   : > { %v1435_v50 = vrot.slane %v1427_v37, %v8340_v30  ;;  %v1442_v6 = vrot.slane %v1428_v43, %v8340_v30  ;;  %v2467_v58 = vcombine.low %v1419_v53, %v1426_v56  ;;  %v7230_v8 = vcombine.high %v1419_v53, %v1426_v56  ;;  %v8571_v56 = vpop.permute.xlu1 %1081 }
 0x1bb   : > { %v2735_v54 = vcombine.low %v2711_v32, %v2727_v0  ;;  %v2736_v46 = vcombine.high %v2711_v32, %v2727_v0  ;;  %v2737_v63 = vcombine.low %v2718_v51, %v2734_v40  ;;  %v2738_v16 = vcombine.high %v2718_v51, %v2734_v40  ;;  %v1080_v51 = vpop.permute.xlu0 %1079 }
 0x1bc   : > { %v2483_v10 = vcombine.low %v1435_v50, %v1442_v6  ;;  %v7231_v13 = vcombine.high %v1435_v50, %v1442_v6  ;;  %v2474_v60 = vrot.slane %v2467_v58, %v8336_v24  ;;  %v2482_v27 = vrot.slane %v7230_v8, %v8336_v24 }
 0x1bd   : > { %v3286_v22 = vpack.c.bf16 %v2735_v54, %v2667_v49  ;;  %v3294_v23 = vpack.c.bf16 %v2736_v46, %v2668_v18  ;;  %v3302_v47 = vpack.c.bf16 %v2737_v63, %v2669_v19  ;;  %v3310_v25 = vpack.c.bf16 %v2738_v16, %v2670_v20 }
 0x1be   : > { %v2490_v28 = vrot.slane %v2483_v10, %v8336_v24  ;;  %v2498_v29 = vrot.slane %v7231_v13, %v8336_v24  ;;  %v1463_v49 = vcombine.low %v8456_v9, %v8496_v17  ;;  %v1464_v18 = vcombine.high %v8456_v9, %v8496_v17 }
 0x1bf   : > { %3319 = vst.msk [vmem:[#allocation2 + $0x18] sm:$0xff] %vm3315_vm2, %v3286_v22  ;;  %3327 = vst.msk [vmem:[#allocation2 + $0x58] sm:$0xff] %vm3315_vm2, %v3294_v23  ;;  %v6005_v19 = vsel %vm3315_vm2, %v5968_v14, 0  ;;  %v6072_v20 = vsel %vm3315_vm2, %v5976_v26, 0  ;;  %v2499_v33 = vcombine.low %v2474_v60, %v2482_v27  ;;  %v2500_v48 = vcombine.high %v2474_v60, %v2482_v27  ;;  %v8598_v27 = vpop.permute.xlu0 %979 }
 0x1c0   : > { %3335 = vst.msk [vmem:[#allocation2 + $0x98] sm:$0xff] %vm3315_vm2, %v3302_v47  ;;  %3343 = vst.msk [vmem:[#allocation2 + $0xd8] sm:$0xff] %vm3315_vm2, %v3310_v25  ;;  %v2515_v35 = vcombine.low %v2490_v28, %v2498_v29  ;;  %v2516_v36 = vcombine.high %v2490_v28, %v2498_v29  ;;  %7490 = vmatpush3.bf16.xpose.msra.mxu1 %v6005_v19  ;;  %v1471_v41 = vrot.slane %v1463_v49, %v8336_v24  ;;  %v8604_v49 = vpop.permute.xlu1 %981 }
 0x1c1   : > { %v1478_v44 = vrot.slane %v1464_v18, %v8336_v24  ;;  %7510 = vmatpush3.bf16.xpose.msra.mxu0 %v6072_v20  ;;  %v1787_v45 = vcombine.low %v8259_v2, %v1032_v15  ;;  %v1788_v9 = vcombine.high %v8259_v2, %v1032_v15  ;;  %v8555_v17 = vrot.slane %v2499_v33, %v8340_v30 }
 0x1c2   : > { %v8558_v37 = vrot.slane %v2500_v48, %v8340_v30  ;;  %v8561_v43 = vrot.slane %v2515_v35, %v8340_v30  ;;  %v8564_v32 = vrot.slane %v2516_v36, %v8340_v30  ;;  %7491 = vmatprep.subr.bf16.mxu1 %v7926_v12  ;;  %v1479_v0 = vcombine.low %v8509_v31, %v1471_v41 }
 0x1c3   : > { %v1480_v40 = vcombine.high %v8509_v31, %v1471_v41  ;;  %v1495_v2 = vcombine.low %v8512_v39, %v1478_v44  ;;  %v1496_v53 = vcombine.high %v8512_v39, %v1478_v44  ;;  %7511 = vmatprep.subr.bf16.mxu0 %v7926_v12  ;;  %v1795_v58 = vrot.slane %v1787_v45, %v8336_v24 }
 0x1c4   : > { %v2531_v50 = vcombine.low %v8555_v17, %v8561_v43  ;;  %v2532_v6 = vcombine.high %v8555_v17, %v8561_v43  ;;  %v2533_v54 = vcombine.low %v8558_v37, %v8564_v32  ;;  %v2534_v31 = vcombine.high %v8558_v37, %v8564_v32 }
 0x1c5   : > { %v1487_v46 = vrot.slane %v1479_v0, %v8340_v30  ;;  %v1494_v39 = vrot.slane %v1480_v40, %v8340_v30  ;;  %v1503_v63 = vrot.slane %v1495_v2, %v8340_v30  ;;  %v1510_v16 = vrot.slane %v1496_v53, %v8340_v30  ;;  %v8620_v2 = vpop.permute.xlu0 %1027 }
 0x1c6   : > { %v1802_v8 = vrot.slane %v1788_v9, %v8336_v24  ;;  %v1855_v10 = vcombine.low %v8266_v3, %v1034_v21  ;;  %v1856_v13 = vcombine.high %v8266_v3, %v1034_v21  ;;  %v1803_v25 = vcombine.low %v8516_v34, %v1080_v51 }
 0x1c7   : > { %v2535_v14 = vcombine.low %v1487_v46, %v1494_v39  ;;  %v7232_v26 = vcombine.high %v1487_v46, %v1494_v39  ;;  %v2551_v15 = vcombine.low %v1503_v63, %v1510_v16  ;;  %v7233_v22 = vcombine.high %v1503_v63, %v1510_v16  ;;  %v8622_v63 = vpop.permute.xlu1 %1029 }
 0x1c8   : > { %v8591_v23 = vrot.slane %v1855_v10, %v8336_v24  ;;  %v8594_v47 = vrot.slane %v1856_v13, %v8336_v24  ;;  %v1804_v60 = vcombine.high %v8516_v34, %v1080_v51  ;;  %v1811_v18 = vrot.slane %v1803_v25, %v8336_v24  ;;  %v5969_v13 = vld [vmem:[#allocation2 + $0x8] sm:$0xff] }
 0x1c9   : > { %v2542_v28 = vrot.slane %v2535_v14, %v8336_v24  ;;  %v2550_v3 = vrot.slane %v7232_v26, %v8336_v24  ;;  %v2558_v21 = vrot.slane %v2551_v15, %v8336_v24  ;;  %v2566_v29 = vrot.slane %v7233_v22, %v8336_v24  ;;  %v5977_v14 = vld [vmem:[#allocation2 + $0x48] sm:$0xff] }
 0x1ca   : > { %v1818_v19 = vrot.slane %v1804_v60, %v8336_v24  ;;  %v1871_v20 = vcombine.low %v8518_v42, %v8571_v56  ;;  %v1872_v34 = vcombine.high %v8518_v42, %v8571_v56  ;;  %v1819_v41 = vcombine.low %v1795_v58, %v1811_v18 }
 0x1cb   : > { %v2567_v33 = vcombine.low %v2542_v28, %v2550_v3  ;;  %v2568_v48 = vcombine.high %v2542_v28, %v2550_v3  ;;  %v2583_v35 = vcombine.low %v2558_v21, %v2566_v29  ;;  %v2584_v36 = vcombine.high %v2558_v21, %v2566_v29 }
 0x1cc   : > { %v1820_v44 = vcombine.high %v1795_v58, %v1811_v18  ;;  %v1835_v45 = vcombine.low %v1802_v8, %v1818_v19  ;;  %v1836_v9 = vcombine.high %v1802_v8, %v1818_v19  ;;  %v1827_v51 = vrot.slane %v1819_v41, %v8340_v30 }
 0x1cd   : > { %v2575_v17 = vrot.slane %v2567_v33, %v8340_v30  ;;  %v2582_v37 = vrot.slane %v2568_v48, %v8340_v30  ;;  %v2591_v43 = vrot.slane %v2583_v35, %v8340_v30  ;;  %v2598_v32 = vrot.slane %v2584_v36, %v8340_v30  ;;  %v1076_v48 = vpop.permute.xlu0 %1075 }
 0x1ce   : > { %v1834_v42 = vrot.slane %v1820_v44, %v8340_v30  ;;  %v1843_v0 = vrot.slane %v1835_v45, %v8340_v30  ;;  %v1850_v40 = vrot.slane %v1836_v9, %v8340_v30 }
 0x1cf   : > { %v2599_v53 = vcombine.low %v2575_v17, %v2591_v43  ;;  %v2600_v56 = vcombine.high %v2575_v17, %v2591_v43  ;;  %v2601_v46 = vcombine.low %v2582_v37, %v2598_v32  ;;  %v2602_v39 = vcombine.high %v2582_v37, %v2598_v32 }
 0x1d0   : > { %v2875_v16 = vcombine.low %v1827_v51, %v1834_v42  ;;  %v7242_v58 = vcombine.high %v1827_v51, %v1834_v42  ;;  %v2891_v8 = vcombine.low %v1843_v0, %v1850_v40  ;;  %v7243_v10 = vcombine.high %v1843_v0, %v1850_v40 }
 0x1d1   : > { %v3285_v26 = vpack.c.bf16 %v2599_v53, %v2531_v50  ;;  %v3293_v15 = vpack.c.bf16 %v2600_v56, %v2532_v6  ;;  %v3301_v22 = vpack.c.bf16 %v2601_v46, %v2533_v54  ;;  %v3309_v25 = vpack.c.bf16 %v2602_v39, %v2534_v31 }
 0x1d2   : > { %v2882_v60 = vrot.slane %v2875_v16, %v8336_v24  ;;  %v2890_v28 = vrot.slane %v7242_v58, %v8336_v24  ;;  %v2898_v3 = vrot.slane %v2891_v8, %v8336_v24  ;;  %v2906_v21 = vrot.slane %v7243_v10, %v8336_v24  ;;  %v8662_v10 = vpop.permute.xlu0 %991 }
 0x1d3   : > { %3318 = vst.msk [vmem:[#allocation2 + $0x10] sm:$0xff] %vm3315_vm2, %v3285_v26  ;;  %3326 = vst.msk [vmem:[#allocation2 + $0x50] sm:$0xff] %vm3315_vm2, %v3293_v15  ;;  %v1879_v50 = vrot.slane %v1871_v20, %v8336_v24  ;;  %v1886_v6 = vrot.slane %v1872_v34, %v8336_v24  ;;  %v6008_v54 = vsel %vm3315_vm2, %v5969_v13, 0  ;;  %v6075_v31 = vsel %vm3315_vm2, %v5977_v14, 0  ;;  %v1078_v34 = vpop.permute.xlu1 %1077 }
 0x1d4   : > { %3334 = vst.msk [vmem:[#allocation2 + $0x90] sm:$0xff] %vm3315_vm2, %v3301_v22  ;;  %3342 = vst.msk [vmem:[#allocation2 + $0xd0] sm:$0xff] %vm3315_vm2, %v3309_v25  ;;  %v2907_v29 = vcombine.low %v2882_v60, %v2890_v28  ;;  %v2908_v18 = vcombine.high %v2882_v60, %v2890_v28  ;;  %v2923_v19 = vcombine.low %v2898_v3, %v2906_v21  ;;  %7492 = vmatpush3.bf16.xpose.msra.mxu1 %v6008_v54 }
 0x1d5   : > { %v2924_v33 = vcombine.high %v2898_v3, %v2906_v21  ;;  %v1887_v35 = vcombine.low %v8591_v23, %v1879_v50  ;;  %v1888_v36 = vcombine.high %v8591_v23, %v1879_v50  ;;  %v1903_v41 = vcombine.low %v8594_v47, %v1886_v6  ;;  %7512 = vmatpush3.bf16.xpose.msra.mxu0 %v6075_v31 }
 0x1d6   : > { %v1904_v20 = vcombine.high %v8594_v47, %v1886_v6  ;;  %v2915_v44 = vrot.slane %v2907_v29, %v8340_v30  ;;  %v8642_v45 = vrot.slane %v2908_v18, %v8340_v30  ;;  %v2931_v9 = vrot.slane %v2923_v19, %v8340_v30  ;;  %7493 = vmatprep.subr.bf16.mxu1 %v7926_v12 }
 0x1d7   : > { %v2938_v17 = vrot.slane %v2924_v33, %v8340_v30  ;;  %v1895_v37 = vrot.slane %v1887_v35, %v8340_v30  ;;  %v1902_v23 = vrot.slane %v1888_v36, %v8340_v30  ;;  %v1911_v43 = vrot.slane %v1903_v41, %v8340_v30  ;;  %7513 = vmatprep.subr.bf16.mxu0 %v7926_v12  ;;  %v8668_v22 = vpop.permute.xlu1 %993 }
 0x1d8   : > { %v1918_v47 = vrot.slane %v1904_v20, %v8340_v30  ;;  %v2939_v32 = vcombine.low %v2915_v44, %v2931_v9  ;;  %v2940_v51 = vcombine.high %v2915_v44, %v2931_v9  ;;  %v1651_v39 = vcombine.low %v8281_v4, %v8620_v2 }
 0x1d9   : > { %v2941_v42 = vcombine.low %v8642_v45, %v2938_v17  ;;  %v2942_v0 = vcombine.high %v8642_v45, %v2938_v17  ;;  %v2943_v40 = vcombine.low %v1895_v37, %v1902_v23  ;;  %v7244_v53 = vcombine.high %v1895_v37, %v1902_v23 }
 0x1da   : > { %v2959_v56 = vcombine.low %v1911_v43, %v1918_v47  ;;  %v7245_v46 = vcombine.high %v1911_v43, %v1918_v47  ;;  %v1652_v16 = vcombine.high %v8281_v4, %v8620_v2  ;;  %v1719_v58 = vcombine.low %v8284_v5, %v8622_v63 }
 0x1db   : > { %v1720_v8 = vcombine.high %v8284_v5, %v8622_v63  ;;  %v2950_v13 = vrot.slane %v2943_v40, %v8336_v24  ;;  %v2958_v14 = vrot.slane %v7244_v53, %v8336_v24  ;;  %v1659_v4 = vrot.slane %v1651_v39, %v8336_v24  ;;  %v8674_v63 = vpop.f32.mrb[4].mxu1  ;;  %v8692_v9 = vpop.permute.xlu1 %989 }
 0x1dc   : > { %v2966_v26 = vrot.slane %v2959_v56, %v8336_v24  ;;  %v2974_v15 = vrot.slane %v7245_v46, %v8336_v24  ;;  %v1666_v2 = vrot.slane %v1652_v16, %v8336_v24  ;;  %v1727_v25 = vrot.slane %v1719_v58, %v8336_v24  ;;  %v8676_v50 = vpop.f32.mrb[5].mxu1 }
 0x1dd   : > { %v1734_v5 = vrot.slane %v1720_v8, %v8336_v24  ;;  %v2975_v60 = vcombine.low %v2950_v13, %v2958_v14  ;;  %v2976_v28 = vcombine.high %v2950_v13, %v2958_v14  ;;  %v1667_v6 = vcombine.low %v8598_v27, %v1076_v48  ;;  %v8698_v8 = vpop.f32.mrb[6].mxu1 }
 0x1de   : > { %v2991_v3 = vcombine.low %v2966_v26, %v2974_v15  ;;  %v2992_v21 = vcombine.high %v2966_v26, %v2974_v15  ;;  %v1668_v54 = vcombine.high %v8598_v27, %v1076_v48  ;;  %v1735_v31 = vcombine.low %v8604_v49, %v1078_v34  ;;  %v8690_v48 = vpop.permute.xlu0 %987  ;;  %v8704_v13 = vpop.f32.mrb[7].mxu1 }
 0x1df   : > { %v1736_v29 = vcombine.high %v8604_v49, %v1078_v34  ;;  %v2983_v18 = vrot.slane %v2975_v60, %v8340_v30  ;;  %v2990_v19 = vrot.slane %v2976_v28, %v8340_v30  ;;  %v1675_v36 = vrot.slane %v1667_v6, %v8336_v24  ;;  %v8710_v6 = vpop.permute.xlu1 %1037 }
 0x1e0   : > { %v2999_v33 = vrot.slane %v2991_v3, %v8340_v30  ;;  %v3006_v35 = vrot.slane %v2992_v21, %v8340_v30  ;;  %v1682_v41 = vrot.slane %v1668_v54, %v8336_v24  ;;  %v1743_v20 = vrot.slane %v1735_v31, %v8336_v24 }
 0x1e1   : > { %v1750_v27 = vrot.slane %v1736_v29, %v8336_v24  ;;  %v1683_v17 = vcombine.low %v1659_v4, %v1675_v36  ;;  %v1684_v37 = vcombine.high %v1659_v4, %v1675_v36 }
 0x1e2   : > { %v3007_v44 = vcombine.low %v2983_v18, %v2999_v33  ;;  %v3008_v49 = vcombine.high %v2983_v18, %v2999_v33  ;;  %v3009_v34 = vcombine.low %v2990_v19, %v3006_v35  ;;  %v3010_v45 = vcombine.high %v2990_v19, %v3006_v35 }
 0x1e3   : > { %v1699_v23 = vcombine.low %v1666_v2, %v1682_v41  ;;  %v1700_v43 = vcombine.high %v1666_v2, %v1682_v41  ;;  %v1691_v46 = vrot.slane %v1683_v17, %v8340_v30  ;;  %v1698_v39 = vrot.slane %v1684_v37, %v8340_v30  ;;  %v1036_v2 = vpop.permute.xlu0 %1035 }
 0x1e4   : > { %v3288_v47 = vpack.c.bf16 %v3007_v44, %v2939_v32  ;;  %v3296_v40 = vpack.c.bf16 %v3008_v49, %v2940_v51  ;;  %v3304_v53 = vpack.c.bf16 %v3009_v34, %v2941_v42  ;;  %v3312_v56 = vpack.c.bf16 %v3010_v45, %v2942_v0 }
 0x1e5   : > { %v1707_v16 = vrot.slane %v1699_v23, %v8340_v30  ;;  %v1714_v58 = vrot.slane %v1700_v43, %v8340_v30  ;;  %v1751_v32 = vcombine.low %v1727_v25, %v1743_v20  ;;  %v1752_v51 = vcombine.high %v1727_v25, %v1743_v20 }
 0x1e6   : > { %3321 = vst.msk [vmem:[#allocation2 + $0x28] sm:$0xff] %vm3315_vm2, %v3288_v47  ;;  %3329 = vst.msk [vmem:[#allocation2 + $0x68] sm:$0xff] %vm3315_vm2, %v3296_v40  ;;  %v1767_v42 = vcombine.low %v1734_v5, %v1750_v27  ;;  %v1768_v0 = vcombine.high %v1734_v5, %v1750_v27  ;;  %v2739_v14 = vcombine.low %v1691_v46, %v1698_v39 }
 0x1e7   : > { %3337 = vst.msk [vmem:[#allocation2 + $0xa8] sm:$0xff] %vm3315_vm2, %v3304_v53  ;;  %3345 = vst.msk [vmem:[#allocation2 + $0xe8] sm:$0xff] %vm3315_vm2, %v3312_v56  ;;  %v7238_v26 = vcombine.high %v1691_v46, %v1698_v39  ;;  %v2755_v15 = vcombine.low %v1707_v16, %v1714_v58  ;;  %v7239_v4 = vcombine.high %v1707_v16, %v1714_v58  ;;  %v1084_v43 = vpop.permute.xlu0 %1083  ;;  %v5970_v46 = vld [vmem:[#allocation2 + $0x10] sm:$0xff]  ;;  %v1086_v16 = vpop.permute.xlu1 %1085 }
 0x1e8   : > { %v1759_v60 = vrot.slane %v1751_v32, %v8340_v30  ;;  %v1766_v28 = vrot.slane %v1752_v51, %v8340_v30  ;;  %v1775_v3 = vrot.slane %v1767_v42, %v8340_v30  ;;  %v1782_v21 = vrot.slane %v1768_v0, %v8340_v30  ;;  %v5978_v39 = vld [vmem:[#allocation2 + $0x50] sm:$0xff] }
 0x1e9   : > { %v2746_v25 = vrot.slane %v2739_v14, %v8336_v24  ;;  %v2754_v5 = vrot.slane %v7238_v26, %v8336_v24  ;;  %v2762_v54 = vrot.slane %v2755_v15, %v8336_v24  ;;  %v2770_v31 = vrot.slane %v7239_v4, %v8336_v24 }
 0x1ea   : > { %v2807_v29 = vcombine.low %v1759_v60, %v1766_v28  ;;  %v7240_v18 = vcombine.high %v1759_v60, %v1766_v28  ;;  %v2823_v19 = vcombine.low %v1775_v3, %v1782_v21  ;;  %v7241_v33 = vcombine.high %v1775_v3, %v1782_v21 }
 0x1eb   : > { %v2771_v35 = vcombine.low %v2746_v25, %v2754_v5  ;;  %v2772_v36 = vcombine.high %v2746_v25, %v2754_v5  ;;  %v2787_v41 = vcombine.low %v2762_v54, %v2770_v31  ;;  %v2788_v20 = vcombine.high %v2762_v54, %v2770_v31  ;;  %v5971_v31 = vld [vmem:[#allocation2 + $0x18] sm:$0xff] }
 0x1ec   : > { %v2814_v27 = vrot.slane %v2807_v29, %v8336_v24  ;;  %v2822_v44 = vrot.slane %v7240_v18, %v8336_v24  ;;  %v2830_v49 = vrot.slane %v2823_v19, %v8336_v24  ;;  %v2838_v34 = vrot.slane %v7241_v33, %v8336_v24  ;;  %v5979_v29 = vld [vmem:[#allocation2 + $0x58] sm:$0xff] }
 0x1ed   : > { %v2779_v45 = vrot.slane %v2771_v35, %v8340_v30  ;;  %v2786_v17 = vrot.slane %v2772_v36, %v8340_v30  ;;  %v2795_v37 = vrot.slane %v2787_v41, %v8340_v30  ;;  %v2802_v23 = vrot.slane %v2788_v20, %v8340_v30  ;;  %v1040_v36 = vpop.permute.xlu0 %1039 }
 0x1ee   : > { %v2839_v47 = vcombine.low %v2814_v27, %v2822_v44  ;;  %v2840_v40 = vcombine.high %v2814_v27, %v2822_v44  ;;  %v2855_v53 = vcombine.low %v2830_v49, %v2838_v34  ;;  %v2856_v56 = vcombine.high %v2830_v49, %v2838_v34  ;;  %v1042_v27 = vpop.permute.xlu1 %1041  ;;  %v8739_v44 = vpop.f32.mrb[8].mxu1 }
 0x1ef   : > { %v2803_v58 = vcombine.low %v2779_v45, %v2795_v37  ;;  %v2804_v32 = vcombine.high %v2779_v45, %v2795_v37  ;;  %v2805_v51 = vcombine.low %v2786_v17, %v2802_v23  ;;  %v2806_v42 = vcombine.high %v2786_v17, %v2802_v23 }
 0x1f0   : > { %v2847_v0 = vrot.slane %v2839_v47, %v8340_v30  ;;  %v2854_v14 = vrot.slane %v2840_v40, %v8340_v30  ;;  %v2863_v26 = vrot.slane %v2855_v53, %v8340_v30  ;;  %v2870_v15 = vrot.slane %v2856_v56, %v8340_v30 }
 0x1f1   : > { %v6011_v4 = vsel %vm3315_vm2, %v5970_v46, 0  ;;  %v6078_v60 = vsel %vm3315_vm2, %v5978_v39, 0  ;;  %v1923_v28 = vcombine.low %v8224_v55, %v1036_v2  ;;  %v1924_v3 = vcombine.high %v8224_v55, %v1036_v2 }
 0x1f2   : > { %v2871_v21 = vcombine.low %v2847_v0, %v2863_v26  ;;  %v2872_v25 = vcombine.high %v2847_v0, %v2863_v26  ;;  %v2873_v5 = vcombine.low %v2854_v14, %v2870_v15  ;;  %v2874_v54 = vcombine.high %v2854_v14, %v2870_v15  ;;  %7494 = vmatpush3.bf16.xpose.msra.mxu1 %v6011_v4 }
 0x1f3   : > { %7514 = vmatpush3.bf16.xpose.msra.mxu0 %v6078_v60  ;;  %v1931_v18 = vrot.slane %v1923_v28, %v8336_v24  ;;  %v1938_v19 = vrot.slane %v1924_v3, %v8336_v24  ;;  %v1991_v33 = vcombine.low %v8234_v59, %v8710_v6  ;;  %v1992_v35 = vcombine.high %v8234_v59, %v8710_v6  ;;  %v8746_v6 = vpop.f32.mrb[9].mxu1 }
 0x1f4   : > { %v3287_v55 = vpack.c.bf16 %v2871_v21, %v2803_v58  ;;  %v3295_v2 = vpack.c.bf16 %v2872_v25, %v2804_v32  ;;  %v3303_v41 = vpack.c.bf16 %v2873_v5, %v2805_v51  ;;  %v3311_v20 = vpack.c.bf16 %v2874_v54, %v2806_v42  ;;  %7495 = vmatprep.subr.bf16.mxu1 %v7926_v12  ;;  %v8756_v40 = vpop.f32.mrb[10].mxu1 }
 0x1f5   : > { %v1999_v49 = vrot.slane %v1991_v33, %v8336_v24  ;;  %v2006_v34 = vrot.slane %v1992_v35, %v8336_v24  ;;  %7515 = vmatprep.subr.bf16.mxu0 %v7926_v12  ;;  %v6014_v45 = vsel %vm3315_vm2, %v5971_v31, 0  ;;  %v6081_v59 = vsel %vm3315_vm2, %v5979_v29, 0  ;;  %v8762_v58 = vpop.f32.mrb[11].mxu1 }
 0x1f6   : > { %3320 = vst.msk [vmem:[#allocation2 + $0x20] sm:$0xff] %vm3315_vm2, %v3287_v55  ;;  %3328 = vst.msk [vmem:[#allocation2 + $0x60] sm:$0xff] %vm3315_vm2, %v3295_v2  ;;  %v1939_v17 = vcombine.low %v8690_v48, %v1084_v43  ;;  %v1940_v37 = vcombine.high %v8690_v48, %v1084_v43  ;;  %v2007_v23 = vcombine.low %v8692_v9, %v1086_v16 }
 0x1f7   : > { %3336 = vst.msk [vmem:[#allocation2 + $0xa0] sm:$0xff] %vm3315_vm2, %v3303_v41  ;;  %3344 = vst.msk [vmem:[#allocation2 + $0xe0] sm:$0xff] %vm3315_vm2, %v3311_v20  ;;  %v2008_v47 = vcombine.high %v8692_v9, %v1086_v16  ;;  %v2059_v53 = vcombine.low %v8218_v52, %v1040_v36  ;;  %v2060_v56 = vcombine.high %v8218_v52, %v1040_v36 }
 0x1f8   : > { %v2127_v46 = vcombine.low %v8229_v57, %v1042_v27  ;;  %v2128_v39 = vcombine.high %v8229_v57, %v1042_v27  ;;  %v1947_v32 = vrot.slane %v1939_v17, %v8336_v24  ;;  %v1954_v48 = vrot.slane %v1940_v37, %v8336_v24 }
 0x1f9   : > { %v2015_v43 = vrot.slane %v2007_v23, %v8336_v24  ;;  %v2022_v9 = vrot.slane %v2008_v47, %v8336_v24  ;;  %v8769_v16 = vrot.slane %v2059_v53, %v8336_v24  ;;  %v8772_v51 = vrot.slane %v2060_v56, %v8336_v24 }
 0x1fa   : > { %v8775_v52 = vrot.slane %v2127_v46, %v8336_v24  ;;  %v8778_v57 = vrot.slane %v2128_v39, %v8336_v24  ;;  %7496 = vmatpush3.bf16.xpose.msra.mxu1 %v6014_v45  ;;  %v1955_v42 = vcombine.low %v1931_v18, %v1947_v32  ;;  %v1956_v0 = vcombine.high %v1931_v18, %v1947_v32  ;;  %v1090_v39 = vpop.permute.xlu1 %1089 }
 0x1fb   : > { %v1971_v14 = vcombine.low %v1938_v19, %v1954_v48  ;;  %v1972_v26 = vcombine.high %v1938_v19, %v1954_v48  ;;  %7516 = vmatpush3.bf16.xpose.msra.mxu0 %v6081_v59  ;;  %v2023_v15 = vcombine.low %v1999_v49, %v2015_v43  ;;  %v2024_v4 = vcombine.high %v1999_v49, %v2015_v43 }
 0x1fc   : > { %v2039_v60 = vcombine.low %v2006_v34, %v2022_v9  ;;  %v2040_v28 = vcombine.high %v2006_v34, %v2022_v9  ;;  %v1963_v3 = vrot.slane %v1955_v42, %v8340_v30  ;;  %v1970_v21 = vrot.slane %v1956_v0, %v8340_v30  ;;  %7497 = vmatprep.subr.bf16.mxu1 %v7926_v12 }
 0x1fd   : > { %v1979_v25 = vrot.slane %v1971_v14, %v8340_v30  ;;  %v1986_v5 = vrot.slane %v1972_v26, %v8340_v30  ;;  %v2031_v54 = vrot.slane %v2023_v15, %v8340_v30  ;;  %v2038_v31 = vrot.slane %v2024_v4, %v8340_v30  ;;  %7517 = vmatprep.subr.bf16.mxu0 %v7926_v12 }
 0x1fe   : > { %v2047_v29 = vrot.slane %v2039_v60, %v8340_v30  ;;  %v2054_v18 = vrot.slane %v2040_v28, %v8340_v30  ;;  %v3011_v19 = vcombine.low %v1963_v3, %v1970_v21  ;;  %v7246_v33 = vcombine.high %v1963_v3, %v1970_v21  ;;  %v1088_v3 = vpop.permute.xlu0 %1087 }
 0x1ff   : > { %v3027_v35 = vcombine.low %v1979_v25, %v1986_v5  ;;  %v7247_v36 = vcombine.high %v1979_v25, %v1986_v5  ;;  %v3079_v55 = vcombine.low %v2031_v54, %v2038_v31  ;;  %v7248_v2 = vcombine.high %v2031_v54, %v2038_v31 }
 0x200   : > { %v3095_v41 = vcombine.low %v2047_v29, %v2054_v18  ;;  %v7249_v20 = vcombine.high %v2047_v29, %v2054_v18  ;;  %v3018_v27 = vrot.slane %v3011_v19, %v8336_v24  ;;  %v3026_v49 = vrot.slane %v7246_v33, %v8336_v24 }
 0x201   : > { %v3034_v34 = vrot.slane %v3027_v35, %v8336_v24  ;;  %v3042_v45 = vrot.slane %v7247_v36, %v8336_v24  ;;  %v3086_v59 = vrot.slane %v3079_v55, %v8336_v24  ;;  %v3094_v17 = vrot.slane %v7248_v2, %v8336_v24  ;;  %v8810_v2 = vpop.permute.xlu1 %5822 }
 0x202   : > { %v3102_v37 = vrot.slane %v3095_v41, %v8336_v24  ;;  %v3110_v23 = vrot.slane %v7249_v20, %v8336_v24  ;;  %v3043_v47 = vcombine.low %v3018_v27, %v3026_v49  ;;  %v3044_v53 = vcombine.high %v3018_v27, %v3026_v49  ;;  %v5972_v41 = vld [vmem:[#allocation2 + $0x20] sm:$0xff] }
 0x203   : > { %v3059_v56 = vcombine.low %v3034_v34, %v3042_v45  ;;  %v3060_v46 = vcombine.high %v3034_v34, %v3042_v45  ;;  %v3111_v32 = vcombine.low %v3086_v59, %v3094_v17  ;;  %v3112_v48 = vcombine.high %v3086_v59, %v3094_v17  ;;  %v5980_v20 = vld [vmem:[#allocation2 + $0x60] sm:$0xff] }
 0x204   : > { %v3127_v43 = vcombine.low %v3102_v37, %v3110_v23  ;;  %v3128_v9 = vcombine.high %v3102_v37, %v3110_v23  ;;  %v3051_v42 = vrot.slane %v3043_v47, %v8340_v30  ;;  %v3058_v0 = vrot.slane %v3044_v53, %v8340_v30 }
 0x205   : > { %v3067_v14 = vrot.slane %v3059_v56, %v8340_v30  ;;  %v3074_v26 = vrot.slane %v3060_v46, %v8340_v30  ;;  %v3119_v15 = vrot.slane %v3111_v32, %v8340_v30  ;;  %v3126_v4 = vrot.slane %v3112_v48, %v8340_v30 }
 0x206   : > { %v3135_v60 = vrot.slane %v3127_v43, %v8340_v30  ;;  %v3142_v28 = vrot.slane %v3128_v9, %v8340_v30  ;;  %v2075_v33 = vcombine.low %v8662_v10, %v1088_v3  ;;  %v2076_v35 = vcombine.high %v8662_v10, %v1088_v3 }
 0x207   : > { %v3075_v21 = vcombine.low %v3051_v42, %v3067_v14  ;;  %v3076_v25 = vcombine.high %v3051_v42, %v3067_v14  ;;  %v3077_v5 = vcombine.low %v3058_v0, %v3074_v26  ;;  %v3078_v54 = vcombine.high %v3058_v0, %v3074_v26 }
 0x208   : > { %v3143_v31 = vcombine.low %v3119_v15, %v3135_v60  ;;  %v3144_v29 = vcombine.high %v3119_v15, %v3135_v60  ;;  %v3145_v18 = vcombine.low %v3126_v4, %v3142_v28  ;;  %v3146_v19 = vcombine.high %v3126_v4, %v3142_v28 }
 0x209   : > { %v2143_v36 = vcombine.low %v8668_v22, %v1090_v39  ;;  %v2144_v55 = vcombine.high %v8668_v22, %v1090_v39  ;;  %v2083_v59 = vrot.slane %v2075_v33, %v8336_v24  ;;  %v2090_v17 = vrot.slane %v2076_v35, %v8336_v24 }
 0x20a   : > { %v3289_v27 = vpack.c.bf16 %v3143_v31, %v3075_v21  ;;  %v3297_v49 = vpack.c.bf16 %v3144_v29, %v3076_v25  ;;  %v3305_v34 = vpack.c.bf16 %v3145_v18, %v3077_v5  ;;  %v3313_v45 = vpack.c.bf16 %v3146_v19, %v3078_v54  ;;  %v5820_v31 = vpop.permute.xlu0 %5819 }
 0x20b   : > { %v2151_v37 = vrot.slane %v2143_v36, %v8336_v24  ;;  %v2158_v10 = vrot.slane %v2144_v55, %v8336_v24  ;;  %v5828_v22 = vcombine.low %v8323_v7, %v8810_v2  ;;  %v5829_v23 = vcombine.high %v8323_v7, %v8810_v2 }
 0x20c   : > { %3322 = vst.msk [vmem:[#allocation2 + $0x30] sm:$0xff] %vm3315_vm2, %v3289_v27  ;;  %3330 = vst.msk [vmem:[#allocation2 + $0x70] sm:$0xff] %vm3315_vm2, %v3297_v49  ;;  %v6017_v47 = vsel %vm3315_vm2, %v5972_v41, 0  ;;  %v6084_v53 = vsel %vm3315_vm2, %v5980_v20, 0  ;;  %v2091_v56 = vcombine.low %v8769_v16, %v2083_v59  ;;  %v2092_v46 = vcombine.high %v8769_v16, %v2083_v59 }
 0x20d   : > { %3338 = vst.msk [vmem:[#allocation2 + $0xb0] sm:$0xff] %vm3315_vm2, %v3305_v34  ;;  %3346 = vst.msk [vmem:[#allocation2 + $0xf0] sm:$0xff] %vm3315_vm2, %v3313_v45  ;;  %v2107_v39 = vcombine.low %v8772_v51, %v2090_v17  ;;  %v2108_v32 = vcombine.high %v8772_v51, %v2090_v17  ;;  %7498 = vmatpush3.bf16.xpose.msra.mxu1 %v6017_v47  ;;  %v2159_v48 = vcombine.low %v8775_v52, %v2151_v37 }
 0x20e   : > { %v2160_v43 = vcombine.high %v8775_v52, %v2151_v37  ;;  %v2175_v9 = vcombine.low %v8778_v57, %v2158_v10  ;;  %v2176_v42 = vcombine.high %v8778_v57, %v2158_v10  ;;  %7518 = vmatpush3.bf16.xpose.msra.mxu0 %v6084_v53  ;;  %v2099_v0 = vrot.slane %v2091_v56, %v8340_v30 }
 0x20f   : > { %v2106_v14 = vrot.slane %v2092_v46, %v8340_v30  ;;  %v2115_v16 = vrot.slane %v2107_v39, %v8340_v30  ;;  %v2122_v26 = vrot.slane %v2108_v32, %v8340_v30  ;;  %7499 = vmatprep.subr.bf16.mxu1 %v7926_v12  ;;  %v2167_v51 = vrot.slane %v2159_v48, %v8340_v30 }
 0x210   : > { %v2174_v15 = vrot.slane %v2160_v43, %v8340_v30  ;;  %v2183_v52 = vrot.slane %v2175_v9, %v8340_v30  ;;  %v2190_v4 = vrot.slane %v2176_v42, %v8340_v30  ;;  %7519 = vmatprep.subr.bf16.mxu0 %v7926_v12  ;;  %v5826_v43 = vpop.permute.xlu0 %5825 }
 0x211   : > { %v3147_v57 = vcombine.low %v2099_v0, %v2106_v14  ;;  %v7250_v60 = vcombine.high %v2099_v0, %v2106_v14  ;;  %v3163_v28 = vcombine.low %v2115_v16, %v2122_v26  ;;  %v7251_v3 = vcombine.high %v2115_v16, %v2122_v26 }
 0x212   : > { %v3215_v21 = vcombine.low %v2167_v51, %v2174_v15  ;;  %v7252_v25 = vcombine.high %v2167_v51, %v2174_v15  ;;  %v3231_v5 = vcombine.low %v2183_v52, %v2190_v4  ;;  %v7253_v54 = vcombine.high %v2183_v52, %v2190_v4  ;;  %v5973_v52 = vld [vmem:[#allocation2 + $0x28] sm:$0xff] }
 0x213   : > { %v3154_v29 = vrot.slane %v3147_v57, %v8336_v24  ;;  %v3162_v18 = vrot.slane %v7250_v60, %v8336_v24  ;;  %v3170_v19 = vrot.slane %v3163_v28, %v8336_v24  ;;  %v3178_v33 = vrot.slane %v7251_v3, %v8336_v24  ;;  %v5981_v4 = vld [vmem:[#allocation2 + $0x68] sm:$0xff] }
 0x214   : > { %v3222_v35 = vrot.slane %v3215_v21, %v8336_v24  ;;  %v3230_v36 = vrot.slane %v7252_v25, %v8336_v24  ;;  %v3238_v55 = vrot.slane %v3231_v5, %v8336_v24  ;;  %v3246_v41 = vrot.slane %v7253_v54, %v8336_v24 }
 0x215   : > { %v3179_v20 = vcombine.low %v3154_v29, %v3162_v18  ;;  %v3180_v27 = vcombine.high %v3154_v29, %v3162_v18  ;;  %v3195_v49 = vcombine.low %v3170_v19, %v3178_v33  ;;  %v3196_v34 = vcombine.high %v3170_v19, %v3178_v33 }
 0x216   : > { %v3247_v45 = vcombine.low %v3222_v35, %v3230_v36  ;;  %v3248_v59 = vcombine.high %v3222_v35, %v3230_v36  ;;  %v3263_v17 = vcombine.low %v3238_v55, %v3246_v41  ;;  %v3264_v37 = vcombine.high %v3238_v55, %v3246_v41  ;;  %v5974_v35 = vld [vmem:[#allocation2 + $0x30] sm:$0xff] }
 0x217   : > { %v3187_v10 = vrot.slane %v3179_v20, %v8340_v30  ;;  %v3194_v47 = vrot.slane %v3180_v27, %v8340_v30  ;;  %v3203_v53 = vrot.slane %v3195_v49, %v8340_v30  ;;  %v3210_v56 = vrot.slane %v3196_v34, %v8340_v30  ;;  %v5982_v36 = vld [vmem:[#allocation2 + $0x70] sm:$0xff] }
 0x218   : > { %v3255_v46 = vrot.slane %v3247_v45, %v8340_v30  ;;  %v3262_v39 = vrot.slane %v3248_v59, %v8340_v30  ;;  %v3271_v32 = vrot.slane %v3263_v17, %v8340_v30  ;;  %v3278_v48 = vrot.slane %v3264_v37, %v8340_v30 }
 0x219   : > { %v3211_v9 = vcombine.low %v3187_v10, %v3203_v53  ;;  %v3212_v42 = vcombine.high %v3187_v10, %v3203_v53  ;;  %v3213_v0 = vcombine.low %v3194_v47, %v3210_v56  ;;  %v3214_v14 = vcombine.high %v3194_v47, %v3210_v56 }
 0x21a   : > { %v3279_v16 = vcombine.low %v3255_v46, %v3271_v32  ;;  %v3280_v26 = vcombine.high %v3255_v46, %v3271_v32  ;;  %v3281_v51 = vcombine.low %v3262_v39, %v3278_v48  ;;  %v3282_v15 = vcombine.high %v3262_v39, %v3278_v48 }
 0x21b   : > { %v5836_v57 = vrot.slane %v5828_v22, %v8336_v24  ;;  %v5843_v60 = vrot.slane %v5829_v23, %v8336_v24  ;;  %v5844_v28 = vcombine.low %v5820_v31, %v5826_v43  ;;  %v5845_v3 = vcombine.high %v5820_v31, %v5826_v43  ;;  %v8875_v22 = vld [vmem:[%s9801_s7] ss:$0 sm:$0xff] }
 0x21c   : > { %v3290_v21 = vpack.c.bf16 %v3279_v16, %v3211_v9  ;;  %v3298_v25 = vpack.c.bf16 %v3280_v26, %v3212_v42  ;;  %v3306_v5 = vpack.c.bf16 %v3281_v51, %v3213_v0  ;;  %v3314_v54 = vpack.c.bf16 %v3282_v15, %v3214_v14 }
 0x21d   : > { %v5852_v29 = vrot.slane %v5844_v28, %v8336_v24  ;;  %v5859_v18 = vrot.slane %v5845_v3, %v8336_v24  ;;  %v6020_v19 = vsel %vm3315_vm2, %v5973_v52, 0  ;;  %v6087_v33 = vsel %vm3315_vm2, %v5981_v4, 0 }
 0x21e   : > { %3323 = vst.msk [vmem:[#allocation2 + $0x38] sm:$0xff] %vm3315_vm2, %v3290_v21  ;;  %3331 = vst.msk [vmem:[#allocation2 + $0x78] sm:$0xff] %vm3315_vm2, %v3298_v25  ;;  %7500 = vmatpush3.bf16.xpose.msra.mxu1 %v6020_v19  ;;  %7520 = vmatpush3.bf16.xpose.msra.mxu0 %v6087_v33  ;;  %v8885_v55 = vadd.f32 %v8875_v22, %v8530_v38  ;;  %v6023_v34 = vsel %vm3315_vm2, %v5974_v35, 0  ;;  %v6090_v45 = vsel %vm3315_vm2, %v5982_v36, 0  ;;  %v5987_v35 = vld [vmem:[#allocation2 + $0x98] sm:$0xff] }
 0x21f   : > { %3339 = vst.msk [vmem:[#allocation2 + $0xb8] sm:$0xff] %vm3315_vm2, %v3306_v5  ;;  %3347 = vst.msk [vmem:[#allocation2 + $0xf8] sm:$0xff] %vm3315_vm2, %v3314_v54  ;;  %v5860_v7 = vcombine.low %v5836_v57, %v5852_v29  ;;  %v5861_v2 = vcombine.high %v5836_v57, %v5852_v29  ;;  %v5876_v23 = vcombine.low %v5843_v60, %v5859_v18  ;;  %7501 = vmatprep.subr.bf16.mxu1 %v7926_v12  ;;  %v5985_v29 = vld [vmem:[#allocation2 + $0x88] sm:$0xff]  ;;  %v5995_v36 = vld [vmem:[#allocation2 + $0xd8] sm:$0xff] }
 0x220   : > { %v5877_v31 = vcombine.high %v5843_v60, %v5859_v18  ;;  %7521 = vmatprep.subr.bf16.mxu0 %v7926_v12  ;;  %v8895_v59 = vadd.f32 %v8875_v22, %v8548_v1  ;;  %3364 = vrot.lane.b32.xlu0 %v8885_v55, %s7928_s1  ;;  %v8919_v15 = vadd.f32 %v8528_v62, %v8875_v22  ;;  %v5984_v62 = vld [vmem:[#allocation2 + $0x80] sm:$0xff]  ;;  %v5993_v18 = vld [vmem:[#allocation2 + $0xc8] sm:$0xff] }
 0x221   : > { %v5868_v41 = vrot.slane %v5860_v7, %v8340_v30  ;;  %v5875_v20 = vrot.slane %v5861_v2, %v8340_v30  ;;  %v5884_v27 = vrot.slane %v5876_v23, %v8340_v30  ;;  %v8929_v57 = vadd.f32 %v8536_v61, %v8875_v22  ;;  %v5992_v61 = vld [vmem:[#allocation2 + $0xc0] sm:$0xff]  ;;  %v5986_v7 = vld [vmem:[#allocation2 + $0x90] sm:$0xff] }
 0x222   : > { %v5891_v49 = vrot.slane %v5877_v31, %v8340_v30  ;;  %3366 = vrot.lane.b32.xlu1 %v8895_v59, %s7928_s1  ;;  %v6139_v25 = vsel %vm3315_vm2, %v5984_v62, 0  ;;  %v6206_v5 = vsel %vm3315_vm2, %v5992_v61, 0  ;;  %v8953_v54 = vadd.f32 %v8875_v22, %v8676_v50  ;;  %v5994_v2 = vld [vmem:[#allocation2 + $0xd0] sm:$0xff] }
 0x223   : > { %v5896_v38 = vcombine.low %v5868_v41, %v5875_v20  ;;  %v7290_v17 = vcombine.high %v5868_v41, %v5875_v20  ;;  %v8965_v19 = vadd.f32 %v8875_v22, %v8704_v13  ;;  %v6142_v50 = vsel %vm3315_vm2, %v5985_v29, 0 }
 0x224   : > { %v5912_v37 = vcombine.low %v5884_v27, %v5891_v49  ;;  %v7291_v10 = vcombine.high %v5884_v27, %v5891_v49  ;;  %3414 = vrot.lane.b32.xlu0 %v8895_v59, %s7929_s24  ;;  %v6209_v33 = vsel %vm3315_vm2, %v5993_v18, 0  ;;  %v8977_v13 = vadd.f32 %v8674_v63, %v8875_v22  ;;  %v5988_v27 = vld [vmem:[#allocation2 + $0xa0] sm:$0xff] }
 0x225   : > { %v5903_v47 = vrot.slane %v5896_v38, %v8336_v24  ;;  %v5911_v53 = vrot.slane %v7290_v17, %v8336_v24  ;;  %v5975_v43 = vld [vmem:[#allocation2 + $0x38] sm:$0xff]  ;;  %v6145_v23 = vsel %vm3315_vm2, %v5986_v7, 0  ;;  %v6212_v31 = vsel %vm3315_vm2, %v5994_v2, 0  ;;  %v5996_v49 = vld [vmem:[#allocation2 + $0xe0] sm:$0xff]  ;;  %v5997_v17 = vld [vmem:[#allocation2 + $0xe8] sm:$0xff] }
 0x226   : > { %v5919_v56 = vrot.slane %v5912_v37, %v8336_v24  ;;  %v5927_v46 = vrot.slane %v7291_v10, %v8336_v24  ;;  %7502 = vmatpush3.bf16.xpose.msra.mxu1 %v6023_v34  ;;  %7522 = vmatpush3.bf16.xpose.msra.mxu0 %v6090_v45  ;;  %v5983_v9 = vld [vmem:[#allocation2 + $0x78] sm:$0xff]  ;;  %v6026_v26 = vsel %vm3315_vm2, %v5975_v43, 0  ;;  %v8989_v63 = vadd.f32 %v8698_v8, %v8875_v22  ;;  %v5990_v37 = vld [vmem:[#allocation2 + $0xb0] sm:$0xff]  ;;  %v9052_v43 = vpop.f32.mrb[12].mxu1 }
 0x227   : > { %v5928_v1 = vcombine.low %v5903_v47, %v5911_v53  ;;  %v5929_v39 = vcombine.high %v5903_v47, %v5911_v53  ;;  %7503 = vmatprep.subr.bf16.mxu1 %v7926_v12  ;;  %7523 = vmatprep.subr.bf16.mxu0 %v7926_v12  ;;  %v6093_v51 = vsel %vm3315_vm2, %v5983_v9, 0  ;;  %v6148_v41 = vsel %vm3315_vm2, %v5987_v35, 0  ;;  %v5998_v10 = vld [vmem:[#allocation2 + $0xf0] sm:$0xff]  ;;  %v9054_v9 = vpop.f32.mrb[13].mxu1 }
 0x228   : > { %v5944_v32 = vcombine.low %v5919_v56, %v5927_v46  ;;  %v5945_v48 = vcombine.high %v5919_v56, %v5927_v46  ;;  %3412 = vrot.lane.b32.xlu1 %v8885_v55, %s7929_s24  ;;  %3462 = vrot.lane.b32.xlu0 %v8895_v59, %s7930_s28  ;;  %v6215_v20 = vsel %vm3315_vm2, %v5995_v36, 0  ;;  %v9009_v8 = vadd.f32 %v8875_v22, %v8746_v6  ;;  %v5989_v6 = vld [vmem:[#allocation2 + $0xa8] sm:$0xff]  ;;  %v5991_v56 = vld [vmem:[#allocation2 + $0xb8] sm:$0xff] }
 0x229   : > { %v5943_v42 = vrot.slane %v5929_v39, %v8340_v30  ;;  %v5936_v14 = vrot.slane %v5928_v1, %v8340_v30  ;;  %v9017_v34 = vadd.f32 %v8875_v22, %v8762_v58  ;;  %v6151_v45 = vsel %vm3315_vm2, %v5988_v27, 0  ;;  %v5999_v46 = vld [vmem:[#allocation2 + $0xf8] sm:$0xff] }
 0x22a   : > { %v5959_v0 = vrot.slane %v5945_v48, %v8340_v30  ;;  %v5952_v16 = vrot.slane %v5944_v32, %v8340_v30  ;;  %v6218_v38 = vsel %vm3315_vm2, %v5996_v49, 0  ;;  %v6154_v58 = vsel %vm3315_vm2, %v5989_v6, 0 }
 0x22b   : > { %v6221_v22 = vsel %vm3315_vm2, %v5997_v17, 0  ;;  %v6157_v47 = vsel %vm3315_vm2, %v5990_v37, 0  ;;  %v6224_v53 = vsel %vm3315_vm2, %v5998_v10, 0  ;;  %v6160_v1 = vsel %vm3315_vm2, %v5991_v56, 0 }
 0x22c   : > { %3460 = vrot.lane.b32.xlu1 %v8885_v55, %s7930_s28  ;;  %v8923_v52 = vcombine.low %v5943_v42, %v5959_v0  ;;  %v8925_v4 = vcombine.high %v5943_v42, %v5959_v0  ;;  %v5960_v60 = vcombine.low %v5936_v14, %v5952_v16  ;;  %v5961_v28 = vcombine.high %v5936_v14, %v5952_v16  ;;  %v9056_v42 = vpop.f32.mrb[14].mxu1 }
 0x22d   : > { %3370 = vrot.lane.b32.xlu0 %v8929_v57, %s7928_s1  ;;  %v6227_v39 = vsel %vm3315_vm2, %v5999_v46, 0  ;;  %v9058_v0 = vpop.f32.mrb[15].mxu1 }
 0x22e   : > { %7504 = vmatpush3.bf16.xpose.msra.mxu1 %v6026_v26  ;;  %7524 = vmatpush3.bf16.xpose.msra.mxu0 %v6093_v51  ;;  %v5964_v3 = vpack.c.bf16 %v5960_v60, %v5960_v60  ;;  %v5965_v21 = vpack.c.bf16 %v5961_v28, %v5961_v28  ;;  %v5966_v32 = vpack.c.bf16 %v8923_v52, %v8923_v52 }
 0x22f   : > { %7529 = vmatprep.subr.bf16.mxu1 %v7926_v12  ;;  %7549 = vmatprep.subr.bf16.mxu0 %v7926_v12  ;;  %v5967_v48 = vpack.c.bf16 %v8925_v4, %v8925_v4 }
 0x230   : > { %3368 = vrot.lane.b32.xlu1 %v8919_v15, %s7928_s1 }
 0x231   : > { %3418 = vrot.lane.b32.xlu0 %v8929_v57, %s7929_s24 }
 0x234   : > { %3416 = vrot.lane.b32.xlu1 %v8919_v15, %s7929_s24 }
 0x235   : > { %7506 = vmatmul.mubr.msk.bf16.vlgmr.msra.gmra.mrb[16].mxu1 %vm3315_vm2, %v5964_v3  ;;  %7526 = vmatmul.mubr.msk.bf16.vlgmr.msra.gmra.mrb[20].mxu0 %vm3315_vm2, %v5965_v21 }
 0x236   : > { %7530 = vmatpush3.bf16.xpose.msra.mxu1 %v6139_v25  ;;  %7550 = vmatpush3.bf16.xpose.msra.mxu0 %v6206_v5 }
 0x237   : > { %7531 = vmatprep.subr.bf16.mxu1 %v7926_v12  ;;  %7551 = vmatprep.subr.bf16.mxu0 %v7926_v12 }
 0x238   : > { %3464 = vrot.lane.b32.xlu1 %v8919_v15, %s7930_s28  ;;  %7545 = vmatprep.mubr.msk.bf16.mxu1 %vm7927_vm1, %v7926_v12 }
 0x239   : > { %7565 = vmatprep.mubr.msk.bf16.mxu0 %vm7927_vm1, %v7926_v12  ;;  %3466 = vrot.lane.b32.xlu0 %v8929_v57, %s7930_s28 }
 0x23c   : > { %3372 = vrot.lane.b32.xlu1 %v8953_v54, %s7928_s1 }
 0x23d   : > { %3374 = vrot.lane.b32.xlu0 %v8965_v19, %s7928_s1 }
 0x23e   : > { %7532 = vmatpush3.bf16.xpose.msra.mxu1 %v6142_v50  ;;  %7552 = vmatpush3.bf16.xpose.msra.mxu0 %v6209_v33 }
 0x23f   : > { %7533 = vmatprep.subr.bf16.mxu1 %v7926_v12  ;;  %7553 = vmatprep.subr.bf16.mxu0 %v7926_v12 }
 0x240   : > { %3420 = vrot.lane.b32.xlu1 %v8953_v54, %s7929_s24 }
 0x241   : > { %3422 = vrot.lane.b32.xlu0 %v8965_v19, %s7929_s24 }
 0x244   : > { %3468 = vrot.lane.b32.xlu1 %v8953_v54, %s7930_s28 }
 0x245   : > { %3470 = vrot.lane.b32.xlu0 %v8965_v19, %s7930_s28 }
 0x246   : > { %7534 = vmatpush3.bf16.xpose.msra.mxu1 %v6145_v23  ;;  %7554 = vmatpush3.bf16.xpose.msra.mxu0 %v6212_v31 }
 0x247   : > { %7535 = vmatprep.subr.bf16.mxu1 %v7926_v12  ;;  %7555 = vmatprep.subr.bf16.mxu0 %v7926_v12 }
 0x248   : > { %3376 = vrot.lane.b32.xlu1 %v8977_v13, %s7928_s1 }
 0x249   : > { %3378 = vrot.lane.b32.xlu0 %v8989_v63, %s7928_s1 }
 0x24c   : > { %3424 = vrot.lane.b32.xlu1 %v8977_v13, %s7929_s24 }
 0x24d   : > { %3426 = vrot.lane.b32.xlu0 %v8989_v63, %s7929_s24 }
 0x24e   : > { %7536 = vmatpush3.bf16.xpose.msra.mxu1 %v6148_v41  ;;  %7556 = vmatpush3.bf16.xpose.msra.mxu0 %v6215_v20 }
 0x24f   : > { %7537 = vmatprep.subr.bf16.mxu1 %v7926_v12  ;;  %7557 = vmatprep.subr.bf16.mxu0 %v7926_v12 }
 0x250   : > { %3472 = vrot.lane.b32.xlu1 %v8977_v13, %s7930_s28 }
 0x251   : > { %3474 = vrot.lane.b32.xlu0 %v8989_v63, %s7930_s28 }
 0x254   : > { %3380 = vrot.lane.b32.xlu1 %v9009_v8, %s7928_s1 }
 0x255   : > { %3382 = vrot.lane.b32.xlu0 %v9017_v34, %s7928_s1 }
 0x256   : > { %7538 = vmatpush3.bf16.xpose.msra.mxu1 %v6151_v45  ;;  %7558 = vmatpush3.bf16.xpose.msra.mxu0 %v6218_v38 }
 0x257   : > { %7539 = vmatprep.subr.bf16.mxu1 %v7926_v12  ;;  %7559 = vmatprep.subr.bf16.mxu0 %v7926_v12 }
 0x258   : > { %3428 = vrot.lane.b32.xlu1 %v9009_v8, %s7929_s24 }
 0x259   : > { %3430 = vrot.lane.b32.xlu0 %v9017_v34, %s7929_s24 }
 0x25c   : > { %3476 = vrot.lane.b32.xlu1 %v9009_v8, %s7930_s28 }
 0x25e   : > { %7540 = vmatpush3.bf16.xpose.msra.mxu1 %v6154_v58  ;;  %7560 = vmatpush3.bf16.xpose.msra.mxu0 %v6221_v22 }
 0x25f   : > { %7541 = vmatprep.subr.bf16.mxu1 %v7926_v12  ;;  %7561 = vmatprep.subr.bf16.mxu0 %v7926_v12 }
 0x266   : > { %7542 = vmatpush3.bf16.xpose.msra.mxu1 %v6157_v47  ;;  %7562 = vmatpush3.bf16.xpose.msra.mxu0 %v6224_v53 }
 0x267   : > { %7543 = vmatprep.subr.bf16.mxu1 %v7926_v12  ;;  %7563 = vmatprep.subr.bf16.mxu0 %v7926_v12 }
 0x26e   : > { %7544 = vmatpush3.bf16.xpose.msra.mxu1 %v6160_v1  ;;  %7564 = vmatpush3.bf16.xpose.msra.mxu0 %v6227_v39 }
 0x26f   : > { %7580 = vmatprep.subr.bf16.mxu1 %v7926_v12 }
 0x275   : > { %7546 = vmatmul.mubr.msk.bf16.vlgmr.msra.gmra.mrb[20].mxu1 %vm3315_vm2, %v5966_v32  ;;  %7566 = vmatmul.mubr.msk.bf16.vlgmr.msra.gmra.mrb[24].mxu0 %vm3315_vm2, %v5967_v48 }
 0x276   : > { %7577 = vmatprep.mubr.msk.f32.mxu0 %vm7927_vm1, %v7926_v12  ;;  %7596 = vmatprep.mubr.msk.bf16.mxu1 %vm7927_vm1, %v7926_v12 }
 0x292   : > { %v3365_v14 = vpop.permute.xlu0 %3364 }
 0x294   : > { %v3367_v16 = vpop.permute.xlu1 %3366 }
 0x296   : > { %v3415_v4 = vpop.permute.xlu0 %3414 }
 0x297   : > { %v3576_v60 = vcombine.low %v8895_v59, %v3415_v4  ;;  %v3577_v28 = vcombine.high %v8895_v59, %v3415_v4 }
 0x299   : > { %v3584_v29 = vrot.slane %v3576_v60, %v8336_v24  ;;  %v3591_v18 = vrot.slane %v3577_v28, %v8336_v24 }
 0x29a   : > { %v3413_v26 = vpop.permute.xlu1 %3412  ;;  %v3463_v5 = vpop.permute.xlu0 %3462 }
 0x29b   : > { %v3508_v51 = vcombine.low %v8885_v55, %v3413_v26  ;;  %v3509_v52 = vcombine.high %v8885_v55, %v3413_v26  ;;  %v3592_v50 = vcombine.low %v3367_v16, %v3463_v5  ;;  %v3593_v33 = vcombine.high %v3367_v16, %v3463_v5 }
 0x29d   : > { %v3516_v61 = vrot.slane %v3508_v51, %v8336_v24  ;;  %v3523_v3 = vrot.slane %v3509_v52, %v8336_v24  ;;  %v3600_v59 = vrot.slane %v3592_v50, %v8336_v24  ;;  %v3607_v2 = vrot.slane %v3593_v33, %v8336_v24 }
 0x29e   : > { %v3461_v62 = vpop.permute.xlu1 %3460 }
 0x29f   : > { %v3524_v21 = vcombine.low %v3365_v14, %v3461_v62  ;;  %v3525_v25 = vcombine.high %v3365_v14, %v3461_v62  ;;  %v3608_v20 = vcombine.low %v3584_v29, %v3600_v59  ;;  %v3609_v27 = vcombine.high %v3584_v29, %v3600_v59  ;;  %v9078_v22 = vpop.permute.xlu0 %3370 }
 0x2a0   : > { %v3624_v49 = vcombine.low %v3591_v18, %v3607_v2  ;;  %v3625_v45 = vcombine.high %v3591_v18, %v3607_v2 }
 0x2a1   : > { %v3532_v55 = vrot.slane %v3524_v21, %v8336_v24  ;;  %v3539_v7 = vrot.slane %v3525_v25, %v8336_v24  ;;  %v3616_v37 = vrot.slane %v3608_v20, %v8340_v30  ;;  %v3623_v10 = vrot.slane %v3609_v27, %v8340_v30 }
 0x2a2   : > { %v9072_v23 = vpop.permute.xlu1 %3368  ;;  %v3632_v47 = vrot.slane %v3624_v49, %v8340_v30  ;;  %v3639_v53 = vrot.slane %v3625_v45, %v8340_v30 }
 0x2a3   : > { %v3540_v31 = vcombine.low %v3516_v61, %v3532_v55  ;;  %v3541_v35 = vcombine.high %v3516_v61, %v3532_v55  ;;  %v3556_v36 = vcombine.low %v3523_v3, %v3539_v7  ;;  %v3557_v41 = vcombine.high %v3523_v3, %v3539_v7  ;;  %v3419_v50 = vpop.permute.xlu0 %3418 }
 0x2a4   : > { %v4664_v48 = vcombine.low %v3616_v37, %v3623_v10  ;;  %v7256_v14 = vcombine.high %v3616_v37, %v3623_v10  ;;  %v4680_v16 = vcombine.low %v3632_v47, %v3639_v53  ;;  %v7257_v26 = vcombine.high %v3632_v47, %v3639_v53 }
 0x2a5   : > { %v3548_v38 = vrot.slane %v3540_v31, %v8340_v30  ;;  %v3555_v6 = vrot.slane %v3541_v35, %v8340_v30  ;;  %v3564_v17 = vrot.slane %v3556_v36, %v8340_v30  ;;  %v3571_v58 = vrot.slane %v3557_v41, %v8340_v30 }
 0x2a6   : > { %v3417_v56 = vpop.permute.xlu1 %3416  ;;  %v4671_v28 = vrot.slane %v4664_v48, %v8336_v24  ;;  %v4679_v62 = vrot.slane %v7256_v14, %v8336_v24  ;;  %v4687_v61 = vrot.slane %v4680_v16, %v8336_v24  ;;  %v4695_v3 = vrot.slane %v7257_v26, %v8336_v24 }
 0x2a7   : > { %v4596_v46 = vcombine.low %v3548_v38, %v3555_v6  ;;  %v7254_v1 = vcombine.high %v3548_v38, %v3555_v6  ;;  %v4612_v39 = vcombine.low %v3564_v17, %v3571_v58  ;;  %v7255_v32 = vcombine.high %v3564_v17, %v3571_v58 }
 0x2a8   : > { %v4696_v33 = vcombine.low %v4671_v28, %v4679_v62  ;;  %v4697_v55 = vcombine.high %v4671_v28, %v4679_v62  ;;  %v4712_v7 = vcombine.low %v4687_v61, %v4695_v3  ;;  %v4713_v59 = vcombine.high %v4687_v61, %v4695_v3 }
 0x2a9   : > { %v4603_v51 = vrot.slane %v4596_v46, %v8336_v24  ;;  %v4611_v52 = vrot.slane %v7254_v1, %v8336_v24  ;;  %v4619_v4 = vrot.slane %v4612_v39, %v8336_v24  ;;  %v4627_v60 = vrot.slane %v7255_v32, %v8336_v24 }
 0x2aa   : > { %v3465_v21 = vpop.permute.xlu1 %3464  ;;  %v4704_v41 = vrot.slane %v4696_v33, %v8340_v30  ;;  %v4711_v20 = vrot.slane %v4697_v55, %v8340_v30  ;;  %v4720_v27 = vrot.slane %v4712_v7, %v8340_v30  ;;  %v4727_v49 = vrot.slane %v4713_v59, %v8340_v30 }
 0x2ab   : > { %v4628_v25 = vcombine.low %v4603_v51, %v4611_v52  ;;  %v4629_v5 = vcombine.high %v4603_v51, %v4611_v52  ;;  %v4644_v29 = vcombine.low %v4619_v4, %v4627_v60  ;;  %v4645_v18 = vcombine.high %v4619_v4, %v4627_v60  ;;  %v3467_v48 = vpop.permute.xlu0 %3466 }
 0x2ac   : > { %v4728_v37 = vcombine.low %v4704_v41, %v4720_v27  ;;  %v4729_v10 = vcombine.high %v4704_v41, %v4720_v27  ;;  %v4730_v47 = vcombine.low %v4711_v20, %v4727_v49  ;;  %v4731_v53 = vcombine.high %v4711_v20, %v4727_v49 }
 0x2ad   : > { %v4636_v2 = vrot.slane %v4628_v25, %v8340_v30  ;;  %v4643_v31 = vrot.slane %v4629_v5, %v8340_v30  ;;  %v4652_v35 = vrot.slane %v4644_v29, %v8340_v30  ;;  %v4659_v36 = vrot.slane %v4645_v18, %v8340_v30 }
 0x2ae   : > { %v9100_v45 = vpop.permute.xlu1 %3372  ;;  %v3644_v46 = vcombine.low %v8919_v15, %v3417_v56  ;;  %v3645_v1 = vcombine.high %v8919_v15, %v3417_v56  ;;  %v3712_v39 = vcombine.low %v8929_v57, %v3419_v50  ;;  %v3713_v32 = vcombine.high %v8929_v57, %v3419_v50 }
 0x2af   : > { %v4660_v38 = vcombine.low %v4636_v2, %v4652_v35  ;;  %v4661_v6 = vcombine.high %v4636_v2, %v4652_v35  ;;  %v4662_v17 = vcombine.low %v4643_v31, %v4659_v36  ;;  %v4663_v58 = vcombine.high %v4643_v31, %v4659_v36 }
 0x2b0   : > { %v3652_v4 = vrot.slane %v3644_v46, %v8336_v24  ;;  %v3659_v60 = vrot.slane %v3645_v1, %v8336_v24  ;;  %v3660_v15 = vcombine.low %v9072_v23, %v3465_v21  ;;  %v3661_v57 = vcombine.high %v9072_v23, %v3465_v21 }
 0x2b1   : > { %v5684_v14 = vpack.c.bf16 %v4728_v37, %v4660_v38  ;;  %v5692_v16 = vpack.c.bf16 %v4729_v10, %v4661_v6  ;;  %v5700_v26 = vpack.c.bf16 %v4730_v47, %v4662_v17  ;;  %v5708_v51 = vpack.c.bf16 %v4731_v53, %v4663_v58 }
 0x2b2   : > { %v3421_v52 = vpop.permute.xlu1 %3420  ;;  %v3728_v56 = vcombine.low %v9078_v22, %v3467_v48  ;;  %v3729_v28 = vcombine.high %v9078_v22, %v3467_v48  ;;  %v3720_v62 = vrot.slane %v3712_v39, %v8336_v24  ;;  %v3727_v61 = vrot.slane %v3713_v32, %v8336_v24  ;;  %v9144_v39 = vpop.permute.xlu0 %3374 }
 0x2b3   : > { %5716 = vst.msk [vmem:[#allocation3] sm:$0xff] %vm3315_vm2, %v5684_v14  ;;  %5724 = vst.msk [vmem:[#allocation3 + $0x40] sm:$0xff] %vm3315_vm2, %v5692_v16  ;;  %v3780_v3 = vcombine.low %v8953_v54, %v3421_v52  ;;  %v3781_v25 = vcombine.high %v8953_v54, %v3421_v52  ;;  %v3668_v5 = vrot.slane %v3660_v15, %v8336_v24 }
 0x2b4   : > { %5732 = vst.msk [vmem:[#allocation3 + $0x80] sm:$0xff] %vm3315_vm2, %v5700_v26  ;;  %5740 = vst.msk [vmem:[#allocation3 + $0xc0] sm:$0xff] %vm3315_vm2, %v5708_v51  ;;  %v3675_v29 = vrot.slane %v3661_v57, %v8336_v24  ;;  %v3736_v18 = vrot.slane %v3728_v56, %v8336_v24  ;;  %v3743_v23 = vrot.slane %v3729_v28, %v8336_v24 }
 0x2b5   : > { %v9127_v22 = vrot.slane %v3780_v3, %v8336_v24  ;;  %v9130_v50 = vrot.slane %v3781_v25, %v8336_v24  ;;  %v3676_v55 = vcombine.low %v3652_v4, %v3668_v5  ;;  %v3677_v7 = vcombine.high %v3652_v4, %v3668_v5 }
 0x2b6   : > { %v9124_v21 = vpop.permute.xlu1 %3468  ;;  %v3692_v59 = vcombine.low %v3659_v60, %v3675_v29  ;;  %v3693_v2 = vcombine.high %v3659_v60, %v3675_v29  ;;  %v3744_v31 = vcombine.low %v3720_v62, %v3736_v18  ;;  %v3745_v35 = vcombine.high %v3720_v62, %v3736_v18 }
 0x2b7   : > { %v3796_v33 = vcombine.low %v9100_v45, %v9124_v21  ;;  %v3797_v54 = vcombine.high %v9100_v45, %v9124_v21  ;;  %v3760_v36 = vcombine.low %v3727_v61, %v3743_v23  ;;  %v3761_v41 = vcombine.high %v3727_v61, %v3743_v23 }
 0x2b8   : > { %v3684_v20 = vrot.slane %v3676_v55, %v8340_v30  ;;  %v3691_v27 = vrot.slane %v3677_v7, %v8340_v30  ;;  %v3700_v49 = vrot.slane %v3692_v59, %v8340_v30  ;;  %v3707_v38 = vrot.slane %v3693_v2, %v8340_v30  ;;  %v3423_v2 = vpop.permute.xlu0 %3422 }
 0x2b9   : > { %v3752_v6 = vrot.slane %v3744_v31, %v8340_v30  ;;  %v3759_v17 = vrot.slane %v3745_v35, %v8340_v30  ;;  %v3768_v58 = vrot.slane %v3760_v36, %v8340_v30  ;;  %v3775_v37 = vrot.slane %v3761_v41, %v8340_v30 }
 0x2ba   : > { %v6394_v10 = vld [vmem:[#allocation3] sm:$0xff]  ;;  %v4732_v47 = vcombine.low %v3684_v20, %v3691_v27  ;;  %v7258_v53 = vcombine.high %v3684_v20, %v3691_v27  ;;  %v4748_v46 = vcombine.low %v3700_v49, %v3707_v38  ;;  %v7259_v1 = vcombine.high %v3700_v49, %v3707_v38 }
 0x2bb   : > { %7581 = vmatpush3.bf16.msra.mxu1 %v6394_v10  ;;  %v4800_v32 = vcombine.low %v3752_v6, %v3759_v17  ;;  %v7260_v48 = vcombine.high %v3752_v6, %v3759_v17  ;;  %v4816_v14 = vcombine.low %v3768_v58, %v3775_v37  ;;  %v7261_v16 = vcombine.high %v3768_v58, %v3775_v37  ;;  %v9163_v6 = vpop.permute.xlu1 %3376 }
 0x2bc   : > { %7582 = vmatprep.subr.bf16.mxu1 %v7926_v12  ;;  %v4739_v26 = vrot.slane %v4732_v47, %v8336_v24  ;;  %v4747_v51 = vrot.slane %v7258_v53, %v8336_v24  ;;  %v4755_v52 = vrot.slane %v4748_v46, %v8336_v24  ;;  %v4763_v4 = vrot.slane %v7259_v1, %v8336_v24 }
 0x2bd   : > { %v4807_v60 = vrot.slane %v4800_v32, %v8336_v24  ;;  %v4815_v15 = vrot.slane %v7260_v48, %v8336_v24  ;;  %v4823_v57 = vrot.slane %v4816_v14, %v8336_v24  ;;  %v4831_v56 = vrot.slane %v7261_v16, %v8336_v24 }
 0x2be   : > { %v4764_v28 = vcombine.low %v4739_v26, %v4747_v51  ;;  %v4765_v62 = vcombine.high %v4739_v26, %v4747_v51  ;;  %v4780_v61 = vcombine.low %v4755_v52, %v4763_v4  ;;  %v4781_v3 = vcombine.high %v4755_v52, %v4763_v4  ;;  %v3471_v4 = vpop.permute.xlu0 %3470 }
 0x2bf   : > { %v4832_v25 = vcombine.low %v4807_v60, %v4815_v15  ;;  %v4833_v5 = vcombine.high %v4807_v60, %v4815_v15  ;;  %v4848_v29 = vcombine.low %v4823_v57, %v4831_v56  ;;  %v4849_v18 = vcombine.high %v4823_v57, %v4831_v56  ;;  %v3425_v57 = vpop.permute.xlu1 %3424 }
 0x2c0   : > { %v4772_v23 = vrot.slane %v4764_v28, %v8340_v30  ;;  %v4779_v55 = vrot.slane %v4765_v62, %v8340_v30  ;;  %v4788_v7 = vrot.slane %v4780_v61, %v8340_v30  ;;  %v4795_v59 = vrot.slane %v4781_v3, %v8340_v30 }
 0x2c1   : > { %v4840_v31 = vrot.slane %v4832_v25, %v8340_v30  ;;  %v4847_v35 = vrot.slane %v4833_v5, %v8340_v30  ;;  %v4856_v36 = vrot.slane %v4848_v29, %v8340_v30  ;;  %v4863_v41 = vrot.slane %v4849_v18, %v8340_v30 }
 0x2c2   : > { %v4796_v20 = vcombine.low %v4772_v23, %v4788_v7  ;;  %v4797_v27 = vcombine.high %v4772_v23, %v4788_v7  ;;  %v4798_v49 = vcombine.low %v4779_v55, %v4795_v59  ;;  %v4799_v38 = vcombine.high %v4779_v55, %v4795_v59 }
 0x2c3   : > { %v4864_v17 = vcombine.low %v4840_v31, %v4856_v36  ;;  %v4865_v58 = vcombine.high %v4840_v31, %v4856_v36  ;;  %v4866_v37 = vcombine.low %v4847_v35, %v4863_v41  ;;  %v4867_v10 = vcombine.high %v4847_v35, %v4863_v41  ;;  %v9199_v35 = vpop.permute.xlu0 %3378 }
 0x2c4   : > { %v3804_v47 = vrot.slane %v3796_v33, %v8336_v24  ;;  %v3811_v53 = vrot.slane %v3797_v54, %v8336_v24  ;;  %v3848_v46 = vcombine.low %v8965_v19, %v3423_v2  ;;  %v3849_v1 = vcombine.high %v8965_v19, %v3423_v2 }
 0x2c5   : > { %v5685_v32 = vpack.c.bf16 %v4864_v17, %v4796_v20  ;;  %v5693_v48 = vpack.c.bf16 %v4865_v58, %v4797_v27  ;;  %v5701_v14 = vpack.c.bf16 %v4866_v37, %v4798_v49  ;;  %v5709_v16 = vpack.c.bf16 %v4867_v10, %v4799_v38 }
 0x2c6   : > { %v3812_v26 = vcombine.low %v9127_v22, %v3804_v47  ;;  %v3813_v51 = vcombine.high %v9127_v22, %v3804_v47  ;;  %v3828_v52 = vcombine.low %v9130_v50, %v3811_v53  ;;  %v3829_v33 = vcombine.high %v9130_v50, %v3811_v53 }
 0x2c7   : > { %5717 = vst.msk [vmem:[#allocation3 + $0x8] sm:$0xff] %vm3315_vm2, %v5685_v32  ;;  %5725 = vst.msk [vmem:[#allocation3 + $0x48] sm:$0xff] %vm3315_vm2, %v5693_v48  ;;  %v3856_v19 = vrot.slane %v3848_v46, %v8336_v24  ;;  %v3863_v45 = vrot.slane %v3849_v1, %v8336_v24  ;;  %v3864_v21 = vcombine.low %v9144_v39, %v3471_v4 }
 0x2c8   : > { %5733 = vst.msk [vmem:[#allocation3 + $0x88] sm:$0xff] %vm3315_vm2, %v5701_v14  ;;  %5741 = vst.msk [vmem:[#allocation3 + $0xc8] sm:$0xff] %vm3315_vm2, %v5709_v16  ;;  %v3865_v22 = vcombine.high %v9144_v39, %v3471_v4  ;;  %v3820_v54 = vrot.slane %v3812_v26, %v8340_v30  ;;  %v3827_v50 = vrot.slane %v3813_v51, %v8340_v30 }
 0x2c9   : > { %v3836_v60 = vrot.slane %v3828_v52, %v8340_v30  ;;  %v3843_v15 = vrot.slane %v3829_v33, %v8340_v30  ;;  %v3872_v56 = vrot.slane %v3864_v21, %v8336_v24  ;;  %v3916_v62 = vcombine.low %v8977_v13, %v3425_v57  ;;  %v3473_v52 = vpop.permute.xlu1 %3472  ;;  %v3427_v21 = vpop.permute.xlu0 %3426 }
 0x2ca   : > { %v3879_v28 = vrot.slane %v3865_v22, %v8336_v24  ;;  %v3917_v61 = vcombine.high %v8977_v13, %v3425_v57  ;;  %v4868_v3 = vcombine.low %v3820_v54, %v3827_v50  ;;  %v7262_v25 = vcombine.high %v3820_v54, %v3827_v50 }
 0x2cb   : > { %v4884_v39 = vcombine.low %v3836_v60, %v3843_v15  ;;  %v7263_v5 = vcombine.high %v3836_v60, %v3843_v15  ;;  %v3880_v29 = vcombine.low %v3856_v19, %v3872_v56  ;;  %v3881_v18 = vcombine.high %v3856_v19, %v3872_v56 }
 0x2cc   : > { %v3896_v23 = vcombine.low %v3863_v45, %v3879_v28  ;;  %v3897_v55 = vcombine.high %v3863_v45, %v3879_v28  ;;  %v4875_v7 = vrot.slane %v4868_v3, %v8336_v24  ;;  %v4883_v59 = vrot.slane %v7262_v25, %v8336_v24 }
 0x2cd   : > { %v4891_v2 = vrot.slane %v4884_v39, %v8336_v24  ;;  %v4899_v31 = vrot.slane %v7263_v5, %v8336_v24  ;;  %v3888_v13 = vrot.slane %v3880_v29, %v8340_v30  ;;  %v3895_v36 = vrot.slane %v3881_v18, %v8340_v30 }
 0x2ce   : > { %v3904_v41 = vrot.slane %v3896_v23, %v8340_v30  ;;  %v3911_v20 = vrot.slane %v3897_v55, %v8340_v30  ;;  %v4900_v27 = vcombine.low %v4875_v7, %v4883_v59  ;;  %v4901_v49 = vcombine.high %v4875_v7, %v4883_v59  ;;  %v6395_v58 = vld [vmem:[#allocation3 + $0x8] sm:$0xff]  ;;  %v9226_v59 = vpop.permute.xlu1 %3380 }
 0x2cf   : > { %v4916_v38 = vcombine.low %v4891_v2, %v4899_v31  ;;  %v4917_v17 = vcombine.high %v4891_v2, %v4899_v31  ;;  %v4936_v37 = vcombine.low %v3888_v13, %v3895_v36  ;;  %v7264_v10 = vcombine.high %v3888_v13, %v3895_v36  ;;  %7583 = vmatpush3.bf16.msra.mxu1 %v6395_v58 }
 0x2d0   : > { %v4952_v47 = vcombine.low %v3904_v41, %v3911_v20  ;;  %v7265_v53 = vcombine.high %v3904_v41, %v3911_v20  ;;  %v4908_v46 = vrot.slane %v4900_v27, %v8340_v30  ;;  %v4915_v1 = vrot.slane %v4901_v49, %v8340_v30  ;;  %7584 = vmatprep.subr.bf16.mxu1 %v7926_v12  ;;  %v3475_v41 = vpop.permute.xlu0 %3474 }
 0x2d1   : > { %v4924_v32 = vrot.slane %v4916_v38, %v8340_v30  ;;  %v4931_v48 = vrot.slane %v4917_v17, %v8340_v30  ;;  %v4943_v14 = vrot.slane %v4936_v37, %v8336_v24  ;;  %v4951_v16 = vrot.slane %v7264_v10, %v8336_v24 }
 0x2d2   : > { %v4959_v26 = vrot.slane %v4952_v47, %v8336_v24  ;;  %v4967_v51 = vrot.slane %v7265_v53, %v8336_v24  ;;  %v3924_v15 = vrot.slane %v3916_v62, %v8336_v24  ;;  %v3931_v57 = vrot.slane %v3917_v61, %v8336_v24 }
 0x2d3   : > { %v4932_v33 = vcombine.low %v4908_v46, %v4924_v32  ;;  %v4933_v4 = vcombine.high %v4908_v46, %v4924_v32  ;;  %v4934_v19 = vcombine.low %v4915_v1, %v4931_v48  ;;  %v4935_v45 = vcombine.high %v4915_v1, %v4931_v48 }
 0x2d4   : > { %v4968_v22 = vcombine.low %v4943_v14, %v4951_v16  ;;  %v4969_v54 = vcombine.high %v4943_v14, %v4951_v16  ;;  %v4984_v50 = vcombine.low %v4959_v26, %v4967_v51  ;;  %v4985_v60 = vcombine.high %v4959_v26, %v4967_v51  ;;  %v3429_v51 = vpop.permute.xlu1 %3428 }
 0x2d5   : > { %v3932_v56 = vcombine.low %v9163_v6, %v3473_v52  ;;  %v3933_v28 = vcombine.high %v9163_v6, %v3473_v52  ;;  %v3984_v62 = vcombine.low %v8989_v63, %v3427_v21  ;;  %v3985_v61 = vcombine.high %v8989_v63, %v3427_v21 }
 0x2d6   : > { %v4976_v3 = vrot.slane %v4968_v22, %v8340_v30  ;;  %v4983_v25 = vrot.slane %v4969_v54, %v8340_v30  ;;  %v4992_v39 = vrot.slane %v4984_v50, %v8340_v30  ;;  %v4999_v5 = vrot.slane %v4985_v60, %v8340_v30 }
 0x2d7   : > { %v3940_v29 = vrot.slane %v3932_v56, %v8336_v24  ;;  %v3947_v18 = vrot.slane %v3933_v28, %v8336_v24  ;;  %v3992_v10 = vrot.slane %v3984_v62, %v8336_v24  ;;  %v3999_v47 = vrot.slane %v3985_v61, %v8336_v24 }
 0x2d8   : > { %v5000_v23 = vcombine.low %v4976_v3, %v4992_v39  ;;  %v5001_v55 = vcombine.high %v4976_v3, %v4992_v39  ;;  %v5002_v7 = vcombine.low %v4983_v25, %v4999_v5  ;;  %v5003_v6 = vcombine.high %v4983_v25, %v4999_v5 }
 0x2d9   : > { %v3948_v2 = vcombine.low %v3924_v15, %v3940_v29  ;;  %v3949_v31 = vcombine.high %v3924_v15, %v3940_v29  ;;  %v3964_v13 = vcombine.low %v3931_v57, %v3947_v18  ;;  %v3965_v36 = vcombine.high %v3931_v57, %v3947_v18 }
 0x2da   : > { %v5686_v20 = vpack.c.bf16 %v5000_v23, %v4932_v33  ;;  %v5694_v27 = vpack.c.bf16 %v5001_v55, %v4933_v4  ;;  %v5702_v49 = vpack.c.bf16 %v5002_v7, %v4934_v19  ;;  %v5710_v38 = vpack.c.bf16 %v5003_v6, %v4935_v45  ;;  %v3477_v7 = vpop.permute.xlu1 %3476 }
 0x2db   : > { %v3956_v17 = vrot.slane %v3948_v2, %v8340_v30  ;;  %v3963_v58 = vrot.slane %v3949_v31, %v8340_v30  ;;  %v3972_v63 = vrot.slane %v3964_v13, %v8340_v30  ;;  %v3979_v37 = vrot.slane %v3965_v36, %v8340_v30 }
 0x2dc   : > { %5718 = vst.msk [vmem:[#allocation3 + $0x10] sm:$0xff] %vm3315_vm2, %v5686_v20  ;;  %5726 = vst.msk [vmem:[#allocation3 + $0x50] sm:$0xff] %vm3315_vm2, %v5694_v27  ;;  %v4000_v53 = vcombine.low %v9199_v35, %v3475_v41  ;;  %v4001_v46 = vcombine.high %v9199_v35, %v3475_v41  ;;  %v4052_v5 = vcombine.low %v9009_v8, %v3429_v51 }
 0x2dd   : > { %5734 = vst.msk [vmem:[#allocation3 + $0x90] sm:$0xff] %vm3315_vm2, %v5702_v49  ;;  %5742 = vst.msk [vmem:[#allocation3 + $0xd0] sm:$0xff] %vm3315_vm2, %v5710_v38  ;;  %v5004_v1 = vcombine.low %v3956_v17, %v3963_v58  ;;  %v7266_v32 = vcombine.high %v3956_v17, %v3963_v58  ;;  %v5020_v48 = vcombine.low %v3972_v63, %v3979_v37 }
 0x2de   : > { %v7267_v14 = vcombine.high %v3972_v63, %v3979_v37  ;;  %v4008_v16 = vrot.slane %v4000_v53, %v8336_v24  ;;  %v4015_v26 = vrot.slane %v4001_v46, %v8336_v24  ;;  %v4053_v29 = vcombine.high %v9009_v8, %v3429_v51 }
 0x2df   : > { %v5011_v52 = vrot.slane %v5004_v1, %v8336_v24  ;;  %v5019_v33 = vrot.slane %v7266_v32, %v8336_v24  ;;  %v5027_v4 = vrot.slane %v5020_v48, %v8336_v24  ;;  %v4060_v27 = vrot.slane %v4052_v5, %v8336_v24 }
 0x2e0   : > { %v5035_v19 = vrot.slane %v7267_v14, %v8336_v24  ;;  %v4016_v45 = vcombine.low %v3992_v10, %v4008_v16  ;;  %v4017_v21 = vcombine.high %v3992_v10, %v4008_v16  ;;  %v4032_v35 = vcombine.low %v3999_v47, %v4015_v26 }
 0x2e1   : > { %v4033_v22 = vcombine.high %v3999_v47, %v4015_v26  ;;  %v5036_v54 = vcombine.low %v5011_v52, %v5019_v33  ;;  %v5037_v50 = vcombine.high %v5011_v52, %v5019_v33  ;;  %v4067_v49 = vrot.slane %v4053_v29, %v8336_v24 }
 0x2e2   : > { %v5052_v60 = vcombine.low %v5027_v4, %v5035_v19  ;;  %v5053_v15 = vcombine.high %v5027_v4, %v5035_v19  ;;  %v4024_v57 = vrot.slane %v4016_v45, %v8340_v30  ;;  %v4031_v56 = vrot.slane %v4017_v21, %v8340_v30 }
 0x2e3   : > { %v4040_v28 = vrot.slane %v4032_v35, %v8340_v30  ;;  %v4047_v3 = vrot.slane %v4033_v22, %v8340_v30  ;;  %v5044_v25 = vrot.slane %v5036_v54, %v8340_v30  ;;  %v6396_v18 = vld [vmem:[#allocation3 + $0x10] sm:$0xff]  ;;  %v5051_v6 = vrot.slane %v5037_v50, %v8340_v30 }
 0x2e4   : > { %v5060_v39 = vrot.slane %v5052_v60, %v8340_v30  ;;  %v5072_v62 = vcombine.low %v4024_v57, %v4031_v56  ;;  %v7268_v61 = vcombine.high %v4024_v57, %v4031_v56  ;;  %7585 = vmatpush3.bf16.msra.mxu1 %v6396_v18  ;;  %v5067_v2 = vrot.slane %v5053_v15, %v8340_v30 }
 0x2e5   : > { %v5088_v23 = vcombine.low %v4040_v28, %v4047_v3  ;;  %v7269_v55 = vcombine.high %v4040_v28, %v4047_v3  ;;  %7586 = vmatprep.subr.bf16.mxu1 %v7926_v12  ;;  %v4068_v38 = vcombine.low %v9226_v59, %v3477_v7  ;;  %v4069_v17 = vcombine.high %v9226_v59, %v3477_v7 }
 0x2e6   : > { %v5068_v31 = vcombine.low %v5044_v25, %v5060_v39  ;;  %v5069_v13 = vcombine.high %v5044_v25, %v5060_v39  ;;  %v5079_v36 = vrot.slane %v5072_v62, %v8336_v24  ;;  %v5087_v41 = vrot.slane %v7268_v61, %v8336_v24 }
 0x2e7   : > { %v5095_v8 = vrot.slane %v5088_v23, %v8336_v24  ;;  %v5103_v20 = vrot.slane %v7269_v55, %v8336_v24  ;;  %v5070_v47 = vcombine.low %v5051_v6, %v5067_v2  ;;  %v5071_v53 = vcombine.high %v5051_v6, %v5067_v2 }
 0x2e8   : > { %v5104_v58 = vcombine.low %v5079_v36, %v5087_v41  ;;  %v5105_v63 = vcombine.high %v5079_v36, %v5087_v41  ;;  %v4076_v46 = vrot.slane %v4068_v38, %v8336_v24  ;;  %v4083_v1 = vrot.slane %v4069_v17, %v8336_v24 }
 0x2e9   : > { %v5120_v37 = vcombine.low %v5095_v8, %v5103_v20  ;;  %v5121_v10 = vcombine.high %v5095_v8, %v5103_v20 }
 0x2ea   : > { %v5112_v32 = vrot.slane %v5104_v58, %v8340_v30  ;;  %v5119_v48 = vrot.slane %v5105_v63, %v8340_v30  ;;  %v4084_v26 = vcombine.low %v4060_v27, %v4076_v46  ;;  %v4085_v59 = vcombine.high %v4060_v27, %v4076_v46 }
 0x2eb   : > { %v5128_v14 = vrot.slane %v5120_v37, %v8340_v30  ;;  %v5135_v16 = vrot.slane %v5121_v10, %v8340_v30  ;;  %v4100_v51 = vcombine.low %v4067_v49, %v4083_v1  ;;  %v4101_v52 = vcombine.high %v4067_v49, %v4083_v1 }
 0x2ec   : > { %v4092_v21 = vrot.slane %v4084_v26, %v8340_v30  ;;  %v4099_v35 = vrot.slane %v4085_v59, %v8340_v30  ;;  %v6270_v27 = vand.u32 127, %v1112_v11 }
 0x2ed   : > { %v5136_v33 = vcombine.low %v5112_v32, %v5128_v14  ;;  %v5137_v4 = vcombine.high %v5112_v32, %v5128_v14  ;;  %v5138_v19 = vcombine.low %v5119_v48, %v5135_v16  ;;  %v5139_v45 = vcombine.high %v5119_v48, %v5135_v16 }
 0x2ee   : > { %v4108_v22 = vrot.slane %v4100_v51, %v8340_v30  ;;  %v4115_v54 = vrot.slane %v4101_v52, %v8340_v30  ;;  %v5140_v56 = vcombine.low %v4092_v21, %v4099_v35  ;;  %v7270_v28 = vcombine.high %v4092_v21, %v4099_v35 }
 0x2ef   : > { %v5687_v50 = vpack.c.bf16 %v5136_v33, %v5068_v31  ;;  %v5695_v60 = vpack.c.bf16 %v5137_v4, %v5069_v13  ;;  %v5703_v15 = vpack.c.bf16 %v5138_v19, %v5070_v47  ;;  %v5711_v57 = vpack.c.bf16 %v5139_v45, %v5071_v53  ;;  %v7812_v33 = vld [vmem:[%s9801_s7] ss:$0 sm:$0xff] }
 0x2f0   : > { %v5156_v3 = vcombine.low %v4108_v22, %v4115_v54  ;;  %v7271_v25 = vcombine.high %v4108_v22, %v4115_v54  ;;  %v5147_v39 = vrot.slane %v5140_v56, %v8336_v24  ;;  %v5155_v5 = vrot.slane %v7270_v28, %v8336_v24 }
 0x2f1   : > { %5719 = vst.msk [vmem:[#allocation3 + $0x18] sm:$0xff] %vm3315_vm2, %v5687_v50  ;;  %5727 = vst.msk [vmem:[#allocation3 + $0x58] sm:$0xff] %vm3315_vm2, %v5695_v60  ;;  %vm6271_vm3 = vcmp.lt.s32.totalorder %v6270_v27, 16  ;;  %v9313_v4 = vadd.f32 %v7812_v33, %v8739_v44  ;;  %v9322_v19 = vadd.f32 %v7812_v33, %v8756_v40  ;;  %v9329_v44 = vadd.f32 %v7812_v33, %v9054_v9 }
 0x2f2   : > { %5735 = vst.msk [vmem:[#allocation3 + $0x98] sm:$0xff] %vm3315_vm2, %v5703_v15  ;;  %5743 = vst.msk [vmem:[#allocation3 + $0xd8] sm:$0xff] %vm3315_vm2, %v5711_v57  ;;  %v5163_v29 = vrot.slane %v5156_v3, %v8336_v24  ;;  %v5171_v18 = vrot.slane %v7271_v25, %v8336_v24  ;;  %v5172_v62 = vcombine.low %v5147_v39, %v5155_v5 }
 0x2f3   : > { %v5173_v61 = vcombine.high %v5147_v39, %v5155_v5  ;;  %v9340_v40 = vadd.f32 %v7812_v33, %v9058_v0  ;;  %v9347_v9 = vadd.f32 %v7812_v33, %v9052_v43  ;;  %v9358_v0 = vadd.f32 %v7812_v33, %v9056_v42  ;;  %v3383_v43 = vpop.permute.xlu0 %3382 }
 0x2f4   : > { %v5188_v23 = vcombine.low %v5163_v29, %v5171_v18  ;;  %v5189_v55 = vcombine.high %v5163_v29, %v5171_v18  ;;  %v9284_v7 = vrot.slane %v5172_v62, %v8340_v30  ;;  %v7933_v42 = vmov 0.0|0.0  }
 0x2f5   : > { %v9287_v6 = vrot.slane %v5173_v61, %v8340_v30  ;;  %7696 = vmatprep.subr.bf16.mxu0 %v7933_v42 }
 0x2f6   : > { %v9290_v2 = vrot.slane %v5188_v23, %v8340_v30  ;;  %v9293_v31 = vrot.slane %v5189_v55, %v8340_v30 }
 0x2f7   : > { %v3431_v45 = vpop.permute.xlu0 %3430 }
 0x2f8   : > { %v5204_v13 = vcombine.low %v9284_v7, %v9290_v2  ;;  %v5205_v36 = vcombine.high %v9284_v7, %v9290_v2  ;;  %v5206_v41 = vcombine.low %v9287_v6, %v9293_v31  ;;  %v5207_v8 = vcombine.high %v9287_v6, %v9293_v31  ;;  %v6397_v20 = vld [vmem:[#allocation3 + $0x18] sm:$0xff] }
 0x2f9   : > { %7587 = vmatpush3.bf16.msra.mxu1 %v6397_v20  ;;  %v4120_v39 = vcombine.low %v9017_v34, %v3431_v45  ;;  %v4121_v5 = vcombine.high %v9017_v34, %v3431_v45 }
 0x2fa   : > { %7588 = vmatprep.subr.bf16.mxu1 %v7926_v12 }
 0x2fb   : > { %v4128_v20 = vrot.slane %v4120_v39, %v8336_v24  ;;  %v4135_v27 = vrot.slane %v4121_v5, %v8336_v24 }
 0x308   : > { %v6062_v49 = vpop.f32.mrb[16].mxu1  ;;  %v6129_v38 = vpop.f32.mrb[20].mxu0 }
 0x309   : > { %v7507_v17 = vpop.f32.mrb[17].mxu1  ;;  %v7527_v58 = vpop.f32.mrb[21].mxu0  ;;  %v6274_v63 = vsel %vm6271_vm3, %v6062_v49, -1e+30  ;;  %v6275_v37 = vsel %vm6271_vm3, %v6129_v38, -1e+30 }
 0x30a   : > { %6278 = vmax.xlane.f32.xlu1 %v6274_v63  ;;  %v6065_v10 = vpop.f32.mrb[18].mxu1  ;;  %6280 = vmax.xlane.f32.xlu0 %v6275_v37  ;;  %v6132_v47 = vpop.f32.mrb[22].mxu0 }
 0x30b   : > { %v7508_v53 = vpop.f32.mrb[19].mxu1  ;;  %v7528_v46 = vpop.f32.mrb[23].mxu0 }
 0x348   : > { %v6196_v1 = vpop.f32.mrb[20].mxu1  ;;  %v6263_v32 = vpop.f32.mrb[24].mxu0 }
 0x349   : > { %v7547_v48 = vpop.f32.mrb[21].mxu1  ;;  %v7567_v14 = vpop.f32.mrb[25].mxu0  ;;  %v6276_v11 = vsel %vm6271_vm3, %v6196_v1, -1e+30  ;;  %v6277_v16 = vsel %vm6271_vm3, %v6263_v32, -1e+30 }
 0x34a   : > { %v6199_v26 = vpop.f32.mrb[22].mxu1  ;;  %6282 = vmax.xlane.f32.xlu0 %v6276_v11  ;;  %6284 = vmax.xlane.f32.xlu1 %v6277_v16  ;;  %v6266_v59 = vpop.f32.mrb[26].mxu0 }
 0x34b   : > { %v7548_v51 = vpop.f32.mrb[23].mxu1  ;;  %v7568_v52 = vpop.f32.mrb[27].mxu0 }
 0x35b   : > { %3384 = vrot.lane.b32.xlu1 %v9313_v4, %s7928_s1 }
 0x35f   : > { %3432 = vrot.lane.b32.xlu1 %v9313_v4, %s7929_s24 }
 0x360   : > { %3478 = vrot.lane.b32.xlu0 %v9017_v34, %s7930_s28 }
 0x363   : > { %3480 = vrot.lane.b32.xlu1 %v9313_v4, %s7930_s28 }
 0x364   : > { %3386 = vrot.lane.b32.xlu0 %v9322_v19, %s7928_s1 }
 0x367   : > { %3388 = vrot.lane.b32.xlu1 %v9329_v44, %s7928_s1 }
 0x368   : > { %3434 = vrot.lane.b32.xlu0 %v9322_v19, %s7929_s24 }
 0x36b   : > { %3436 = vrot.lane.b32.xlu1 %v9329_v44, %s7929_s24 }
 0x36c   : > { %3482 = vrot.lane.b32.xlu0 %v9322_v19, %s7930_s28 }
 0x36f   : > { %3484 = vrot.lane.b32.xlu1 %v9329_v44, %s7930_s28 }
 0x370   : > { %3390 = vrot.lane.b32.xlu0 %v9340_v40, %s7928_s1 }
 0x373   : > { %3392 = vrot.lane.b32.xlu1 %v9347_v9, %s7928_s1 }
 0x374   : > { %3438 = vrot.lane.b32.xlu0 %v9340_v40, %s7929_s24 }
 0x377   : > { %3440 = vrot.lane.b32.xlu1 %v9347_v9, %s7929_s24 }
 0x378   : > { %3486 = vrot.lane.b32.xlu0 %v9340_v40, %s7930_s28 }
 0x37c   : > { %3394 = vrot.lane.b32.xlu0 %v9358_v0, %s7928_s1  ;;  %s9520_s1 = sand.u32 1, %s7908_s30  }
 0x397   : > { %v6279_v21 = vpop.xlane.xlu1 %6278  ;;  %v6281_v35 = vpop.xlane.xlu0 %6280 }
 0x398   : > { %v6286_v22 = vsub.f32 %v6274_v63, %v6279_v21  ;;  %v6287_v54 = vsub.f32 %v6275_v37, %v6281_v35 }
 0x39a   : > { %v6290_v50 = vmul.f32 1.442695, %v6286_v22  ;;  %v6292_v60 = vmul.f32 1.442695, %v6287_v54 }
 0x39c   : > { %7792 = vpow2.f32 %v6290_v50 }
 0x39d   : > { %7794 = vpow2.f32 %v6292_v60 }
 0x3a6   : > { %v9362_v15 = vpop.eup %7792 }
 0x3a7   : > { %v9364_v57 = vpop.eup %7794  ;;  %6298 = vadd.xlane.f32.xlu0 %v9362_v15 }
 0x3a8   : > { %6300 = vadd.xlane.f32.xlu1 %v9364_v57 }
 0x3d7   : > { %v6283_v56 = vpop.xlane.xlu0 %6282  ;;  %v6285_v28 = vpop.xlane.xlu1 %6284 }
 0x3d8   : > { %v6288_v3 = vsub.f32 %v6276_v11, %v6283_v56  ;;  %v6289_v25 = vsub.f32 %v6277_v16, %v6285_v28 }
 0x3da   : > { %v6294_v29 = vmul.f32 1.442695, %v6288_v3  ;;  %v6296_v18 = vmul.f32 1.442695, %v6289_v25 }
 0x3db   : > { %v3479_v62 = vpop.permute.xlu0 %3478  ;;  %v3385_v61 = vpop.permute.xlu1 %3384 }
 0x3dc   : > { %7796 = vpow2.f32 %v6294_v29  ;;  %v4136_v23 = vcombine.low %v3383_v43, %v3479_v62  ;;  %v4137_v55 = vcombine.high %v3383_v43, %v3479_v62 }
 0x3dd   : > { %7798 = vpow2.f32 %v6296_v18 }
 0x3de   : > { %v4144_v49 = vrot.slane %v4136_v23, %v8336_v24  ;;  %v4151_v38 = vrot.slane %v4137_v55, %v8336_v24 }
 0x3df   : > { %v9375_v17 = vpop.permute.xlu0 %3386  ;;  %v3433_v58 = vpop.permute.xlu1 %3432 }
 0x3e0   : > { %v4152_v34 = vcombine.low %v4128_v20, %v4144_v49  ;;  %v4153_v63 = vcombine.high %v4128_v20, %v4144_v49  ;;  %v4168_v37 = vcombine.low %v4135_v27, %v4151_v38  ;;  %v4169_v10 = vcombine.high %v4135_v27, %v4151_v38 }
 0x3e1   : > { %v4188_v47 = vcombine.low %v9313_v4, %v3433_v58  ;;  %v4189_v53 = vcombine.high %v9313_v4, %v3433_v58 }
 0x3e2   : > { %v4160_v46 = vrot.slane %v4152_v34, %v8340_v30  ;;  %v4167_v1 = vrot.slane %v4153_v63, %v8340_v30  ;;  %v4176_v32 = vrot.slane %v4168_v37, %v8340_v30  ;;  %v4183_v48 = vrot.slane %v4169_v10, %v8340_v30 }
 0x3e3   : > { %v3481_v14 = vpop.permute.xlu1 %3480  ;;  %v3435_v51 = vpop.permute.xlu0 %3434  ;;  %v4196_v52 = vrot.slane %v4188_v47, %v8336_v24  ;;  %v4203_v33 = vrot.slane %v4189_v53, %v8336_v24 }
 0x3e4   : > { %v5208_v11 = vcombine.low %v4160_v46, %v4167_v1  ;;  %v7272_v16 = vcombine.high %v4160_v46, %v4167_v1  ;;  %v5224_v26 = vcombine.low %v4176_v32, %v4183_v48  ;;  %v7273_v59 = vcombine.high %v4176_v32, %v4183_v48 }
 0x3e5   : > { %v4204_v43 = vcombine.low %v3385_v61, %v3481_v14  ;;  %v4205_v4 = vcombine.high %v3385_v61, %v3481_v14  ;;  %v4256_v60 = vcombine.low %v9322_v19, %v3435_v51  ;;  %v4257_v56 = vcombine.high %v9322_v19, %v3435_v51 }
 0x3e6   : > { %v9385_v45 = vpop.eup %7796  ;;  %v5215_v21 = vrot.slane %v5208_v11, %v8336_v24  ;;  %v5223_v35 = vrot.slane %v7272_v16, %v8336_v24  ;;  %v5231_v22 = vrot.slane %v5224_v26, %v8336_v24  ;;  %v5239_v54 = vrot.slane %v7273_v59, %v8336_v24 }
 0x3e7   : > { %v9391_v50 = vpop.eup %7798  ;;  %v4212_v28 = vrot.slane %v4204_v43, %v8336_v24  ;;  %v4219_v3 = vrot.slane %v4205_v4, %v8336_v24  ;;  %6302 = vadd.xlane.f32.xlu0 %v9385_v45  ;;  %v9399_v18 = vpop.permute.xlu1 %3388 }
 0x3e8   : > { %v5240_v25 = vcombine.low %v5215_v21, %v5223_v35  ;;  %v5241_v39 = vcombine.high %v5215_v21, %v5223_v35  ;;  %v5256_v5 = vcombine.low %v5231_v22, %v5239_v54  ;;  %v5257_v29 = vcombine.high %v5231_v22, %v5239_v54  ;;  %6304 = vadd.xlane.f32.xlu1 %v9391_v50  ;;  %v3483_v14 = vpop.permute.xlu0 %3482 }
 0x3e9   : > { %v4220_v62 = vcombine.low %v4196_v52, %v4212_v28  ;;  %v4221_v61 = vcombine.high %v4196_v52, %v4212_v28  ;;  %v4236_v23 = vcombine.low %v4203_v33, %v4219_v3  ;;  %v4237_v55 = vcombine.high %v4203_v33, %v4219_v3 }
 0x3ea   : > { %v5248_v19 = vrot.slane %v5240_v25, %v8340_v30  ;;  %v5255_v20 = vrot.slane %v5241_v39, %v8340_v30  ;;  %v5264_v27 = vrot.slane %v5256_v5, %v8340_v30  ;;  %v5271_v49 = vrot.slane %v5257_v29, %v8340_v30 }
 0x3eb   : > { %v4228_v38 = vrot.slane %v4220_v62, %v8340_v30  ;;  %v4235_v58 = vrot.slane %v4221_v61, %v8340_v30  ;;  %v4244_v34 = vrot.slane %v4236_v23, %v8340_v30  ;;  %v4251_v63 = vrot.slane %v4237_v55, %v8340_v30  ;;  %v3437_v51 = vpop.permute.xlu1 %3436 }
 0x3ec   : > { %v5272_v37 = vcombine.low %v5248_v19, %v5264_v27  ;;  %v5273_v10 = vcombine.high %v5248_v19, %v5264_v27  ;;  %v5274_v47 = vcombine.low %v5255_v20, %v5271_v49  ;;  %v5275_v53 = vcombine.high %v5255_v20, %v5271_v49  ;;  %v9437_v5 = vpop.permute.xlu0 %3390 }
 0x3ed   : > { %v5276_v46 = vcombine.low %v4228_v38, %v4235_v58  ;;  %v7274_v1 = vcombine.high %v4228_v38, %v4235_v58  ;;  %v5292_v32 = vcombine.low %v4244_v34, %v4251_v63  ;;  %v7275_v48 = vcombine.high %v4244_v34, %v4251_v63 }
 0x3ee   : > { %v5688_v11 = vpack.c.bf16 %v5272_v37, %v5204_v13  ;;  %v5696_v16 = vpack.c.bf16 %v5273_v10, %v5205_v36  ;;  %v5704_v26 = vpack.c.bf16 %v5274_v47, %v5206_v41  ;;  %v5712_v59 = vpack.c.bf16 %v5275_v53, %v5207_v8 }
 0x3ef   : > { %v5283_v52 = vrot.slane %v5276_v46, %v8336_v24  ;;  %v5291_v33 = vrot.slane %v7274_v1, %v8336_v24  ;;  %v4272_v7 = vcombine.low %v9375_v17, %v3483_v14  ;;  %v4273_v2 = vcombine.high %v9375_v17, %v3483_v14  ;;  %v3485_v3 = vpop.permute.xlu1 %3484 }
 0x3f0   : > { %5720 = vst.msk [vmem:[#allocation3 + $0x20] sm:$0xff] %vm3315_vm2, %v5688_v11  ;;  %5728 = vst.msk [vmem:[#allocation3 + $0x60] sm:$0xff] %vm3315_vm2, %v5696_v16  ;;  %v5299_v6 = vrot.slane %v5292_v32, %v8336_v24  ;;  %v5307_v31 = vrot.slane %v7275_v48, %v8336_v24  ;;  %v4324_v13 = vcombine.low %v9329_v44, %v3437_v51  ;;  %v3439_v32 = vpop.permute.xlu0 %3438 }
 0x3f1   : > { %5736 = vst.msk [vmem:[#allocation3 + $0xa0] sm:$0xff] %vm3315_vm2, %v5704_v26  ;;  %5744 = vst.msk [vmem:[#allocation3 + $0xe0] sm:$0xff] %vm3315_vm2, %v5712_v59  ;;  %v4325_v36 = vcombine.high %v9329_v44, %v3437_v51  ;;  %v4264_v41 = vrot.slane %v4256_v60, %v8336_v24  ;;  %v4271_v8 = vrot.slane %v4257_v56, %v8336_v24 }
 0x3f2   : > { %v4280_v43 = vrot.slane %v4272_v7, %v8336_v24  ;;  %v4287_v4 = vrot.slane %v4273_v2, %v8336_v24  ;;  %v5308_v21 = vcombine.low %v5283_v52, %v5291_v33  ;;  %v5309_v35 = vcombine.high %v5283_v52, %v5291_v33 }
 0x3f3   : > { %v5324_v25 = vcombine.low %v5299_v6, %v5307_v31  ;;  %v5325_v39 = vcombine.high %v5299_v6, %v5307_v31  ;;  %v4332_v44 = vrot.slane %v4324_v13, %v8336_v24  ;;  %v4339_v60 = vrot.slane %v4325_v36, %v8336_v24 }
 0x3f4   : > { %v4288_v22 = vcombine.low %v4264_v41, %v4280_v43  ;;  %v4289_v17 = vcombine.high %v4264_v41, %v4280_v43  ;;  %v4304_v54 = vcombine.low %v4271_v8, %v4287_v4  ;;  %v4305_v28 = vcombine.high %v4271_v8, %v4287_v4 }
 0x3f5   : > { %v5316_v23 = vrot.slane %v5308_v21, %v8340_v30  ;;  %v5323_v55 = vrot.slane %v5309_v35, %v8340_v30  ;;  %v4340_v19 = vcombine.low %v9399_v18, %v3485_v3  ;;  %v4341_v20 = vcombine.high %v9399_v18, %v3485_v3 }
 0x3f6   : > { %v4296_v56 = vrot.slane %v4288_v22, %v8340_v30  ;;  %v4303_v29 = vrot.slane %v4289_v17, %v8340_v30  ;;  %v4312_v62 = vrot.slane %v4304_v54, %v8340_v30  ;;  %v4319_v61 = vrot.slane %v4305_v28, %v8340_v30 }
 0x3f7   : > { %v6398_v27 = vld [vmem:[#allocation3 + $0x20] sm:$0xff]  ;;  %v5332_v63 = vrot.slane %v5324_v25, %v8340_v30  ;;  %v5339_v37 = vrot.slane %v5325_v39, %v8340_v30  ;;  %v4348_v10 = vrot.slane %v4340_v19, %v8336_v24  ;;  %v4355_v47 = vrot.slane %v4341_v20, %v8336_v24  ;;  %v3487_v25 = vpop.permute.xlu0 %3486 }
 0x3f8   : > { %v5344_v49 = vcombine.low %v4296_v56, %v4303_v29  ;;  %v7276_v38 = vcombine.high %v4296_v56, %v4303_v29  ;;  %v5360_v58 = vcombine.low %v4312_v62, %v4319_v61  ;;  %v7277_v34 = vcombine.high %v4312_v62, %v4319_v61  ;;  %7589 = vmatpush3.bf16.msra.mxu1 %v6398_v27 }
 0x3f9   : > { %3488 = vrot.lane.b32.xlu1 %v9347_v9, %s7930_s28  ;;  %7590 = vmatprep.subr.bf16.mxu1 %v7926_v12  ;;  %v4356_v48 = vcombine.low %v4332_v44, %v4348_v10  ;;  %v4357_v14 = vcombine.high %v4332_v44, %v4348_v10  ;;  %v4372_v11 = vcombine.low %v4339_v60, %v4355_v47 }
 0x3fa   : > { %v5351_v53 = vrot.slane %v5344_v49, %v8336_v24  ;;  %v5359_v18 = vrot.slane %v7276_v38, %v8336_v24  ;;  %v5367_v46 = vrot.slane %v5360_v58, %v8336_v24  ;;  %v5375_v1 = vrot.slane %v7277_v34, %v8336_v24 }
 0x3fb   : > { %v4373_v16 = vcombine.high %v4339_v60, %v4355_v47  ;;  %v5340_v33 = vcombine.low %v5316_v23, %v5332_v63  ;;  %v5341_v7 = vcombine.high %v5316_v23, %v5332_v63  ;;  %v5342_v2 = vcombine.low %v5323_v55, %v5339_v37 }
 0x3fc   : > { %v5376_v26 = vcombine.low %v5351_v53, %v5359_v18  ;;  %v5377_v59 = vcombine.high %v5351_v53, %v5359_v18  ;;  %v5392_v51 = vcombine.low %v5367_v46, %v5375_v1  ;;  %v5393_v52 = vcombine.high %v5367_v46, %v5375_v1 }
 0x3fd   : > { %v5343_v6 = vcombine.high %v5323_v55, %v5339_v37  ;;  %3442 = vrot.lane.b32.xlu0 %v9358_v0, %s7929_s24  ;;  %v4364_v8 = vrot.slane %v4356_v48, %v8340_v30  ;;  %v4371_v43 = vrot.slane %v4357_v14, %v8340_v30  ;;  %v4380_v4 = vrot.slane %v4372_v11, %v8340_v30  ;;  %s9523_s24 = scalar_lea.vmem [#allocation6], %s9520_s1 }
 0x3fe   : > { %v5384_v31 = vrot.slane %v5376_v26, %v8340_v30  ;;  %v5391_v13 = vrot.slane %v5377_v59, %v8340_v30  ;;  %v5400_v36 = vrot.slane %v5392_v51, %v8340_v30  ;;  %v5407_v41 = vrot.slane %v5393_v52, %v8340_v30  ;;  %5748 = vst [vmem:[%s9523_s24] sm:$0x1] %v7926_v12  ;;  %s7080_s26 = sshll.u32 %s9523_s24, 4  ;;  %s7081_s26 = int_to_ptr.vmem [resolvable:$true] %s7080_s26 }
 0x3ff   : > { %v4387_v21 = vrot.slane %v4373_v16, %v8340_v30  ;;  %v4392_v28 = vcombine.low %v9340_v40, %v3439_v32  ;;  %v4393_v3 = vcombine.high %v9340_v40, %v3439_v32  ;;  %v5412_v29 = vcombine.low %v4364_v8, %v4371_v43  ;;  %s7814_s20 = scalar_lea.vmem %s7081_s26, 16 }
 0x400   : > { %v5408_v35 = vcombine.low %v5384_v31, %v5400_v36  ;;  %v5409_v22 = vcombine.high %v5384_v31, %v5400_v36  ;;  %v5410_v17 = vcombine.low %v5391_v13, %v5407_v41  ;;  %v5411_v54 = vcombine.high %v5391_v13, %v5407_v41  ;;  %p7815_p12 = scmp.ne.s32.totalorder %s7081_s26, %s7814_s20 }
 0x401   : > { %3490 = vrot.lane.b32.xlu0 %v9358_v0, %s7930_s28  ;;  %v7278_v62 = vcombine.high %v4364_v8, %v4371_v43  ;;  %v5428_v61 = vcombine.low %v4380_v4, %v4387_v21  ;;  %v7279_v23 = vcombine.high %v4380_v4, %v4387_v21  ;;  %v4408_v40 = vcombine.low %v9437_v5, %v3487_v25  ;;  %s7938_s28 = smov [#allocation6]  }
 0x402   : > { %v5689_v39 = vpack.c.bf16 %v5408_v35, %v5340_v33  ;;  %v5697_v44 = vpack.c.bf16 %v5409_v22, %v5341_v7  ;;  %v5705_v60 = vpack.c.bf16 %v5410_v17, %v5342_v2  ;;  %v5713_v56 = vpack.c.bf16 %v5411_v54, %v5343_v6  ;;  %p7816_p13 = pnand %p7815_p12, %p8080_p4  ;;  %s7818_s23 = sshll.u32 %s7938_s28, 4  ;;  %s7819_s23 = int_to_ptr.vmem [resolvable:$false] %s7818_s23 }
 0x403   : > { %v4409_v55 = vcombine.high %v9437_v5, %v3487_v25  ;;  %v4400_v19 = vrot.slane %v4392_v28, %v8336_v24  ;;  %v4407_v20 = vrot.slane %v4393_v3, %v8336_v24  ;;  %v4416_v27 = vrot.slane %v4408_v40, %v8336_v24  ;;  %s7820_s4 = scalar_lea.vmem %s7819_s23, 32  ;;  %p7821_p1 = scmp.lt.s32.totalorder %s7081_s26, %s7819_s23 }
 0x404   : > { %5721 = vst.msk [vmem:[#allocation3 + $0x28] sm:$0xff] %vm3315_vm2, %v5689_v39  ;;  %5729 = vst.msk [vmem:[#allocation3 + $0x68] sm:$0xff] %vm3315_vm2, %v5697_v44  ;;  %v5419_v38 = vrot.slane %v5412_v29, %v8336_v24  ;;  %v5427_v58 = vrot.slane %v7278_v62, %v8336_v24  ;;  %v5435_v34 = vrot.slane %v5428_v61, %v8336_v24  ;;  %p7817_p0 = pneg %p7816_p13  ;;  %p7822_p2 = scmp.lt.s32.totalorder %s7820_s4, %s7814_s20 }
 0x405   : > { %5737 = vst.msk [vmem:[#allocation3 + $0xa8] sm:$0xff] %vm3315_vm2, %v5705_v60  ;;  %5745 = vst.msk [vmem:[#allocation3 + $0xe8] sm:$0xff] %vm3315_vm2, %v5713_v56  ;;  %v4423_v49 = vrot.slane %v4409_v55, %v8336_v24  ;;  %v5443_v63 = vrot.slane %v7279_v23, %v8336_v24  ;;  %v4424_v37 = vcombine.low %v4400_v19, %v4416_v27 }
 0x406   : > { %v4425_v10 = vcombine.high %v4400_v19, %v4416_v27  ;;  %v5444_v32 = vcombine.low %v5419_v38, %v5427_v58  ;;  %v5445_v48 = vcombine.high %v5419_v38, %v5427_v58  ;;  %v3393_v19 = vpop.permute.xlu1 %3392  ;;  %p7823_p3 = por %p7822_p2, %p7821_p1 }
 0x407   : > { %v4440_v47 = vcombine.low %v4407_v20, %v4423_v49  ;;  %v4441_v5 = vcombine.high %v4407_v20, %v4423_v49  ;;  %v4432_v53 = vrot.slane %v4424_v37, %v8340_v30  ;;  %v5460_v14 = vcombine.low %v5435_v34, %v5443_v63  ;;  %v3395_v20 = vpop.permute.xlu0 %3394 }
 0x408   : > { %v4439_v18 = vrot.slane %v4425_v10, %v8340_v30  ;;  %v5461_v11 = vcombine.high %v5435_v34, %v5443_v63  ;;  %v5452_v31 = vrot.slane %v5444_v32, %v8340_v30  ;;  %v5459_v13 = vrot.slane %v5445_v48, %v8340_v30  ;;  %p7824_p5 = pnand %p7823_p3, %p7817_p0 }
 0x409   : > { %v4448_v46 = vrot.slane %v4440_v47, %v8340_v30  ;;  %v4455_v1 = vrot.slane %v4441_v5, %v8340_v30  ;;  %v5468_v36 = vrot.slane %v5460_v14, %v8340_v30 }
 0x40a   : > { %v5480_v26 = vcombine.low %v4432_v53, %v4439_v18  ;;  %v7280_v59 = vcombine.high %v4432_v53, %v4439_v18  ;;  %v5475_v41 = vrot.slane %v5461_v11, %v8340_v30  ;;  %v3441_v27 = vpop.permute.xlu1 %3440 }
 0x40b   : > { %v6399_v16 = vld [vmem:[#allocation3 + $0x28] sm:$0xff]  ;;  %v5496_v51 = vcombine.low %v4448_v46, %v4455_v1  ;;  %v7281_v52 = vcombine.high %v4448_v46, %v4455_v1  ;;  %v5476_v28 = vcombine.low %v5452_v31, %v5468_v36  ;;  %v5477_v3 = vcombine.high %v5452_v31, %v5468_v36 }
 0x40c   : > { %7591 = vmatpush3.bf16.msra.mxu1 %v6399_v16  ;;  %v5487_v33 = vrot.slane %v5480_v26, %v8336_v24  ;;  %v5495_v7 = vrot.slane %v7280_v59, %v8336_v24  ;;  %v5478_v25 = vcombine.low %v5459_v13, %v5475_v41  ;;  %v5479_v39 = vcombine.high %v5459_v13, %v5475_v41 }
 0x40d   : > { %7592 = vmatprep.subr.bf16.mxu1 %v7926_v12  ;;  %v5503_v2 = vrot.slane %v5496_v51, %v8336_v24  ;;  %v5511_v6 = vrot.slane %v7281_v52, %v8336_v24  ;;  %v4460_v5 = vcombine.low %v9347_v9, %v3441_v27 }
 0x40e   : > { %v5512_v8 = vcombine.low %v5487_v33, %v5495_v7  ;;  %v5513_v43 = vcombine.high %v5487_v33, %v5495_v7 }
 0x40f   : > { %v5528_v4 = vcombine.low %v5503_v2, %v5511_v6  ;;  %v5529_v21 = vcombine.high %v5503_v2, %v5511_v6 }
 0x410   : > { %v5520_v35 = vrot.slane %v5512_v8, %v8340_v30  ;;  %v5527_v22 = vrot.slane %v5513_v43, %v8340_v30 }
 0x411   : > { %v5536_v17 = vrot.slane %v5528_v4, %v8340_v30  ;;  %v5543_v54 = vrot.slane %v5529_v21, %v8340_v30 }
 0x413   : > { %v5544_v44 = vcombine.low %v5520_v35, %v5536_v17  ;;  %v5545_v60 = vcombine.high %v5520_v35, %v5536_v17  ;;  %v5546_v56 = vcombine.low %v5527_v22, %v5543_v54  ;;  %v5547_v29 = vcombine.high %v5527_v22, %v5543_v54 }
 0x415   : > { %v5690_v62 = vpack.c.bf16 %v5544_v44, %v5476_v28  ;;  %v5698_v61 = vpack.c.bf16 %v5545_v60, %v5477_v3  ;;  %v5706_v23 = vpack.c.bf16 %v5546_v56, %v5478_v25  ;;  %v5714_v40 = vpack.c.bf16 %v5547_v29, %v5479_v39 }
 0x417   : > { %5722 = vst.msk [vmem:[#allocation3 + $0x30] sm:$0xff] %vm3315_vm2, %v5690_v62  ;;  %5730 = vst.msk [vmem:[#allocation3 + $0x70] sm:$0xff] %vm3315_vm2, %v5698_v61 }
 0x418   : > { %5738 = vst.msk [vmem:[#allocation3 + $0xb0] sm:$0xff] %vm3315_vm2, %v5706_v23  ;;  %5746 = vst.msk [vmem:[#allocation3 + $0xf0] sm:$0xff] %vm3315_vm2, %v5714_v40 }
 0x41e   : > { %v6400_v55 = vld [vmem:[#allocation3 + $0x30] sm:$0xff] }
 0x41f   : > { %7593 = vmatpush3.bf16.msra.mxu1 %v6400_v55 }
 0x420   : > { %7594 = vmatprep.subr.bf16.mxu1 %v7926_v12 }
 0x434   : > { %v6299_v49 = vpop.xlane.xlu0 %6298 }
 0x435   : > { %7800 = vrcp.f32 %v6299_v49  ;;  %v6301_v38 = vpop.xlane.xlu1 %6300 }
 0x436   : > { %7802 = vrcp.f32 %v6301_v38 }
 0x43f   : > { %v7801_v58 = vpop.eup %7800 }
 0x440   : > { %v7803_v34 = vpop.eup %7802  ;;  %v9511_v63 = vmul.f32 %v7801_v58, %v9362_v15 }
 0x441   : > { %v9514_v37 = vmul.f32 %v7803_v34, %v9364_v57  ;;  %v4461_v57 = vcombine.high %v9347_v9, %v3441_v27 }
 0x443   : > { %v7697_v10 = vpack.c.bf16 %v9514_v37, %v9511_v63  ;;  %v4475_v14 = vrot.slane %v4461_v57, %v8336_v24 }
 0x445   : > { %7698 = vmatpush3.bf16.msra.mxu0 %v7697_v10 }
 0x446   : > { %7699 = vmatprep.subr.bf16.mxu0 %v7933_v42  ;;  %v4468_v42 = vrot.slane %v4460_v5, %v8336_v24 }
 0x474   : > { %v6303_v47 = vpop.xlane.xlu0 %6302 }
 0x475   : > { %v6305_v15 = vpop.xlane.xlu1 %6304  ;;  %7804 = vrcp.f32 %v6303_v47 }
 0x476   : > { %7806 = vrcp.f32 %v6305_v15 }
 0x478   : > { %v3443_v53 = vpop.permute.xlu0 %3442 }
 0x479   : > { %v3489_v18 = vpop.permute.xlu1 %3488  ;;  %v4528_v32 = vcombine.low %v9358_v0, %v3443_v53  ;;  %v4529_v48 = vcombine.high %v9358_v0, %v3443_v53 }
 0x47a   : > { %v4476_v46 = vcombine.low %v3393_v19, %v3489_v18  ;;  %v4477_v1 = vcombine.high %v3393_v19, %v3489_v18 }
 0x47b   : > { %v4536_v2 = vrot.slane %v4528_v32, %v8336_v24  ;;  %v4543_v6 = vrot.slane %v4529_v48, %v8336_v24 }
 0x47c   : > { %v4484_v11 = vrot.slane %v4476_v46, %v8336_v24  ;;  %v4491_v16 = vrot.slane %v4477_v1, %v8336_v24  ;;  %v3491_v26 = vpop.permute.xlu0 %3490 }
 0x47d   : > { %v4544_v9 = vcombine.low %v3395_v20, %v3491_v26  ;;  %v4545_v59 = vcombine.high %v3395_v20, %v3491_v26 }
 0x47e   : > { %v4492_v51 = vcombine.low %v4468_v42, %v4484_v11  ;;  %v4493_v52 = vcombine.high %v4468_v42, %v4484_v11  ;;  %v4508_v33 = vcombine.low %v4475_v14, %v4491_v16  ;;  %v4509_v7 = vcombine.high %v4475_v14, %v4491_v16 }
 0x47f   : > { %v4552_v0 = vrot.slane %v4544_v9, %v8336_v24  ;;  %v4559_v31 = vrot.slane %v4545_v59, %v8336_v24  ;;  %v7805_v19 = vpop.eup %7804 }
 0x480   : > { %v4500_v13 = vrot.slane %v4492_v51, %v8340_v30  ;;  %v4507_v36 = vrot.slane %v4493_v52, %v8340_v30  ;;  %v4516_v41 = vrot.slane %v4508_v33, %v8340_v30  ;;  %v4523_v8 = vrot.slane %v4509_v7, %v8340_v30  ;;  %v7807_v58 = vpop.eup %7806 }
 0x481   : > { %v4560_v43 = vcombine.low %v4536_v2, %v4552_v0  ;;  %v4561_v4 = vcombine.high %v4536_v2, %v4552_v0  ;;  %v4576_v21 = vcombine.low %v4543_v6, %v4559_v31  ;;  %v4577_v35 = vcombine.high %v4543_v6, %v4559_v31 }
 0x482   : > { %v5548_v22 = vcombine.low %v4500_v13, %v4507_v36  ;;  %v7282_v17 = vcombine.high %v4500_v13, %v4507_v36  ;;  %v5564_v54 = vcombine.low %v4516_v41, %v4523_v8  ;;  %v7283_v28 = vcombine.high %v4516_v41, %v4523_v8 }
 0x483   : > { %v4568_v3 = vrot.slane %v4560_v43, %v8340_v30  ;;  %v4575_v25 = vrot.slane %v4561_v4, %v8340_v30  ;;  %v4584_v39 = vrot.slane %v4576_v21, %v8340_v30  ;;  %v4591_v44 = vrot.slane %v4577_v35, %v8340_v30  ;;  %v6403_v43 = vld [vmem:[#allocation3 + $0x48] sm:$0xff]  ;;  %v6404_v35 = vld [vmem:[#allocation3 + $0x50] sm:$0xff] }
 0x484   : > { %v5555_v60 = vrot.slane %v5548_v22, %v8336_v24  ;;  %v5563_v56 = vrot.slane %v7282_v17, %v8336_v24  ;;  %v5571_v29 = vrot.slane %v5564_v54, %v8336_v24  ;;  %v5579_v62 = vrot.slane %v7283_v28, %v8336_v24  ;;  %v6410_v22 = vld [vmem:[#allocation3 + $0x80] sm:$0xff]  ;;  %v6405_v17 = vld [vmem:[#allocation3 + $0x58] sm:$0xff]  ;;  %v6411_v54 = vld [vmem:[#allocation3 + $0x88] sm:$0xff] }
 0x485   : > { %v5616_v61 = vcombine.low %v4568_v3, %v4575_v25  ;;  %v7284_v23 = vcombine.high %v4568_v3, %v4575_v25  ;;  %v5632_v40 = vcombine.low %v4584_v39, %v4591_v44  ;;  %v7285_v55 = vcombine.high %v4584_v39, %v4591_v44  ;;  %v6412_v28 = vld [vmem:[#allocation3 + $0x90] sm:$0xff]  ;;  %v6407_v3 = vld [vmem:[#allocation3 + $0x68] sm:$0xff]  ;;  %v6413_v25 = vld [vmem:[#allocation3 + $0x98] sm:$0xff] }
 0x486   : > { %v5580_v20 = vcombine.low %v5555_v60, %v5563_v56  ;;  %v5581_v27 = vcombine.high %v5555_v60, %v5563_v56  ;;  %v5596_v49 = vcombine.low %v5571_v29, %v5579_v62  ;;  %v5597_v38 = vcombine.high %v5571_v29, %v5579_v62  ;;  %v6408_v39 = vld [vmem:[#allocation3 + $0x70] sm:$0xff]  ;;  %v6414_v44 = vld [vmem:[#allocation3 + $0xa0] sm:$0xff]  ;;  %v6415_v56 = vld [vmem:[#allocation3 + $0xa8] sm:$0xff] }
 0x487   : > { %v5623_v34 = vrot.slane %v5616_v61, %v8336_v24  ;;  %v5631_v10 = vrot.slane %v7284_v23, %v8336_v24  ;;  %v5639_v47 = vrot.slane %v5632_v40, %v8336_v24  ;;  %v5647_v15 = vrot.slane %v7285_v55, %v8336_v24  ;;  %v6418_v62 = vld [vmem:[#allocation3 + $0xc0] sm:$0xff]  ;;  %v6416_v61 = vld [vmem:[#allocation3 + $0xb0] sm:$0xff]  ;;  %v6419_v23 = vld [vmem:[#allocation3 + $0xc8] sm:$0xff] }
 0x488   : > { %v5588_v5 = vrot.slane %v5580_v20, %v8340_v30  ;;  %v5595_v57 = vrot.slane %v5581_v27, %v8340_v30  ;;  %v5604_v53 = vrot.slane %v5596_v49, %v8340_v30  ;;  %v5611_v18 = vrot.slane %v5597_v38, %v8340_v30  ;;  %v6420_v55 = vld [vmem:[#allocation3 + $0xd0] sm:$0xff]  ;;  %v6422_v20 = vld [vmem:[#allocation3 + $0xe0] sm:$0xff]  ;;  %v6423_v27 = vld [vmem:[#allocation3 + $0xe8] sm:$0xff] }
 0x489   : > { %v5648_v46 = vcombine.low %v5623_v34, %v5631_v10  ;;  %v5649_v1 = vcombine.high %v5623_v34, %v5631_v10  ;;  %v5664_v42 = vcombine.low %v5639_v47, %v5647_v15  ;;  %v5665_v32 = vcombine.high %v5639_v47, %v5647_v15  ;;  %v6424_v49 = vld [vmem:[#allocation3 + $0xf0] sm:$0xff]  ;;  %v7780_v34 = vld [vmem:[%s9802_s8] sm:$0xff]  }
 0x48a   : > { %v5612_v48 = vcombine.low %v5588_v5, %v5604_v53  ;;  %v5613_v14 = vcombine.high %v5588_v5, %v5604_v53  ;;  %v5614_v59 = vcombine.low %v5595_v57, %v5611_v18  ;;  %v5615_v51 = vcombine.high %v5595_v57, %v5611_v18  ;;  %v6318_v10 = vld [vmem:[%s9523_s24] sm:$0x1] }
 0x48b   : > { %v5656_v11 = vrot.slane %v5648_v46, %v8340_v30  ;;  %v5663_v16 = vrot.slane %v5649_v1, %v8340_v30  ;;  %v5672_v26 = vrot.slane %v5664_v42, %v8340_v30  ;;  %v5679_v9 = vrot.slane %v5665_v32, %v8340_v30 }
 0x48c   : > { %v9564_v52 = vmul.f32 %v7805_v19, %v9385_v45  ;;  %v9567_v33 = vmul.f32 %v7807_v58, %v9391_v50  ;;  %v7934_v45 = vmov 1.0   ;;  %v6402_v50 = vld [vmem:[#allocation3 + $0x40] sm:$0xff]  ;;  %v6314_v21 = vpack.c.bf16 %v9511_v63, %v9511_v63  ;;  %v6421_v19 = vld [vmem:[#allocation3 + $0xd8] sm:$0xff] }
 0x48d   : > { %v5680_v7 = vcombine.low %v5656_v11, %v5672_v26  ;;  %v5681_v2 = vcombine.high %v5656_v11, %v5672_v26  ;;  %v5682_v6 = vcombine.low %v5663_v16, %v5679_v9  ;;  %v5683_v0 = vcombine.high %v5663_v16, %v5679_v9  ;;  %v6406_v63 = vld [vmem:[#allocation3 + $0x60] sm:$0xff] }
 0x48e   : > { %v7700_v31 = vpack.c.bf16 %v9567_v33, %v9564_v52  ;;  %v6315_v29 = vpack.c.bf16 %v9514_v37, %v9514_v37  ;;  %v6316_v40 = vpack.c.bf16 %v9564_v52, %v9564_v52  ;;  %v6317_v58 = vpack.c.bf16 %v9567_v33, %v9567_v33 }
 0x48f   : > { %v5691_v13 = vpack.c.bf16 %v5680_v7, %v5612_v48  ;;  %v5699_v36 = vpack.c.bf16 %v5681_v2, %v5613_v14  ;;  %v5707_v41 = vpack.c.bf16 %v5682_v6, %v5614_v59  ;;  %v5715_v8 = vpack.c.bf16 %v5683_v0, %v5615_v51 }
 0x490   : > { %7701 = vmatpush3.bf16.msra.mxu0 %v7700_v31 }
 0x491   : > { %5723 = vst.msk [vmem:[#allocation3 + $0x38] sm:$0xff] %vm3315_vm2, %v5691_v13  ;;  %5731 = vst.msk [vmem:[#allocation3 + $0x78] sm:$0xff] %vm3315_vm2, %v5699_v36  ;;  %7600 = vmatprep.subr.bf16.mxu0 %v7926_v12 }
 0x492   : > { %5739 = vst.msk [vmem:[#allocation3 + $0xb8] sm:$0xff] %vm3315_vm2, %v5707_v41  ;;  %5747 = vst.msk [vmem:[#allocation3 + $0xf8] sm:$0xff] %vm3315_vm2, %v5715_v8 }
 0x493   : > { %7578 = vmatmul.mubr.msk.f32.vlgmr.msra.gmra.mrb[28].mxu0 %vm705_vm0, %v7934_v45 }
 0x494   : > { %7601 = vmatpush3.bf16.msra.mxu0 %v6402_v50  ;;  %7616 = vmatprep.mubr.msk.bf16.mxu0 %vm7927_vm1, %v7926_v12 }
 0x495   : > { %7602 = vmatprep.subr.bf16.mxu0 %v7926_v12 }
 0x498   : > { %7603 = vmatpush3.bf16.msra.mxu0 %v6403_v43  ;;  %v6401_v4 = vld [vmem:[#allocation3 + $0x38] sm:$0xff]  ;;  %v7781_v43 = vld [vmem:[%s9802_s8 + $0x8] sm:$0xff]  }
 0x499   : > { %7604 = vmatprep.subr.bf16.mxu0 %v7926_v12  ;;  %7595 = vmatpush3.bf16.msra.mxu1 %v6401_v4  ;;  %v6409_v60 = vld [vmem:[#allocation3 + $0x78] sm:$0xff] }
 0x49a   : > { %7620 = vmatprep.subr.bf16.mxu1 %v7926_v12  ;;  %v6417_v37 = vld [vmem:[#allocation3 + $0xb8] sm:$0xff] }
 0x49b   : > { %v6425_v38 = vld [vmem:[#allocation3 + $0xf8] sm:$0xff] }
 0x49c   : > { %7605 = vmatpush3.bf16.msra.mxu0 %v6404_v35  ;;  %7597 = vmatmul.mubr.bf16.vlgmr.msra.gmra.mrb[24].mxu1 %v6314_v21 }
 0x49d   : > { %7606 = vmatprep.subr.bf16.mxu0 %v7926_v12  ;;  %7621 = vmatpush3.bf16.msra.mxu1 %v6410_v22 }
 0x49e   : > { %7622 = vmatprep.subr.bf16.mxu1 %v7926_v12  ;;  %7636 = vmatprep.mubr.msk.bf16.mxu1 %vm7927_vm1, %v7926_v12 }
 0x4a0   : > { %7607 = vmatpush3.bf16.msra.mxu0 %v6405_v17 }
 0x4a1   : > { %7608 = vmatprep.subr.bf16.mxu0 %v7926_v12  ;;  %7623 = vmatpush3.bf16.msra.mxu1 %v6411_v54 }
 0x4a2   : > { %7624 = vmatprep.subr.bf16.mxu1 %v7926_v12 }
 0x4a4   : > { %7609 = vmatpush3.bf16.msra.mxu0 %v6406_v63 }
 0x4a5   : > { %7610 = vmatprep.subr.bf16.mxu0 %v7926_v12  ;;  %7625 = vmatpush3.bf16.msra.mxu1 %v6412_v28 }
 0x4a6   : > { %7626 = vmatprep.subr.bf16.mxu1 %v7926_v12 }
 0x4a8   : > { %7611 = vmatpush3.bf16.msra.mxu0 %v6407_v3 }
 0x4a9   : > { %7612 = vmatprep.subr.bf16.mxu0 %v7926_v12  ;;  %7627 = vmatpush3.bf16.msra.mxu1 %v6413_v25 }
 0x4aa   : > { %7628 = vmatprep.subr.bf16.mxu1 %v7926_v12 }
 0x4ac   : > { %7613 = vmatpush3.bf16.msra.mxu0 %v6408_v39 }
 0x4ad   : > { %7614 = vmatprep.subr.bf16.mxu0 %v7926_v12  ;;  %7629 = vmatpush3.bf16.msra.mxu1 %v6414_v44 }
 0x4ae   : > { %7630 = vmatprep.subr.bf16.mxu1 %v7926_v12 }
 0x4b0   : > { %7615 = vmatpush3.bf16.msra.mxu0 %v6409_v60 }
 0x4b1   : > { %7640 = vmatprep.subr.bf16.mxu0 %v7926_v12  ;;  %7631 = vmatpush3.bf16.msra.mxu1 %v6415_v56 }
 0x4b2   : > { %7632 = vmatprep.subr.bf16.mxu1 %v7926_v12 }
 0x4b3   : > { %7617 = vmatmul.mubr.bf16.vlgmr.msra.gmra.mrb[32].mxu0 %v6315_v29 }
 0x4b4   : > { %7641 = vmatpush3.bf16.msra.mxu0 %v6418_v62  ;;  %7656 = vmatprep.mubr.msk.bf16.mxu0 %vm7927_vm1, %v7926_v12 }
 0x4b5   : > { %7642 = vmatprep.subr.bf16.mxu0 %v7926_v12  ;;  %7633 = vmatpush3.bf16.msra.mxu1 %v6416_v61 }
 0x4b6   : > { %7634 = vmatprep.subr.bf16.mxu1 %v7926_v12 }
 0x4b8   : > { %7643 = vmatpush3.bf16.msra.mxu0 %v6419_v23 }
 0x4b9   : > { %7644 = vmatprep.subr.bf16.mxu0 %v7926_v12  ;;  %7635 = vmatpush3.bf16.msra.mxu1 %v6417_v37 }
 0x4ba   : > { %7660 = vmatprep.subr.bf16.mxu1 %v7926_v12 }
 0x4bc   : > { %7645 = vmatpush3.bf16.msra.mxu0 %v6420_v55  ;;  %7637 = vmatmul.mubr.bf16.vlgmr.msra.gmra.mrb[28].mxu1 %v6316_v40 }
 0x4bd   : > { %7646 = vmatprep.subr.bf16.mxu0 %v7926_v12  ;;  %7664 = vmatprep.mubr.msk.bf16.mxu1 %vm7927_vm1, %v7926_v12 }
 0x4be   : > { %7661 = vmatpush3.bf16.msra.mxu1 %v7780_v34 }
 0x4bf   : > { %7662 = vmatprep.subr.bf16.mxu1 %v7926_v12 }
 0x4c0   : > { %7647 = vmatpush3.bf16.msra.mxu0 %v6421_v19 }
 0x4c1   : > { %7648 = vmatprep.subr.bf16.mxu0 %v7926_v12 }
 0x4c2   : > { %7663 = vmatpush3.bf16.msra.mxu1 %v7781_v43  ;;  %v7789_v43 = vld [vmem:[%s9808_s14 + $0x28] sm:$0xff]  }
 0x4c3   : > { %7668 = vmatprep.subr.bf16.mxu1 %v7926_v12 }
 0x4c4   : > { %7649 = vmatpush3.bf16.msra.mxu0 %v6422_v20 }
 0x4c5   : > { %7650 = vmatprep.subr.bf16.mxu0 %v7926_v12 }
 0x4c8   : > { %7651 = vmatpush3.bf16.msra.mxu0 %v6423_v27 }
 0x4c9   : > { %7652 = vmatprep.subr.bf16.mxu0 %v7926_v12 }
 0x4cc   : > { %7653 = vmatpush3.bf16.msra.mxu0 %v6424_v49 }
 0x4cd   : > { %7654 = vmatprep.subr.bf16.mxu0 %v7926_v12 }
 0x4d0   : > { %7655 = vmatpush3.bf16.msra.mxu0 %v6425_v38 }
 0x4d3   : > { %7657 = vmatmul.mubr.bf16.vlgmr.msra.gmra.mrb[36].mxu0 %v6317_v58 }
 0x566   : > { %v6388_v47 = vpop.f32.mrb[28].mxu0 }
 0x567   : > { %v6392_v15 = vadd.f32 %v6388_v47, %v6318_v10  ;;  %v7579_v5 = vpop.f32.mrb[29].mxu0  ;;  %v7299_v47 = vld [vmem:[%s9803_s9] ss:$0 sm:$0xff] }
 0x569   : > { %6393 = vst [vmem:[%s9523_s24] sm:$0x1] %v6392_v15 }
 0x56f   : > { %v6460_v57 = vpop.f32.mrb[24].mxu1 }
 0x570   : > { %v7598_v53 = vpop.f32.mrb[25].mxu1 }
 0x571   : > { %v6463_v18 = vpop.f32.mrb[26].mxu1 }
 0x572   : > { %v7599_v46 = vpop.f32.mrb[27].mxu1  ;;  %v7813_v18 = vld [vmem:[%s8148_s25] sm:$0xff] }
 0x586   : > { %v6500_v1 = vpop.f32.mrb[32].mxu0 }
 0x587   : > { %v7618_v42 = vpop.f32.mrb[33].mxu0 }
 0x588   : > { %v6503_v32 = vpop.f32.mrb[34].mxu0 }
 0x589   : > { %v7619_v48 = vpop.f32.mrb[35].mxu0 }
 0x58f   : > { %v6540_v14 = vpop.f32.mrb[28].mxu1 }
 0x590   : > { %v6586_v11 = vcombine.low %v6460_v57, %v6540_v14  ;;  %v6587_v16 = vcombine.high %v6460_v57, %v6540_v14  ;;  %v7638_v26 = vpop.f32.mrb[29].mxu1 }
 0x591   : > { %v6543_v9 = vpop.f32.mrb[30].mxu1  ;;  %v7782_v26 = vld [vmem:[%s9806_s12] sm:$0xff]  }
 0x592   : > { %v7639_v59 = vpop.f32.mrb[31].mxu1  ;;  %v6594_v6 = vrot.slane %v6586_v11, %v8336_v24  ;;  %v6601_v0 = vrot.slane %v6587_v16, %v8336_v24  ;;  %v7783_v9 = vld [vmem:[%s9806_s12 + $0x8] sm:$0xff]  }
 0x5a6   : > { %v6580_v51 = vpop.f32.mrb[36].mxu0 }
 0x5a7   : > { %v6602_v52 = vcombine.low %v6500_v1, %v6580_v51  ;;  %v6603_v33 = vcombine.high %v6500_v1, %v6580_v51  ;;  %v7658_v7 = vpop.f32.mrb[37].mxu0 }
 0x5a8   : > { %v6583_v2 = vpop.f32.mrb[38].mxu0  ;;  %v7303_v7 = vld [vmem:[%s9804_s10] ss:$0 sm:$0xff] }
 0x5a9   : > { %v6610_v31 = vrot.slane %v6602_v52, %v8336_v24  ;;  %v6617_v13 = vrot.slane %v6603_v33, %v8336_v24  ;;  %v7659_v36 = vpop.f32.mrb[39].mxu0 }
 0x5ab   : > { %v6618_v41 = vcombine.low %v6594_v6, %v6610_v31  ;;  %v6619_v8 = vcombine.high %v6594_v6, %v6610_v31  ;;  %v6634_v45 = vcombine.low %v6601_v0, %v6617_v13  ;;  %v6635_v50 = vcombine.high %v6601_v0, %v6617_v13  ;;  %v7304_v6 = vld [vmem:[%s9805_s11] ss:$0 sm:$0xff] }
 0x5ac   : > { %v7784_v13 = vld [vmem:[%s9808_s14] sm:$0xff]  }
 0x5ad   : > { %v6626_v4 = vrot.slane %v6618_v41, %v8340_v30  ;;  %v6633_v21 = vrot.slane %v6619_v8, %v8340_v30  ;;  %v6642_v35 = vrot.slane %v6634_v45, %v8340_v30  ;;  %v6649_v22 = vrot.slane %v6635_v50, %v8340_v30  ;;  %v7785_v41 = vld [vmem:[%s9808_s14 + $0x8] sm:$0xff]   ;;  %v7786_v8 = vld [vmem:[%s9808_s14 + $0x10] sm:$0xff]   ;;  %v7787_v45 = vld [vmem:[%s9808_s14 + $0x18] sm:$0xff]  }
 0x5ae   : > { %v7788_v50 = vld [vmem:[%s9808_s14 + $0x20] sm:$0xff]  }
 0x5af   : > { %v6654_v17 = vcombine.low %v6626_v4, %v6633_v21  ;;  %v7297_v54 = vcombine.high %v6626_v4, %v6633_v21  ;;  %v6670_v63 = vcombine.low %v6642_v35, %v6649_v22  ;;  %v7298_v28 = vcombine.high %v6642_v35, %v6649_v22  ;;  %v7790_v4 = vld [vmem:[%s9808_s14 + $0x30] sm:$0xff]   ;;  %v7791_v21 = vld [vmem:[%s9808_s14 + $0x38] sm:$0xff]   ;;  %v7305_v35 = vld [vmem:[%s9807_s13] ss:$0 sm:$0xff] }
 0x5b1   : > { %v6661_v3 = vrot.slane %v6654_v17, %v8336_v24  ;;  %v6669_v25 = vrot.slane %v7297_v54, %v8336_v24  ;;  %v6677_v39 = vrot.slane %v6670_v63, %v8336_v24  ;;  %v6685_v44 = vrot.slane %v7298_v28, %v8336_v24 }
 0x5b3   : > { %v6687_v60 = vcombine.high %v6661_v3, %v6669_v25  ;;  %v6703_v56 = vcombine.high %v6677_v39, %v6685_v44  ;;  %v6686_v29 = vcombine.low %v6661_v3, %v6669_v25  ;;  %v6702_v62 = vcombine.low %v6677_v39, %v6685_v44  ;;  %v7309_v39 = vld [vmem:[%s9809_s15] ss:$0 sm:$0xff] }
 0x5b5   : > { %v6701_v61 = vrot.slane %v6687_v60, %v8340_v30  ;;  %v6717_v23 = vrot.slane %v6703_v56, %v8340_v30  ;;  %v6694_v37 = vrot.slane %v6686_v29, %v8340_v30  ;;  %v6710_v40 = vrot.slane %v6702_v62, %v8340_v30 }
 0x5b7   : > { %v6720_v55 = vcombine.low %v6701_v61, %v6717_v23  ;;  %v6719_v19 = vcombine.high %v6694_v37, %v6710_v40  ;;  %v6721_v20 = vcombine.high %v6701_v61, %v6717_v23  ;;  %v6718_v27 = vcombine.low %v6694_v37, %v6710_v40 }
 0x5b9   : > { %6727 = vrot.lane.b32.xlu0 %v6720_v55, %s7935_s29  ;;  %6723 = vrot.lane.b32.xlu1 %v6719_v19, %s7936_s2  ;;  %s9714_s2 = scalar_lea.hbm %s9813_s19, %s7322_s27 }
 0x5bd   : > { %6731 = vrot.lane.b32.xlu1 %v6721_v20, %s7937_s0  ;;  %s7054_s0 = scalar_lea.sflag [#allocation7], %s9520_s1 }
 0x62b   : > { %v6724_v24 = vpop.permute.xlu1 %6723  ;;  %v6728_v49 = vpop.permute.xlu0 %6727 }
 0x62c   : > { %v6734_v38 = vsel %vm3315_vm2, %v6718_v27, %v6724_v24 }
 0x62d   : > { %v6736_v34 = vsel %vm6735_vm4, %v6734_v38, %v6728_v49 }
 0x62f   : > { %v6732_v58 = vpop.permute.xlu1 %6731 }
 0x630   : > { %v6738_v30 = vsel %vm6737_vm5, %v6736_v34, %v6732_v58 }
 0x631   : > { %v6739_v10 = vpack.c.bf16 %v6738_v30, %v6738_v30 }
 0x633   : > { %7665 = vmatmul.mubr.msk.bf16.vlgmr.msra.gmra.mrb[32].mxu1 %vm705_vm0, %v6739_v10 }
 0x634   : > { %7672 = vmatprep.mubr.msk.bf16.mxu1 %vm7927_vm1, %v7926_v12  ;;  %7669 = vmatpush3.bf16.msra.mxu1 %v7782_v26 }
 0x635   : > { %7670 = vmatprep.subr.bf16.mxu1 %v7926_v12 }
 0x638   : > { %7671 = vmatpush3.bf16.msra.mxu1 %v7783_v9 }
 0x639   : > { %7676 = vmatprep.subr.bf16.mxu1 %v7926_v12 }
 0x706   : > { %v6800_v15 = vpop.f32.mrb[32].mxu1 }
 0x707   : > { %v6801_v5 = vadd.f32 %v7299_v47, %v6800_v15  ;;  %v7666_v57 = vpop.f32.mrb[33].mxu1 }
 0x708   : > { %v6803_v53 = vpop.f32.mrb[34].mxu1 }
 0x709   : > { %v6806_v46 = vadd.f32 %v7813_v18, %v6801_v5  ;;  %v7667_v1 = vpop.f32.mrb[35].mxu1 }
 0x70b   : > { %v6807_v42 = vsel %vm705_vm0, %v6806_v46, 0.0 }
 0x70c   : > { %6808 = vadd.xlane.f32.xlu0 %v6807_v42 }
 0x799   : > { %v6809_v32 = vpop.xlane.xlu0 %6808 }
 0x79a   : > { %v6811_v48 = vmul.f32 0.03125, %v6809_v32 }
 0x79c   : > { %v6812_v14 = vsub.f32 %v6806_v46, %v6811_v48 }
 0x79e   : > { %v6813_v11 = vmul.f32 %v6812_v14, %v6812_v14 }
 0x7a0   : > { %v6814_v16 = vsel %vm705_vm0, %v6813_v11, 0.0 }
 0x7a1   : > { %6815 = vadd.xlane.f32.xlu1 %v6814_v16 }
 0x82e   : > { %v6816_v59 = vpop.xlane.xlu1 %6815 }
 0x82f   : > { %v6817_v51 = vmul.f32 0.03125, %v6816_v59 }
 0x831   : > { %v6818_v52 = vadd.f32 1e-05, %v6817_v51 }
 0x833   : > { %7808 = vrsqrt.f32 %v6818_v52 }
 0x83d   : > { %v7809_v33 = vpop.eup %7808 }
 0x83e   : > { %v6820_v2 = vmul.f32 %v7809_v33, %v6812_v14 }
 0x840   : > { %v6828_v0 = vmul.f32 %v7303_v7, %v6820_v2 }
 0x842   : > { %v6836_v31 = vadd.f32 %v7304_v6, %v6828_v0 }
 0x844   : > { %v6837_v36 = vpack.c.bf16 %v6836_v31, %v6836_v31 }
 0x846   : > { %7673 = vmatmul.mubr.msk.bf16.vlgmr.msra.gmra.mrb[36].mxu1 %vm705_vm0, %v6837_v36 }
 0x847   : > { %7677 = vmatpush3.bf16.msra.mxu1 %v7784_v13  ;;  %7692 = vmatprep.mubr.msk.bf16.mxu1 %vm7927_vm1, %v7926_v12 }
 0x848   : > { %7678 = vmatprep.subr.bf16.mxu1 %v7926_v12 }
 0x84b   : > { %7679 = vmatpush3.bf16.msra.mxu1 %v7785_v41 }
 0x84c   : > { %7680 = vmatprep.subr.bf16.mxu1 %v7926_v12 }
 0x84f   : > { %7681 = vmatpush3.bf16.msra.mxu1 %v7786_v8 }
 0x850   : > { %7682 = vmatprep.subr.bf16.mxu1 %v7926_v12 }
 0x853   : > { %7683 = vmatpush3.bf16.msra.mxu1 %v7787_v45 }
 0x854   : > { %7684 = vmatprep.subr.bf16.mxu1 %v7926_v12 }
 0x857   : > { %7685 = vmatpush3.bf16.msra.mxu1 %v7788_v50 }
 0x858   : > { %7686 = vmatprep.subr.bf16.mxu1 %v7926_v12 }
 0x85b   : > { %7687 = vmatpush3.bf16.msra.mxu1 %v7789_v43 }
 0x85c   : > { %7688 = vmatprep.subr.bf16.mxu1 %v7926_v12 }
 0x85f   : > { %7689 = vmatpush3.bf16.msra.mxu1 %v7790_v4 }
 0x860   : > { %7690 = vmatprep.subr.bf16.mxu1 %v7926_v12 }
 0x863   : > { %7691 = vmatpush3.bf16.msra.mxu1 %v7791_v21 }
 0x919   : > { %v6898_v22 = vpop.f32.mrb[36].mxu1 }
 0x91a   : > { %v6899_v17 = vadd.f32 %v7305_v35, %v6898_v22  ;;  %v7674_v54 = vpop.f32.mrb[37].mxu1 }
 0x91b   : > { %v6901_v63 = vpop.f32.mrb[38].mxu1 }
 0x91c   : > { %v6904_v28 = vmax.f32 %v6899_v17, 0.0  ;;  %v7675_v3 = vpop.f32.mrb[39].mxu1 }
 0x91e   : > { %v6905_v25 = vpack.c.bf16 %v6904_v28, %v6904_v28 }
 0x920   : > { %7693 = vmatmul.mubr.bf16.vlgmr.msra.gmra.mrb[40].mxu1 %v6905_v25 }
 0x9f3   : > { %v7011_v12 = vpop.f32.mrb[40].mxu1 }
 0x9f4   : > { %v7012_v44 = vadd.f32 %v7309_v39, %v7011_v12  ;;  %v7694_v60 = vpop.f32.mrb[41].mxu1 }
 0x9f5   : > { %v7014_v56 = vpop.f32.mrb[42].mxu1 }
 0x9f6   : > { %v7017_v29 = vadd.f32 %v7012_v44, %v6836_v31  ;;  %v7695_v62 = vpop.f32.mrb[43].mxu1 }
 0x9f8   : > { %v7018_v61 = vsel %vm705_vm0, %v7017_v29, 0.0 }
 0x9f9   : > { %7019 = vadd.xlane.f32.xlu0 %v7018_v61 }
 0xa86   : > { %v7020_v23 = vpop.xlane.xlu0 %7019 }
 0xa87   : > { %v7021_v37 = vmul.f32 0.03125, %v7020_v23 }
 0xa89   : > { %v7022_v40 = vsub.f32 %v7017_v29, %v7021_v37 }
 0xa8b   : > { %v7023_v55 = vmul.f32 %v7022_v40, %v7022_v40 }
 0xa8d   : > { %v7024_v19 = vsel %vm705_vm0, %v7023_v55, 0.0 }
 0xa8e   : > { %7025 = vadd.xlane.f32.xlu0 %v7024_v19 }
 0xa8f   : > { %7827 = shalt.err (!%p7824_p5)
}
 0xa90   : > { %s7828_s24 = scalar_lea.hbm %s9714_s2, 16  ;;  %s7832_s25 = scalar_lea.hbm %s9813_s19, 32 }
 0xa91   : > { %p7829_p6 = scmp.ne.s32.totalorder %s9714_s2, %s7828_s24  ;;  %p7833_p10 = scmp.lt.u32.totalorder %s9714_s2, %s9813_s19 }
 0xa92   : > { %p7834_p11 = scmp.lt.u32.totalorder %s7832_s25, %s7828_s24  ;;  %p7836_p13 = scmp.lt.u32.totalorder %s7828_s24, %s9714_s2 }
 0xa93   : > { %p7830_p7 = pnand %p7829_p6, %p8080_p4 }
 0xa94   : > { %p7835_p12 = por %p7834_p11, %p7833_p10 }
 0xa95   : > { %p7831_p9 = pneg %p7830_p7 }
 0xa96   : > { %p7837_p0 = por %p7836_p13, %p7835_p12 }
 0xa98   : > { %p7838_p1 = pnand %p7837_p0, %p7831_p9 }
 0xa9a   : > { %7841 = shalt.err (!%p7838_p1)
}
 0xa9b   : > { %7703 = dma.vmem_to_hbm [thread:$0]  (%p8080_p4), %s7081_s26, 16, %s9714_s2, %s7054_s0   ;;  %v7318_v38 = vld [vmem:[%s9810_s16] ss:$0 sm:$0xff] }
 0xa9c   : > { %s7196_s4 = sshll.u32 %s9520_s1, 3  ;;  %v7319_v34 = vld [vmem:[%s9811_s17] ss:$0 sm:$0xff]  ;;  %s7321_s25 = sshll.u32 %s7916_s21, 7 }
 0xa9d   : > { %s634_s28 = scalar_lea.vmem [#allocation4], %s7196_s4  ;;  %s9843_s23 = sld [smem:[#allocation22_spill]] }
 0xa9e   : > { %s7067_s26 = sshll.u32 %s634_s28, 4  ;;  %s7049_s20 = scalar_lea.sflag [#allocation5], %s9520_s1  ;;  %s9747_s26 = int_to_ptr.vmem [resolvable:$true] %s7067_s26 }
 0xa9f   : > { %s7842_s27 = scalar_lea.vmem %s9747_s26, 128  ;;  %s7939_s21 = smov [#allocation4]  }
 0xaa0   : > { %p7843_p2 = scmp.ne.s32.totalorder %s9747_s26, %s7842_s27  ;;  %s7846_s4 = sshll.u32 %s7939_s21, 4  ;;  %s7847_s4 = int_to_ptr.vmem [resolvable:$false] %s7846_s4 }
 0xaa1   : > { %s7848_s24 = scalar_lea.vmem %s7847_s4, 256  ;;  %p7849_p6 = scmp.lt.s32.totalorder %s9747_s26, %s7847_s4 }
 0xaa2   : > { %p7844_p3 = pnand %p7843_p2, %p8080_p4  ;;  %p7850_p7 = scmp.lt.s32.totalorder %s7848_s24, %s7842_s27 }
 0xaa3   : > { %s9745_s5 = scalar_lea.hbm %s9843_s23, %s7321_s25 }
 0xaa4   : > { %p7845_p5 = pneg %p7844_p3  ;;  %p7851_p9 = por %p7850_p7, %p7849_p6 }
 0xaa6   : > { %p7852_p10 = pnand %p7851_p9, %p7845_p5 }
 0xb1b   : > { %v7026_v20 = vpop.xlane.xlu0 %7025 }
 0xb1c   : > { %v7027_v27 = vmul.f32 0.03125, %v7026_v20 }
 0xb1e   : > { %v7028_v24 = vadd.f32 1e-05, %v7027_v27 }
 0xb20   : > { %7810 = vrsqrt.f32 %v7028_v24 }
 0xb2a   : > { %v7811_v49 = vpop.eup %7810 }
 0xb2b   : > { %v7030_v58 = vmul.f32 %v7811_v49, %v7022_v40 }
 0xb2d   : > { %v7038_v30 = vmul.f32 %v7318_v38, %v7030_v58 }
 0xb2f   : > { %v7046_v10 = vadd.f32 %v7319_v34, %v7038_v30 }
 0xb31   : > { %7047 = vst.msk [vmem:[%s634_s28] sm:$0xff] %vm705_vm0, %v7046_v10 }
 0xb32   : > { %7855 = shalt.err (!%p7852_p10)
}
 0xb33   : > { %s7856_s1 = scalar_lea.hbm %s9745_s5, 128  ;;  %s7860_s28 = scalar_lea.hbm %s9843_s23, 256 }
 0xb34   : > { %p7857_p11 = scmp.ne.s32.totalorder %s9745_s5, %s7856_s1  ;;  %p7861_p0 = scmp.lt.u32.totalorder %s9745_s5, %s9843_s23 }
 0xb35   : > { %p7862_p1 = scmp.lt.u32.totalorder %s7860_s28, %s7856_s1  ;;  %p7864_p3 = scmp.lt.u32.totalorder %s7856_s1, %s9745_s5 }
 0xb36   : > { %p7858_p12 = pnand %p7857_p11, %p8080_p4 }
 0xb37   : > { %p7863_p2 = por %p7862_p1, %p7861_p0 }
 0xb38   : > { %p7859_p13 = pneg %p7858_p12 }
 0xb39   : > { %p7865_p5 = por %p7864_p3, %p7863_p2 }
 0xb3b   : > { %p7866_p6 = pnand %p7865_p5, %p7859_p13 }
 0xb3d   : > { %7869 = shalt.err (!%p7866_p6)
}
 0xb3e   : > { %7702 = dma.vmem_to_hbm [thread:$0]  (%p8080_p4), %s9747_s26, 128, %s9745_s5, %s7049_s20  }
 0xb3f PF: > { %s9844_s27 = sld [smem:[#allocation10_spill]]  ;;  %p7713_p7 = scmp.ge.s32.totalorder %s7924_s22, 2 }
 0xb41   : > { %p7707_p9 = pnand %p7713_p7, %p8087_p8 }
 0xb45   : > { %s7092_s4 = sand.u32 1, %s9844_s27  }
 0xb46   : > { %s7093_s24 = scalar_lea.sflag [#allocation5], %s7092_s4 }
 0xb47   : > { %7895 = dma.done.wait (!%p7707_p9), %s7093_s24, 128  }
 0xb48   : > { %7897 = vsyncadd (!%p7707_p9), %s7093_s24, 4294967168  ;;  %s7102_s1 = scalar_lea.sflag [#allocation7], %s7092_s4 }
 0xb49   : > { %7899 = dma.done.wait (!%p7707_p9), %s7102_s1, 16  }
 0xb4a   : > { %7901 = vsyncadd (!%p7707_p9), %s7102_s1, 4294967280  ;;  %s36_s22 = sadd.s32 1, %s7924_s22   ;;  %s9846_s3 = sld [smem:[#allocation11_spill]] }
 0xb4b   : > { %p33_p10 = scmp.ge.s32.totalorder %s36_s22, 4   ;;  %s9847_s20 = sld [smem:[#allocation15_spill]] }
 0xb4c   : > { %s9848_s21 = sld [smem:[#allocation12_spill]]  ;;  %s9849_s1 = sld [smem:[#allocation13_spill]] }
 0xb4d   : > { %s9850_s0 = smov %s7908_s30  ;;  %35 = sbr.rel (!%p33_p10) target bundleno = 14 (0xe), region = 151 }
 0xb50   : > { %s9851_s30 = smov %s9846_s3 }
 0xb54   :  { %7106 = vsyncpa [#allocation5], 1 }
 0xb55   :  { %7108 = vsyncpa [#allocation5 + $0x1], 1 }
 0xb56   :  { %7109 = vsyncpa [#allocation7], 1 }
 0xb57   :  { %7111 = vsyncpa [#allocation7 + $0x1], 1 }

// kernel: tpu_custom_call.1
= control target key start
LH: loop header
LB: loop body
LE: loop exit
PB: predicated region body
PF: predicated region fallthrough
CT: control target
= control target key end

     0   :  { %s9794_s0 = inlined_call_operand.vmem [shape: f32[2,8,32], index: 0, kind: input, shape index: {}]   ;;  %s9795_s1 = inlined_call_operand.vmem [shape: f32[2,128,32], index: 1, kind: input, shape index: {}]   ;;  %s9796_s2 = inlined_call_operand.vmem [shape: bf16[32,32], index: 2, kind: input, shape index: {}]   ;;  %s9797_s3 = inlined_call_operand.vmem [shape: f32[1,32], index: 3, kind: input, shape index: {}]   ;;  %s9798_s4 = inlined_call_operand.vmem [shape: bf16[32,32], index: 4, kind: input, shape index: {}]   ;;  %s9799_s5 = inlined_call_operand.vmem [shape: f32[1,32], index: 5, kind: input, shape index: {}]   ;;  %s9800_s6 = inlined_call_operand.vmem [shape: bf16[32,32], index: 6, kind: input, shape index: {}]   ;;  %s9801_s7 = inlined_call_operand.vmem [shape: f32[1,32], index: 7, kind: input, shape index: {}]   ;;  %s9802_s8 = inlined_call_operand.vmem [shape: bf16[32,32], index: 8, kind: input, shape index: {}]   ;;  %s9803_s9 = inlined_call_operand.vmem [shape: f32[1,32], index: 9, kind: input, shape index: {}]   ;;  %s9804_s10 = inlined_call_operand.vmem [shape: f32[1,32], index: 10, kind: input, shape index: {}]   ;;  %s9805_s11 = inlined_call_operand.vmem [shape: f32[1,32], index: 11, kind: input, shape index: {}]   ;;  %s9806_s12 = inlined_call_operand.vmem [shape: bf16[32,128], index: 12, kind: input, shape index: {}]   ;;  %s9807_s13 = inlined_call_operand.vmem [shape: f32[1,128], index: 13, kind: input, shape index: {}]   ;;  %s9808_s14 = inlined_call_operand.vmem [shape: bf16[128,32], index: 14, kind: input, shape index: {}]   ;;  %s9809_s15 = inlined_call_operand.vmem [shape: f32[1,32], index: 15, kind: input, shape index: {}]   ;;  %s9810_s16 = inlined_call_operand.vmem [shape: f32[1,32], index: 16, kind: input, shape index: {}]   ;;  %s9811_s17 = inlined_call_operand.vmem [shape: f32[1,32], index: 17, kind: input, shape index: {}]   ;;  %s9812_s18 = inlined_call_operand.hbm [shape: f32[2,8,32], index: 18, kind: output, shape index: {0}]   ;;  %s9813_s19 = inlined_call_operand.hbm [shape: f32[2,1,128], index: 19, kind: output, shape index: {1}]  }
   0x1   :  { %9821 = sst [smem:[#allocation16_spill]] %s9794_s0 }
   0x2   :  { %9822 = sst [smem:[#allocation17_spill]] %s9795_s1 }
   0x3   :  { %9823 = sst [smem:[#allocation18_spill]] %s9796_s2 }
   0x4   :  { %9824 = sst [smem:[#allocation19_spill]] %s9797_s3 }
   0x5   :  { %9825 = sst [smem:[#allocation20_spill]] %s9798_s4 }
   0x6   :  { %9826 = sst [smem:[#allocation21_spill]] %s9799_s5 }
   0x7   :  { %9827 = sst [smem:[#allocation22_spill]] %s9812_s18 }
   0x8   :  { %25 = vsyncpa [#allocation5], 0 }
   0x9   :  { %27 = vsyncpa [#allocation5 + $0x1], 0 }
   0xa   :  { %28 = vsyncpa [#allocation7], 0 }
   0xb   :  { %30 = vsyncpa [#allocation7 + $0x1], 0  ;;  %s8040_s0 = smov 0   ;;  %s8042_s30 = smov 0  }
   0xc   :  { %s8044_s20 = smov 0   ;;  %s8046_s21 = smov 0  }
   0xd   :  { %s8048_s1 = smov 0   ;;  %s8050_s22 = smov 0  }
   0xe LB: > { %9828 = sst [smem:[#allocation10_spill]] %s7904_s0  ;;  %s7191_s2 = sadd.s32 4294967295, %s7924_s22   ;;  %s7924_s22 = sphi %s8050_s22, %s36_s22   ;;  %s7920_s1 = sphi %s8048_s1, %s9849_s1   ;;  %s7916_s21 = sphi %s8046_s21, %s9848_s21   ;;  %s7912_s20 = sphi %s8044_s20, %s9847_s20   ;;  %s7908_s30 = sphi %s8042_s30, %s9851_s30   ;;  %s7904_s0 = sphi %s8040_s0, %s9850_s0  }
   0xf   : > { %9829 = sst [smem:[#allocation11_spill]] %s7912_s20  ;;  %s7192_s23 = sadd.s32 4294967294, %s7924_s22  }
  0x10   : > { %9830 = sst [smem:[#allocation12_spill]] %s7920_s1  ;;  %s48_s24 = sadd.s32 1, %s7920_s1 }
  0x11   : > { %s447_s25 = sadd.s32 1, %s7912_s20  ;;  %p50_p0 = scmp.ge.s32.totalorder %s48_s24, 2 }
  0x12   : > { %p457_p1 = scmp.ne.s32.totalorder %s7912_s20, %s7908_s30  ;;  %p458_p2 = scmp.eq.s32.totalorder %s7191_s2, 1 }
  0x13   : > { %p463_p3 = scmp.ne.s32.totalorder %s7908_s30, %s7904_s0  ;;  %s9853_s24 = smov (%p50_p0, %s48_s24), 0 }
  0x14   : > { %9831 = sst [smem:[#allocation13_spill]] %s9853_s24  ;;  %p8080_p4 = por %p458_p2, %p457_p1 }
  0x15   : > { %p464_p5 = scmp.eq.s32.totalorder %s7192_s23, 1  ;;  %s442_s26 = ssub.s32 %s7920_s1, %s9853_s24 }
  0x16   : > { %p7195_p6 = scmp.ge.s32.totalorder %s7924_s22, 1  ;;  %p445_p7 = scmp.eq.s32.totalorder %s442_s26, 0 }
  0x17   : > { %p8087_p8 = por %p464_p5, %p463_p3  ;;  %p574_p9 = scmp.lt.s32.totalorder %s7924_s22, 3 }
  0x18   : > { %s8093_s28 = scalar_select %p445_p7, %s7912_s20, %s447_s25  }
  0x19   : > { %s9833_s27 = scalar_select %p8087_p8, 1, 0 }
  0x1a   : > { %9835 = sst [smem:[#allocation15_spill]] %s8093_s28  ;;  %p575_p10 = pnand %p7195_p6, %p574_p9 }
  0x1b   : > { %9834 = sst [smem:[#allocation14_spill]] %s9833_s27  ;;  %p641_p11 = scmp.lt.s32.totalorder (!%p575_p10), %s7916_s21, 1  ;;  %vm705_vm0 = vcmask (!%p575_p10), 261120   ;;  %v7926_v12 = vmov (!%p575_p10), 0.0   ;;  %vm7927_vm1 = vmmov (!%p575_p10), 0   ;;  %v7778_v31 = vld [vmem:[%s9800_s6] sm:$0xff] (!%p575_p10)  }
  0x1c   : > { %578 = sbr.rel (%p575_p10) target bundleno = 2879 (0xb3f), region = 92  ;;  %s9836_s4 = sld [smem:[#allocation20_spill]] (!%p575_p10)  ;;  %7461 = vmatprep.subr.bf16.mxu1 (!%p575_p10), %v7778_v31  ;;  %v7779_v32 = vld [vmem:[%s9800_s6 + $0x8] sm:$0xff] (!%p575_p10)   ;;  %vm3315_vm2 = vcmask (!%p575_p10), 64512   ;;  %vm6735_vm4 = vcmask (!%p575_p10), 130048   ;;  %vm6737_vm5 = vcmask (!%p575_p10), 195584  }
  0x1d   : > { %s9837_s20 = sld [smem:[#allocation17_spill]] (!%p575_p10)  ;;  %s9838_s0 = sld [smem:[#allocation18_spill]] (!%p575_p10)  ;;  %7462 = vmatpush3.bf16.msra.mxu1 (!%p575_p10), %v7778_v31 }
  0x1e   : > { %s9840_s23 = sld [smem:[#allocation16_spill]] (!%p575_p10)  ;;  %7463 = vmatprep.subr.bf16.mxu1 (!%p575_p10), %v7779_v32  ;;  %s9841_s5 = sld [smem:[#allocation21_spill]] (!%p575_p10) }
  0x1f   : > { %s7929_s24 = smov (!%p575_p10), 112   ;;  %s7930_s28 = smov (!%p575_p10), 104  }
  0x20   : > { %s7935_s29 = smov (!%p575_p10), 16   ;;  %s7936_s2 = smov (!%p575_p10), 8  }
  0x21   : > { %7464 = vmatpush3.bf16.msra.mxu1 (!%p575_p10), %v7779_v32 }
  0x22   : > { %v7774_v0 = vld [vmem:[%s9836_s4] sm:$0xff] (!%p575_p10)   ;;  %v7775_v1 = vld [vmem:[%s9836_s4 + $0x8] sm:$0xff] (!%p575_p10)   ;;  %7489 = vmatprep.subr.bf16.mxu1 (!%p575_p10), %v7926_v12 }
  0x23   : > { %7441 = vmatprep.subr.bf16.mxu0 %v7774_v0  ;;  %s8103_s26 = scalar_select %p641_p11, %s7916_s21, 1  ;;  %v7776_v2 = vld [vmem:[%s9838_s0] sm:$0xff]  }
  0x24   : > { %7442 = vmatpush3.bf16.msra.mxu0 %v7774_v0  ;;  %s9839_s18 = smov %s9838_s0  ;;  %v8176_v33 = vld [vmem:[%s9841_s5] ss:$0 sm:$0xff]  ;;  %s7937_s0 = smov 24  }
  0x25   : > { %7443 = vmatprep.subr.bf16.mxu0 %v7775_v1  ;;  %s7325_s25 = sshll.u32 %s8103_s26, 7  ;;  %v7777_v15 = vld [vmem:[%s9839_s18 + $0x8] sm:$0xff]   ;;  %s7197_s1 = sshll.u32 %s8103_s26, 3 }
  0x26   : > { %s8109_s27 = scalar_lea.vmem %s9837_s20, %s7325_s25  ;;  %s8148_s25 = scalar_lea.vmem %s9840_s23, %s7197_s1 }
  0x27   : > { %v658_v3 = vld [vmem:[%s8109_s27] sm:$0xff]  ;;  %v659_v4 = vld [vmem:[%s8109_s27 + $0x8] sm:$0xff]  ;;  %v660_v5 = vld [vmem:[%s8109_s27 + $0x10] sm:$0xff]  ;;  %s7928_s1 = smov 120   ;;  %s9842_s26 = sld [smem:[#allocation19_spill]] }
  0x28   : > { %7444 = vmatpush3.bf16.msra.mxu0 %v7775_v1  ;;  %v674_v6 = vpack.c.bf16 %v659_v4, %v658_v3  ;;  %v661_v7 = vld [vmem:[%s8109_s27 + $0x18] sm:$0xff]  ;;  %v662_v8 = vld [vmem:[%s8109_s27 + $0x20] sm:$0xff]  ;;  %v663_v9 = vld [vmem:[%s8109_s27 + $0x28] sm:$0xff] }
  0x29   : > { %v675_v10 = vpack.c.bf16 %v661_v7, %v660_v5  ;;  %v676_v11 = vpack.c.bf16 %v663_v9, %v662_v8  ;;  %7481 = vmatprep.subr.bf16.mxu0 %v7926_v12  ;;  %v664_v13 = vld [vmem:[%s8109_s27 + $0x30] sm:$0xff]  ;;  %v665_v14 = vld [vmem:[%s8109_s27 + $0x38] sm:$0xff]  ;;  %v666_v16 = vld [vmem:[%s8109_s27 + $0x40] sm:$0xff]  ;;  %v7931_v9 = vmov 1983009808  }
  0x2a   : > { %7445 = vmatprep.mubr.msk.bf16.mxu0 %vm705_vm0, %v674_v6  ;;  %7465 = vmatprep.mubr.msk.bf16.mxu1 %vm705_vm0, %v674_v6  ;;  %v667_v17 = vld [vmem:[%s8109_s27 + $0x48] sm:$0xff]  ;;  %v677_v18 = vpack.c.bf16 %v665_v14, %v664_v13  ;;  %v668_v20 = vld [vmem:[%s8109_s27 + $0x50] sm:$0xff]  ;;  %v669_v21 = vld [vmem:[%s8109_s27 + $0x58] sm:$0xff]  ;;  %v7932_v14 = vmov 1934713408  }
  0x2b   : > { %7446 = vmatmul.mubr.msk.bf16.vlgmr.msra.gmra.mrb[0].mxu0 %vm705_vm0, %v675_v10  ;;  %v678_v19 = vpack.c.bf16 %v667_v17, %v666_v16  ;;  %v670_v22 = vld [vmem:[%s8109_s27 + $0x60] sm:$0xff]  ;;  %v671_v23 = vld [vmem:[%s8109_s27 + $0x68] sm:$0xff]  ;;  %v679_v24 = vpack.c.bf16 %v669_v21, %v668_v20  ;;  %v672_v26 = vld [vmem:[%s8109_s27 + $0x70] sm:$0xff]  ;;  %7466 = vmatmul.mubr.msk.bf16.vlgmr.msra.gmra.mrb[0].mxu1 %vm705_vm0, %v675_v10  ;;  %v1110_v10 = vunpack.c.l.s4 %v7931_v9 }
  0x2c   : > { %7449 = vmatprep.mubr.msk.bf16.mxu0 %vm705_vm0, %v676_v11  ;;  %7482 = vmatpush3.bf16.msra.mxu0 %v7776_v2  ;;  %v680_v25 = vpack.c.bf16 %v671_v23, %v670_v22  ;;  %v673_v27 = vld [vmem:[%s8109_s27 + $0x78] sm:$0xff]  ;;  %v5749_v29 = vld [vmem:[%s8148_s25] sm:$0xff]  ;;  %s7322_s27 = sshll.u32 %s7916_s21, 4 }
  0x2d   : > { %7483 = vmatprep.subr.bf16.mxu0 %v7926_v12  ;;  %v681_v28 = vpack.c.bf16 %v673_v27, %v672_v26  ;;  %v5750_v30 = vpack.c.bf16 %v5749_v29, %v5749_v29  ;;  %7469 = vmatprep.mubr.msk.bf16.mxu1 %vm705_vm0, %v676_v11  ;;  %v7286_v6 = vld [vmem:[%s9842_s26] ss:$0 sm:$0xff]  ;;  %v1112_v11 = vlaneseq  ;;  %v1111_v17 = vunpack.c.0.s8 %v1110_v10 }
  0x30   : > { %7484 = vmatpush3.bf16.msra.mxu0 %v7777_v15  ;;  %v1142_v15 = vunpack.c.l.s4 %v7932_v14 }
  0x31   : > { %7509 = vmatprep.subr.bf16.mxu0 %v7926_v12 }
  0x32   : > { %v1143_v20 = vunpack.c.0.s8 %v1142_v15 }
  0x33   : > { %7450 = vmatmul.mubr.msk.bf16.gmra.mrb[4].mxu0 %vm705_vm0, %v677_v18  ;;  %7470 = vmatmul.mubr.msk.bf16.gmra.mrb[4].mxu1 %vm705_vm0, %v677_v18  ;;  %v1113_v18 = vshrl.u32 %v1112_v11, 7 }
  0x34   : > { %7453 = vmatprep.mubr.msk.bf16.mxu0 %vm705_vm0, %v678_v19  ;;  %7473 = vmatprep.mubr.msk.bf16.mxu1 %vm705_vm0, %v678_v19 }
  0x3b   : > { %7454 = vmatmul.mubr.msk.bf16.gmra.mrb[8].mxu0 %vm705_vm0, %v679_v24  ;;  %7474 = vmatmul.mubr.msk.bf16.gmra.mrb[8].mxu1 %vm705_vm0, %v679_v24  ;;  %v8336_v24 = vsub.s32 %v1111_v17, %v1113_v18 }
  0x3c   : > { %7457 = vmatprep.mubr.msk.bf16.mxu0 %vm705_vm0, %v680_v25  ;;  %7477 = vmatprep.mubr.msk.bf16.mxu1 %vm705_vm0, %v680_v25 }
  0x43   : > { %7458 = vmatmul.mubr.msk.bf16.gmra.mrb[12].mxu0 %vm705_vm0, %v681_v28  ;;  %7478 = vmatmul.mubr.msk.bf16.gmra.mrb[12].mxu1 %vm705_vm0, %v681_v28 }
  0x44   : > { %7485 = vmatprep.mubr.msk.bf16.mxu0 %vm7927_vm1, %v7926_v12  ;;  %7505 = vmatprep.mubr.msk.bf16.mxu1 %vm7927_vm1, %v7926_v12 }
  0x4b   : > { %7486 = vmatmul.mubr.msk.bf16.vlgmr.msra.gmra.mrb[16].mxu0 %vm705_vm0, %v5750_v30  ;;  %v8340_v30 = vsub.s32 %v1143_v20, %v1113_v18 }
  0x4c   : > { %7525 = vmatprep.mubr.msk.bf16.mxu0 %vm7927_vm1, %v7926_v12 }
  0xfe   : > { %v7447_v34 = vpop.f32.mrb[0].mxu0 }
  0xff   : > { %v8179_v35 = vadd.f32 %v7447_v34, %v8176_v33  ;;  %v764_v36 = vpop.f32.mrb[1].mxu0 }
 0x100   : > { %v8182_v37 = vadd.f32 %v8176_v33, %v764_v36  ;;  %v7448_v38 = vpop.f32.mrb[2].mxu0 }
 0x101   : > { %967 = vrot.lane.b32.xlu0 %v8179_v35, %s7928_s1  ;;  %v767_v39 = vpop.f32.mrb[3].mxu0  ;;  %v8189_v40 = vadd.f32 %v7448_v38, %v8176_v33 }
 0x102   : > { %1011 = vrot.lane.b32.xlu1 %v8182_v37, %s7929_s24  ;;  %v8204_v47 = vadd.f32 %v8176_v33, %v767_v39 }
 0x105   : > { %1015 = vrot.lane.b32.xlu0 %v8179_v35, %s7929_s24 }
 0x106   : > { %969 = vrot.lane.b32.xlu1 %v8189_v40, %s7928_s1  ;;  %v7451_v41 = vpop.f32.mrb[4].mxu0 }
 0x107   : > { %v780_v42 = vpop.f32.mrb[5].mxu0  ;;  %v8211_v50 = vadd.f32 %v7451_v41, %v8176_v33 }
 0x108   : > { %v7452_v43 = vpop.f32.mrb[6].mxu0  ;;  %v8245_v0 = vadd.f32 %v8176_v33, %v780_v42 }
 0x109   : > { %1063 = vrot.lane.b32.xlu0 %v8179_v35, %s7930_s28  ;;  %v783_v44 = vpop.f32.mrb[7].mxu0  ;;  %v8221_v54 = vadd.f32 %v7452_v43, %v8176_v33 }
 0x10a   : > { %1017 = vrot.lane.b32.xlu1 %v8189_v40, %s7929_s24  ;;  %v8248_v1 = vadd.f32 %v8176_v33, %v783_v44 }
 0x10d   : > { %963 = vrot.lane.b32.xlu0 %v8182_v37, %s7928_s1 }
 0x10e   : > { %1065 = vrot.lane.b32.xlu1 %v8189_v40, %s7930_s28  ;;  %v7455_v45 = vpop.f32.mrb[8].mxu0 }
 0x10f   : > { %v796_v46 = vpop.f32.mrb[9].mxu0  ;;  %v8259_v2 = vadd.f32 %v7455_v45, %v8176_v33 }
 0x110   : > { %v7456_v48 = vpop.f32.mrb[10].mxu0  ;;  %v8281_v4 = vadd.f32 %v8176_v33, %v796_v46 }
 0x111   : > { %1059 = vrot.lane.b32.xlu0 %v8182_v37, %s7930_s28  ;;  %v799_v49 = vpop.f32.mrb[11].mxu0  ;;  %v8266_v3 = vadd.f32 %v7456_v48, %v8176_v33 }
 0x112   : > { %1013 = vrot.lane.b32.xlu1 %v8204_v47, %s7929_s24  ;;  %v8284_v5 = vadd.f32 %v8176_v33, %v799_v49 }
 0x115   : > { %965 = vrot.lane.b32.xlu0 %v8204_v47, %s7928_s1 }
 0x116   : > { %1061 = vrot.lane.b32.xlu1 %v8204_v47, %s7930_s28  ;;  %v7459_v51 = vpop.f32.mrb[12].mxu0 }
 0x117   : > { %v8218_v52 = vadd.f32 %v7459_v51, %v8176_v33  ;;  %v812_v53 = vpop.f32.mrb[13].mxu0 }
 0x118   : > { %v8224_v55 = vadd.f32 %v8176_v33, %v812_v53  ;;  %v7460_v56 = vpop.f32.mrb[14].mxu0 }
 0x119   : > { %975 = vrot.lane.b32.xlu0 %v8211_v50, %s7928_s1  ;;  %v8229_v57 = vadd.f32 %v7460_v56, %v8176_v33  ;;  %v815_v58 = vpop.f32.mrb[15].mxu0 }
 0x11a   : > { %977 = vrot.lane.b32.xlu1 %v8221_v54, %s7928_s1  ;;  %v8234_v59 = vadd.f32 %v8176_v33, %v815_v58 }
 0x11d   : > { %1023 = vrot.lane.b32.xlu0 %v8211_v50, %s7929_s24 }
 0x11e   : > { %1025 = vrot.lane.b32.xlu1 %v8221_v54, %s7929_s24  ;;  %v5812_v60 = vpop.f32.mrb[16].mxu0 }
 0x11f   : > { %v7487_v61 = vpop.f32.mrb[17].mxu0  ;;  %v8323_v7 = vadd.f32 %v7286_v6, %v5812_v60 }
 0x120   : > { %v5815_v62 = vpop.f32.mrb[18].mxu0 }
 0x121   : > { %1071 = vrot.lane.b32.xlu0 %v8211_v50, %s7930_s28  ;;  %v7488_v63 = vpop.f32.mrb[19].mxu0 }
 0x122   : > { %1073 = vrot.lane.b32.xlu1 %v8221_v54, %s7930_s28 }
 0x125   : > { %971 = vrot.lane.b32.xlu0 %v8245_v0, %s7928_s1 }
 0x126   : > { %973 = vrot.lane.b32.xlu1 %v8248_v1, %s7928_s1 }
 0x129   : > { %1019 = vrot.lane.b32.xlu0 %v8245_v0, %s7929_s24 }
 0x12a   : > { %1021 = vrot.lane.b32.xlu1 %v8248_v1, %s7929_s24 }
 0x12d   : > { %1067 = vrot.lane.b32.xlu0 %v8245_v0, %s7930_s28 }
 0x12e   : > { %1069 = vrot.lane.b32.xlu1 %v8248_v1, %s7930_s28 }
 0x131   : > { %983 = vrot.lane.b32.xlu0 %v8259_v2, %s7928_s1 }
 0x132   : > { %985 = vrot.lane.b32.xlu1 %v8266_v3, %s7928_s1 }
 0x135   : > { %1031 = vrot.lane.b32.xlu0 %v8259_v2, %s7929_s24 }
 0x136   : > { %1033 = vrot.lane.b32.xlu1 %v8266_v3, %s7929_s24 }
 0x139   : > { %1079 = vrot.lane.b32.xlu0 %v8259_v2, %s7930_s28 }
 0x13a   : > { %1081 = vrot.lane.b32.xlu1 %v8266_v3, %s7930_s28 }
 0x13d   : > { %979 = vrot.lane.b32.xlu0 %v8281_v4, %s7928_s1 }
 0x13e   : > { %981 = vrot.lane.b32.xlu1 %v8284_v5, %s7928_s1 }
 0x141   : > { %1027 = vrot.lane.b32.xlu0 %v8281_v4, %s7929_s24 }
 0x142   : > { %1029 = vrot.lane.b32.xlu1 %v8284_v5, %s7929_s24 }
 0x145   : > { %1075 = vrot.lane.b32.xlu0 %v8281_v4, %s7930_s28 }
 0x146   : > { %1077 = vrot.lane.b32.xlu1 %v8284_v5, %s7930_s28 }
 0x149   : > { %991 = vrot.lane.b32.xlu0 %v8218_v52, %s7928_s1 }
 0x14a   : > { %993 = vrot.lane.b32.xlu1 %v8229_v57, %s7928_s1 }
 0x14d   : > { %987 = vrot.lane.b32.xlu0 %v8224_v55, %s7928_s1 }
 0x14e   : > { %989 = vrot.lane.b32.xlu1 %v8234_v59, %s7928_s1 }
 0x151   : > { %1035 = vrot.lane.b32.xlu0 %v8224_v55, %s7929_s24 }
 0x152   : > { %1037 = vrot.lane.b32.xlu1 %v8234_v59, %s7929_s24 }
 0x155   : > { %1083 = vrot.lane.b32.xlu0 %v8224_v55, %s7930_s28 }
 0x156   : > { %1085 = vrot.lane.b32.xlu1 %v8234_v59, %s7930_s28 }
 0x159   : > { %1039 = vrot.lane.b32.xlu0 %v8218_v52, %s7929_s24 }
 0x15a   : > { %1041 = vrot.lane.b32.xlu1 %v8229_v57, %s7929_s24 }
 0x15d   : > { %1087 = vrot.lane.b32.xlu0 %v8218_v52, %s7930_s28 }
 0x15e   : > { %1089 = vrot.lane.b32.xlu1 %v8229_v57, %s7930_s28 }
 0x161   : > { %5819 = vrot.lane.b32.xlu0 %v8323_v7, %s7928_s1 }
 0x162   : > { %5822 = vrot.lane.b32.xlu1 %v8323_v7, %s7929_s24 }
 0x165   : > { %5825 = vrot.lane.b32.xlu0 %v8323_v7, %s7930_s28 }
 0x173   : > { %v968_v8 = vpop.permute.xlu0 %967 }
 0x174   : > { %v1012_v13 = vpop.permute.xlu1 %1011 }
 0x175   : > { %v1107_v28 = vcombine.low %v8182_v37, %v1012_v13  ;;  %v1108_v29 = vcombine.high %v8182_v37, %v1012_v13 }
 0x177   : > { %v1016_v16 = vpop.permute.xlu0 %1015  ;;  %v8351_v44 = vrot.slane %v1107_v28, %v8336_v24  ;;  %v8354_v45 = vrot.slane %v1108_v29, %v8336_v24 }
 0x178   : > { %v970_v19 = vpop.permute.xlu1 %969  ;;  %v1243_v21 = vcombine.low %v8179_v35, %v1016_v16  ;;  %v1244_v22 = vcombine.high %v8179_v35, %v1016_v16 }
 0x17a   : > { %v1251_v31 = vrot.slane %v1243_v21, %v8336_v24  ;;  %v1258_v32 = vrot.slane %v1244_v22, %v8336_v24 }
 0x17b   : > { %v1064_v23 = vpop.permute.xlu0 %1063 }
 0x17c   : > { %v1259_v25 = vcombine.low %v968_v8, %v1064_v23  ;;  %v1260_v26 = vcombine.high %v968_v8, %v1064_v23  ;;  %v1018_v27 = vpop.permute.xlu1 %1017 }
 0x17d   : > { %v1311_v35 = vcombine.low %v8189_v40, %v1018_v27  ;;  %v1312_v36 = vcombine.high %v8189_v40, %v1018_v27 }
 0x17e   : > { %v1267_v33 = vrot.slane %v1259_v25, %v8336_v24  ;;  %v1274_v34 = vrot.slane %v1260_v26, %v8336_v24 }
 0x17f   : > { %v8348_v38 = vpop.permute.xlu0 %963  ;;  %v1319_v56 = vrot.slane %v1311_v35, %v8336_v24  ;;  %v1326_v58 = vrot.slane %v1312_v36, %v8336_v24 }
 0x180   : > { %v1275_v39 = vcombine.low %v1251_v31, %v1267_v33  ;;  %v1276_v41 = vcombine.high %v1251_v31, %v1267_v33  ;;  %v1291_v42 = vcombine.low %v1258_v32, %v1274_v34  ;;  %v1292_v37 = vcombine.high %v1258_v32, %v1274_v34  ;;  %v1066_v43 = vpop.permute.xlu1 %1065 }
 0x181   : > { %v1327_v46 = vcombine.low %v970_v19, %v1066_v43  ;;  %v1328_v48 = vcombine.high %v970_v19, %v1066_v43 }
 0x182   : > { %v1283_v49 = vrot.slane %v1275_v39, %v8340_v30  ;;  %v1290_v51 = vrot.slane %v1276_v41, %v8340_v30  ;;  %v1299_v40 = vrot.slane %v1291_v42, %v8340_v30  ;;  %v1306_v53 = vrot.slane %v1292_v37, %v8340_v30 }
 0x183   : > { %v1335_v60 = vrot.slane %v1327_v46, %v8336_v24  ;;  %v1342_v61 = vrot.slane %v1328_v48, %v8336_v24  ;;  %v1060_v62 = vpop.permute.xlu0 %1059 }
 0x184   : > { %v2331_v63 = vcombine.low %v1283_v49, %v1290_v51  ;;  %v7226_v6 = vcombine.high %v1283_v49, %v1290_v51  ;;  %v2347_v8 = vcombine.low %v1299_v40, %v1306_v53  ;;  %v7227_v9 = vcombine.high %v1299_v40, %v1306_v53  ;;  %v1014_v16 = vpop.permute.xlu1 %1013 }
 0x185   : > { %v1343_v10 = vcombine.low %v1319_v56, %v1335_v60  ;;  %v1344_v13 = vcombine.high %v1319_v56, %v1335_v60  ;;  %v1359_v14 = vcombine.low %v1326_v58, %v1342_v61  ;;  %v1360_v15 = vcombine.high %v1326_v58, %v1342_v61 }
 0x186   : > { %v2338_v17 = vrot.slane %v2331_v63, %v8336_v24  ;;  %v2346_v18 = vrot.slane %v7226_v6, %v8336_v24  ;;  %v2354_v19 = vrot.slane %v2347_v8, %v8336_v24  ;;  %v2362_v20 = vrot.slane %v7227_v9, %v8336_v24 }
 0x187   : > { %v1351_v21 = vrot.slane %v1343_v10, %v8340_v30  ;;  %v1358_v22 = vrot.slane %v1344_v13, %v8340_v30  ;;  %v1367_v23 = vrot.slane %v1359_v14, %v8340_v30  ;;  %v1374_v25 = vrot.slane %v1360_v15, %v8340_v30  ;;  %v8372_v26 = vpop.permute.xlu0 %965 }
 0x188   : > { %v2363_v27 = vcombine.low %v2338_v17, %v2346_v18  ;;  %v2364_v28 = vcombine.high %v2338_v17, %v2346_v18  ;;  %v2379_v29 = vcombine.low %v2354_v19, %v2362_v20  ;;  %v2380_v31 = vcombine.high %v2354_v19, %v2362_v20  ;;  %v1062_v49 = vpop.permute.xlu1 %1061 }
 0x189   : > { %v2399_v32 = vcombine.low %v1351_v21, %v1358_v22  ;;  %v7228_v33 = vcombine.high %v1351_v21, %v1358_v22  ;;  %v2415_v34 = vcombine.low %v1367_v23, %v1374_v25  ;;  %v7229_v35 = vcombine.high %v1367_v23, %v1374_v25 }
 0x18a   : > { %v2371_v36 = vrot.slane %v2363_v27, %v8340_v30  ;;  %v2378_v39 = vrot.slane %v2364_v28, %v8340_v30  ;;  %v2387_v41 = vrot.slane %v2379_v29, %v8340_v30  ;;  %v2394_v42 = vrot.slane %v2380_v31, %v8340_v30 }
 0x18b   : > { %v2406_v37 = vrot.slane %v2399_v32, %v8336_v24  ;;  %v2414_v43 = vrot.slane %v7228_v33, %v8336_v24  ;;  %v2422_v46 = vrot.slane %v2415_v34, %v8336_v24  ;;  %v2430_v48 = vrot.slane %v7229_v35, %v8336_v24  ;;  %v8382_v58 = vpop.permute.xlu0 %975 }
 0x18c   : > { %v2395_v51 = vcombine.low %v2371_v36, %v2387_v41  ;;  %v2396_v40 = vcombine.high %v2371_v36, %v2387_v41  ;;  %v2397_v53 = vcombine.low %v2378_v39, %v2394_v42  ;;  %v2398_v56 = vcombine.high %v2378_v39, %v2394_v42 }
 0x18d   : > { %v2431_v60 = vcombine.low %v2406_v37, %v2414_v43  ;;  %v2432_v61 = vcombine.high %v2406_v37, %v2414_v43  ;;  %v2447_v63 = vcombine.low %v2422_v46, %v2430_v48  ;;  %v2448_v6 = vcombine.high %v2422_v46, %v2430_v48 }
 0x18e   : > { %v1123_v8 = vcombine.low %v8348_v38, %v1060_v62  ;;  %v1124_v9 = vcombine.high %v8348_v38, %v1060_v62  ;;  %v1175_v10 = vcombine.low %v8204_v47, %v1014_v16  ;;  %v1176_v13 = vcombine.high %v8204_v47, %v1014_v16  ;;  %v8396_v16 = vpop.permute.xlu1 %977 }
 0x18f   : > { %v2439_v14 = vrot.slane %v2431_v60, %v8340_v30  ;;  %v2446_v15 = vrot.slane %v2432_v61, %v8340_v30  ;;  %v2455_v17 = vrot.slane %v2447_v63, %v8340_v30  ;;  %v2462_v18 = vrot.slane %v2448_v6, %v8340_v30  ;;  %v1024_v31 = vpop.permute.xlu0 %1023 }
 0x190   : > { %v1131_v19 = vrot.slane %v1123_v8, %v8336_v24  ;;  %v1138_v20 = vrot.slane %v1124_v9, %v8336_v24  ;;  %v1183_v21 = vrot.slane %v1175_v10, %v8336_v24  ;;  %v1190_v38 = vrot.slane %v1176_v13, %v8336_v24 }
 0x191   : > { %v2463_v62 = vcombine.low %v2439_v14, %v2455_v17  ;;  %v2464_v22 = vcombine.high %v2439_v14, %v2455_v17  ;;  %v2465_v23 = vcombine.low %v2446_v15, %v2462_v18  ;;  %v2466_v47 = vcombine.high %v2446_v15, %v2462_v18 }
 0x192   : > { %v1139_v25 = vcombine.low %v8351_v44, %v1131_v19  ;;  %v1140_v27 = vcombine.high %v8351_v44, %v1131_v19  ;;  %v1155_v28 = vcombine.low %v8354_v45, %v1138_v20  ;;  %v1156_v29 = vcombine.high %v8354_v45, %v1138_v20  ;;  %v1026_v63 = vpop.permute.xlu1 %1025 }
 0x193   : > { %v3284_v32 = vpack.c.bf16 %v2463_v62, %v2395_v51  ;;  %v3292_v33 = vpack.c.bf16 %v2464_v22, %v2396_v40  ;;  %v3300_v34 = vpack.c.bf16 %v2465_v23, %v2397_v53  ;;  %v3308_v35 = vpack.c.bf16 %v2466_v47, %v2398_v56  ;;  %v1072_v19 = vpop.permute.xlu0 %1071 }
 0x194   : > { %v1147_v36 = vrot.slane %v1139_v25, %v8340_v30  ;;  %v1154_v39 = vrot.slane %v1140_v27, %v8340_v30  ;;  %v1163_v41 = vrot.slane %v1155_v28, %v8340_v30  ;;  %v1170_v42 = vrot.slane %v1156_v29, %v8340_v30 }
 0x195   : > { %3317 = vst.msk [vmem:[#allocation2 + $0x8] sm:$0xff] %vm3315_vm2, %v3284_v32  ;;  %3325 = vst.msk [vmem:[#allocation2 + $0x48] sm:$0xff] %vm3315_vm2, %v3292_v33  ;;  %v1191_v44 = vcombine.low %v8372_v26, %v1062_v49  ;;  %v1192_v45 = vcombine.high %v8372_v26, %v1062_v49  ;;  %v1515_v37 = vcombine.low %v8211_v50, %v1024_v31 }
 0x196   : > { %3333 = vst.msk [vmem:[#allocation2 + $0x88] sm:$0xff] %vm3315_vm2, %v3300_v34  ;;  %3341 = vst.msk [vmem:[#allocation2 + $0xc8] sm:$0xff] %vm3315_vm2, %v3308_v35  ;;  %v1516_v43 = vcombine.high %v8211_v50, %v1024_v31  ;;  %v2195_v46 = vcombine.low %v1147_v36, %v1154_v39  ;;  %v7222_v48 = vcombine.high %v1147_v36, %v1154_v39  ;;  %v8434_v32 = vpop.permute.xlu1 %1073 }
 0x197   : > { %v2211_v51 = vcombine.low %v1163_v41, %v1170_v42  ;;  %v7223_v40 = vcombine.high %v1163_v41, %v1170_v42  ;;  %v1199_v53 = vrot.slane %v1191_v44, %v8336_v24  ;;  %v1206_v56 = vrot.slane %v1192_v45, %v8336_v24 }
 0x198   : > { %v8417_v60 = vrot.slane %v1515_v37, %v8336_v24  ;;  %v8420_v61 = vrot.slane %v1516_v43, %v8336_v24  ;;  %v2202_v26 = vrot.slane %v2195_v46, %v8336_v24  ;;  %v2210_v49 = vrot.slane %v7222_v48, %v8336_v24  ;;  %v8444_v48 = vpop.permute.xlu0 %971 }
 0x199   : > { %v2218_v50 = vrot.slane %v2211_v51, %v8336_v24  ;;  %v2226_v6 = vrot.slane %v7223_v40, %v8336_v24  ;;  %v1207_v8 = vcombine.low %v1183_v21, %v1199_v53  ;;  %v1208_v9 = vcombine.high %v1183_v21, %v1199_v53 }
 0x19a   : > { %v1223_v10 = vcombine.low %v1190_v38, %v1206_v56  ;;  %v1224_v13 = vcombine.high %v1190_v38, %v1206_v56  ;;  %v2227_v14 = vcombine.low %v2202_v26, %v2210_v49  ;;  %v2228_v15 = vcombine.high %v2202_v26, %v2210_v49 }
 0x19b   : > { %v2243_v17 = vcombine.low %v2218_v50, %v2226_v6  ;;  %v2244_v18 = vcombine.high %v2218_v50, %v2226_v6  ;;  %v1215_v20 = vrot.slane %v1207_v8, %v8340_v30  ;;  %v1222_v62 = vrot.slane %v1208_v9, %v8340_v30  ;;  %v8456_v9 = vpop.permute.xlu1 %973 }
 0x19c   : > { %v1231_v22 = vrot.slane %v1223_v10, %v8340_v30  ;;  %v1238_v23 = vrot.slane %v1224_v13, %v8340_v30  ;;  %v2235_v47 = vrot.slane %v2227_v14, %v8340_v30  ;;  %v2242_v25 = vrot.slane %v2228_v15, %v8340_v30 }
 0x19d   : > { %v2251_v21 = vrot.slane %v2243_v17, %v8340_v30  ;;  %v2258_v38 = vrot.slane %v2244_v18, %v8340_v30  ;;  %v2263_v27 = vcombine.low %v1215_v20, %v1222_v62  ;;  %v7224_v28 = vcombine.high %v1215_v20, %v1222_v62 }
 0x19e   : > { %v2279_v29 = vcombine.low %v1231_v22, %v1238_v23  ;;  %v7225_v31 = vcombine.high %v1231_v22, %v1238_v23  ;;  %v1583_v45 = vcombine.low %v8221_v54, %v1026_v63  ;;  %v1584_v37 = vcombine.high %v8221_v54, %v1026_v63 }
 0x19f   : > { %v2259_v33 = vcombine.low %v2235_v47, %v2251_v21  ;;  %v2260_v34 = vcombine.high %v2235_v47, %v2251_v21  ;;  %v2261_v35 = vcombine.low %v2242_v25, %v2258_v38  ;;  %v2262_v36 = vcombine.high %v2242_v25, %v2258_v38  ;;  %v1020_v25 = vpop.permute.xlu0 %1019 }
 0x1a0   : > { %v2270_v39 = vrot.slane %v2263_v27, %v8336_v24  ;;  %v2278_v41 = vrot.slane %v7224_v28, %v8336_v24  ;;  %v2286_v42 = vrot.slane %v2279_v29, %v8336_v24  ;;  %v2294_v44 = vrot.slane %v7225_v31, %v8336_v24 }
 0x1a1   : > { %v1531_v43 = vcombine.low %v8382_v58, %v1072_v19  ;;  %v1532_v46 = vcombine.high %v8382_v58, %v1072_v19  ;;  %v1591_v26 = vrot.slane %v1583_v45, %v8336_v24  ;;  %v8448_v49 = vrot.slane %v1584_v37, %v8336_v24 }
 0x1a2   : > { %v2295_v51 = vcombine.low %v2270_v39, %v2278_v41  ;;  %v2296_v40 = vcombine.high %v2270_v39, %v2278_v41  ;;  %v2311_v53 = vcombine.low %v2286_v42, %v2294_v44  ;;  %v2312_v56 = vcombine.high %v2286_v42, %v2294_v44 }
 0x1a3   : > { %v1539_v50 = vrot.slane %v1531_v43, %v8336_v24  ;;  %v1546_v6 = vrot.slane %v1532_v46, %v8336_v24  ;;  %v1599_v39 = vcombine.low %v8396_v16, %v8434_v32 }
 0x1a4   : > { %v2303_v54 = vrot.slane %v2295_v51, %v8340_v30  ;;  %v2310_v63 = vrot.slane %v2296_v40, %v8340_v30  ;;  %v2319_v58 = vrot.slane %v2311_v53, %v8340_v30  ;;  %v2326_v8 = vrot.slane %v2312_v56, %v8340_v30 }
 0x1a5   : > { %v1547_v10 = vcombine.low %v8417_v60, %v1539_v50  ;;  %v1548_v13 = vcombine.high %v8417_v60, %v1539_v50  ;;  %v1563_v14 = vcombine.low %v8420_v61, %v1546_v6  ;;  %v1564_v15 = vcombine.high %v8420_v61, %v1546_v6 }
 0x1a6   : > { %v2327_v17 = vcombine.low %v2303_v54, %v2319_v58  ;;  %v2328_v18 = vcombine.high %v2303_v54, %v2319_v58  ;;  %v2329_v19 = vcombine.low %v2310_v63, %v2326_v8  ;;  %v2330_v20 = vcombine.high %v2310_v63, %v2326_v8 }
 0x1a7   : > { %v1555_v62 = vrot.slane %v1547_v10, %v8340_v30  ;;  %v1562_v22 = vrot.slane %v1548_v13, %v8340_v30  ;;  %v1571_v23 = vrot.slane %v1563_v14, %v8340_v30  ;;  %v1578_v47 = vrot.slane %v1564_v15, %v8340_v30  ;;  %v1068_v10 = vpop.permute.xlu0 %1067 }
 0x1a8   : > { %v3283_v21 = vpack.c.bf16 %v2327_v17, %v2259_v33  ;;  %v3291_v38 = vpack.c.bf16 %v2328_v18, %v2260_v34  ;;  %v3299_v60 = vpack.c.bf16 %v2329_v19, %v2261_v35  ;;  %v3307_v27 = vpack.c.bf16 %v2330_v20, %v2262_v36  ;;  %v1022_v36 = vpop.permute.xlu1 %1021 }
 0x1a9   : > { %v2603_v28 = vcombine.low %v1555_v62, %v1562_v22  ;;  %v7234_v29 = vcombine.high %v1555_v62, %v1562_v22  ;;  %v2619_v61 = vcombine.low %v1571_v23, %v1578_v47  ;;  %v7235_v31 = vcombine.high %v1571_v23, %v1578_v47 }
 0x1aa   : > { %3316 = vst.msk [vmem:[#allocation2] sm:$0xff] %vm3315_vm2, %v3283_v21  ;;  %3324 = vst.msk [vmem:[#allocation2 + $0x40] sm:$0xff] %vm3315_vm2, %v3291_v38  ;;  %v1600_v33 = vcombine.high %v8396_v16, %v8434_v32  ;;  %v1379_v34 = vcombine.low %v8245_v0, %v1020_v25  ;;  %v1380_v35 = vcombine.high %v8245_v0, %v1020_v25 }
 0x1ab   : > { %3332 = vst.msk [vmem:[#allocation2 + $0x80] sm:$0xff] %vm3315_vm2, %v3299_v60  ;;  %3340 = vst.msk [vmem:[#allocation2 + $0xc0] sm:$0xff] %vm3315_vm2, %v3307_v27  ;;  %v2610_v41 = vrot.slane %v2603_v28, %v8336_v24  ;;  %v2618_v42 = vrot.slane %v7234_v29, %v8336_v24  ;;  %v2626_v44 = vrot.slane %v2619_v61, %v8336_v24 }
 0x1ac   : > { %v2634_v45 = vrot.slane %v7235_v31, %v8336_v24  ;;  %v1607_v37 = vrot.slane %v1599_v39, %v8336_v24  ;;  %v1614_v43 = vrot.slane %v1600_v33, %v8336_v24  ;;  %v1387_v46 = vrot.slane %v1379_v34, %v8336_v24  ;;  %v8496_v17 = vpop.permute.xlu1 %1069  ;;  %v8516_v34 = vpop.permute.xlu0 %983 }
 0x1ad   : > { %v1394_v16 = vrot.slane %v1380_v35, %v8336_v24  ;;  %v2635_v32 = vcombine.low %v2610_v41, %v2618_v42  ;;  %v2636_v51 = vcombine.high %v2610_v41, %v2618_v42  ;;  %v1447_v25 = vcombine.low %v8248_v1, %v1022_v36 }
 0x1ae   : > { %v2651_v0 = vcombine.low %v2626_v44, %v2634_v45  ;;  %v2652_v40 = vcombine.high %v2626_v44, %v2634_v45  ;;  %v1615_v53 = vcombine.low %v1591_v26, %v1607_v37  ;;  %v1616_v56 = vcombine.high %v1591_v26, %v1607_v37 }
 0x1af   : > { %v1631_v50 = vcombine.low %v8448_v49, %v1614_v43  ;;  %v1632_v6 = vcombine.high %v8448_v49, %v1614_v43  ;;  %v2643_v54 = vrot.slane %v2635_v32, %v8340_v30  ;;  %v8488_v63 = vrot.slane %v2636_v51, %v8340_v30 }
 0x1b0   : > { %v2659_v58 = vrot.slane %v2651_v0, %v8340_v30  ;;  %v2666_v8 = vrot.slane %v2652_v40, %v8340_v30  ;;  %v1623_v13 = vrot.slane %v1615_v53, %v8340_v30  ;;  %v1630_v14 = vrot.slane %v1616_v56, %v8340_v30  ;;  %v8518_v42 = vpop.permute.xlu1 %985 }
 0x1b1   : > { %v1639_v26 = vrot.slane %v1631_v50, %v8340_v30  ;;  %v1646_v15 = vrot.slane %v1632_v6, %v8340_v30  ;;  %v1448_v21 = vcombine.high %v8248_v1, %v1022_v36  ;;  %v1395_v38 = vcombine.low %v8444_v48, %v1068_v10 }
 0x1b2   : > { %v2667_v49 = vcombine.low %v2643_v54, %v2659_v58  ;;  %v2668_v18 = vcombine.high %v2643_v54, %v2659_v58  ;;  %v2669_v19 = vcombine.low %v8488_v63, %v2666_v8  ;;  %v2670_v20 = vcombine.high %v8488_v63, %v2666_v8 }
 0x1b3   : > { %v2671_v62 = vcombine.low %v1623_v13, %v1630_v14  ;;  %v7236_v22 = vcombine.high %v1623_v13, %v1630_v14  ;;  %v2687_v23 = vcombine.low %v1639_v26, %v1646_v15  ;;  %v7237_v47 = vcombine.high %v1639_v26, %v1646_v15  ;;  %v5968_v14 = vld [vmem:[#allocation2] sm:$0xff]  ;;  %v1032_v15 = vpop.permute.xlu0 %1031 }
 0x1b4   : > { %v1396_v60 = vcombine.high %v8444_v48, %v1068_v10  ;;  %v8509_v31 = vrot.slane %v1447_v25, %v8336_v24  ;;  %v8512_v39 = vrot.slane %v1448_v21, %v8336_v24  ;;  %v1403_v1 = vrot.slane %v1395_v38, %v8336_v24  ;;  %v5976_v26 = vld [vmem:[#allocation2 + $0x40] sm:$0xff]  ;;  %v1034_v21 = vpop.permute.xlu1 %1033 }
 0x1b5   : > { %v2678_v27 = vrot.slane %v2671_v62, %v8336_v24  ;;  %v2686_v28 = vrot.slane %v7236_v22, %v8336_v24  ;;  %v2694_v29 = vrot.slane %v2687_v23, %v8336_v24  ;;  %v2702_v61 = vrot.slane %v7237_v47, %v8336_v24  ;;  %v8528_v62 = vpop.f32.mrb[0].mxu1 }
 0x1b6   : > { %v1410_v33 = vrot.slane %v1396_v60, %v8336_v24  ;;  %v1411_v44 = vcombine.low %v1387_v46, %v1403_v1  ;;  %v1412_v45 = vcombine.high %v1387_v46, %v1403_v1  ;;  %v8530_v38 = vpop.f32.mrb[1].mxu1 }
 0x1b7   : > { %v2703_v48 = vcombine.low %v2678_v27, %v2686_v28  ;;  %v2704_v35 = vcombine.high %v2678_v27, %v2686_v28  ;;  %v2719_v36 = vcombine.low %v2694_v29, %v2702_v61  ;;  %v2720_v41 = vcombine.high %v2694_v29, %v2702_v61  ;;  %v8536_v61 = vpop.f32.mrb[2].mxu1 }
 0x1b8   : > { %v1427_v37 = vcombine.low %v1394_v16, %v1410_v33  ;;  %v1428_v43 = vcombine.high %v1394_v16, %v1410_v33  ;;  %v1419_v53 = vrot.slane %v1411_v44, %v8340_v30  ;;  %v1426_v56 = vrot.slane %v1412_v45, %v8340_v30  ;;  %v8548_v1 = vpop.f32.mrb[3].mxu1 }
 0x1b9   : > { %v2711_v32 = vrot.slane %v2703_v48, %v8340_v30  ;;  %v2718_v51 = vrot.slane %v2704_v35, %v8340_v30  ;;  %v2727_v0 = vrot.slane %v2719_v36, %v8340_v30  ;;  %v2734_v40 = vrot.slane %v2720_v41, %v8340_v30 }
 0x1ba   : > { %v1435_v50 = vrot.slane %v1427_v37, %v8340_v30  ;;  %v1442_v6 = vrot.slane %v1428_v43, %v8340_v30  ;;  %v2467_v58 = vcombine.low %v1419_v53, %v1426_v56  ;;  %v7230_v8 = vcombine.high %v1419_v53, %v1426_v56  ;;  %v8571_v56 = vpop.permute.xlu1 %1081 }
 0x1bb   : > { %v2735_v54 = vcombine.low %v2711_v32, %v2727_v0  ;;  %v2736_v46 = vcombine.high %v2711_v32, %v2727_v0  ;;  %v2737_v63 = vcombine.low %v2718_v51, %v2734_v40  ;;  %v2738_v16 = vcombine.high %v2718_v51, %v2734_v40  ;;  %v1080_v51 = vpop.permute.xlu0 %1079 }
 0x1bc   : > { %v2483_v10 = vcombine.low %v1435_v50, %v1442_v6  ;;  %v7231_v13 = vcombine.high %v1435_v50, %v1442_v6  ;;  %v2474_v60 = vrot.slane %v2467_v58, %v8336_v24  ;;  %v2482_v27 = vrot.slane %v7230_v8, %v8336_v24 }
 0x1bd   : > { %v3286_v22 = vpack.c.bf16 %v2735_v54, %v2667_v49  ;;  %v3294_v23 = vpack.c.bf16 %v2736_v46, %v2668_v18  ;;  %v3302_v47 = vpack.c.bf16 %v2737_v63, %v2669_v19  ;;  %v3310_v25 = vpack.c.bf16 %v2738_v16, %v2670_v20 }
 0x1be   : > { %v2490_v28 = vrot.slane %v2483_v10, %v8336_v24  ;;  %v2498_v29 = vrot.slane %v7231_v13, %v8336_v24  ;;  %v1463_v49 = vcombine.low %v8456_v9, %v8496_v17  ;;  %v1464_v18 = vcombine.high %v8456_v9, %v8496_v17 }
 0x1bf   : > { %3319 = vst.msk [vmem:[#allocation2 + $0x18] sm:$0xff] %vm3315_vm2, %v3286_v22  ;;  %3327 = vst.msk [vmem:[#allocation2 + $0x58] sm:$0xff] %vm3315_vm2, %v3294_v23  ;;  %v6005_v19 = vsel %vm3315_vm2, %v5968_v14, 0  ;;  %v6072_v20 = vsel %vm3315_vm2, %v5976_v26, 0  ;;  %v2499_v33 = vcombine.low %v2474_v60, %v2482_v27  ;;  %v2500_v48 = vcombine.high %v2474_v60, %v2482_v27  ;;  %v8598_v27 = vpop.permute.xlu0 %979 }
 0x1c0   : > { %3335 = vst.msk [vmem:[#allocation2 + $0x98] sm:$0xff] %vm3315_vm2, %v3302_v47  ;;  %3343 = vst.msk [vmem:[#allocation2 + $0xd8] sm:$0xff] %vm3315_vm2, %v3310_v25  ;;  %v2515_v35 = vcombine.low %v2490_v28, %v2498_v29  ;;  %v2516_v36 = vcombine.high %v2490_v28, %v2498_v29  ;;  %7490 = vmatpush3.bf16.xpose.msra.mxu1 %v6005_v19  ;;  %v1471_v41 = vrot.slane %v1463_v49, %v8336_v24  ;;  %v8604_v49 = vpop.permute.xlu1 %981 }
 0x1c1   : > { %v1478_v44 = vrot.slane %v1464_v18, %v8336_v24  ;;  %7510 = vmatpush3.bf16.xpose.msra.mxu0 %v6072_v20  ;;  %v1787_v45 = vcombine.low %v8259_v2, %v1032_v15  ;;  %v1788_v9 = vcombine.high %v8259_v2, %v1032_v15  ;;  %v8555_v17 = vrot.slane %v2499_v33, %v8340_v30 }
 0x1c2   : > { %v8558_v37 = vrot.slane %v2500_v48, %v8340_v30  ;;  %v8561_v43 = vrot.slane %v2515_v35, %v8340_v30  ;;  %v8564_v32 = vrot.slane %v2516_v36, %v8340_v30  ;;  %7491 = vmatprep.subr.bf16.mxu1 %v7926_v12  ;;  %v1479_v0 = vcombine.low %v8509_v31, %v1471_v41 }
 0x1c3   : > { %v1480_v40 = vcombine.high %v8509_v31, %v1471_v41  ;;  %v1495_v2 = vcombine.low %v8512_v39, %v1478_v44  ;;  %v1496_v53 = vcombine.high %v8512_v39, %v1478_v44  ;;  %7511 = vmatprep.subr.bf16.mxu0 %v7926_v12  ;;  %v1795_v58 = vrot.slane %v1787_v45, %v8336_v24 }
 0x1c4   : > { %v2531_v50 = vcombine.low %v8555_v17, %v8561_v43  ;;  %v2532_v6 = vcombine.high %v8555_v17, %v8561_v43  ;;  %v2533_v54 = vcombine.low %v8558_v37, %v8564_v32  ;;  %v2534_v31 = vcombine.high %v8558_v37, %v8564_v32 }
 0x1c5   : > { %v1487_v46 = vrot.slane %v1479_v0, %v8340_v30  ;;  %v1494_v39 = vrot.slane %v1480_v40, %v8340_v30  ;;  %v1503_v63 = vrot.slane %v1495_v2, %v8340_v30  ;;  %v1510_v16 = vrot.slane %v1496_v53, %v8340_v30  ;;  %v8620_v2 = vpop.permute.xlu0 %1027 }
 0x1c6   : > { %v1802_v8 = vrot.slane %v1788_v9, %v8336_v24  ;;  %v1855_v10 = vcombine.low %v8266_v3, %v1034_v21  ;;  %v1856_v13 = vcombine.high %v8266_v3, %v1034_v21  ;;  %v1803_v25 = vcombine.low %v8516_v34, %v1080_v51 }
 0x1c7   : > { %v2535_v14 = vcombine.low %v1487_v46, %v1494_v39  ;;  %v7232_v26 = vcombine.high %v1487_v46, %v1494_v39  ;;  %v2551_v15 = vcombine.low %v1503_v63, %v1510_v16  ;;  %v7233_v22 = vcombine.high %v1503_v63, %v1510_v16  ;;  %v8622_v63 = vpop.permute.xlu1 %1029 }
 0x1c8   : > { %v8591_v23 = vrot.slane %v1855_v10, %v8336_v24  ;;  %v8594_v47 = vrot.slane %v1856_v13, %v8336_v24  ;;  %v1804_v60 = vcombine.high %v8516_v34, %v1080_v51  ;;  %v1811_v18 = vrot.slane %v1803_v25, %v8336_v24  ;;  %v5969_v13 = vld [vmem:[#allocation2 + $0x8] sm:$0xff] }
 0x1c9   : > { %v2542_v28 = vrot.slane %v2535_v14, %v8336_v24  ;;  %v2550_v3 = vrot.slane %v7232_v26, %v8336_v24  ;;  %v2558_v21 = vrot.slane %v2551_v15, %v8336_v24  ;;  %v2566_v29 = vrot.slane %v7233_v22, %v8336_v24  ;;  %v5977_v14 = vld [vmem:[#allocation2 + $0x48] sm:$0xff] }
 0x1ca   : > { %v1818_v19 = vrot.slane %v1804_v60, %v8336_v24  ;;  %v1871_v20 = vcombine.low %v8518_v42, %v8571_v56  ;;  %v1872_v34 = vcombine.high %v8518_v42, %v8571_v56  ;;  %v1819_v41 = vcombine.low %v1795_v58, %v1811_v18 }
 0x1cb   : > { %v2567_v33 = vcombine.low %v2542_v28, %v2550_v3  ;;  %v2568_v48 = vcombine.high %v2542_v28, %v2550_v3  ;;  %v2583_v35 = vcombine.low %v2558_v21, %v2566_v29  ;;  %v2584_v36 = vcombine.high %v2558_v21, %v2566_v29 }
 0x1cc   : > { %v1820_v44 = vcombine.high %v1795_v58, %v1811_v18  ;;  %v1835_v45 = vcombine.low %v1802_v8, %v1818_v19  ;;  %v1836_v9 = vcombine.high %v1802_v8, %v1818_v19  ;;  %v1827_v51 = vrot.slane %v1819_v41, %v8340_v30 }
 0x1cd   : > { %v2575_v17 = vrot.slane %v2567_v33, %v8340_v30  ;;  %v2582_v37 = vrot.slane %v2568_v48, %v8340_v30  ;;  %v2591_v43 = vrot.slane %v2583_v35, %v8340_v30  ;;  %v2598_v32 = vrot.slane %v2584_v36, %v8340_v30  ;;  %v1076_v48 = vpop.permute.xlu0 %1075 }
 0x1ce   : > { %v1834_v42 = vrot.slane %v1820_v44, %v8340_v30  ;;  %v1843_v0 = vrot.slane %v1835_v45, %v8340_v30  ;;  %v1850_v40 = vrot.slane %v1836_v9, %v8340_v30 }
 0x1cf   : > { %v2599_v53 = vcombine.low %v2575_v17, %v2591_v43  ;;  %v2600_v56 = vcombine.high %v2575_v17, %v2591_v43  ;;  %v2601_v46 = vcombine.low %v2582_v37, %v2598_v32  ;;  %v2602_v39 = vcombine.high %v2582_v37, %v2598_v32 }
 0x1d0   : > { %v2875_v16 = vcombine.low %v1827_v51, %v1834_v42  ;;  %v7242_v58 = vcombine.high %v1827_v51, %v1834_v42  ;;  %v2891_v8 = vcombine.low %v1843_v0, %v1850_v40  ;;  %v7243_v10 = vcombine.high %v1843_v0, %v1850_v40 }
 0x1d1   : > { %v3285_v26 = vpack.c.bf16 %v2599_v53, %v2531_v50  ;;  %v3293_v15 = vpack.c.bf16 %v2600_v56, %v2532_v6  ;;  %v3301_v22 = vpack.c.bf16 %v2601_v46, %v2533_v54  ;;  %v3309_v25 = vpack.c.bf16 %v2602_v39, %v2534_v31 }
 0x1d2   : > { %v2882_v60 = vrot.slane %v2875_v16, %v8336_v24  ;;  %v2890_v28 = vrot.slane %v7242_v58, %v8336_v24  ;;  %v2898_v3 = vrot.slane %v2891_v8, %v8336_v24  ;;  %v2906_v21 = vrot.slane %v7243_v10, %v8336_v24  ;;  %v8662_v10 = vpop.permute.xlu0 %991 }
 0x1d3   : > { %3318 = vst.msk [vmem:[#allocation2 + $0x10] sm:$0xff] %vm3315_vm2, %v3285_v26  ;;  %3326 = vst.msk [vmem:[#allocation2 + $0x50] sm:$0xff] %vm3315_vm2, %v3293_v15  ;;  %v1879_v50 = vrot.slane %v1871_v20, %v8336_v24  ;;  %v1886_v6 = vrot.slane %v1872_v34, %v8336_v24  ;;  %v6008_v54 = vsel %vm3315_vm2, %v5969_v13, 0  ;;  %v6075_v31 = vsel %vm3315_vm2, %v5977_v14, 0  ;;  %v1078_v34 = vpop.permute.xlu1 %1077 }
 0x1d4   : > { %3334 = vst.msk [vmem:[#allocation2 + $0x90] sm:$0xff] %vm3315_vm2, %v3301_v22  ;;  %3342 = vst.msk [vmem:[#allocation2 + $0xd0] sm:$0xff] %vm3315_vm2, %v3309_v25  ;;  %v2907_v29 = vcombine.low %v2882_v60, %v2890_v28  ;;  %v2908_v18 = vcombine.high %v2882_v60, %v2890_v28  ;;  %v2923_v19 = vcombine.low %v2898_v3, %v2906_v21  ;;  %7492 = vmatpush3.bf16.xpose.msra.mxu1 %v6008_v54 }
 0x1d5   : > { %v2924_v33 = vcombine.high %v2898_v3, %v2906_v21  ;;  %v1887_v35 = vcombine.low %v8591_v23, %v1879_v50  ;;  %v1888_v36 = vcombine.high %v8591_v23, %v1879_v50  ;;  %v1903_v41 = vcombine.low %v8594_v47, %v1886_v6  ;;  %7512 = vmatpush3.bf16.xpose.msra.mxu0 %v6075_v31 }
 0x1d6   : > { %v1904_v20 = vcombine.high %v8594_v47, %v1886_v6  ;;  %v2915_v44 = vrot.slane %v2907_v29, %v8340_v30  ;;  %v8642_v45 = vrot.slane %v2908_v18, %v8340_v30  ;;  %v2931_v9 = vrot.slane %v2923_v19, %v8340_v30  ;;  %7493 = vmatprep.subr.bf16.mxu1 %v7926_v12 }
 0x1d7   : > { %v2938_v17 = vrot.slane %v2924_v33, %v8340_v30  ;;  %v1895_v37 = vrot.slane %v1887_v35, %v8340_v30  ;;  %v1902_v23 = vrot.slane %v1888_v36, %v8340_v30  ;;  %v1911_v43 = vrot.slane %v1903_v41, %v8340_v30  ;;  %7513 = vmatprep.subr.bf16.mxu0 %v7926_v12  ;;  %v8668_v22 = vpop.permute.xlu1 %993 }
 0x1d8   : > { %v1918_v47 = vrot.slane %v1904_v20, %v8340_v30  ;;  %v2939_v32 = vcombine.low %v2915_v44, %v2931_v9  ;;  %v2940_v51 = vcombine.high %v2915_v44, %v2931_v9  ;;  %v1651_v39 = vcombine.low %v8281_v4, %v8620_v2 }
 0x1d9   : > { %v2941_v42 = vcombine.low %v8642_v45, %v2938_v17  ;;  %v2942_v0 = vcombine.high %v8642_v45, %v2938_v17  ;;  %v2943_v40 = vcombine.low %v1895_v37, %v1902_v23  ;;  %v7244_v53 = vcombine.high %v1895_v37, %v1902_v23 }
 0x1da   : > { %v2959_v56 = vcombine.low %v1911_v43, %v1918_v47  ;;  %v7245_v46 = vcombine.high %v1911_v43, %v1918_v47  ;;  %v1652_v16 = vcombine.high %v8281_v4, %v8620_v2  ;;  %v1719_v58 = vcombine.low %v8284_v5, %v8622_v63 }
 0x1db   : > { %v1720_v8 = vcombine.high %v8284_v5, %v8622_v63  ;;  %v2950_v13 = vrot.slane %v2943_v40, %v8336_v24  ;;  %v2958_v14 = vrot.slane %v7244_v53, %v8336_v24  ;;  %v1659_v4 = vrot.slane %v1651_v39, %v8336_v24  ;;  %v8674_v63 = vpop.f32.mrb[4].mxu1  ;;  %v8692_v9 = vpop.permute.xlu1 %989 }
 0x1dc   : > { %v2966_v26 = vrot.slane %v2959_v56, %v8336_v24  ;;  %v2974_v15 = vrot.slane %v7245_v46, %v8336_v24  ;;  %v1666_v2 = vrot.slane %v1652_v16, %v8336_v24  ;;  %v1727_v25 = vrot.slane %v1719_v58, %v8336_v24  ;;  %v8676_v50 = vpop.f32.mrb[5].mxu1 }
 0x1dd   : > { %v1734_v5 = vrot.slane %v1720_v8, %v8336_v24  ;;  %v2975_v60 = vcombine.low %v2950_v13, %v2958_v14  ;;  %v2976_v28 = vcombine.high %v2950_v13, %v2958_v14  ;;  %v1667_v6 = vcombine.low %v8598_v27, %v1076_v48  ;;  %v8698_v8 = vpop.f32.mrb[6].mxu1 }
 0x1de   : > { %v2991_v3 = vcombine.low %v2966_v26, %v2974_v15  ;;  %v2992_v21 = vcombine.high %v2966_v26, %v2974_v15  ;;  %v1668_v54 = vcombine.high %v8598_v27, %v1076_v48  ;;  %v1735_v31 = vcombine.low %v8604_v49, %v1078_v34  ;;  %v8690_v48 = vpop.permute.xlu0 %987  ;;  %v8704_v13 = vpop.f32.mrb[7].mxu1 }
 0x1df   : > { %v1736_v29 = vcombine.high %v8604_v49, %v1078_v34  ;;  %v2983_v18 = vrot.slane %v2975_v60, %v8340_v30  ;;  %v2990_v19 = vrot.slane %v2976_v28, %v8340_v30  ;;  %v1675_v36 = vrot.slane %v1667_v6, %v8336_v24  ;;  %v8710_v6 = vpop.permute.xlu1 %1037 }
 0x1e0   : > { %v2999_v33 = vrot.slane %v2991_v3, %v8340_v30  ;;  %v3006_v35 = vrot.slane %v2992_v21, %v8340_v30  ;;  %v1682_v41 = vrot.slane %v1668_v54, %v8336_v24  ;;  %v1743_v20 = vrot.slane %v1735_v31, %v8336_v24 }
 0x1e1   : > { %v1750_v27 = vrot.slane %v1736_v29, %v8336_v24  ;;  %v1683_v17 = vcombine.low %v1659_v4, %v1675_v36  ;;  %v1684_v37 = vcombine.high %v1659_v4, %v1675_v36 }
 0x1e2   : > { %v3007_v44 = vcombine.low %v2983_v18, %v2999_v33  ;;  %v3008_v49 = vcombine.high %v2983_v18, %v2999_v33  ;;  %v3009_v34 = vcombine.low %v2990_v19, %v3006_v35  ;;  %v3010_v45 = vcombine.high %v2990_v19, %v3006_v35 }
 0x1e3   : > { %v1699_v23 = vcombine.low %v1666_v2, %v1682_v41  ;;  %v1700_v43 = vcombine.high %v1666_v2, %v1682_v41  ;;  %v1691_v46 = vrot.slane %v1683_v17, %v8340_v30  ;;  %v1698_v39 = vrot.slane %v1684_v37, %v8340_v30  ;;  %v1036_v2 = vpop.permute.xlu0 %1035 }
 0x1e4   : > { %v3288_v47 = vpack.c.bf16 %v3007_v44, %v2939_v32  ;;  %v3296_v40 = vpack.c.bf16 %v3008_v49, %v2940_v51  ;;  %v3304_v53 = vpack.c.bf16 %v3009_v34, %v2941_v42  ;;  %v3312_v56 = vpack.c.bf16 %v3010_v45, %v2942_v0 }
 0x1e5   : > { %v1707_v16 = vrot.slane %v1699_v23, %v8340_v30  ;;  %v1714_v58 = vrot.slane %v1700_v43, %v8340_v30  ;;  %v1751_v32 = vcombine.low %v1727_v25, %v1743_v20  ;;  %v1752_v51 = vcombine.high %v1727_v25, %v1743_v20 }
 0x1e6   : > { %3321 = vst.msk [vmem:[#allocation2 + $0x28] sm:$0xff] %vm3315_vm2, %v3288_v47  ;;  %3329 = vst.msk [vmem:[#allocation2 + $0x68] sm:$0xff] %vm3315_vm2, %v3296_v40  ;;  %v1767_v42 = vcombine.low %v1734_v5, %v1750_v27  ;;  %v1768_v0 = vcombine.high %v1734_v5, %v1750_v27  ;;  %v2739_v14 = vcombine.low %v1691_v46, %v1698_v39 }
 0x1e7   : > { %3337 = vst.msk [vmem:[#allocation2 + $0xa8] sm:$0xff] %vm3315_vm2, %v3304_v53  ;;  %3345 = vst.msk [vmem:[#allocation2 + $0xe8] sm:$0xff] %vm3315_vm2, %v3312_v56  ;;  %v7238_v26 = vcombine.high %v1691_v46, %v1698_v39  ;;  %v2755_v15 = vcombine.low %v1707_v16, %v1714_v58  ;;  %v7239_v4 = vcombine.high %v1707_v16, %v1714_v58  ;;  %v1084_v43 = vpop.permute.xlu0 %1083  ;;  %v5970_v46 = vld [vmem:[#allocation2 + $0x10] sm:$0xff]  ;;  %v1086_v16 = vpop.permute.xlu1 %1085 }
 0x1e8   : > { %v1759_v60 = vrot.slane %v1751_v32, %v8340_v30  ;;  %v1766_v28 = vrot.slane %v1752_v51, %v8340_v30  ;;  %v1775_v3 = vrot.slane %v1767_v42, %v8340_v30  ;;  %v1782_v21 = vrot.slane %v1768_v0, %v8340_v30  ;;  %v5978_v39 = vld [vmem:[#allocation2 + $0x50] sm:$0xff] }
 0x1e9   : > { %v2746_v25 = vrot.slane %v2739_v14, %v8336_v24  ;;  %v2754_v5 = vrot.slane %v7238_v26, %v8336_v24  ;;  %v2762_v54 = vrot.slane %v2755_v15, %v8336_v24  ;;  %v2770_v31 = vrot.slane %v7239_v4, %v8336_v24 }
 0x1ea   : > { %v2807_v29 = vcombine.low %v1759_v60, %v1766_v28  ;;  %v7240_v18 = vcombine.high %v1759_v60, %v1766_v28  ;;  %v2823_v19 = vcombine.low %v1775_v3, %v1782_v21  ;;  %v7241_v33 = vcombine.high %v1775_v3, %v1782_v21 }
 0x1eb   : > { %v2771_v35 = vcombine.low %v2746_v25, %v2754_v5  ;;  %v2772_v36 = vcombine.high %v2746_v25, %v2754_v5  ;;  %v2787_v41 = vcombine.low %v2762_v54, %v2770_v31  ;;  %v2788_v20 = vcombine.high %v2762_v54, %v2770_v31  ;;  %v5971_v31 = vld [vmem:[#allocation2 + $0x18] sm:$0xff] }
 0x1ec   : > { %v2814_v27 = vrot.slane %v2807_v29, %v8336_v24  ;;  %v2822_v44 = vrot.slane %v7240_v18, %v8336_v24  ;;  %v2830_v49 = vrot.slane %v2823_v19, %v8336_v24  ;;  %v2838_v34 = vrot.slane %v7241_v33, %v8336_v24  ;;  %v5979_v29 = vld [vmem:[#allocation2 + $0x58] sm:$0xff] }
 0x1ed   : > { %v2779_v45 = vrot.slane %v2771_v35, %v8340_v30  ;;  %v2786_v17 = vrot.slane %v2772_v36, %v8340_v30  ;;  %v2795_v37 = vrot.slane %v2787_v41, %v8340_v30  ;;  %v2802_v23 = vrot.slane %v2788_v20, %v8340_v30  ;;  %v1040_v36 = vpop.permute.xlu0 %1039 }
 0x1ee   : > { %v2839_v47 = vcombine.low %v2814_v27, %v2822_v44  ;;  %v2840_v40 = vcombine.high %v2814_v27, %v2822_v44  ;;  %v2855_v53 = vcombine.low %v2830_v49, %v2838_v34  ;;  %v2856_v56 = vcombine.high %v2830_v49, %v2838_v34  ;;  %v1042_v27 = vpop.permute.xlu1 %1041  ;;  %v8739_v44 = vpop.f32.mrb[8].mxu1 }
 0x1ef   : > { %v2803_v58 = vcombine.low %v2779_v45, %v2795_v37  ;;  %v2804_v32 = vcombine.high %v2779_v45, %v2795_v37  ;;  %v2805_v51 = vcombine.low %v2786_v17, %v2802_v23  ;;  %v2806_v42 = vcombine.high %v2786_v17, %v2802_v23 }
 0x1f0   : > { %v2847_v0 = vrot.slane %v2839_v47, %v8340_v30  ;;  %v2854_v14 = vrot.slane %v2840_v40, %v8340_v30  ;;  %v2863_v26 = vrot.slane %v2855_v53, %v8340_v30  ;;  %v2870_v15 = vrot.slane %v2856_v56, %v8340_v30 }
 0x1f1   : > { %v6011_v4 = vsel %vm3315_vm2, %v5970_v46, 0  ;;  %v6078_v60 = vsel %vm3315_vm2, %v5978_v39, 0  ;;  %v1923_v28 = vcombine.low %v8224_v55, %v1036_v2  ;;  %v1924_v3 = vcombine.high %v8224_v55, %v1036_v2 }
 0x1f2   : > { %v2871_v21 = vcombine.low %v2847_v0, %v2863_v26  ;;  %v2872_v25 = vcombine.high %v2847_v0, %v2863_v26  ;;  %v2873_v5 = vcombine.low %v2854_v14, %v2870_v15  ;;  %v2874_v54 = vcombine.high %v2854_v14, %v2870_v15  ;;  %7494 = vmatpush3.bf16.xpose.msra.mxu1 %v6011_v4 }
 0x1f3   : > { %7514 = vmatpush3.bf16.xpose.msra.mxu0 %v6078_v60  ;;  %v1931_v18 = vrot.slane %v1923_v28, %v8336_v24  ;;  %v1938_v19 = vrot.slane %v1924_v3, %v8336_v24  ;;  %v1991_v33 = vcombine.low %v8234_v59, %v8710_v6  ;;  %v1992_v35 = vcombine.high %v8234_v59, %v8710_v6  ;;  %v8746_v6 = vpop.f32.mrb[9].mxu1 }
 0x1f4   : > { %v3287_v55 = vpack.c.bf16 %v2871_v21, %v2803_v58  ;;  %v3295_v2 = vpack.c.bf16 %v2872_v25, %v2804_v32  ;;  %v3303_v41 = vpack.c.bf16 %v2873_v5, %v2805_v51  ;;  %v3311_v20 = vpack.c.bf16 %v2874_v54, %v2806_v42  ;;  %7495 = vmatprep.subr.bf16.mxu1 %v7926_v12  ;;  %v8756_v40 = vpop.f32.mrb[10].mxu1 }
 0x1f5   : > { %v1999_v49 = vrot.slane %v1991_v33, %v8336_v24  ;;  %v2006_v34 = vrot.slane %v1992_v35, %v8336_v24  ;;  %7515 = vmatprep.subr.bf16.mxu0 %v7926_v12  ;;  %v6014_v45 = vsel %vm3315_vm2, %v5971_v31, 0  ;;  %v6081_v59 = vsel %vm3315_vm2, %v5979_v29, 0  ;;  %v8762_v58 = vpop.f32.mrb[11].mxu1 }
 0x1f6   : > { %3320 = vst.msk [vmem:[#allocation2 + $0x20] sm:$0xff] %vm3315_vm2, %v3287_v55  ;;  %3328 = vst.msk [vmem:[#allocation2 + $0x60] sm:$0xff] %vm3315_vm2, %v3295_v2  ;;  %v1939_v17 = vcombine.low %v8690_v48, %v1084_v43  ;;  %v1940_v37 = vcombine.high %v8690_v48, %v1084_v43  ;;  %v2007_v23 = vcombine.low %v8692_v9, %v1086_v16 }
 0x1f7   : > { %3336 = vst.msk [vmem:[#allocation2 + $0xa0] sm:$0xff] %vm3315_vm2, %v3303_v41  ;;  %3344 = vst.msk [vmem:[#allocation2 + $0xe0] sm:$0xff] %vm3315_vm2, %v3311_v20  ;;  %v2008_v47 = vcombine.high %v8692_v9, %v1086_v16  ;;  %v2059_v53 = vcombine.low %v8218_v52, %v1040_v36  ;;  %v2060_v56 = vcombine.high %v8218_v52, %v1040_v36 }
 0x1f8   : > { %v2127_v46 = vcombine.low %v8229_v57, %v1042_v27  ;;  %v2128_v39 = vcombine.high %v8229_v57, %v1042_v27  ;;  %v1947_v32 = vrot.slane %v1939_v17, %v8336_v24  ;;  %v1954_v48 = vrot.slane %v1940_v37, %v8336_v24 }
 0x1f9   : > { %v2015_v43 = vrot.slane %v2007_v23, %v8336_v24  ;;  %v2022_v9 = vrot.slane %v2008_v47, %v8336_v24  ;;  %v8769_v16 = vrot.slane %v2059_v53, %v8336_v24  ;;  %v8772_v51 = vrot.slane %v2060_v56, %v8336_v24 }
 0x1fa   : > { %v8775_v52 = vrot.slane %v2127_v46, %v8336_v24  ;;  %v8778_v57 = vrot.slane %v2128_v39, %v8336_v24  ;;  %7496 = vmatpush3.bf16.xpose.msra.mxu1 %v6014_v45  ;;  %v1955_v42 = vcombine.low %v1931_v18, %v1947_v32  ;;  %v1956_v0 = vcombine.high %v1931_v18, %v1947_v32  ;;  %v1090_v39 = vpop.permute.xlu1 %1089 }
 0x1fb   : > { %v1971_v14 = vcombine.low %v1938_v19, %v1954_v48  ;;  %v1972_v26 = vcombine.high %v1938_v19, %v1954_v48  ;;  %7516 = vmatpush3.bf16.xpose.msra.mxu0 %v6081_v59  ;;  %v2023_v15 = vcombine.low %v1999_v49, %v2015_v43  ;;  %v2024_v4 = vcombine.high %v1999_v49, %v2015_v43 }
 0x1fc   : > { %v2039_v60 = vcombine.low %v2006_v34, %v2022_v9  ;;  %v2040_v28 = vcombine.high %v2006_v34, %v2022_v9  ;;  %v1963_v3 = vrot.slane %v1955_v42, %v8340_v30  ;;  %v1970_v21 = vrot.slane %v1956_v0, %v8340_v30  ;;  %7497 = vmatprep.subr.bf16.mxu1 %v7926_v12 }
 0x1fd   : > { %v1979_v25 = vrot.slane %v1971_v14, %v8340_v30  ;;  %v1986_v5 = vrot.slane %v1972_v26, %v8340_v30  ;;  %v2031_v54 = vrot.slane %v2023_v15, %v8340_v30  ;;  %v2038_v31 = vrot.slane %v2024_v4, %v8340_v30  ;;  %7517 = vmatprep.subr.bf16.mxu0 %v7926_v12 }
 0x1fe   : > { %v2047_v29 = vrot.slane %v2039_v60, %v8340_v30  ;;  %v2054_v18 = vrot.slane %v2040_v28, %v8340_v30  ;;  %v3011_v19 = vcombine.low %v1963_v3, %v1970_v21  ;;  %v7246_v33 = vcombine.high %v1963_v3, %v1970_v21  ;;  %v1088_v3 = vpop.permute.xlu0 %1087 }
 0x1ff   : > { %v3027_v35 = vcombine.low %v1979_v25, %v1986_v5  ;;  %v7247_v36 = vcombine.high %v1979_v25, %v1986_v5  ;;  %v3079_v55 = vcombine.low %v2031_v54, %v2038_v31  ;;  %v7248_v2 = vcombine.high %v2031_v54, %v2038_v31 }
 0x200   : > { %v3095_v41 = vcombine.low %v2047_v29, %v2054_v18  ;;  %v7249_v20 = vcombine.high %v2047_v29, %v2054_v18  ;;  %v3018_v27 = vrot.slane %v3011_v19, %v8336_v24  ;;  %v3026_v49 = vrot.slane %v7246_v33, %v8336_v24 }
 0x201   : > { %v3034_v34 = vrot.slane %v3027_v35, %v8336_v24  ;;  %v3042_v45 = vrot.slane %v7247_v36, %v8336_v24  ;;  %v3086_v59 = vrot.slane %v3079_v55, %v8336_v24  ;;  %v3094_v17 = vrot.slane %v7248_v2, %v8336_v24  ;;  %v8810_v2 = vpop.permute.xlu1 %5822 }
 0x202   : > { %v3102_v37 = vrot.slane %v3095_v41, %v8336_v24  ;;  %v3110_v23 = vrot.slane %v7249_v20, %v8336_v24  ;;  %v3043_v47 = vcombine.low %v3018_v27, %v3026_v49  ;;  %v3044_v53 = vcombine.high %v3018_v27, %v3026_v49  ;;  %v5972_v41 = vld [vmem:[#allocation2 + $0x20] sm:$0xff] }
 0x203   : > { %v3059_v56 = vcombine.low %v3034_v34, %v3042_v45  ;;  %v3060_v46 = vcombine.high %v3034_v34, %v3042_v45  ;;  %v3111_v32 = vcombine.low %v3086_v59, %v3094_v17  ;;  %v3112_v48 = vcombine.high %v3086_v59, %v3094_v17  ;;  %v5980_v20 = vld [vmem:[#allocation2 + $0x60] sm:$0xff] }
 0x204   : > { %v3127_v43 = vcombine.low %v3102_v37, %v3110_v23  ;;  %v3128_v9 = vcombine.high %v3102_v37, %v3110_v23  ;;  %v3051_v42 = vrot.slane %v3043_v47, %v8340_v30  ;;  %v3058_v0 = vrot.slane %v3044_v53, %v8340_v30 }
 0x205   : > { %v3067_v14 = vrot.slane %v3059_v56, %v8340_v30  ;;  %v3074_v26 = vrot.slane %v3060_v46, %v8340_v30  ;;  %v3119_v15 = vrot.slane %v3111_v32, %v8340_v30  ;;  %v3126_v4 = vrot.slane %v3112_v48, %v8340_v30 }
 0x206   : > { %v3135_v60 = vrot.slane %v3127_v43, %v8340_v30  ;;  %v3142_v28 = vrot.slane %v3128_v9, %v8340_v30  ;;  %v2075_v33 = vcombine.low %v8662_v10, %v1088_v3  ;;  %v2076_v35 = vcombine.high %v8662_v10, %v1088_v3 }
 0x207   : > { %v3075_v21 = vcombine.low %v3051_v42, %v3067_v14  ;;  %v3076_v25 = vcombine.high %v3051_v42, %v3067_v14  ;;  %v3077_v5 = vcombine.low %v3058_v0, %v3074_v26  ;;  %v3078_v54 = vcombine.high %v3058_v0, %v3074_v26 }
 0x208   : > { %v3143_v31 = vcombine.low %v3119_v15, %v3135_v60  ;;  %v3144_v29 = vcombine.high %v3119_v15, %v3135_v60  ;;  %v3145_v18 = vcombine.low %v3126_v4, %v3142_v28  ;;  %v3146_v19 = vcombine.high %v3126_v4, %v3142_v28 }
 0x209   : > { %v2143_v36 = vcombine.low %v8668_v22, %v1090_v39  ;;  %v2144_v55 = vcombine.high %v8668_v22, %v1090_v39  ;;  %v2083_v59 = vrot.slane %v2075_v33, %v8336_v24  ;;  %v2090_v17 = vrot.slane %v2076_v35, %v8336_v24 }
 0x20a   : > { %v3289_v27 = vpack.c.bf16 %v3143_v31, %v3075_v21  ;;  %v3297_v49 = vpack.c.bf16 %v3144_v29, %v3076_v25  ;;  %v3305_v34 = vpack.c.bf16 %v3145_v18, %v3077_v5  ;;  %v3313_v45 = vpack.c.bf16 %v3146_v19, %v3078_v54  ;;  %v5820_v31 = vpop.permute.xlu0 %5819 }
 0x20b   : > { %v2151_v37 = vrot.slane %v2143_v36, %v8336_v24  ;;  %v2158_v10 = vrot.slane %v2144_v55, %v8336_v24  ;;  %v5828_v22 = vcombine.low %v8323_v7, %v8810_v2  ;;  %v5829_v23 = vcombine.high %v8323_v7, %v8810_v2 }
 0x20c   : > { %3322 = vst.msk [vmem:[#allocation2 + $0x30] sm:$0xff] %vm3315_vm2, %v3289_v27  ;;  %3330 = vst.msk [vmem:[#allocation2 + $0x70] sm:$0xff] %vm3315_vm2, %v3297_v49  ;;  %v6017_v47 = vsel %vm3315_vm2, %v5972_v41, 0  ;;  %v6084_v53 = vsel %vm3315_vm2, %v5980_v20, 0  ;;  %v2091_v56 = vcombine.low %v8769_v16, %v2083_v59  ;;  %v2092_v46 = vcombine.high %v8769_v16, %v2083_v59 }
 0x20d   : > { %3338 = vst.msk [vmem:[#allocation2 + $0xb0] sm:$0xff] %vm3315_vm2, %v3305_v34  ;;  %3346 = vst.msk [vmem:[#allocation2 + $0xf0] sm:$0xff] %vm3315_vm2, %v3313_v45  ;;  %v2107_v39 = vcombine.low %v8772_v51, %v2090_v17  ;;  %v2108_v32 = vcombine.high %v8772_v51, %v2090_v17  ;;  %7498 = vmatpush3.bf16.xpose.msra.mxu1 %v6017_v47  ;;  %v2159_v48 = vcombine.low %v8775_v52, %v2151_v37 }
 0x20e   : > { %v2160_v43 = vcombine.high %v8775_v52, %v2151_v37  ;;  %v2175_v9 = vcombine.low %v8778_v57, %v2158_v10  ;;  %v2176_v42 = vcombine.high %v8778_v57, %v2158_v10  ;;  %7518 = vmatpush3.bf16.xpose.msra.mxu0 %v6084_v53  ;;  %v2099_v0 = vrot.slane %v2091_v56, %v8340_v30 }
 0x20f   : > { %v2106_v14 = vrot.slane %v2092_v46, %v8340_v30  ;;  %v2115_v16 = vrot.slane %v2107_v39, %v8340_v30  ;;  %v2122_v26 = vrot.slane %v2108_v32, %v8340_v30  ;;  %7499 = vmatprep.subr.bf16.mxu1 %v7926_v12  ;;  %v2167_v51 = vrot.slane %v2159_v48, %v8340_v30 }
 0x210   : > { %v2174_v15 = vrot.slane %v2160_v43, %v8340_v30  ;;  %v2183_v52 = vrot.slane %v2175_v9, %v8340_v30  ;;  %v2190_v4 = vrot.slane %v2176_v42, %v8340_v30  ;;  %7519 = vmatprep.subr.bf16.mxu0 %v7926_v12  ;;  %v5826_v43 = vpop.permute.xlu0 %5825 }
 0x211   : > { %v3147_v57 = vcombine.low %v2099_v0, %v2106_v14  ;;  %v7250_v60 = vcombine.high %v2099_v0, %v2106_v14  ;;  %v3163_v28 = vcombine.low %v2115_v16, %v2122_v26  ;;  %v7251_v3 = vcombine.high %v2115_v16, %v2122_v26 }
 0x212   : > { %v3215_v21 = vcombine.low %v2167_v51, %v2174_v15  ;;  %v7252_v25 = vcombine.high %v2167_v51, %v2174_v15  ;;  %v3231_v5 = vcombine.low %v2183_v52, %v2190_v4  ;;  %v7253_v54 = vcombine.high %v2183_v52, %v2190_v4  ;;  %v5973_v52 = vld [vmem:[#allocation2 + $0x28] sm:$0xff] }
 0x213   : > { %v3154_v29 = vrot.slane %v3147_v57, %v8336_v24  ;;  %v3162_v18 = vrot.slane %v7250_v60, %v8336_v24  ;;  %v3170_v19 = vrot.slane %v3163_v28, %v8336_v24  ;;  %v3178_v33 = vrot.slane %v7251_v3, %v8336_v24  ;;  %v5981_v4 = vld [vmem:[#allocation2 + $0x68] sm:$0xff] }
 0x214   : > { %v3222_v35 = vrot.slane %v3215_v21, %v8336_v24  ;;  %v3230_v36 = vrot.slane %v7252_v25, %v8336_v24  ;;  %v3238_v55 = vrot.slane %v3231_v5, %v8336_v24  ;;  %v3246_v41 = vrot.slane %v7253_v54, %v8336_v24 }
 0x215   : > { %v3179_v20 = vcombine.low %v3154_v29, %v3162_v18  ;;  %v3180_v27 = vcombine.high %v3154_v29, %v3162_v18  ;;  %v3195_v49 = vcombine.low %v3170_v19, %v3178_v33  ;;  %v3196_v34 = vcombine.high %v3170_v19, %v3178_v33 }
 0x216   : > { %v3247_v45 = vcombine.low %v3222_v35, %v3230_v36  ;;  %v3248_v59 = vcombine.high %v3222_v35, %v3230_v36  ;;  %v3263_v17 = vcombine.low %v3238_v55, %v3246_v41  ;;  %v3264_v37 = vcombine.high %v3238_v55, %v3246_v41  ;;  %v5974_v35 = vld [vmem:[#allocation2 + $0x30] sm:$0xff] }
 0x217   : > { %v3187_v10 = vrot.slane %v3179_v20, %v8340_v30  ;;  %v3194_v47 = vrot.slane %v3180_v27, %v8340_v30  ;;  %v3203_v53 = vrot.slane %v3195_v49, %v8340_v30  ;;  %v3210_v56 = vrot.slane %v3196_v34, %v8340_v30  ;;  %v5982_v36 = vld [vmem:[#allocation2 + $0x70] sm:$0xff] }
 0x218   : > { %v3255_v46 = vrot.slane %v3247_v45, %v8340_v30  ;;  %v3262_v39 = vrot.slane %v3248_v59, %v8340_v30  ;;  %v3271_v32 = vrot.slane %v3263_v17, %v8340_v30  ;;  %v3278_v48 = vrot.slane %v3264_v37, %v8340_v30 }
 0x219   : > { %v3211_v9 = vcombine.low %v3187_v10, %v3203_v53  ;;  %v3212_v42 = vcombine.high %v3187_v10, %v3203_v53  ;;  %v3213_v0 = vcombine.low %v3194_v47, %v3210_v56  ;;  %v3214_v14 = vcombine.high %v3194_v47, %v3210_v56 }
 0x21a   : > { %v3279_v16 = vcombine.low %v3255_v46, %v3271_v32  ;;  %v3280_v26 = vcombine.high %v3255_v46, %v3271_v32  ;;  %v3281_v51 = vcombine.low %v3262_v39, %v3278_v48  ;;  %v3282_v15 = vcombine.high %v3262_v39, %v3278_v48 }
 0x21b   : > { %v5836_v57 = vrot.slane %v5828_v22, %v8336_v24  ;;  %v5843_v60 = vrot.slane %v5829_v23, %v8336_v24  ;;  %v5844_v28 = vcombine.low %v5820_v31, %v5826_v43  ;;  %v5845_v3 = vcombine.high %v5820_v31, %v5826_v43  ;;  %v8875_v22 = vld [vmem:[%s9801_s7] ss:$0 sm:$0xff] }
 0x21c   : > { %v3290_v21 = vpack.c.bf16 %v3279_v16, %v3211_v9  ;;  %v3298_v25 = vpack.c.bf16 %v3280_v26, %v3212_v42  ;;  %v3306_v5 = vpack.c.bf16 %v3281_v51, %v3213_v0  ;;  %v3314_v54 = vpack.c.bf16 %v3282_v15, %v3214_v14 }
 0x21d   : > { %v5852_v29 = vrot.slane %v5844_v28, %v8336_v24  ;;  %v5859_v18 = vrot.slane %v5845_v3, %v8336_v24  ;;  %v6020_v19 = vsel %vm3315_vm2, %v5973_v52, 0  ;;  %v6087_v33 = vsel %vm3315_vm2, %v5981_v4, 0 }
 0x21e   : > { %3323 = vst.msk [vmem:[#allocation2 + $0x38] sm:$0xff] %vm3315_vm2, %v3290_v21  ;;  %3331 = vst.msk [vmem:[#allocation2 + $0x78] sm:$0xff] %vm3315_vm2, %v3298_v25  ;;  %7500 = vmatpush3.bf16.xpose.msra.mxu1 %v6020_v19  ;;  %7520 = vmatpush3.bf16.xpose.msra.mxu0 %v6087_v33  ;;  %v8885_v55 = vadd.f32 %v8875_v22, %v8530_v38  ;;  %v6023_v34 = vsel %vm3315_vm2, %v5974_v35, 0  ;;  %v6090_v45 = vsel %vm3315_vm2, %v5982_v36, 0  ;;  %v5987_v35 = vld [vmem:[#allocation2 + $0x98] sm:$0xff] }
 0x21f   : > { %3339 = vst.msk [vmem:[#allocation2 + $0xb8] sm:$0xff] %vm3315_vm2, %v3306_v5  ;;  %3347 = vst.msk [vmem:[#allocation2 + $0xf8] sm:$0xff] %vm3315_vm2, %v3314_v54  ;;  %v5860_v7 = vcombine.low %v5836_v57, %v5852_v29  ;;  %v5861_v2 = vcombine.high %v5836_v57, %v5852_v29  ;;  %v5876_v23 = vcombine.low %v5843_v60, %v5859_v18  ;;  %7501 = vmatprep.subr.bf16.mxu1 %v7926_v12  ;;  %v5985_v29 = vld [vmem:[#allocation2 + $0x88] sm:$0xff]  ;;  %v5995_v36 = vld [vmem:[#allocation2 + $0xd8] sm:$0xff] }
 0x220   : > { %v5877_v31 = vcombine.high %v5843_v60, %v5859_v18  ;;  %7521 = vmatprep.subr.bf16.mxu0 %v7926_v12  ;;  %v8895_v59 = vadd.f32 %v8875_v22, %v8548_v1  ;;  %3364 = vrot.lane.b32.xlu0 %v8885_v55, %s7928_s1  ;;  %v8919_v15 = vadd.f32 %v8528_v62, %v8875_v22  ;;  %v5984_v62 = vld [vmem:[#allocation2 + $0x80] sm:$0xff]  ;;  %v5993_v18 = vld [vmem:[#allocation2 + $0xc8] sm:$0xff] }
 0x221   : > { %v5868_v41 = vrot.slane %v5860_v7, %v8340_v30  ;;  %v5875_v20 = vrot.slane %v5861_v2, %v8340_v30  ;;  %v5884_v27 = vrot.slane %v5876_v23, %v8340_v30  ;;  %v8929_v57 = vadd.f32 %v8536_v61, %v8875_v22  ;;  %v5992_v61 = vld [vmem:[#allocation2 + $0xc0] sm:$0xff]  ;;  %v5986_v7 = vld [vmem:[#allocation2 + $0x90] sm:$0xff] }
 0x222   : > { %v5891_v49 = vrot.slane %v5877_v31, %v8340_v30  ;;  %3366 = vrot.lane.b32.xlu1 %v8895_v59, %s7928_s1  ;;  %v6139_v25 = vsel %vm3315_vm2, %v5984_v62, 0  ;;  %v6206_v5 = vsel %vm3315_vm2, %v5992_v61, 0  ;;  %v8953_v54 = vadd.f32 %v8875_v22, %v8676_v50  ;;  %v5994_v2 = vld [vmem:[#allocation2 + $0xd0] sm:$0xff] }
 0x223   : > { %v5896_v38 = vcombine.low %v5868_v41, %v5875_v20  ;;  %v7290_v17 = vcombine.high %v5868_v41, %v5875_v20  ;;  %v8965_v19 = vadd.f32 %v8875_v22, %v8704_v13  ;;  %v6142_v50 = vsel %vm3315_vm2, %v5985_v29, 0 }
 0x224   : > { %v5912_v37 = vcombine.low %v5884_v27, %v5891_v49  ;;  %v7291_v10 = vcombine.high %v5884_v27, %v5891_v49  ;;  %3414 = vrot.lane.b32.xlu0 %v8895_v59, %s7929_s24  ;;  %v6209_v33 = vsel %vm3315_vm2, %v5993_v18, 0  ;;  %v8977_v13 = vadd.f32 %v8674_v63, %v8875_v22  ;;  %v5988_v27 = vld [vmem:[#allocation2 + $0xa0] sm:$0xff] }
 0x225   : > { %v5903_v47 = vrot.slane %v5896_v38, %v8336_v24  ;;  %v5911_v53 = vrot.slane %v7290_v17, %v8336_v24  ;;  %v5975_v43 = vld [vmem:[#allocation2 + $0x38] sm:$0xff]  ;;  %v6145_v23 = vsel %vm3315_vm2, %v5986_v7, 0  ;;  %v6212_v31 = vsel %vm3315_vm2, %v5994_v2, 0  ;;  %v5996_v49 = vld [vmem:[#allocation2 + $0xe0] sm:$0xff]  ;;  %v5997_v17 = vld [vmem:[#allocation2 + $0xe8] sm:$0xff] }
 0x226   : > { %v5919_v56 = vrot.slane %v5912_v37, %v8336_v24  ;;  %v5927_v46 = vrot.slane %v7291_v10, %v8336_v24  ;;  %7502 = vmatpush3.bf16.xpose.msra.mxu1 %v6023_v34  ;;  %7522 = vmatpush3.bf16.xpose.msra.mxu0 %v6090_v45  ;;  %v5983_v9 = vld [vmem:[#allocation2 + $0x78] sm:$0xff]  ;;  %v6026_v26 = vsel %vm3315_vm2, %v5975_v43, 0  ;;  %v8989_v63 = vadd.f32 %v8698_v8, %v8875_v22  ;;  %v5990_v37 = vld [vmem:[#allocation2 + $0xb0] sm:$0xff]  ;;  %v9052_v43 = vpop.f32.mrb[12].mxu1 }
 0x227   : > { %v5928_v1 = vcombine.low %v5903_v47, %v5911_v53  ;;  %v5929_v39 = vcombine.high %v5903_v47, %v5911_v53  ;;  %7503 = vmatprep.subr.bf16.mxu1 %v7926_v12  ;;  %7523 = vmatprep.subr.bf16.mxu0 %v7926_v12  ;;  %v6093_v51 = vsel %vm3315_vm2, %v5983_v9, 0  ;;  %v6148_v41 = vsel %vm3315_vm2, %v5987_v35, 0  ;;  %v5998_v10 = vld [vmem:[#allocation2 + $0xf0] sm:$0xff]  ;;  %v9054_v9 = vpop.f32.mrb[13].mxu1 }
 0x228   : > { %v5944_v32 = vcombine.low %v5919_v56, %v5927_v46  ;;  %v5945_v48 = vcombine.high %v5919_v56, %v5927_v46  ;;  %3412 = vrot.lane.b32.xlu1 %v8885_v55, %s7929_s24  ;;  %3462 = vrot.lane.b32.xlu0 %v8895_v59, %s7930_s28  ;;  %v6215_v20 = vsel %vm3315_vm2, %v5995_v36, 0  ;;  %v9009_v8 = vadd.f32 %v8875_v22, %v8746_v6  ;;  %v5989_v6 = vld [vmem:[#allocation2 + $0xa8] sm:$0xff]  ;;  %v5991_v56 = vld [vmem:[#allocation2 + $0xb8] sm:$0xff] }
 0x229   : > { %v5943_v42 = vrot.slane %v5929_v39, %v8340_v30  ;;  %v5936_v14 = vrot.slane %v5928_v1, %v8340_v30  ;;  %v9017_v34 = vadd.f32 %v8875_v22, %v8762_v58  ;;  %v6151_v45 = vsel %vm3315_vm2, %v5988_v27, 0  ;;  %v5999_v46 = vld [vmem:[#allocation2 + $0xf8] sm:$0xff] }
 0x22a   : > { %v5959_v0 = vrot.slane %v5945_v48, %v8340_v30  ;;  %v5952_v16 = vrot.slane %v5944_v32, %v8340_v30  ;;  %v6218_v38 = vsel %vm3315_vm2, %v5996_v49, 0  ;;  %v6154_v58 = vsel %vm3315_vm2, %v5989_v6, 0 }
 0x22b   : > { %v6221_v22 = vsel %vm3315_vm2, %v5997_v17, 0  ;;  %v6157_v47 = vsel %vm3315_vm2, %v5990_v37, 0  ;;  %v6224_v53 = vsel %vm3315_vm2, %v5998_v10, 0  ;;  %v6160_v1 = vsel %vm3315_vm2, %v5991_v56, 0 }
 0x22c   : > { %3460 = vrot.lane.b32.xlu1 %v8885_v55, %s7930_s28  ;;  %v8923_v52 = vcombine.low %v5943_v42, %v5959_v0  ;;  %v8925_v4 = vcombine.high %v5943_v42, %v5959_v0  ;;  %v5960_v60 = vcombine.low %v5936_v14, %v5952_v16  ;;  %v5961_v28 = vcombine.high %v5936_v14, %v5952_v16  ;;  %v9056_v42 = vpop.f32.mrb[14].mxu1 }
 0x22d   : > { %3370 = vrot.lane.b32.xlu0 %v8929_v57, %s7928_s1  ;;  %v6227_v39 = vsel %vm3315_vm2, %v5999_v46, 0  ;;  %v9058_v0 = vpop.f32.mrb[15].mxu1 }
 0x22e   : > { %7504 = vmatpush3.bf16.xpose.msra.mxu1 %v6026_v26  ;;  %7524 = vmatpush3.bf16.xpose.msra.mxu0 %v6093_v51  ;;  %v5964_v3 = vpack.c.bf16 %v5960_v60, %v5960_v60  ;;  %v5965_v21 = vpack.c.bf16 %v5961_v28, %v5961_v28  ;;  %v5966_v32 = vpack.c.bf16 %v8923_v52, %v8923_v52 }
 0x22f   : > { %7529 = vmatprep.subr.bf16.mxu1 %v7926_v12  ;;  %7549 = vmatprep.subr.bf16.mxu0 %v7926_v12  ;;  %v5967_v48 = vpack.c.bf16 %v8925_v4, %v8925_v4 }
 0x230   : > { %3368 = vrot.lane.b32.xlu1 %v8919_v15, %s7928_s1 }
 0x231   : > { %3418 = vrot.lane.b32.xlu0 %v8929_v57, %s7929_s24 }
 0x234   : > { %3416 = vrot.lane.b32.xlu1 %v8919_v15, %s7929_s24 }
 0x235   : > { %7506 = vmatmul.mubr.msk.bf16.vlgmr.msra.gmra.mrb[16].mxu1 %vm3315_vm2, %v5964_v3  ;;  %7526 = vmatmul.mubr.msk.bf16.vlgmr.msra.gmra.mrb[20].mxu0 %vm3315_vm2, %v5965_v21 }
 0x236   : > { %7530 = vmatpush3.bf16.xpose.msra.mxu1 %v6139_v25  ;;  %7550 = vmatpush3.bf16.xpose.msra.mxu0 %v6206_v5 }
 0x237   : > { %7531 = vmatprep.subr.bf16.mxu1 %v7926_v12  ;;  %7551 = vmatprep.subr.bf16.mxu0 %v7926_v12 }
 0x238   : > { %3464 = vrot.lane.b32.xlu1 %v8919_v15, %s7930_s28  ;;  %7545 = vmatprep.mubr.msk.bf16.mxu1 %vm7927_vm1, %v7926_v12 }
 0x239   : > { %7565 = vmatprep.mubr.msk.bf16.mxu0 %vm7927_vm1, %v7926_v12  ;;  %3466 = vrot.lane.b32.xlu0 %v8929_v57, %s7930_s28 }
 0x23c   : > { %3372 = vrot.lane.b32.xlu1 %v8953_v54, %s7928_s1 }
 0x23d   : > { %3374 = vrot.lane.b32.xlu0 %v8965_v19, %s7928_s1 }
 0x23e   : > { %7532 = vmatpush3.bf16.xpose.msra.mxu1 %v6142_v50  ;;  %7552 = vmatpush3.bf16.xpose.msra.mxu0 %v6209_v33 }
 0x23f   : > { %7533 = vmatprep.subr.bf16.mxu1 %v7926_v12  ;;  %7553 = vmatprep.subr.bf16.mxu0 %v7926_v12 }
 0x240   : > { %3420 = vrot.lane.b32.xlu1 %v8953_v54, %s7929_s24 }
 0x241   : > { %3422 = vrot.lane.b32.xlu0 %v8965_v19, %s7929_s24 }
 0x244   : > { %3468 = vrot.lane.b32.xlu1 %v8953_v54, %s7930_s28 }
 0x245   : > { %3470 = vrot.lane.b32.xlu0 %v8965_v19, %s7930_s28 }
 0x246   : > { %7534 = vmatpush3.bf16.xpose.msra.mxu1 %v6145_v23  ;;  %7554 = vmatpush3.bf16.xpose.msra.mxu0 %v6212_v31 }
 0x247   : > { %7535 = vmatprep.subr.bf16.mxu1 %v7926_v12  ;;  %7555 = vmatprep.subr.bf16.mxu0 %v7926_v12 }
 0x248   : > { %3376 = vrot.lane.b32.xlu1 %v8977_v13, %s7928_s1 }
 0x249   : > { %3378 = vrot.lane.b32.xlu0 %v8989_v63, %s7928_s1 }
 0x24c   : > { %3424 = vrot.lane.b32.xlu1 %v8977_v13, %s7929_s24 }
 0x24d   : > { %3426 = vrot.lane.b32.xlu0 %v8989_v63, %s7929_s24 }
 0x24e   : > { %7536 = vmatpush3.bf16.xpose.msra.mxu1 %v6148_v41  ;;  %7556 = vmatpush3.bf16.xpose.msra.mxu0 %v6215_v20 }
 0x24f   : > { %7537 = vmatprep.subr.bf16.mxu1 %v7926_v12  ;;  %7557 = vmatprep.subr.bf16.mxu0 %v7926_v12 }
 0x250   : > { %3472 = vrot.lane.b32.xlu1 %v8977_v13, %s7930_s28 }
 0x251   : > { %3474 = vrot.lane.b32.xlu0 %v8989_v63, %s7930_s28 }
 0x254   : > { %3380 = vrot.lane.b32.xlu1 %v9009_v8, %s7928_s1 }
 0x255   : > { %3382 = vrot.lane.b32.xlu0 %v9017_v34, %s7928_s1 }
 0x256   : > { %7538 = vmatpush3.bf16.xpose.msra.mxu1 %v6151_v45  ;;  %7558 = vmatpush3.bf16.xpose.msra.mxu0 %v6218_v38 }
 0x257   : > { %7539 = vmatprep.subr.bf16.mxu1 %v7926_v12  ;;  %7559 = vmatprep.subr.bf16.mxu0 %v7926_v12 }
 0x258   : > { %3428 = vrot.lane.b32.xlu1 %v9009_v8, %s7929_s24 }
 0x259   : > { %3430 = vrot.lane.b32.xlu0 %v9017_v34, %s7929_s24 }
 0x25c   : > { %3476 = vrot.lane.b32.xlu1 %v9009_v8, %s7930_s28 }
 0x25e   : > { %7540 = vmatpush3.bf16.xpose.msra.mxu1 %v6154_v58  ;;  %7560 = vmatpush3.bf16.xpose.msra.mxu0 %v6221_v22 }
 0x25f   : > { %7541 = vmatprep.subr.bf16.mxu1 %v7926_v12  ;;  %7561 = vmatprep.subr.bf16.mxu0 %v7926_v12 }
 0x266   : > { %7542 = vmatpush3.bf16.xpose.msra.mxu1 %v6157_v47  ;;  %7562 = vmatpush3.bf16.xpose.msra.mxu0 %v6224_v53 }
 0x267   : > { %7543 = vmatprep.subr.bf16.mxu1 %v7926_v12  ;;  %7563 = vmatprep.subr.bf16.mxu0 %v7926_v12 }
 0x26e   : > { %7544 = vmatpush3.bf16.xpose.msra.mxu1 %v6160_v1  ;;  %7564 = vmatpush3.bf16.xpose.msra.mxu0 %v6227_v39 }
 0x26f   : > { %7580 = vmatprep.subr.bf16.mxu1 %v7926_v12 }
 0x275   : > { %7546 = vmatmul.mubr.msk.bf16.vlgmr.msra.gmra.mrb[20].mxu1 %vm3315_vm2, %v5966_v32  ;;  %7566 = vmatmul.mubr.msk.bf16.vlgmr.msra.gmra.mrb[24].mxu0 %vm3315_vm2, %v5967_v48 }
 0x276   : > { %7577 = vmatprep.mubr.msk.f32.mxu0 %vm7927_vm1, %v7926_v12  ;;  %7596 = vmatprep.mubr.msk.bf16.mxu1 %vm7927_vm1, %v7926_v12 }
 0x292   : > { %v3365_v14 = vpop.permute.xlu0 %3364 }
 0x294   : > { %v3367_v16 = vpop.permute.xlu1 %3366 }
 0x296   : > { %v3415_v4 = vpop.permute.xlu0 %3414 }
 0x297   : > { %v3576_v60 = vcombine.low %v8895_v59, %v3415_v4  ;;  %v3577_v28 = vcombine.high %v8895_v59, %v3415_v4 }
 0x299   : > { %v3584_v29 = vrot.slane %v3576_v60, %v8336_v24  ;;  %v3591_v18 = vrot.slane %v3577_v28, %v8336_v24 }
 0x29a   : > { %v3413_v26 = vpop.permute.xlu1 %3412  ;;  %v3463_v5 = vpop.permute.xlu0 %3462 }
 0x29b   : > { %v3508_v51 = vcombine.low %v8885_v55, %v3413_v26  ;;  %v3509_v52 = vcombine.high %v8885_v55, %v3413_v26  ;;  %v3592_v50 = vcombine.low %v3367_v16, %v3463_v5  ;;  %v3593_v33 = vcombine.high %v3367_v16, %v3463_v5 }
 0x29d   : > { %v3516_v61 = vrot.slane %v3508_v51, %v8336_v24  ;;  %v3523_v3 = vrot.slane %v3509_v52, %v8336_v24  ;;  %v3600_v59 = vrot.slane %v3592_v50, %v8336_v24  ;;  %v3607_v2 = vrot.slane %v3593_v33, %v8336_v24 }
 0x29e   : > { %v3461_v62 = vpop.permute.xlu1 %3460 }
 0x29f   : > { %v3524_v21 = vcombine.low %v3365_v14, %v3461_v62  ;;  %v3525_v25 = vcombine.high %v3365_v14, %v3461_v62  ;;  %v3608_v20 = vcombine.low %v3584_v29, %v3600_v59  ;;  %v3609_v27 = vcombine.high %v3584_v29, %v3600_v59  ;;  %v9078_v22 = vpop.permute.xlu0 %3370 }
 0x2a0   : > { %v3624_v49 = vcombine.low %v3591_v18, %v3607_v2  ;;  %v3625_v45 = vcombine.high %v3591_v18, %v3607_v2 }
 0x2a1   : > { %v3532_v55 = vrot.slane %v3524_v21, %v8336_v24  ;;  %v3539_v7 = vrot.slane %v3525_v25, %v8336_v24  ;;  %v3616_v37 = vrot.slane %v3608_v20, %v8340_v30  ;;  %v3623_v10 = vrot.slane %v3609_v27, %v8340_v30 }
 0x2a2   : > { %v9072_v23 = vpop.permute.xlu1 %3368  ;;  %v3632_v47 = vrot.slane %v3624_v49, %v8340_v30  ;;  %v3639_v53 = vrot.slane %v3625_v45, %v8340_v30 }
 0x2a3   : > { %v3540_v31 = vcombine.low %v3516_v61, %v3532_v55  ;;  %v3541_v35 = vcombine.high %v3516_v61, %v3532_v55  ;;  %v3556_v36 = vcombine.low %v3523_v3, %v3539_v7  ;;  %v3557_v41 = vcombine.high %v3523_v3, %v3539_v7  ;;  %v3419_v50 = vpop.permute.xlu0 %3418 }
 0x2a4   : > { %v4664_v48 = vcombine.low %v3616_v37, %v3623_v10  ;;  %v7256_v14 = vcombine.high %v3616_v37, %v3623_v10  ;;  %v4680_v16 = vcombine.low %v3632_v47, %v3639_v53  ;;  %v7257_v26 = vcombine.high %v3632_v47, %v3639_v53 }
 0x2a5   : > { %v3548_v38 = vrot.slane %v3540_v31, %v8340_v30  ;;  %v3555_v6 = vrot.slane %v3541_v35, %v8340_v30  ;;  %v3564_v17 = vrot.slane %v3556_v36, %v8340_v30  ;;  %v3571_v58 = vrot.slane %v3557_v41, %v8340_v30 }
 0x2a6   : > { %v3417_v56 = vpop.permute.xlu1 %3416  ;;  %v4671_v28 = vrot.slane %v4664_v48, %v8336_v24  ;;  %v4679_v62 = vrot.slane %v7256_v14, %v8336_v24  ;;  %v4687_v61 = vrot.slane %v4680_v16, %v8336_v24  ;;  %v4695_v3 = vrot.slane %v7257_v26, %v8336_v24 }
 0x2a7   : > { %v4596_v46 = vcombine.low %v3548_v38, %v3555_v6  ;;  %v7254_v1 = vcombine.high %v3548_v38, %v3555_v6  ;;  %v4612_v39 = vcombine.low %v3564_v17, %v3571_v58  ;;  %v7255_v32 = vcombine.high %v3564_v17, %v3571_v58 }
 0x2a8   : > { %v4696_v33 = vcombine.low %v4671_v28, %v4679_v62  ;;  %v4697_v55 = vcombine.high %v4671_v28, %v4679_v62  ;;  %v4712_v7 = vcombine.low %v4687_v61, %v4695_v3  ;;  %v4713_v59 = vcombine.high %v4687_v61, %v4695_v3 }
 0x2a9   : > { %v4603_v51 = vrot.slane %v4596_v46, %v8336_v24  ;;  %v4611_v52 = vrot.slane %v7254_v1, %v8336_v24  ;;  %v4619_v4 = vrot.slane %v4612_v39, %v8336_v24  ;;  %v4627_v60 = vrot.slane %v7255_v32, %v8336_v24 }
 0x2aa   : > { %v3465_v21 = vpop.permute.xlu1 %3464  ;;  %v4704_v41 = vrot.slane %v4696_v33, %v8340_v30  ;;  %v4711_v20 = vrot.slane %v4697_v55, %v8340_v30  ;;  %v4720_v27 = vrot.slane %v4712_v7, %v8340_v30  ;;  %v4727_v49 = vrot.slane %v4713_v59, %v8340_v30 }
 0x2ab   : > { %v4628_v25 = vcombine.low %v4603_v51, %v4611_v52  ;;  %v4629_v5 = vcombine.high %v4603_v51, %v4611_v52  ;;  %v4644_v29 = vcombine.low %v4619_v4, %v4627_v60  ;;  %v4645_v18 = vcombine.high %v4619_v4, %v4627_v60  ;;  %v3467_v48 = vpop.permute.xlu0 %3466 }
 0x2ac   : > { %v4728_v37 = vcombine.low %v4704_v41, %v4720_v27  ;;  %v4729_v10 = vcombine.high %v4704_v41, %v4720_v27  ;;  %v4730_v47 = vcombine.low %v4711_v20, %v4727_v49  ;;  %v4731_v53 = vcombine.high %v4711_v20, %v4727_v49 }
 0x2ad   : > { %v4636_v2 = vrot.slane %v4628_v25, %v8340_v30  ;;  %v4643_v31 = vrot.slane %v4629_v5, %v8340_v30  ;;  %v4652_v35 = vrot.slane %v4644_v29, %v8340_v30  ;;  %v4659_v36 = vrot.slane %v4645_v18, %v8340_v30 }
 0x2ae   : > { %v9100_v45 = vpop.permute.xlu1 %3372  ;;  %v3644_v46 = vcombine.low %v8919_v15, %v3417_v56  ;;  %v3645_v1 = vcombine.high %v8919_v15, %v3417_v56  ;;  %v3712_v39 = vcombine.low %v8929_v57, %v3419_v50  ;;  %v3713_v32 = vcombine.high %v8929_v57, %v3419_v50 }
 0x2af   : > { %v4660_v38 = vcombine.low %v4636_v2, %v4652_v35  ;;  %v4661_v6 = vcombine.high %v4636_v2, %v4652_v35  ;;  %v4662_v17 = vcombine.low %v4643_v31, %v4659_v36  ;;  %v4663_v58 = vcombine.high %v4643_v31, %v4659_v36 }
 0x2b0   : > { %v3652_v4 = vrot.slane %v3644_v46, %v8336_v24  ;;  %v3659_v60 = vrot.slane %v3645_v1, %v8336_v24  ;;  %v3660_v15 = vcombine.low %v9072_v23, %v3465_v21  ;;  %v3661_v57 = vcombine.high %v9072_v23, %v3465_v21 }
 0x2b1   : > { %v5684_v14 = vpack.c.bf16 %v4728_v37, %v4660_v38  ;;  %v5692_v16 = vpack.c.bf16 %v4729_v10, %v4661_v6  ;;  %v5700_v26 = vpack.c.bf16 %v4730_v47, %v4662_v17  ;;  %v5708_v51 = vpack.c.bf16 %v4731_v53, %v4663_v58 }
 0x2b2   : > { %v3421_v52 = vpop.permute.xlu1 %3420  ;;  %v3728_v56 = vcombine.low %v9078_v22, %v3467_v48  ;;  %v3729_v28 = vcombine.high %v9078_v22, %v3467_v48  ;;  %v3720_v62 = vrot.slane %v3712_v39, %v8336_v24  ;;  %v3727_v61 = vrot.slane %v3713_v32, %v8336_v24  ;;  %v9144_v39 = vpop.permute.xlu0 %3374 }
 0x2b3   : > { %5716 = vst.msk [vmem:[#allocation3] sm:$0xff] %vm3315_vm2, %v5684_v14  ;;  %5724 = vst.msk [vmem:[#allocation3 + $0x40] sm:$0xff] %vm3315_vm2, %v5692_v16  ;;  %v3780_v3 = vcombine.low %v8953_v54, %v3421_v52  ;;  %v3781_v25 = vcombine.high %v8953_v54, %v3421_v52  ;;  %v3668_v5 = vrot.slane %v3660_v15, %v8336_v24 }
 0x2b4   : > { %5732 = vst.msk [vmem:[#allocation3 + $0x80] sm:$0xff] %vm3315_vm2, %v5700_v26  ;;  %5740 = vst.msk [vmem:[#allocation3 + $0xc0] sm:$0xff] %vm3315_vm2, %v5708_v51  ;;  %v3675_v29 = vrot.slane %v3661_v57, %v8336_v24  ;;  %v3736_v18 = vrot.slane %v3728_v56, %v8336_v24  ;;  %v3743_v23 = vrot.slane %v3729_v28, %v8336_v24 }
 0x2b5   : > { %v9127_v22 = vrot.slane %v3780_v3, %v8336_v24  ;;  %v9130_v50 = vrot.slane %v3781_v25, %v8336_v24  ;;  %v3676_v55 = vcombine.low %v3652_v4, %v3668_v5  ;;  %v3677_v7 = vcombine.high %v3652_v4, %v3668_v5 }
 0x2b6   : > { %v9124_v21 = vpop.permute.xlu1 %3468  ;;  %v3692_v59 = vcombine.low %v3659_v60, %v3675_v29  ;;  %v3693_v2 = vcombine.high %v3659_v60, %v3675_v29  ;;  %v3744_v31 = vcombine.low %v3720_v62, %v3736_v18  ;;  %v3745_v35 = vcombine.high %v3720_v62, %v3736_v18 }
 0x2b7   : > { %v3796_v33 = vcombine.low %v9100_v45, %v9124_v21  ;;  %v3797_v54 = vcombine.high %v9100_v45, %v9124_v21  ;;  %v3760_v36 = vcombine.low %v3727_v61, %v3743_v23  ;;  %v3761_v41 = vcombine.high %v3727_v61, %v3743_v23 }
 0x2b8   : > { %v3684_v20 = vrot.slane %v3676_v55, %v8340_v30  ;;  %v3691_v27 = vrot.slane %v3677_v7, %v8340_v30  ;;  %v3700_v49 = vrot.slane %v3692_v59, %v8340_v30  ;;  %v3707_v38 = vrot.slane %v3693_v2, %v8340_v30  ;;  %v3423_v2 = vpop.permute.xlu0 %3422 }
 0x2b9   : > { %v3752_v6 = vrot.slane %v3744_v31, %v8340_v30  ;;  %v3759_v17 = vrot.slane %v3745_v35, %v8340_v30  ;;  %v3768_v58 = vrot.slane %v3760_v36, %v8340_v30  ;;  %v3775_v37 = vrot.slane %v3761_v41, %v8340_v30 }
 0x2ba   : > { %v6394_v10 = vld [vmem:[#allocation3] sm:$0xff]  ;;  %v4732_v47 = vcombine.low %v3684_v20, %v3691_v27  ;;  %v7258_v53 = vcombine.high %v3684_v20, %v3691_v27  ;;  %v4748_v46 = vcombine.low %v3700_v49, %v3707_v38  ;;  %v7259_v1 = vcombine.high %v3700_v49, %v3707_v38 }
 0x2bb   : > { %7581 = vmatpush3.bf16.msra.mxu1 %v6394_v10  ;;  %v4800_v32 = vcombine.low %v3752_v6, %v3759_v17  ;;  %v7260_v48 = vcombine.high %v3752_v6, %v3759_v17  ;;  %v4816_v14 = vcombine.low %v3768_v58, %v3775_v37  ;;  %v7261_v16 = vcombine.high %v3768_v58, %v3775_v37  ;;  %v9163_v6 = vpop.permute.xlu1 %3376 }
 0x2bc   : > { %7582 = vmatprep.subr.bf16.mxu1 %v7926_v12  ;;  %v4739_v26 = vrot.slane %v4732_v47, %v8336_v24  ;;  %v4747_v51 = vrot.slane %v7258_v53, %v8336_v24  ;;  %v4755_v52 = vrot.slane %v4748_v46, %v8336_v24  ;;  %v4763_v4 = vrot.slane %v7259_v1, %v8336_v24 }
 0x2bd   : > { %v4807_v60 = vrot.slane %v4800_v32, %v8336_v24  ;;  %v4815_v15 = vrot.slane %v7260_v48, %v8336_v24  ;;  %v4823_v57 = vrot.slane %v4816_v14, %v8336_v24  ;;  %v4831_v56 = vrot.slane %v7261_v16, %v8336_v24 }
 0x2be   : > { %v4764_v28 = vcombine.low %v4739_v26, %v4747_v51  ;;  %v4765_v62 = vcombine.high %v4739_v26, %v4747_v51  ;;  %v4780_v61 = vcombine.low %v4755_v52, %v4763_v4  ;;  %v4781_v3 = vcombine.high %v4755_v52, %v4763_v4  ;;  %v3471_v4 = vpop.permute.xlu0 %3470 }
 0x2bf   : > { %v4832_v25 = vcombine.low %v4807_v60, %v4815_v15  ;;  %v4833_v5 = vcombine.high %v4807_v60, %v4815_v15  ;;  %v4848_v29 = vcombine.low %v4823_v57, %v4831_v56  ;;  %v4849_v18 = vcombine.high %v4823_v57, %v4831_v56  ;;  %v3425_v57 = vpop.permute.xlu1 %3424 }
 0x2c0   : > { %v4772_v23 = vrot.slane %v4764_v28, %v8340_v30  ;;  %v4779_v55 = vrot.slane %v4765_v62, %v8340_v30  ;;  %v4788_v7 = vrot.slane %v4780_v61, %v8340_v30  ;;  %v4795_v59 = vrot.slane %v4781_v3, %v8340_v30 }
 0x2c1   : > { %v4840_v31 = vrot.slane %v4832_v25, %v8340_v30  ;;  %v4847_v35 = vrot.slane %v4833_v5, %v8340_v30  ;;  %v4856_v36 = vrot.slane %v4848_v29, %v8340_v30  ;;  %v4863_v41 = vrot.slane %v4849_v18, %v8340_v30 }
 0x2c2   : > { %v4796_v20 = vcombine.low %v4772_v23, %v4788_v7  ;;  %v4797_v27 = vcombine.high %v4772_v23, %v4788_v7  ;;  %v4798_v49 = vcombine.low %v4779_v55, %v4795_v59  ;;  %v4799_v38 = vcombine.high %v4779_v55, %v4795_v59 }
 0x2c3   : > { %v4864_v17 = vcombine.low %v4840_v31, %v4856_v36  ;;  %v4865_v58 = vcombine.high %v4840_v31, %v4856_v36  ;;  %v4866_v37 = vcombine.low %v4847_v35, %v4863_v41  ;;  %v4867_v10 = vcombine.high %v4847_v35, %v4863_v41  ;;  %v9199_v35 = vpop.permute.xlu0 %3378 }
 0x2c4   : > { %v3804_v47 = vrot.slane %v3796_v33, %v8336_v24  ;;  %v3811_v53 = vrot.slane %v3797_v54, %v8336_v24  ;;  %v3848_v46 = vcombine.low %v8965_v19, %v3423_v2  ;;  %v3849_v1 = vcombine.high %v8965_v19, %v3423_v2 }
 0x2c5   : > { %v5685_v32 = vpack.c.bf16 %v4864_v17, %v4796_v20  ;;  %v5693_v48 = vpack.c.bf16 %v4865_v58, %v4797_v27  ;;  %v5701_v14 = vpack.c.bf16 %v4866_v37, %v4798_v49  ;;  %v5709_v16 = vpack.c.bf16 %v4867_v10, %v4799_v38 }
 0x2c6   : > { %v3812_v26 = vcombine.low %v9127_v22, %v3804_v47  ;;  %v3813_v51 = vcombine.high %v9127_v22, %v3804_v47  ;;  %v3828_v52 = vcombine.low %v9130_v50, %v3811_v53  ;;  %v3829_v33 = vcombine.high %v9130_v50, %v3811_v53 }
 0x2c7   : > { %5717 = vst.msk [vmem:[#allocation3 + $0x8] sm:$0xff] %vm3315_vm2, %v5685_v32  ;;  %5725 = vst.msk [vmem:[#allocation3 + $0x48] sm:$0xff] %vm3315_vm2, %v5693_v48  ;;  %v3856_v19 = vrot.slane %v3848_v46, %v8336_v24  ;;  %v3863_v45 = vrot.slane %v3849_v1, %v8336_v24  ;;  %v3864_v21 = vcombine.low %v9144_v39, %v3471_v4 }
 0x2c8   : > { %5733 = vst.msk [vmem:[#allocation3 + $0x88] sm:$0xff] %vm3315_vm2, %v5701_v14  ;;  %5741 = vst.msk [vmem:[#allocation3 + $0xc8] sm:$0xff] %vm3315_vm2, %v5709_v16  ;;  %v3865_v22 = vcombine.high %v9144_v39, %v3471_v4  ;;  %v3820_v54 = vrot.slane %v3812_v26, %v8340_v30  ;;  %v3827_v50 = vrot.slane %v3813_v51, %v8340_v30 }
 0x2c9   : > { %v3836_v60 = vrot.slane %v3828_v52, %v8340_v30  ;;  %v3843_v15 = vrot.slane %v3829_v33, %v8340_v30  ;;  %v3872_v56 = vrot.slane %v3864_v21, %v8336_v24  ;;  %v3916_v62 = vcombine.low %v8977_v13, %v3425_v57  ;;  %v3473_v52 = vpop.permute.xlu1 %3472  ;;  %v3427_v21 = vpop.permute.xlu0 %3426 }
 0x2ca   : > { %v3879_v28 = vrot.slane %v3865_v22, %v8336_v24  ;;  %v3917_v61 = vcombine.high %v8977_v13, %v3425_v57  ;;  %v4868_v3 = vcombine.low %v3820_v54, %v3827_v50  ;;  %v7262_v25 = vcombine.high %v3820_v54, %v3827_v50 }
 0x2cb   : > { %v4884_v39 = vcombine.low %v3836_v60, %v3843_v15  ;;  %v7263_v5 = vcombine.high %v3836_v60, %v3843_v15  ;;  %v3880_v29 = vcombine.low %v3856_v19, %v3872_v56  ;;  %v3881_v18 = vcombine.high %v3856_v19, %v3872_v56 }
 0x2cc   : > { %v3896_v23 = vcombine.low %v3863_v45, %v3879_v28  ;;  %v3897_v55 = vcombine.high %v3863_v45, %v3879_v28  ;;  %v4875_v7 = vrot.slane %v4868_v3, %v8336_v24  ;;  %v4883_v59 = vrot.slane %v7262_v25, %v8336_v24 }
 0x2cd   : > { %v4891_v2 = vrot.slane %v4884_v39, %v8336_v24  ;;  %v4899_v31 = vrot.slane %v7263_v5, %v8336_v24  ;;  %v3888_v13 = vrot.slane %v3880_v29, %v8340_v30  ;;  %v3895_v36 = vrot.slane %v3881_v18, %v8340_v30 }
 0x2ce   : > { %v3904_v41 = vrot.slane %v3896_v23, %v8340_v30  ;;  %v3911_v20 = vrot.slane %v3897_v55, %v8340_v30  ;;  %v4900_v27 = vcombine.low %v4875_v7, %v4883_v59  ;;  %v4901_v49 = vcombine.high %v4875_v7, %v4883_v59  ;;  %v6395_v58 = vld [vmem:[#allocation3 + $0x8] sm:$0xff]  ;;  %v9226_v59 = vpop.permute.xlu1 %3380 }
 0x2cf   : > { %v4916_v38 = vcombine.low %v4891_v2, %v4899_v31  ;;  %v4917_v17 = vcombine.high %v4891_v2, %v4899_v31  ;;  %v4936_v37 = vcombine.low %v3888_v13, %v3895_v36  ;;  %v7264_v10 = vcombine.high %v3888_v13, %v3895_v36  ;;  %7583 = vmatpush3.bf16.msra.mxu1 %v6395_v58 }
 0x2d0   : > { %v4952_v47 = vcombine.low %v3904_v41, %v3911_v20  ;;  %v7265_v53 = vcombine.high %v3904_v41, %v3911_v20  ;;  %v4908_v46 = vrot.slane %v4900_v27, %v8340_v30  ;;  %v4915_v1 = vrot.slane %v4901_v49, %v8340_v30  ;;  %7584 = vmatprep.subr.bf16.mxu1 %v7926_v12  ;;  %v3475_v41 = vpop.permute.xlu0 %3474 }
 0x2d1   : > { %v4924_v32 = vrot.slane %v4916_v38, %v8340_v30  ;;  %v4931_v48 = vrot.slane %v4917_v17, %v8340_v30  ;;  %v4943_v14 = vrot.slane %v4936_v37, %v8336_v24  ;;  %v4951_v16 = vrot.slane %v7264_v10, %v8336_v24 }
 0x2d2   : > { %v4959_v26 = vrot.slane %v4952_v47, %v8336_v24  ;;  %v4967_v51 = vrot.slane %v7265_v53, %v8336_v24  ;;  %v3924_v15 = vrot.slane %v3916_v62, %v8336_v24  ;;  %v3931_v57 = vrot.slane %v3917_v61, %v8336_v24 }
 0x2d3   : > { %v4932_v33 = vcombine.low %v4908_v46, %v4924_v32  ;;  %v4933_v4 = vcombine.high %v4908_v46, %v4924_v32  ;;  %v4934_v19 = vcombine.low %v4915_v1, %v4931_v48  ;;  %v4935_v45 = vcombine.high %v4915_v1, %v4931_v48 }
 0x2d4   : > { %v4968_v22 = vcombine.low %v4943_v14, %v4951_v16  ;;  %v4969_v54 = vcombine.high %v4943_v14, %v4951_v16  ;;  %v4984_v50 = vcombine.low %v4959_v26, %v4967_v51  ;;  %v4985_v60 = vcombine.high %v4959_v26, %v4967_v51  ;;  %v3429_v51 = vpop.permute.xlu1 %3428 }
 0x2d5   : > { %v3932_v56 = vcombine.low %v9163_v6, %v3473_v52  ;;  %v3933_v28 = vcombine.high %v9163_v6, %v3473_v52  ;;  %v3984_v62 = vcombine.low %v8989_v63, %v3427_v21  ;;  %v3985_v61 = vcombine.high %v8989_v63, %v3427_v21 }
 0x2d6   : > { %v4976_v3 = vrot.slane %v4968_v22, %v8340_v30  ;;  %v4983_v25 = vrot.slane %v4969_v54, %v8340_v30  ;;  %v4992_v39 = vrot.slane %v4984_v50, %v8340_v30  ;;  %v4999_v5 = vrot.slane %v4985_v60, %v8340_v30 }
 0x2d7   : > { %v3940_v29 = vrot.slane %v3932_v56, %v8336_v24  ;;  %v3947_v18 = vrot.slane %v3933_v28, %v8336_v24  ;;  %v3992_v10 = vrot.slane %v3984_v62, %v8336_v24  ;;  %v3999_v47 = vrot.slane %v3985_v61, %v8336_v24 }
 0x2d8   : > { %v5000_v23 = vcombine.low %v4976_v3, %v4992_v39  ;;  %v5001_v55 = vcombine.high %v4976_v3, %v4992_v39  ;;  %v5002_v7 = vcombine.low %v4983_v25, %v4999_v5  ;;  %v5003_v6 = vcombine.high %v4983_v25, %v4999_v5 }
 0x2d9   : > { %v3948_v2 = vcombine.low %v3924_v15, %v3940_v29  ;;  %v3949_v31 = vcombine.high %v3924_v15, %v3940_v29  ;;  %v3964_v13 = vcombine.low %v3931_v57, %v3947_v18  ;;  %v3965_v36 = vcombine.high %v3931_v57, %v3947_v18 }
 0x2da   : > { %v5686_v20 = vpack.c.bf16 %v5000_v23, %v4932_v33  ;;  %v5694_v27 = vpack.c.bf16 %v5001_v55, %v4933_v4  ;;  %v5702_v49 = vpack.c.bf16 %v5002_v7, %v4934_v19  ;;  %v5710_v38 = vpack.c.bf16 %v5003_v6, %v4935_v45  ;;  %v3477_v7 = vpop.permute.xlu1 %3476 }
 0x2db   : > { %v3956_v17 = vrot.slane %v3948_v2, %v8340_v30  ;;  %v3963_v58 = vrot.slane %v3949_v31, %v8340_v30  ;;  %v3972_v63 = vrot.slane %v3964_v13, %v8340_v30  ;;  %v3979_v37 = vrot.slane %v3965_v36, %v8340_v30 }
 0x2dc   : > { %5718 = vst.msk [vmem:[#allocation3 + $0x10] sm:$0xff] %vm3315_vm2, %v5686_v20  ;;  %5726 = vst.msk [vmem:[#allocation3 + $0x50] sm:$0xff] %vm3315_vm2, %v5694_v27  ;;  %v4000_v53 = vcombine.low %v9199_v35, %v3475_v41  ;;  %v4001_v46 = vcombine.high %v9199_v35, %v3475_v41  ;;  %v4052_v5 = vcombine.low %v9009_v8, %v3429_v51 }
 0x2dd   : > { %5734 = vst.msk [vmem:[#allocation3 + $0x90] sm:$0xff] %vm3315_vm2, %v5702_v49  ;;  %5742 = vst.msk [vmem:[#allocation3 + $0xd0] sm:$0xff] %vm3315_vm2, %v5710_v38  ;;  %v5004_v1 = vcombine.low %v3956_v17, %v3963_v58  ;;  %v7266_v32 = vcombine.high %v3956_v17, %v3963_v58  ;;  %v5020_v48 = vcombine.low %v3972_v63, %v3979_v37 }
 0x2de   : > { %v7267_v14 = vcombine.high %v3972_v63, %v3979_v37  ;;  %v4008_v16 = vrot.slane %v4000_v53, %v8336_v24  ;;  %v4015_v26 = vrot.slane %v4001_v46, %v8336_v24  ;;  %v4053_v29 = vcombine.high %v9009_v8, %v3429_v51 }
 0x2df   : > { %v5011_v52 = vrot.slane %v5004_v1, %v8336_v24  ;;  %v5019_v33 = vrot.slane %v7266_v32, %v8336_v24  ;;  %v5027_v4 = vrot.slane %v5020_v48, %v8336_v24  ;;  %v4060_v27 = vrot.slane %v4052_v5, %v8336_v24 }
 0x2e0   : > { %v5035_v19 = vrot.slane %v7267_v14, %v8336_v24  ;;  %v4016_v45 = vcombine.low %v3992_v10, %v4008_v16  ;;  %v4017_v21 = vcombine.high %v3992_v10, %v4008_v16  ;;  %v4032_v35 = vcombine.low %v3999_v47, %v4015_v26 }
 0x2e1   : > { %v4033_v22 = vcombine.high %v3999_v47, %v4015_v26  ;;  %v5036_v54 = vcombine.low %v5011_v52, %v5019_v33  ;;  %v5037_v50 = vcombine.high %v5011_v52, %v5019_v33  ;;  %v4067_v49 = vrot.slane %v4053_v29, %v8336_v24 }
 0x2e2   : > { %v5052_v60 = vcombine.low %v5027_v4, %v5035_v19  ;;  %v5053_v15 = vcombine.high %v5027_v4, %v5035_v19  ;;  %v4024_v57 = vrot.slane %v4016_v45, %v8340_v30  ;;  %v4031_v56 = vrot.slane %v4017_v21, %v8340_v30 }
 0x2e3   : > { %v4040_v28 = vrot.slane %v4032_v35, %v8340_v30  ;;  %v4047_v3 = vrot.slane %v4033_v22, %v8340_v30  ;;  %v5044_v25 = vrot.slane %v5036_v54, %v8340_v30  ;;  %v6396_v18 = vld [vmem:[#allocation3 + $0x10] sm:$0xff]  ;;  %v5051_v6 = vrot.slane %v5037_v50, %v8340_v30 }
 0x2e4   : > { %v5060_v39 = vrot.slane %v5052_v60, %v8340_v30  ;;  %v5072_v62 = vcombine.low %v4024_v57, %v4031_v56  ;;  %v7268_v61 = vcombine.high %v4024_v57, %v4031_v56  ;;  %7585 = vmatpush3.bf16.msra.mxu1 %v6396_v18  ;;  %v5067_v2 = vrot.slane %v5053_v15, %v8340_v30 }
 0x2e5   : > { %v5088_v23 = vcombine.low %v4040_v28, %v4047_v3  ;;  %v7269_v55 = vcombine.high %v4040_v28, %v4047_v3  ;;  %7586 = vmatprep.subr.bf16.mxu1 %v7926_v12  ;;  %v4068_v38 = vcombine.low %v9226_v59, %v3477_v7  ;;  %v4069_v17 = vcombine.high %v9226_v59, %v3477_v7 }
 0x2e6   : > { %v5068_v31 = vcombine.low %v5044_v25, %v5060_v39  ;;  %v5069_v13 = vcombine.high %v5044_v25, %v5060_v39  ;;  %v5079_v36 = vrot.slane %v5072_v62, %v8336_v24  ;;  %v5087_v41 = vrot.slane %v7268_v61, %v8336_v24 }
 0x2e7   : > { %v5095_v8 = vrot.slane %v5088_v23, %v8336_v24  ;;  %v5103_v20 = vrot.slane %v7269_v55, %v8336_v24  ;;  %v5070_v47 = vcombine.low %v5051_v6, %v5067_v2  ;;  %v5071_v53 = vcombine.high %v5051_v6, %v5067_v2 }
 0x2e8   : > { %v5104_v58 = vcombine.low %v5079_v36, %v5087_v41  ;;  %v5105_v63 = vcombine.high %v5079_v36, %v5087_v41  ;;  %v4076_v46 = vrot.slane %v4068_v38, %v8336_v24  ;;  %v4083_v1 = vrot.slane %v4069_v17, %v8336_v24 }
 0x2e9   : > { %v5120_v37 = vcombine.low %v5095_v8, %v5103_v20  ;;  %v5121_v10 = vcombine.high %v5095_v8, %v5103_v20 }
 0x2ea   : > { %v5112_v32 = vrot.slane %v5104_v58, %v8340_v30  ;;  %v5119_v48 = vrot.slane %v5105_v63, %v8340_v30  ;;  %v4084_v26 = vcombine.low %v4060_v27, %v4076_v46  ;;  %v4085_v59 = vcombine.high %v4060_v27, %v4076_v46 }
 0x2eb   : > { %v5128_v14 = vrot.slane %v5120_v37, %v8340_v30  ;;  %v5135_v16 = vrot.slane %v5121_v10, %v8340_v30  ;;  %v4100_v51 = vcombine.low %v4067_v49, %v4083_v1  ;;  %v4101_v52 = vcombine.high %v4067_v49, %v4083_v1 }
 0x2ec   : > { %v4092_v21 = vrot.slane %v4084_v26, %v8340_v30  ;;  %v4099_v35 = vrot.slane %v4085_v59, %v8340_v30  ;;  %v6270_v27 = vand.u32 127, %v1112_v11 }
 0x2ed   : > { %v5136_v33 = vcombine.low %v5112_v32, %v5128_v14  ;;  %v5137_v4 = vcombine.high %v5112_v32, %v5128_v14  ;;  %v5138_v19 = vcombine.low %v5119_v48, %v5135_v16  ;;  %v5139_v45 = vcombine.high %v5119_v48, %v5135_v16 }
 0x2ee   : > { %v4108_v22 = vrot.slane %v4100_v51, %v8340_v30  ;;  %v4115_v54 = vrot.slane %v4101_v52, %v8340_v30  ;;  %v5140_v56 = vcombine.low %v4092_v21, %v4099_v35  ;;  %v7270_v28 = vcombine.high %v4092_v21, %v4099_v35 }
 0x2ef   : > { %v5687_v50 = vpack.c.bf16 %v5136_v33, %v5068_v31  ;;  %v5695_v60 = vpack.c.bf16 %v5137_v4, %v5069_v13  ;;  %v5703_v15 = vpack.c.bf16 %v5138_v19, %v5070_v47  ;;  %v5711_v57 = vpack.c.bf16 %v5139_v45, %v5071_v53  ;;  %v7812_v33 = vld [vmem:[%s9801_s7] ss:$0 sm:$0xff] }
 0x2f0   : > { %v5156_v3 = vcombine.low %v4108_v22, %v4115_v54  ;;  %v7271_v25 = vcombine.high %v4108_v22, %v4115_v54  ;;  %v5147_v39 = vrot.slane %v5140_v56, %v8336_v24  ;;  %v5155_v5 = vrot.slane %v7270_v28, %v8336_v24 }
 0x2f1   : > { %5719 = vst.msk [vmem:[#allocation3 + $0x18] sm:$0xff] %vm3315_vm2, %v5687_v50  ;;  %5727 = vst.msk [vmem:[#allocation3 + $0x58] sm:$0xff] %vm3315_vm2, %v5695_v60  ;;  %vm6271_vm3 = vcmp.lt.s32.totalorder %v6270_v27, 16  ;;  %v9313_v4 = vadd.f32 %v7812_v33, %v8739_v44  ;;  %v9322_v19 = vadd.f32 %v7812_v33, %v8756_v40  ;;  %v9329_v44 = vadd.f32 %v7812_v33, %v9054_v9 }
 0x2f2   : > { %5735 = vst.msk [vmem:[#allocation3 + $0x98] sm:$0xff] %vm3315_vm2, %v5703_v15  ;;  %5743 = vst.msk [vmem:[#allocation3 + $0xd8] sm:$0xff] %vm3315_vm2, %v5711_v57  ;;  %v5163_v29 = vrot.slane %v5156_v3, %v8336_v24  ;;  %v5171_v18 = vrot.slane %v7271_v25, %v8336_v24  ;;  %v5172_v62 = vcombine.low %v5147_v39, %v5155_v5 }
 0x2f3   : > { %v5173_v61 = vcombine.high %v5147_v39, %v5155_v5  ;;  %v9340_v40 = vadd.f32 %v7812_v33, %v9058_v0  ;;  %v9347_v9 = vadd.f32 %v7812_v33, %v9052_v43  ;;  %v9358_v0 = vadd.f32 %v7812_v33, %v9056_v42  ;;  %v3383_v43 = vpop.permute.xlu0 %3382 }
 0x2f4   : > { %v5188_v23 = vcombine.low %v5163_v29, %v5171_v18  ;;  %v5189_v55 = vcombine.high %v5163_v29, %v5171_v18  ;;  %v9284_v7 = vrot.slane %v5172_v62, %v8340_v30  ;;  %v7933_v42 = vmov 0.0|0.0  }
 0x2f5   : > { %v9287_v6 = vrot.slane %v5173_v61, %v8340_v30  ;;  %7696 = vmatprep.subr.bf16.mxu0 %v7933_v42 }
 0x2f6   : > { %v9290_v2 = vrot.slane %v5188_v23, %v8340_v30  ;;  %v9293_v31 = vrot.slane %v5189_v55, %v8340_v30 }
 0x2f7   : > { %v3431_v45 = vpop.permute.xlu0 %3430 }
 0x2f8   : > { %v5204_v13 = vcombine.low %v9284_v7, %v9290_v2  ;;  %v5205_v36 = vcombine.high %v9284_v7, %v9290_v2  ;;  %v5206_v41 = vcombine.low %v9287_v6, %v9293_v31  ;;  %v5207_v8 = vcombine.high %v9287_v6, %v9293_v31  ;;  %v6397_v20 = vld [vmem:[#allocation3 + $0x18] sm:$0xff] }
 0x2f9   : > { %7587 = vmatpush3.bf16.msra.mxu1 %v6397_v20  ;;  %v4120_v39 = vcombine.low %v9017_v34, %v3431_v45  ;;  %v4121_v5 = vcombine.high %v9017_v34, %v3431_v45 }
 0x2fa   : > { %7588 = vmatprep.subr.bf16.mxu1 %v7926_v12 }
 0x2fb   : > { %v4128_v20 = vrot.slane %v4120_v39, %v8336_v24  ;;  %v4135_v27 = vrot.slane %v4121_v5, %v8336_v24 }
 0x308   : > { %v6062_v49 = vpop.f32.mrb[16].mxu1  ;;  %v6129_v38 = vpop.f32.mrb[20].mxu0 }
 0x309   : > { %v7507_v17 = vpop.f32.mrb[17].mxu1  ;;  %v7527_v58 = vpop.f32.mrb[21].mxu0  ;;  %v6274_v63 = vsel %vm6271_vm3, %v6062_v49, -1e+30  ;;  %v6275_v37 = vsel %vm6271_vm3, %v6129_v38, -1e+30 }
 0x30a   : > { %6278 = vmax.xlane.f32.xlu1 %v6274_v63  ;;  %v6065_v10 = vpop.f32.mrb[18].mxu1  ;;  %6280 = vmax.xlane.f32.xlu0 %v6275_v37  ;;  %v6132_v47 = vpop.f32.mrb[22].mxu0 }
 0x30b   : > { %v7508_v53 = vpop.f32.mrb[19].mxu1  ;;  %v7528_v46 = vpop.f32.mrb[23].mxu0 }
 0x348   : > { %v6196_v1 = vpop.f32.mrb[20].mxu1  ;;  %v6263_v32 = vpop.f32.mrb[24].mxu0 }
 0x349   : > { %v7547_v48 = vpop.f32.mrb[21].mxu1  ;;  %v7567_v14 = vpop.f32.mrb[25].mxu0  ;;  %v6276_v11 = vsel %vm6271_vm3, %v6196_v1, -1e+30  ;;  %v6277_v16 = vsel %vm6271_vm3, %v6263_v32, -1e+30 }
 0x34a   : > { %v6199_v26 = vpop.f32.mrb[22].mxu1  ;;  %6282 = vmax.xlane.f32.xlu0 %v6276_v11  ;;  %6284 = vmax.xlane.f32.xlu1 %v6277_v16  ;;  %v6266_v59 = vpop.f32.mrb[26].mxu0 }
 0x34b   : > { %v7548_v51 = vpop.f32.mrb[23].mxu1  ;;  %v7568_v52 = vpop.f32.mrb[27].mxu0 }
 0x35b   : > { %3384 = vrot.lane.b32.xlu1 %v9313_v4, %s7928_s1 }
 0x35f   : > { %3432 = vrot.lane.b32.xlu1 %v9313_v4, %s7929_s24 }
 0x360   : > { %3478 = vrot.lane.b32.xlu0 %v9017_v34, %s7930_s28 }
 0x363   : > { %3480 = vrot.lane.b32.xlu1 %v9313_v4, %s7930_s28 }
 0x364   : > { %3386 = vrot.lane.b32.xlu0 %v9322_v19, %s7928_s1 }
 0x367   : > { %3388 = vrot.lane.b32.xlu1 %v9329_v44, %s7928_s1 }
 0x368   : > { %3434 = vrot.lane.b32.xlu0 %v9322_v19, %s7929_s24 }
 0x36b   : > { %3436 = vrot.lane.b32.xlu1 %v9329_v44, %s7929_s24 }
 0x36c   : > { %3482 = vrot.lane.b32.xlu0 %v9322_v19, %s7930_s28 }
 0x36f   : > { %3484 = vrot.lane.b32.xlu1 %v9329_v44, %s7930_s28 }
 0x370   : > { %3390 = vrot.lane.b32.xlu0 %v9340_v40, %s7928_s1 }
 0x373   : > { %3392 = vrot.lane.b32.xlu1 %v9347_v9, %s7928_s1 }
 0x374   : > { %3438 = vrot.lane.b32.xlu0 %v9340_v40, %s7929_s24 }
 0x377   : > { %3440 = vrot.lane.b32.xlu1 %v9347_v9, %s7929_s24 }
 0x378   : > { %3486 = vrot.lane.b32.xlu0 %v9340_v40, %s7930_s28 }
 0x37c   : > { %3394 = vrot.lane.b32.xlu0 %v9358_v0, %s7928_s1  ;;  %s9520_s1 = sand.u32 1, %s7908_s30  }
 0x397   : > { %v6279_v21 = vpop.xlane.xlu1 %6278  ;;  %v6281_v35 = vpop.xlane.xlu0 %6280 }
 0x398   : > { %v6286_v22 = vsub.f32 %v6274_v63, %v6279_v21  ;;  %v6287_v54 = vsub.f32 %v6275_v37, %v6281_v35 }
 0x39a   : > { %v6290_v50 = vmul.f32 1.442695, %v6286_v22  ;;  %v6292_v60 = vmul.f32 1.442695, %v6287_v54 }
 0x39c   : > { %7792 = vpow2.f32 %v6290_v50 }
 0x39d   : > { %7794 = vpow2.f32 %v6292_v60 }
 0x3a6   : > { %v9362_v15 = vpop.eup %7792 }
 0x3a7   : > { %v9364_v57 = vpop.eup %7794  ;;  %6298 = vadd.xlane.f32.xlu0 %v9362_v15 }
 0x3a8   : > { %6300 = vadd.xlane.f32.xlu1 %v9364_v57 }
 0x3d7   : > { %v6283_v56 = vpop.xlane.xlu0 %6282  ;;  %v6285_v28 = vpop.xlane.xlu1 %6284 }
 0x3d8   : > { %v6288_v3 = vsub.f32 %v6276_v11, %v6283_v56  ;;  %v6289_v25 = vsub.f32 %v6277_v16, %v6285_v28 }
 0x3da   : > { %v6294_v29 = vmul.f32 1.442695, %v6288_v3  ;;  %v6296_v18 = vmul.f32 1.442695, %v6289_v25 }
 0x3db   : > { %v3479_v62 = vpop.permute.xlu0 %3478  ;;  %v3385_v61 = vpop.permute.xlu1 %3384 }
 0x3dc   : > { %7796 = vpow2.f32 %v6294_v29  ;;  %v4136_v23 = vcombine.low %v3383_v43, %v3479_v62  ;;  %v4137_v55 = vcombine.high %v3383_v43, %v3479_v62 }
 0x3dd   : > { %7798 = vpow2.f32 %v6296_v18 }
 0x3de   : > { %v4144_v49 = vrot.slane %v4136_v23, %v8336_v24  ;;  %v4151_v38 = vrot.slane %v4137_v55, %v8336_v24 }
 0x3df   : > { %v9375_v17 = vpop.permute.xlu0 %3386  ;;  %v3433_v58 = vpop.permute.xlu1 %3432 }
 0x3e0   : > { %v4152_v34 = vcombine.low %v4128_v20, %v4144_v49  ;;  %v4153_v63 = vcombine.high %v4128_v20, %v4144_v49  ;;  %v4168_v37 = vcombine.low %v4135_v27, %v4151_v38  ;;  %v4169_v10 = vcombine.high %v4135_v27, %v4151_v38 }
 0x3e1   : > { %v4188_v47 = vcombine.low %v9313_v4, %v3433_v58  ;;  %v4189_v53 = vcombine.high %v9313_v4, %v3433_v58 }
 0x3e2   : > { %v4160_v46 = vrot.slane %v4152_v34, %v8340_v30  ;;  %v4167_v1 = vrot.slane %v4153_v63, %v8340_v30  ;;  %v4176_v32 = vrot.slane %v4168_v37, %v8340_v30  ;;  %v4183_v48 = vrot.slane %v4169_v10, %v8340_v30 }
 0x3e3   : > { %v3481_v14 = vpop.permute.xlu1 %3480  ;;  %v3435_v51 = vpop.permute.xlu0 %3434  ;;  %v4196_v52 = vrot.slane %v4188_v47, %v8336_v24  ;;  %v4203_v33 = vrot.slane %v4189_v53, %v8336_v24 }
 0x3e4   : > { %v5208_v11 = vcombine.low %v4160_v46, %v4167_v1  ;;  %v7272_v16 = vcombine.high %v4160_v46, %v4167_v1  ;;  %v5224_v26 = vcombine.low %v4176_v32, %v4183_v48  ;;  %v7273_v59 = vcombine.high %v4176_v32, %v4183_v48 }
 0x3e5   : > { %v4204_v43 = vcombine.low %v3385_v61, %v3481_v14  ;;  %v4205_v4 = vcombine.high %v3385_v61, %v3481_v14  ;;  %v4256_v60 = vcombine.low %v9322_v19, %v3435_v51  ;;  %v4257_v56 = vcombine.high %v9322_v19, %v3435_v51 }
 0x3e6   : > { %v9385_v45 = vpop.eup %7796  ;;  %v5215_v21 = vrot.slane %v5208_v11, %v8336_v24  ;;  %v5223_v35 = vrot.slane %v7272_v16, %v8336_v24  ;;  %v5231_v22 = vrot.slane %v5224_v26, %v8336_v24  ;;  %v5239_v54 = vrot.slane %v7273_v59, %v8336_v24 }
 0x3e7   : > { %v9391_v50 = vpop.eup %7798  ;;  %v4212_v28 = vrot.slane %v4204_v43, %v8336_v24  ;;  %v4219_v3 = vrot.slane %v4205_v4, %v8336_v24  ;;  %6302 = vadd.xlane.f32.xlu0 %v9385_v45  ;;  %v9399_v18 = vpop.permute.xlu1 %3388 }
 0x3e8   : > { %v5240_v25 = vcombine.low %v5215_v21, %v5223_v35  ;;  %v5241_v39 = vcombine.high %v5215_v21, %v5223_v35  ;;  %v5256_v5 = vcombine.low %v5231_v22, %v5239_v54  ;;  %v5257_v29 = vcombine.high %v5231_v22, %v5239_v54  ;;  %6304 = vadd.xlane.f32.xlu1 %v9391_v50  ;;  %v3483_v14 = vpop.permute.xlu0 %3482 }
 0x3e9   : > { %v4220_v62 = vcombine.low %v4196_v52, %v4212_v28  ;;  %v4221_v61 = vcombine.high %v4196_v52, %v4212_v28  ;;  %v4236_v23 = vcombine.low %v4203_v33, %v4219_v3  ;;  %v4237_v55 = vcombine.high %v4203_v33, %v4219_v3 }
 0x3ea   : > { %v5248_v19 = vrot.slane %v5240_v25, %v8340_v30  ;;  %v5255_v20 = vrot.slane %v5241_v39, %v8340_v30  ;;  %v5264_v27 = vrot.slane %v5256_v5, %v8340_v30  ;;  %v5271_v49 = vrot.slane %v5257_v29, %v8340_v30 }
 0x3eb   : > { %v4228_v38 = vrot.slane %v4220_v62, %v8340_v30  ;;  %v4235_v58 = vrot.slane %v4221_v61, %v8340_v30  ;;  %v4244_v34 = vrot.slane %v4236_v23, %v8340_v30  ;;  %v4251_v63 = vrot.slane %v4237_v55, %v8340_v30  ;;  %v3437_v51 = vpop.permute.xlu1 %3436 }
 0x3ec   : > { %v5272_v37 = vcombine.low %v5248_v19, %v5264_v27  ;;  %v5273_v10 = vcombine.high %v5248_v19, %v5264_v27  ;;  %v5274_v47 = vcombine.low %v5255_v20, %v5271_v49  ;;  %v5275_v53 = vcombine.high %v5255_v20, %v5271_v49  ;;  %v9437_v5 = vpop.permute.xlu0 %3390 }
 0x3ed   : > { %v5276_v46 = vcombine.low %v4228_v38, %v4235_v58  ;;  %v7274_v1 = vcombine.high %v4228_v38, %v4235_v58  ;;  %v5292_v32 = vcombine.low %v4244_v34, %v4251_v63  ;;  %v7275_v48 = vcombine.high %v4244_v34, %v4251_v63 }
 0x3ee   : > { %v5688_v11 = vpack.c.bf16 %v5272_v37, %v5204_v13  ;;  %v5696_v16 = vpack.c.bf16 %v5273_v10, %v5205_v36  ;;  %v5704_v26 = vpack.c.bf16 %v5274_v47, %v5206_v41  ;;  %v5712_v59 = vpack.c.bf16 %v5275_v53, %v5207_v8 }
 0x3ef   : > { %v5283_v52 = vrot.slane %v5276_v46, %v8336_v24  ;;  %v5291_v33 = vrot.slane %v7274_v1, %v8336_v24  ;;  %v4272_v7 = vcombine.low %v9375_v17, %v3483_v14  ;;  %v4273_v2 = vcombine.high %v9375_v17, %v3483_v14  ;;  %v3485_v3 = vpop.permute.xlu1 %3484 }
 0x3f0   : > { %5720 = vst.msk [vmem:[#allocation3 + $0x20] sm:$0xff] %vm3315_vm2, %v5688_v11  ;;  %5728 = vst.msk [vmem:[#allocation3 + $0x60] sm:$0xff] %vm3315_vm2, %v5696_v16  ;;  %v5299_v6 = vrot.slane %v5292_v32, %v8336_v24  ;;  %v5307_v31 = vrot.slane %v7275_v48, %v8336_v24  ;;  %v4324_v13 = vcombine.low %v9329_v44, %v3437_v51  ;;  %v3439_v32 = vpop.permute.xlu0 %3438 }
 0x3f1   : > { %5736 = vst.msk [vmem:[#allocation3 + $0xa0] sm:$0xff] %vm3315_vm2, %v5704_v26  ;;  %5744 = vst.msk [vmem:[#allocation3 + $0xe0] sm:$0xff] %vm3315_vm2, %v5712_v59  ;;  %v4325_v36 = vcombine.high %v9329_v44, %v3437_v51  ;;  %v4264_v41 = vrot.slane %v4256_v60, %v8336_v24  ;;  %v4271_v8 = vrot.slane %v4257_v56, %v8336_v24 }
 0x3f2   : > { %v4280_v43 = vrot.slane %v4272_v7, %v8336_v24  ;;  %v4287_v4 = vrot.slane %v4273_v2, %v8336_v24  ;;  %v5308_v21 = vcombine.low %v5283_v52, %v5291_v33  ;;  %v5309_v35 = vcombine.high %v5283_v52, %v5291_v33 }
 0x3f3   : > { %v5324_v25 = vcombine.low %v5299_v6, %v5307_v31  ;;  %v5325_v39 = vcombine.high %v5299_v6, %v5307_v31  ;;  %v4332_v44 = vrot.slane %v4324_v13, %v8336_v24  ;;  %v4339_v60 = vrot.slane %v4325_v36, %v8336_v24 }
 0x3f4   : > { %v4288_v22 = vcombine.low %v4264_v41, %v4280_v43  ;;  %v4289_v17 = vcombine.high %v4264_v41, %v4280_v43  ;;  %v4304_v54 = vcombine.low %v4271_v8, %v4287_v4  ;;  %v4305_v28 = vcombine.high %v4271_v8, %v4287_v4 }
 0x3f5   : > { %v5316_v23 = vrot.slane %v5308_v21, %v8340_v30  ;;  %v5323_v55 = vrot.slane %v5309_v35, %v8340_v30  ;;  %v4340_v19 = vcombine.low %v9399_v18, %v3485_v3  ;;  %v4341_v20 = vcombine.high %v9399_v18, %v3485_v3 }
 0x3f6   : > { %v4296_v56 = vrot.slane %v4288_v22, %v8340_v30  ;;  %v4303_v29 = vrot.slane %v4289_v17, %v8340_v30  ;;  %v4312_v62 = vrot.slane %v4304_v54, %v8340_v30  ;;  %v4319_v61 = vrot.slane %v4305_v28, %v8340_v30 }
 0x3f7   : > { %v6398_v27 = vld [vmem:[#allocation3 + $0x20] sm:$0xff]  ;;  %v5332_v63 = vrot.slane %v5324_v25, %v8340_v30  ;;  %v5339_v37 = vrot.slane %v5325_v39, %v8340_v30  ;;  %v4348_v10 = vrot.slane %v4340_v19, %v8336_v24  ;;  %v4355_v47 = vrot.slane %v4341_v20, %v8336_v24  ;;  %v3487_v25 = vpop.permute.xlu0 %3486 }
 0x3f8   : > { %v5344_v49 = vcombine.low %v4296_v56, %v4303_v29  ;;  %v7276_v38 = vcombine.high %v4296_v56, %v4303_v29  ;;  %v5360_v58 = vcombine.low %v4312_v62, %v4319_v61  ;;  %v7277_v34 = vcombine.high %v4312_v62, %v4319_v61  ;;  %7589 = vmatpush3.bf16.msra.mxu1 %v6398_v27 }
 0x3f9   : > { %3488 = vrot.lane.b32.xlu1 %v9347_v9, %s7930_s28  ;;  %7590 = vmatprep.subr.bf16.mxu1 %v7926_v12  ;;  %v4356_v48 = vcombine.low %v4332_v44, %v4348_v10  ;;  %v4357_v14 = vcombine.high %v4332_v44, %v4348_v10  ;;  %v4372_v11 = vcombine.low %v4339_v60, %v4355_v47 }
 0x3fa   : > { %v5351_v53 = vrot.slane %v5344_v49, %v8336_v24  ;;  %v5359_v18 = vrot.slane %v7276_v38, %v8336_v24  ;;  %v5367_v46 = vrot.slane %v5360_v58, %v8336_v24  ;;  %v5375_v1 = vrot.slane %v7277_v34, %v8336_v24 }
 0x3fb   : > { %v4373_v16 = vcombine.high %v4339_v60, %v4355_v47  ;;  %v5340_v33 = vcombine.low %v5316_v23, %v5332_v63  ;;  %v5341_v7 = vcombine.high %v5316_v23, %v5332_v63  ;;  %v5342_v2 = vcombine.low %v5323_v55, %v5339_v37 }
 0x3fc   : > { %v5376_v26 = vcombine.low %v5351_v53, %v5359_v18  ;;  %v5377_v59 = vcombine.high %v5351_v53, %v5359_v18  ;;  %v5392_v51 = vcombine.low %v5367_v46, %v5375_v1  ;;  %v5393_v52 = vcombine.high %v5367_v46, %v5375_v1 }
 0x3fd   : > { %v5343_v6 = vcombine.high %v5323_v55, %v5339_v37  ;;  %3442 = vrot.lane.b32.xlu0 %v9358_v0, %s7929_s24  ;;  %v4364_v8 = vrot.slane %v4356_v48, %v8340_v30  ;;  %v4371_v43 = vrot.slane %v4357_v14, %v8340_v30  ;;  %v4380_v4 = vrot.slane %v4372_v11, %v8340_v30  ;;  %s9523_s24 = scalar_lea.vmem [#allocation6], %s9520_s1 }
 0x3fe   : > { %v5384_v31 = vrot.slane %v5376_v26, %v8340_v30  ;;  %v5391_v13 = vrot.slane %v5377_v59, %v8340_v30  ;;  %v5400_v36 = vrot.slane %v5392_v51, %v8340_v30  ;;  %v5407_v41 = vrot.slane %v5393_v52, %v8340_v30  ;;  %5748 = vst [vmem:[%s9523_s24] sm:$0x1] %v7926_v12  ;;  %s7080_s26 = sshll.u32 %s9523_s24, 4  ;;  %s7081_s26 = int_to_ptr.vmem [resolvable:$true] %s7080_s26 }
 0x3ff   : > { %v4387_v21 = vrot.slane %v4373_v16, %v8340_v30  ;;  %v4392_v28 = vcombine.low %v9340_v40, %v3439_v32  ;;  %v4393_v3 = vcombine.high %v9340_v40, %v3439_v32  ;;  %v5412_v29 = vcombine.low %v4364_v8, %v4371_v43  ;;  %s7814_s20 = scalar_lea.vmem %s7081_s26, 16 }
 0x400   : > { %v5408_v35 = vcombine.low %v5384_v31, %v5400_v36  ;;  %v5409_v22 = vcombine.high %v5384_v31, %v5400_v36  ;;  %v5410_v17 = vcombine.low %v5391_v13, %v5407_v41  ;;  %v5411_v54 = vcombine.high %v5391_v13, %v5407_v41  ;;  %p7815_p12 = scmp.ne.s32.totalorder %s7081_s26, %s7814_s20 }
 0x401   : > { %3490 = vrot.lane.b32.xlu0 %v9358_v0, %s7930_s28  ;;  %v7278_v62 = vcombine.high %v4364_v8, %v4371_v43  ;;  %v5428_v61 = vcombine.low %v4380_v4, %v4387_v21  ;;  %v7279_v23 = vcombine.high %v4380_v4, %v4387_v21  ;;  %v4408_v40 = vcombine.low %v9437_v5, %v3487_v25  ;;  %s7938_s28 = smov [#allocation6]  }
 0x402   : > { %v5689_v39 = vpack.c.bf16 %v5408_v35, %v5340_v33  ;;  %v5697_v44 = vpack.c.bf16 %v5409_v22, %v5341_v7  ;;  %v5705_v60 = vpack.c.bf16 %v5410_v17, %v5342_v2  ;;  %v5713_v56 = vpack.c.bf16 %v5411_v54, %v5343_v6  ;;  %p7816_p13 = pnand %p7815_p12, %p8080_p4  ;;  %s7818_s23 = sshll.u32 %s7938_s28, 4  ;;  %s7819_s23 = int_to_ptr.vmem [resolvable:$false] %s7818_s23 }
 0x403   : > { %v4409_v55 = vcombine.high %v9437_v5, %v3487_v25  ;;  %v4400_v19 = vrot.slane %v4392_v28, %v8336_v24  ;;  %v4407_v20 = vrot.slane %v4393_v3, %v8336_v24  ;;  %v4416_v27 = vrot.slane %v4408_v40, %v8336_v24  ;;  %s7820_s4 = scalar_lea.vmem %s7819_s23, 32  ;;  %p7821_p1 = scmp.lt.s32.totalorder %s7081_s26, %s7819_s23 }
 0x404   : > { %5721 = vst.msk [vmem:[#allocation3 + $0x28] sm:$0xff] %vm3315_vm2, %v5689_v39  ;;  %5729 = vst.msk [vmem:[#allocation3 + $0x68] sm:$0xff] %vm3315_vm2, %v5697_v44  ;;  %v5419_v38 = vrot.slane %v5412_v29, %v8336_v24  ;;  %v5427_v58 = vrot.slane %v7278_v62, %v8336_v24  ;;  %v5435_v34 = vrot.slane %v5428_v61, %v8336_v24  ;;  %p7817_p0 = pneg %p7816_p13  ;;  %p7822_p2 = scmp.lt.s32.totalorder %s7820_s4, %s7814_s20 }
 0x405   : > { %5737 = vst.msk [vmem:[#allocation3 + $0xa8] sm:$0xff] %vm3315_vm2, %v5705_v60  ;;  %5745 = vst.msk [vmem:[#allocation3 + $0xe8] sm:$0xff] %vm3315_vm2, %v5713_v56  ;;  %v4423_v49 = vrot.slane %v4409_v55, %v8336_v24  ;;  %v5443_v63 = vrot.slane %v7279_v23, %v8336_v24  ;;  %v4424_v37 = vcombine.low %v4400_v19, %v4416_v27 }
 0x406   : > { %v4425_v10 = vcombine.high %v4400_v19, %v4416_v27  ;;  %v5444_v32 = vcombine.low %v5419_v38, %v5427_v58  ;;  %v5445_v48 = vcombine.high %v5419_v38, %v5427_v58  ;;  %v3393_v19 = vpop.permute.xlu1 %3392  ;;  %p7823_p3 = por %p7822_p2, %p7821_p1 }
 0x407   : > { %v4440_v47 = vcombine.low %v4407_v20, %v4423_v49  ;;  %v4441_v5 = vcombine.high %v4407_v20, %v4423_v49  ;;  %v4432_v53 = vrot.slane %v4424_v37, %v8340_v30  ;;  %v5460_v14 = vcombine.low %v5435_v34, %v5443_v63  ;;  %v3395_v20 = vpop.permute.xlu0 %3394 }
 0x408   : > { %v4439_v18 = vrot.slane %v4425_v10, %v8340_v30  ;;  %v5461_v11 = vcombine.high %v5435_v34, %v5443_v63  ;;  %v5452_v31 = vrot.slane %v5444_v32, %v8340_v30  ;;  %v5459_v13 = vrot.slane %v5445_v48, %v8340_v30  ;;  %p7824_p5 = pnand %p7823_p3, %p7817_p0 }
 0x409   : > { %v4448_v46 = vrot.slane %v4440_v47, %v8340_v30  ;;  %v4455_v1 = vrot.slane %v4441_v5, %v8340_v30  ;;  %v5468_v36 = vrot.slane %v5460_v14, %v8340_v30 }
 0x40a   : > { %v5480_v26 = vcombine.low %v4432_v53, %v4439_v18  ;;  %v7280_v59 = vcombine.high %v4432_v53, %v4439_v18  ;;  %v5475_v41 = vrot.slane %v5461_v11, %v8340_v30  ;;  %v3441_v27 = vpop.permute.xlu1 %3440 }
 0x40b   : > { %v6399_v16 = vld [vmem:[#allocation3 + $0x28] sm:$0xff]  ;;  %v5496_v51 = vcombine.low %v4448_v46, %v4455_v1  ;;  %v7281_v52 = vcombine.high %v4448_v46, %v4455_v1  ;;  %v5476_v28 = vcombine.low %v5452_v31, %v5468_v36  ;;  %v5477_v3 = vcombine.high %v5452_v31, %v5468_v36 }
 0x40c   : > { %7591 = vmatpush3.bf16.msra.mxu1 %v6399_v16  ;;  %v5487_v33 = vrot.slane %v5480_v26, %v8336_v24  ;;  %v5495_v7 = vrot.slane %v7280_v59, %v8336_v24  ;;  %v5478_v25 = vcombine.low %v5459_v13, %v5475_v41  ;;  %v5479_v39 = vcombine.high %v5459_v13, %v5475_v41 }
 0x40d   : > { %7592 = vmatprep.subr.bf16.mxu1 %v7926_v12  ;;  %v5503_v2 = vrot.slane %v5496_v51, %v8336_v24  ;;  %v5511_v6 = vrot.slane %v7281_v52, %v8336_v24  ;;  %v4460_v5 = vcombine.low %v9347_v9, %v3441_v27 }
 0x40e   : > { %v5512_v8 = vcombine.low %v5487_v33, %v5495_v7  ;;  %v5513_v43 = vcombine.high %v5487_v33, %v5495_v7 }
 0x40f   : > { %v5528_v4 = vcombine.low %v5503_v2, %v5511_v6  ;;  %v5529_v21 = vcombine.high %v5503_v2, %v5511_v6 }
 0x410   : > { %v5520_v35 = vrot.slane %v5512_v8, %v8340_v30  ;;  %v5527_v22 = vrot.slane %v5513_v43, %v8340_v30 }
 0x411   : > { %v5536_v17 = vrot.slane %v5528_v4, %v8340_v30  ;;  %v5543_v54 = vrot.slane %v5529_v21, %v8340_v30 }
 0x413   : > { %v5544_v44 = vcombine.low %v5520_v35, %v5536_v17  ;;  %v5545_v60 = vcombine.high %v5520_v35, %v5536_v17  ;;  %v5546_v56 = vcombine.low %v5527_v22, %v5543_v54  ;;  %v5547_v29 = vcombine.high %v5527_v22, %v5543_v54 }
 0x415   : > { %v5690_v62 = vpack.c.bf16 %v5544_v44, %v5476_v28  ;;  %v5698_v61 = vpack.c.bf16 %v5545_v60, %v5477_v3  ;;  %v5706_v23 = vpack.c.bf16 %v5546_v56, %v5478_v25  ;;  %v5714_v40 = vpack.c.bf16 %v5547_v29, %v5479_v39 }
 0x417   : > { %5722 = vst.msk [vmem:[#allocation3 + $0x30] sm:$0xff] %vm3315_vm2, %v5690_v62  ;;  %5730 = vst.msk [vmem:[#allocation3 + $0x70] sm:$0xff] %vm3315_vm2, %v5698_v61 }
 0x418   : > { %5738 = vst.msk [vmem:[#allocation3 + $0xb0] sm:$0xff] %vm3315_vm2, %v5706_v23  ;;  %5746 = vst.msk [vmem:[#allocation3 + $0xf0] sm:$0xff] %vm3315_vm2, %v5714_v40 }
 0x41e   : > { %v6400_v55 = vld [vmem:[#allocation3 + $0x30] sm:$0xff] }
 0x41f   : > { %7593 = vmatpush3.bf16.msra.mxu1 %v6400_v55 }
 0x420   : > { %7594 = vmatprep.subr.bf16.mxu1 %v7926_v12 }
 0x434   : > { %v6299_v49 = vpop.xlane.xlu0 %6298 }
 0x435   : > { %7800 = vrcp.f32 %v6299_v49  ;;  %v6301_v38 = vpop.xlane.xlu1 %6300 }
 0x436   : > { %7802 = vrcp.f32 %v6301_v38 }
 0x43f   : > { %v7801_v58 = vpop.eup %7800 }
 0x440   : > { %v7803_v34 = vpop.eup %7802  ;;  %v9511_v63 = vmul.f32 %v7801_v58, %v9362_v15 }
 0x441   : > { %v9514_v37 = vmul.f32 %v7803_v34, %v9364_v57  ;;  %v4461_v57 = vcombine.high %v9347_v9, %v3441_v27 }
 0x443   : > { %v7697_v10 = vpack.c.bf16 %v9514_v37, %v9511_v63  ;;  %v4475_v14 = vrot.slane %v4461_v57, %v8336_v24 }
 0x445   : > { %7698 = vmatpush3.bf16.msra.mxu0 %v7697_v10 }
 0x446   : > { %7699 = vmatprep.subr.bf16.mxu0 %v7933_v42  ;;  %v4468_v42 = vrot.slane %v4460_v5, %v8336_v24 }
 0x474   : > { %v6303_v47 = vpop.xlane.xlu0 %6302 }
 0x475   : > { %v6305_v15 = vpop.xlane.xlu1 %6304  ;;  %7804 = vrcp.f32 %v6303_v47 }
 0x476   : > { %7806 = vrcp.f32 %v6305_v15 }
 0x478   : > { %v3443_v53 = vpop.permute.xlu0 %3442 }
 0x479   : > { %v3489_v18 = vpop.permute.xlu1 %3488  ;;  %v4528_v32 = vcombine.low %v9358_v0, %v3443_v53  ;;  %v4529_v48 = vcombine.high %v9358_v0, %v3443_v53 }
 0x47a   : > { %v4476_v46 = vcombine.low %v3393_v19, %v3489_v18  ;;  %v4477_v1 = vcombine.high %v3393_v19, %v3489_v18 }
 0x47b   : > { %v4536_v2 = vrot.slane %v4528_v32, %v8336_v24  ;;  %v4543_v6 = vrot.slane %v4529_v48, %v8336_v24 }
 0x47c   : > { %v4484_v11 = vrot.slane %v4476_v46, %v8336_v24  ;;  %v4491_v16 = vrot.slane %v4477_v1, %v8336_v24  ;;  %v3491_v26 = vpop.permute.xlu0 %3490 }
 0x47d   : > { %v4544_v9 = vcombine.low %v3395_v20, %v3491_v26  ;;  %v4545_v59 = vcombine.high %v3395_v20, %v3491_v26 }
 0x47e   : > { %v4492_v51 = vcombine.low %v4468_v42, %v4484_v11  ;;  %v4493_v52 = vcombine.high %v4468_v42, %v4484_v11  ;;  %v4508_v33 = vcombine.low %v4475_v14, %v4491_v16  ;;  %v4509_v7 = vcombine.high %v4475_v14, %v4491_v16 }
 0x47f   : > { %v4552_v0 = vrot.slane %v4544_v9, %v8336_v24  ;;  %v4559_v31 = vrot.slane %v4545_v59, %v8336_v24  ;;  %v7805_v19 = vpop.eup %7804 }
 0x480   : > { %v4500_v13 = vrot.slane %v4492_v51, %v8340_v30  ;;  %v4507_v36 = vrot.slane %v4493_v52, %v8340_v30  ;;  %v4516_v41 = vrot.slane %v4508_v33, %v8340_v30  ;;  %v4523_v8 = vrot.slane %v4509_v7, %v8340_v30  ;;  %v7807_v58 = vpop.eup %7806 }
 0x481   : > { %v4560_v43 = vcombine.low %v4536_v2, %v4552_v0  ;;  %v4561_v4 = vcombine.high %v4536_v2, %v4552_v0  ;;  %v4576_v21 = vcombine.low %v4543_v6, %v4559_v31  ;;  %v4577_v35 = vcombine.high %v4543_v6, %v4559_v31 }
 0x482   : > { %v5548_v22 = vcombine.low %v4500_v13, %v4507_v36  ;;  %v7282_v17 = vcombine.high %v4500_v13, %v4507_v36  ;;  %v5564_v54 = vcombine.low %v4516_v41, %v4523_v8  ;;  %v7283_v28 = vcombine.high %v4516_v41, %v4523_v8 }
 0x483   : > { %v4568_v3 = vrot.slane %v4560_v43, %v8340_v30  ;;  %v4575_v25 = vrot.slane %v4561_v4, %v8340_v30  ;;  %v4584_v39 = vrot.slane %v4576_v21, %v8340_v30  ;;  %v4591_v44 = vrot.slane %v4577_v35, %v8340_v30  ;;  %v6403_v43 = vld [vmem:[#allocation3 + $0x48] sm:$0xff]  ;;  %v6404_v35 = vld [vmem:[#allocation3 + $0x50] sm:$0xff] }
 0x484   : > { %v5555_v60 = vrot.slane %v5548_v22, %v8336_v24  ;;  %v5563_v56 = vrot.slane %v7282_v17, %v8336_v24  ;;  %v5571_v29 = vrot.slane %v5564_v54, %v8336_v24  ;;  %v5579_v62 = vrot.slane %v7283_v28, %v8336_v24  ;;  %v6410_v22 = vld [vmem:[#allocation3 + $0x80] sm:$0xff]  ;;  %v6405_v17 = vld [vmem:[#allocation3 + $0x58] sm:$0xff]  ;;  %v6411_v54 = vld [vmem:[#allocation3 + $0x88] sm:$0xff] }
 0x485   : > { %v5616_v61 = vcombine.low %v4568_v3, %v4575_v25  ;;  %v7284_v23 = vcombine.high %v4568_v3, %v4575_v25  ;;  %v5632_v40 = vcombine.low %v4584_v39, %v4591_v44  ;;  %v7285_v55 = vcombine.high %v4584_v39, %v4591_v44  ;;  %v6412_v28 = vld [vmem:[#allocation3 + $0x90] sm:$0xff]  ;;  %v6407_v3 = vld [vmem:[#allocation3 + $0x68] sm:$0xff]  ;;  %v6413_v25 = vld [vmem:[#allocation3 + $0x98] sm:$0xff] }
 0x486   : > { %v5580_v20 = vcombine.low %v5555_v60, %v5563_v56  ;;  %v5581_v27 = vcombine.high %v5555_v60, %v5563_v56  ;;  %v5596_v49 = vcombine.low %v5571_v29, %v5579_v62  ;;  %v5597_v38 = vcombine.high %v5571_v29, %v5579_v62  ;;  %v6408_v39 = vld [vmem:[#allocation3 + $0x70] sm:$0xff]  ;;  %v6414_v44 = vld [vmem:[#allocation3 + $0xa0] sm:$0xff]  ;;  %v6415_v56 = vld [vmem:[#allocation3 + $0xa8] sm:$0xff] }
 0x487   : > { %v5623_v34 = vrot.slane %v5616_v61, %v8336_v24  ;;  %v5631_v10 = vrot.slane %v7284_v23, %v8336_v24  ;;  %v5639_v47 = vrot.slane %v5632_v40, %v8336_v24  ;;  %v5647_v15 = vrot.slane %v7285_v55, %v8336_v24  ;;  %v6418_v62 = vld [vmem:[#allocation3 + $0xc0] sm:$0xff]  ;;  %v6416_v61 = vld [vmem:[#allocation3 + $0xb0] sm:$0xff]  ;;  %v6419_v23 = vld [vmem:[#allocation3 + $0xc8] sm:$0xff] }
 0x488   : > { %v5588_v5 = vrot.slane %v5580_v20, %v8340_v30  ;;  %v5595_v57 = vrot.slane %v5581_v27, %v8340_v30  ;;  %v5604_v53 = vrot.slane %v5596_v49, %v8340_v30  ;;  %v5611_v18 = vrot.slane %v5597_v38, %v8340_v30  ;;  %v6420_v55 = vld [vmem:[#allocation3 + $0xd0] sm:$0xff]  ;;  %v6422_v20 = vld [vmem:[#allocation3 + $0xe0] sm:$0xff]  ;;  %v6423_v27 = vld [vmem:[#allocation3 + $0xe8] sm:$0xff] }
 0x489   : > { %v5648_v46 = vcombine.low %v5623_v34, %v5631_v10  ;;  %v5649_v1 = vcombine.high %v5623_v34, %v5631_v10  ;;  %v5664_v42 = vcombine.low %v5639_v47, %v5647_v15  ;;  %v5665_v32 = vcombine.high %v5639_v47, %v5647_v15  ;;  %v6424_v49 = vld [vmem:[#allocation3 + $0xf0] sm:$0xff]  ;;  %v7780_v34 = vld [vmem:[%s9802_s8] sm:$0xff]  }
 0x48a   : > { %v5612_v48 = vcombine.low %v5588_v5, %v5604_v53  ;;  %v5613_v14 = vcombine.high %v5588_v5, %v5604_v53  ;;  %v5614_v59 = vcombine.low %v5595_v57, %v5611_v18  ;;  %v5615_v51 = vcombine.high %v5595_v57, %v5611_v18  ;;  %v6318_v10 = vld [vmem:[%s9523_s24] sm:$0x1] }
 0x48b   : > { %v5656_v11 = vrot.slane %v5648_v46, %v8340_v30  ;;  %v5663_v16 = vrot.slane %v5649_v1, %v8340_v30  ;;  %v5672_v26 = vrot.slane %v5664_v42, %v8340_v30  ;;  %v5679_v9 = vrot.slane %v5665_v32, %v8340_v30 }
 0x48c   : > { %v9564_v52 = vmul.f32 %v7805_v19, %v9385_v45  ;;  %v9567_v33 = vmul.f32 %v7807_v58, %v9391_v50  ;;  %v7934_v45 = vmov 1.0   ;;  %v6402_v50 = vld [vmem:[#allocation3 + $0x40] sm:$0xff]  ;;  %v6314_v21 = vpack.c.bf16 %v9511_v63, %v9511_v63  ;;  %v6421_v19 = vld [vmem:[#allocation3 + $0xd8] sm:$0xff] }
 0x48d   : > { %v5680_v7 = vcombine.low %v5656_v11, %v5672_v26  ;;  %v5681_v2 = vcombine.high %v5656_v11, %v5672_v26  ;;  %v5682_v6 = vcombine.low %v5663_v16, %v5679_v9  ;;  %v5683_v0 = vcombine.high %v5663_v16, %v5679_v9  ;;  %v6406_v63 = vld [vmem:[#allocation3 + $0x60] sm:$0xff] }
 0x48e   : > { %v7700_v31 = vpack.c.bf16 %v9567_v33, %v9564_v52  ;;  %v6315_v29 = vpack.c.bf16 %v9514_v37, %v9514_v37  ;;  %v6316_v40 = vpack.c.bf16 %v9564_v52, %v9564_v52  ;;  %v6317_v58 = vpack.c.bf16 %v9567_v33, %v9567_v33 }
 0x48f   : > { %v5691_v13 = vpack.c.bf16 %v5680_v7, %v5612_v48  ;;  %v5699_v36 = vpack.c.bf16 %v5681_v2, %v5613_v14  ;;  %v5707_v41 = vpack.c.bf16 %v5682_v6, %v5614_v59  ;;  %v5715_v8 = vpack.c.bf16 %v5683_v0, %v5615_v51 }
 0x490   : > { %7701 = vmatpush3.bf16.msra.mxu0 %v7700_v31 }
 0x491   : > { %5723 = vst.msk [vmem:[#allocation3 + $0x38] sm:$0xff] %vm3315_vm2, %v5691_v13  ;;  %5731 = vst.msk [vmem:[#allocation3 + $0x78] sm:$0xff] %vm3315_vm2, %v5699_v36  ;;  %7600 = vmatprep.subr.bf16.mxu0 %v7926_v12 }
 0x492   : > { %5739 = vst.msk [vmem:[#allocation3 + $0xb8] sm:$0xff] %vm3315_vm2, %v5707_v41  ;;  %5747 = vst.msk [vmem:[#allocation3 + $0xf8] sm:$0xff] %vm3315_vm2, %v5715_v8 }
 0x493   : > { %7578 = vmatmul.mubr.msk.f32.vlgmr.msra.gmra.mrb[28].mxu0 %vm705_vm0, %v7934_v45 }
 0x494   : > { %7601 = vmatpush3.bf16.msra.mxu0 %v6402_v50  ;;  %7616 = vmatprep.mubr.msk.bf16.mxu0 %vm7927_vm1, %v7926_v12 }
 0x495   : > { %7602 = vmatprep.subr.bf16.mxu0 %v7926_v12 }
 0x498   : > { %7603 = vmatpush3.bf16.msra.mxu0 %v6403_v43  ;;  %v6401_v4 = vld [vmem:[#allocation3 + $0x38] sm:$0xff]  ;;  %v7781_v43 = vld [vmem:[%s9802_s8 + $0x8] sm:$0xff]  }
 0x499   : > { %7604 = vmatprep.subr.bf16.mxu0 %v7926_v12  ;;  %7595 = vmatpush3.bf16.msra.mxu1 %v6401_v4  ;;  %v6409_v60 = vld [vmem:[#allocation3 + $0x78] sm:$0xff] }
 0x49a   : > { %7620 = vmatprep.subr.bf16.mxu1 %v7926_v12  ;;  %v6417_v37 = vld [vmem:[#allocation3 + $0xb8] sm:$0xff] }
 0x49b   : > { %v6425_v38 = vld [vmem:[#allocation3 + $0xf8] sm:$0xff] }
 0x49c   : > { %7605 = vmatpush3.bf16.msra.mxu0 %v6404_v35  ;;  %7597 = vmatmul.mubr.bf16.vlgmr.msra.gmra.mrb[24].mxu1 %v6314_v21 }
 0x49d   : > { %7606 = vmatprep.subr.bf16.mxu0 %v7926_v12  ;;  %7621 = vmatpush3.bf16.msra.mxu1 %v6410_v22 }
 0x49e   : > { %7622 = vmatprep.subr.bf16.mxu1 %v7926_v12  ;;  %7636 = vmatprep.mubr.msk.bf16.mxu1 %vm7927_vm1, %v7926_v12 }
 0x4a0   : > { %7607 = vmatpush3.bf16.msra.mxu0 %v6405_v17 }
 0x4a1   : > { %7608 = vmatprep.subr.bf16.mxu0 %v7926_v12  ;;  %7623 = vmatpush3.bf16.msra.mxu1 %v6411_v54 }
 0x4a2   : > { %7624 = vmatprep.subr.bf16.mxu1 %v7926_v12 }
 0x4a4   : > { %7609 = vmatpush3.bf16.msra.mxu0 %v6406_v63 }
 0x4a5   : > { %7610 = vmatprep.subr.bf16.mxu0 %v7926_v12  ;;  %7625 = vmatpush3.bf16.msra.mxu1 %v6412_v28 }
 0x4a6   : > { %7626 = vmatprep.subr.bf16.mxu1 %v7926_v12 }
 0x4a8   : > { %7611 = vmatpush3.bf16.msra.mxu0 %v6407_v3 }
 0x4a9   : > { %7612 = vmatprep.subr.bf16.mxu0 %v7926_v12  ;;  %7627 = vmatpush3.bf16.msra.mxu1 %v6413_v25 }
 0x4aa   : > { %7628 = vmatprep.subr.bf16.mxu1 %v7926_v12 }
 0x4ac   : > { %7613 = vmatpush3.bf16.msra.mxu0 %v6408_v39 }
 0x4ad   : > { %7614 = vmatprep.subr.bf16.mxu0 %v7926_v12  ;;  %7629 = vmatpush3.bf16.msra.mxu1 %v6414_v44 }
 0x4ae   : > { %7630 = vmatprep.subr.bf16.mxu1 %v7926_v12 }
 0x4b0   : > { %7615 = vmatpush3.bf16.msra.mxu0 %v6409_v60 }
 0x4b1   : > { %7640 = vmatprep.subr.bf16.mxu0 %v7926_v12  ;;  %7631 = vmatpush3.bf16.msra.mxu1 %v6415_v56 }
 0x4b2   : > { %7632 = vmatprep.subr.bf16.mxu1 %v7926_v12 }
 0x4b3   : > { %7617 = vmatmul.mubr.bf16.vlgmr.msra.gmra.mrb[32].mxu0 %v6315_v29 }
 0x4b4   : > { %7641 = vmatpush3.bf16.msra.mxu0 %v6418_v62  ;;  %7656 = vmatprep.mubr.msk.bf16.mxu0 %vm7927_vm1, %v7926_v12 }
 0x4b5   : > { %7642 = vmatprep.subr.bf16.mxu0 %v7926_v12  ;;  %7633 = vmatpush3.bf16.msra.mxu1 %v6416_v61 }
 0x4b6   : > { %7634 = vmatprep.subr.bf16.mxu1 %v7926_v12 }
 0x4b8   : > { %7643 = vmatpush3.bf16.msra.mxu0 %v6419_v23 }
 0x4b9   : > { %7644 = vmatprep.subr.bf16.mxu0 %v7926_v12  ;;  %7635 = vmatpush3.bf16.msra.mxu1 %v6417_v37 }
 0x4ba   : > { %7660 = vmatprep.subr.bf16.mxu1 %v7926_v12 }
 0x4bc   : > { %7645 = vmatpush3.bf16.msra.mxu0 %v6420_v55  ;;  %7637 = vmatmul.mubr.bf16.vlgmr.msra.gmra.mrb[28].mxu1 %v6316_v40 }
 0x4bd   : > { %7646 = vmatprep.subr.bf16.mxu0 %v7926_v12  ;;  %7664 = vmatprep.mubr.msk.bf16.mxu1 %vm7927_vm1, %v7926_v12 }
 0x4be   : > { %7661 = vmatpush3.bf16.msra.mxu1 %v7780_v34 }
 0x4bf   : > { %7662 = vmatprep.subr.bf16.mxu1 %v7926_v12 }
 0x4c0   : > { %7647 = vmatpush3.bf16.msra.mxu0 %v6421_v19 }
 0x4c1   : > { %7648 = vmatprep.subr.bf16.mxu0 %v7926_v12 }
 0x4c2   : > { %7663 = vmatpush3.bf16.msra.mxu1 %v7781_v43  ;;  %v7789_v43 = vld [vmem:[%s9808_s14 + $0x28] sm:$0xff]  }
 0x4c3   : > { %7668 = vmatprep.subr.bf16.mxu1 %v7926_v12 }
 0x4c4   : > { %7649 = vmatpush3.bf16.msra.mxu0 %v6422_v20 }
 0x4c5   : > { %7650 = vmatprep.subr.bf16.mxu0 %v7926_v12 }
 0x4c8   : > { %7651 = vmatpush3.bf16.msra.mxu0 %v6423_v27 }
 0x4c9   : > { %7652 = vmatprep.subr.bf16.mxu0 %v7926_v12 }
 0x4cc   : > { %7653 = vmatpush3.bf16.msra.mxu0 %v6424_v49 }
 0x4cd   : > { %7654 = vmatprep.subr.bf16.mxu0 %v7926_v12 }
 0x4d0   : > { %7655 = vmatpush3.bf16.msra.mxu0 %v6425_v38 }
 0x4d3   : > { %7657 = vmatmul.mubr.bf16.vlgmr.msra.gmra.mrb[36].mxu0 %v6317_v58 }
 0x566   : > { %v6388_v47 = vpop.f32.mrb[28].mxu0 }
 0x567   : > { %v6392_v15 = vadd.f32 %v6388_v47, %v6318_v10  ;;  %v7579_v5 = vpop.f32.mrb[29].mxu0  ;;  %v7299_v47 = vld [vmem:[%s9803_s9] ss:$0 sm:$0xff] }
 0x569   : > { %6393 = vst [vmem:[%s9523_s24] sm:$0x1] %v6392_v15 }
 0x56f   : > { %v6460_v57 = vpop.f32.mrb[24].mxu1 }
 0x570   : > { %v7598_v53 = vpop.f32.mrb[25].mxu1 }
 0x571   : > { %v6463_v18 = vpop.f32.mrb[26].mxu1 }
 0x572   : > { %v7599_v46 = vpop.f32.mrb[27].mxu1  ;;  %v7813_v18 = vld [vmem:[%s8148_s25] sm:$0xff] }
 0x586   : > { %v6500_v1 = vpop.f32.mrb[32].mxu0 }
 0x587   : > { %v7618_v42 = vpop.f32.mrb[33].mxu0 }
 0x588   : > { %v6503_v32 = vpop.f32.mrb[34].mxu0 }
 0x589   : > { %v7619_v48 = vpop.f32.mrb[35].mxu0 }
 0x58f   : > { %v6540_v14 = vpop.f32.mrb[28].mxu1 }
 0x590   : > { %v6586_v11 = vcombine.low %v6460_v57, %v6540_v14  ;;  %v6587_v16 = vcombine.high %v6460_v57, %v6540_v14  ;;  %v7638_v26 = vpop.f32.mrb[29].mxu1 }
 0x591   : > { %v6543_v9 = vpop.f32.mrb[30].mxu1  ;;  %v7782_v26 = vld [vmem:[%s9806_s12] sm:$0xff]  }
 0x592   : > { %v7639_v59 = vpop.f32.mrb[31].mxu1  ;;  %v6594_v6 = vrot.slane %v6586_v11, %v8336_v24  ;;  %v6601_v0 = vrot.slane %v6587_v16, %v8336_v24  ;;  %v7783_v9 = vld [vmem:[%s9806_s12 + $0x8] sm:$0xff]  }
 0x5a6   : > { %v6580_v51 = vpop.f32.mrb[36].mxu0 }
 0x5a7   : > { %v6602_v52 = vcombine.low %v6500_v1, %v6580_v51  ;;  %v6603_v33 = vcombine.high %v6500_v1, %v6580_v51  ;;  %v7658_v7 = vpop.f32.mrb[37].mxu0 }
 0x5a8   : > { %v6583_v2 = vpop.f32.mrb[38].mxu0  ;;  %v7303_v7 = vld [vmem:[%s9804_s10] ss:$0 sm:$0xff] }
 0x5a9   : > { %v6610_v31 = vrot.slane %v6602_v52, %v8336_v24  ;;  %v6617_v13 = vrot.slane %v6603_v33, %v8336_v24  ;;  %v7659_v36 = vpop.f32.mrb[39].mxu0 }
 0x5ab   : > { %v6618_v41 = vcombine.low %v6594_v6, %v6610_v31  ;;  %v6619_v8 = vcombine.high %v6594_v6, %v6610_v31  ;;  %v6634_v45 = vcombine.low %v6601_v0, %v6617_v13  ;;  %v6635_v50 = vcombine.high %v6601_v0, %v6617_v13  ;;  %v7304_v6 = vld [vmem:[%s9805_s11] ss:$0 sm:$0xff] }
 0x5ac   : > { %v7784_v13 = vld [vmem:[%s9808_s14] sm:$0xff]  }
 0x5ad   : > { %v6626_v4 = vrot.slane %v6618_v41, %v8340_v30  ;;  %v6633_v21 = vrot.slane %v6619_v8, %v8340_v30  ;;  %v6642_v35 = vrot.slane %v6634_v45, %v8340_v30  ;;  %v6649_v22 = vrot.slane %v6635_v50, %v8340_v30  ;;  %v7785_v41 = vld [vmem:[%s9808_s14 + $0x8] sm:$0xff]   ;;  %v7786_v8 = vld [vmem:[%s9808_s14 + $0x10] sm:$0xff]   ;;  %v7787_v45 = vld [vmem:[%s9808_s14 + $0x18] sm:$0xff]  }
 0x5ae   : > { %v7788_v50 = vld [vmem:[%s9808_s14 + $0x20] sm:$0xff]  }
 0x5af   : > { %v6654_v17 = vcombine.low %v6626_v4, %v6633_v21  ;;  %v7297_v54 = vcombine.high %v6626_v4, %v6633_v21  ;;  %v6670_v63 = vcombine.low %v6642_v35, %v6649_v22  ;;  %v7298_v28 = vcombine.high %v6642_v35, %v6649_v22  ;;  %v7790_v4 = vld [vmem:[%s9808_s14 + $0x30] sm:$0xff]   ;;  %v7791_v21 = vld [vmem:[%s9808_s14 + $0x38] sm:$0xff]   ;;  %v7305_v35 = vld [vmem:[%s9807_s13] ss:$0 sm:$0xff] }
 0x5b1   : > { %v6661_v3 = vrot.slane %v6654_v17, %v8336_v24  ;;  %v6669_v25 = vrot.slane %v7297_v54, %v8336_v24  ;;  %v6677_v39 = vrot.slane %v6670_v63, %v8336_v24  ;;  %v6685_v44 = vrot.slane %v7298_v28, %v8336_v24 }
 0x5b3   : > { %v6687_v60 = vcombine.high %v6661_v3, %v6669_v25  ;;  %v6703_v56 = vcombine.high %v6677_v39, %v6685_v44  ;;  %v6686_v29 = vcombine.low %v6661_v3, %v6669_v25  ;;  %v6702_v62 = vcombine.low %v6677_v39, %v6685_v44  ;;  %v7309_v39 = vld [vmem:[%s9809_s15] ss:$0 sm:$0xff] }
 0x5b5   : > { %v6701_v61 = vrot.slane %v6687_v60, %v8340_v30  ;;  %v6717_v23 = vrot.slane %v6703_v56, %v8340_v30  ;;  %v6694_v37 = vrot.slane %v6686_v29, %v8340_v30  ;;  %v6710_v40 = vrot.slane %v6702_v62, %v8340_v30 }
 0x5b7   : > { %v6720_v55 = vcombine.low %v6701_v61, %v6717_v23  ;;  %v6719_v19 = vcombine.high %v6694_v37, %v6710_v40  ;;  %v6721_v20 = vcombine.high %v6701_v61, %v6717_v23  ;;  %v6718_v27 = vcombine.low %v6694_v37, %v6710_v40 }
 0x5b9   : > { %6727 = vrot.lane.b32.xlu0 %v6720_v55, %s7935_s29  ;;  %6723 = vrot.lane.b32.xlu1 %v6719_v19, %s7936_s2  ;;  %s9714_s2 = scalar_lea.hbm %s9813_s19, %s7322_s27 }
 0x5bd   : > { %6731 = vrot.lane.b32.xlu1 %v6721_v20, %s7937_s0  ;;  %s7054_s0 = scalar_lea.sflag [#allocation7], %s9520_s1 }
 0x62b   : > { %v6724_v24 = vpop.permute.xlu1 %6723  ;;  %v6728_v49 = vpop.permute.xlu0 %6727 }
 0x62c   : > { %v6734_v38 = vsel %vm3315_vm2, %v6718_v27, %v6724_v24 }
 0x62d   : > { %v6736_v34 = vsel %vm6735_vm4, %v6734_v38, %v6728_v49 }
 0x62f   : > { %v6732_v58 = vpop.permute.xlu1 %6731 }
 0x630   : > { %v6738_v30 = vsel %vm6737_vm5, %v6736_v34, %v6732_v58 }
 0x631   : > { %v6739_v10 = vpack.c.bf16 %v6738_v30, %v6738_v30 }
 0x633   : > { %7665 = vmatmul.mubr.msk.bf16.vlgmr.msra.gmra.mrb[32].mxu1 %vm705_vm0, %v6739_v10 }
 0x634   : > { %7672 = vmatprep.mubr.msk.bf16.mxu1 %vm7927_vm1, %v7926_v12  ;;  %7669 = vmatpush3.bf16.msra.mxu1 %v7782_v26 }
 0x635   : > { %7670 = vmatprep.subr.bf16.mxu1 %v7926_v12 }
 0x638   : > { %7671 = vmatpush3.bf16.msra.mxu1 %v7783_v9 }
 0x639   : > { %7676 = vmatprep.subr.bf16.mxu1 %v7926_v12 }
 0x706   : > { %v6800_v15 = vpop.f32.mrb[32].mxu1 }
 0x707   : > { %v6801_v5 = vadd.f32 %v7299_v47, %v6800_v15  ;;  %v7666_v57 = vpop.f32.mrb[33].mxu1 }
 0x708   : > { %v6803_v53 = vpop.f32.mrb[34].mxu1 }
 0x709   : > { %v6806_v46 = vadd.f32 %v7813_v18, %v6801_v5  ;;  %v7667_v1 = vpop.f32.mrb[35].mxu1 }
 0x70b   : > { %v6807_v42 = vsel %vm705_vm0, %v6806_v46, 0.0 }
 0x70c   : > { %6808 = vadd.xlane.f32.xlu0 %v6807_v42 }
 0x799   : > { %v6809_v32 = vpop.xlane.xlu0 %6808 }
 0x79a   : > { %v6811_v48 = vmul.f32 0.03125, %v6809_v32 }
 0x79c   : > { %v6812_v14 = vsub.f32 %v6806_v46, %v6811_v48 }
 0x79e   : > { %v6813_v11 = vmul.f32 %v6812_v14, %v6812_v14 }
 0x7a0   : > { %v6814_v16 = vsel %vm705_vm0, %v6813_v11, 0.0 }
 0x7a1   : > { %6815 = vadd.xlane.f32.xlu1 %v6814_v16 }
 0x82e   : > { %v6816_v59 = vpop.xlane.xlu1 %6815 }
 0x82f   : > { %v6817_v51 = vmul.f32 0.03125, %v6816_v59 }
 0x831   : > { %v6818_v52 = vadd.f32 1e-05, %v6817_v51 }
 0x833   : > { %7808 = vrsqrt.f32 %v6818_v52 }
 0x83d   : > { %v7809_v33 = vpop.eup %7808 }
 0x83e   : > { %v6820_v2 = vmul.f32 %v7809_v33, %v6812_v14 }
 0x840   : > { %v6828_v0 = vmul.f32 %v7303_v7, %v6820_v2 }
 0x842   : > { %v6836_v31 = vadd.f32 %v7304_v6, %v6828_v0 }
 0x844   : > { %v6837_v36 = vpack.c.bf16 %v6836_v31, %v6836_v31 }
 0x846   : > { %7673 = vmatmul.mubr.msk.bf16.vlgmr.msra.gmra.mrb[36].mxu1 %vm705_vm0, %v6837_v36 }
 0x847   : > { %7677 = vmatpush3.bf16.msra.mxu1 %v7784_v13  ;;  %7692 = vmatprep.mubr.msk.bf16.mxu1 %vm7927_vm1, %v7926_v12 }
 0x848   : > { %7678 = vmatprep.subr.bf16.mxu1 %v7926_v12 }
 0x84b   : > { %7679 = vmatpush3.bf16.msra.mxu1 %v7785_v41 }
 0x84c   : > { %7680 = vmatprep.subr.bf16.mxu1 %v7926_v12 }
 0x84f   : > { %7681 = vmatpush3.bf16.msra.mxu1 %v7786_v8 }
 0x850   : > { %7682 = vmatprep.subr.bf16.mxu1 %v7926_v12 }
 0x853   : > { %7683 = vmatpush3.bf16.msra.mxu1 %v7787_v45 }
 0x854   : > { %7684 = vmatprep.subr.bf16.mxu1 %v7926_v12 }
 0x857   : > { %7685 = vmatpush3.bf16.msra.mxu1 %v7788_v50 }
 0x858   : > { %7686 = vmatprep.subr.bf16.mxu1 %v7926_v12 }
 0x85b   : > { %7687 = vmatpush3.bf16.msra.mxu1 %v7789_v43 }
 0x85c   : > { %7688 = vmatprep.subr.bf16.mxu1 %v7926_v12 }
 0x85f   : > { %7689 = vmatpush3.bf16.msra.mxu1 %v7790_v4 }
 0x860   : > { %7690 = vmatprep.subr.bf16.mxu1 %v7926_v12 }
 0x863   : > { %7691 = vmatpush3.bf16.msra.mxu1 %v7791_v21 }
 0x919   : > { %v6898_v22 = vpop.f32.mrb[36].mxu1 }
 0x91a   : > { %v6899_v17 = vadd.f32 %v7305_v35, %v6898_v22  ;;  %v7674_v54 = vpop.f32.mrb[37].mxu1 }
 0x91b   : > { %v6901_v63 = vpop.f32.mrb[38].mxu1 }
 0x91c   : > { %v6904_v28 = vmax.f32 %v6899_v17, 0.0  ;;  %v7675_v3 = vpop.f32.mrb[39].mxu1 }
 0x91e   : > { %v6905_v25 = vpack.c.bf16 %v6904_v28, %v6904_v28 }
 0x920   : > { %7693 = vmatmul.mubr.bf16.vlgmr.msra.gmra.mrb[40].mxu1 %v6905_v25 }
 0x9f3   : > { %v7011_v12 = vpop.f32.mrb[40].mxu1 }
 0x9f4   : > { %v7012_v44 = vadd.f32 %v7309_v39, %v7011_v12  ;;  %v7694_v60 = vpop.f32.mrb[41].mxu1 }
 0x9f5   : > { %v7014_v56 = vpop.f32.mrb[42].mxu1 }
 0x9f6   : > { %v7017_v29 = vadd.f32 %v7012_v44, %v6836_v31  ;;  %v7695_v62 = vpop.f32.mrb[43].mxu1 }
 0x9f8   : > { %v7018_v61 = vsel %vm705_vm0, %v7017_v29, 0.0 }
 0x9f9   : > { %7019 = vadd.xlane.f32.xlu0 %v7018_v61 }
 0xa86   : > { %v7020_v23 = vpop.xlane.xlu0 %7019 }
 0xa87   : > { %v7021_v37 = vmul.f32 0.03125, %v7020_v23 }
 0xa89   : > { %v7022_v40 = vsub.f32 %v7017_v29, %v7021_v37 }
 0xa8b   : > { %v7023_v55 = vmul.f32 %v7022_v40, %v7022_v40 }
 0xa8d   : > { %v7024_v19 = vsel %vm705_vm0, %v7023_v55, 0.0 }
 0xa8e   : > { %7025 = vadd.xlane.f32.xlu0 %v7024_v19 }
 0xa8f   : > { %7827 = shalt.err (!%p7824_p5)
}
 0xa90   : > { %s7828_s24 = scalar_lea.hbm %s9714_s2, 16  ;;  %s7832_s25 = scalar_lea.hbm %s9813_s19, 32 }
 0xa91   : > { %p7829_p6 = scmp.ne.s32.totalorder %s9714_s2, %s7828_s24  ;;  %p7833_p10 = scmp.lt.u32.totalorder %s9714_s2, %s9813_s19 }
 0xa92   : > { %p7834_p11 = scmp.lt.u32.totalorder %s7832_s25, %s7828_s24  ;;  %p7836_p13 = scmp.lt.u32.totalorder %s7828_s24, %s9714_s2 }
 0xa93   : > { %p7830_p7 = pnand %p7829_p6, %p8080_p4 }
 0xa94   : > { %p7835_p12 = por %p7834_p11, %p7833_p10 }
 0xa95   : > { %p7831_p9 = pneg %p7830_p7 }
 0xa96   : > { %p7837_p0 = por %p7836_p13, %p7835_p12 }
 0xa98   : > { %p7838_p1 = pnand %p7837_p0, %p7831_p9 }
 0xa9a   : > { %7841 = shalt.err (!%p7838_p1)
}
 0xa9b   : > { %7703 = dma.vmem_to_hbm [thread:$0]  (%p8080_p4), %s7081_s26, 16, %s9714_s2, %s7054_s0   ;;  %v7318_v38 = vld [vmem:[%s9810_s16] ss:$0 sm:$0xff] }
 0xa9c   : > { %s7196_s4 = sshll.u32 %s9520_s1, 3  ;;  %v7319_v34 = vld [vmem:[%s9811_s17] ss:$0 sm:$0xff]  ;;  %s7321_s25 = sshll.u32 %s7916_s21, 7 }
 0xa9d   : > { %s634_s28 = scalar_lea.vmem [#allocation4], %s7196_s4  ;;  %s9843_s23 = sld [smem:[#allocation22_spill]] }
 0xa9e   : > { %s7067_s26 = sshll.u32 %s634_s28, 4  ;;  %s7049_s20 = scalar_lea.sflag [#allocation5], %s9520_s1  ;;  %s9747_s26 = int_to_ptr.vmem [resolvable:$true] %s7067_s26 }
 0xa9f   : > { %s7842_s27 = scalar_lea.vmem %s9747_s26, 128  ;;  %s7939_s21 = smov [#allocation4]  }
 0xaa0   : > { %p7843_p2 = scmp.ne.s32.totalorder %s9747_s26, %s7842_s27  ;;  %s7846_s4 = sshll.u32 %s7939_s21, 4  ;;  %s7847_s4 = int_to_ptr.vmem [resolvable:$false] %s7846_s4 }
 0xaa1   : > { %s7848_s24 = scalar_lea.vmem %s7847_s4, 256  ;;  %p7849_p6 = scmp.lt.s32.totalorder %s9747_s26, %s7847_s4 }
 0xaa2   : > { %p7844_p3 = pnand %p7843_p2, %p8080_p4  ;;  %p7850_p7 = scmp.lt.s32.totalorder %s7848_s24, %s7842_s27 }
 0xaa3   : > { %s9745_s5 = scalar_lea.hbm %s9843_s23, %s7321_s25 }
 0xaa4   : > { %p7845_p5 = pneg %p7844_p3  ;;  %p7851_p9 = por %p7850_p7, %p7849_p6 }
 0xaa6   : > { %p7852_p10 = pnand %p7851_p9, %p7845_p5 }
 0xb1b   : > { %v7026_v20 = vpop.xlane.xlu0 %7025 }
 0xb1c   : > { %v7027_v27 = vmul.f32 0.03125, %v7026_v20 }
 0xb1e   : > { %v7028_v24 = vadd.f32 1e-05, %v7027_v27 }
 0xb20   : > { %7810 = vrsqrt.f32 %v7028_v24 }
 0xb2a   : > { %v7811_v49 = vpop.eup %7810 }
 0xb2b   : > { %v7030_v58 = vmul.f32 %v7811_v49, %v7022_v40 }
 0xb2d   : > { %v7038_v30 = vmul.f32 %v7318_v38, %v7030_v58 }
 0xb2f   : > { %v7046_v10 = vadd.f32 %v7319_v34, %v7038_v30 }
 0xb31   : > { %7047 = vst.msk [vmem:[%s634_s28] sm:$0xff] %vm705_vm0, %v7046_v10 }
 0xb32   : > { %7855 = shalt.err (!%p7852_p10)
}
 0xb33   : > { %s7856_s1 = scalar_lea.hbm %s9745_s5, 128  ;;  %s7860_s28 = scalar_lea.hbm %s9843_s23, 256 }
 0xb34   : > { %p7857_p11 = scmp.ne.s32.totalorder %s9745_s5, %s7856_s1  ;;  %p7861_p0 = scmp.lt.u32.totalorder %s9745_s5, %s9843_s23 }
 0xb35   : > { %p7862_p1 = scmp.lt.u32.totalorder %s7860_s28, %s7856_s1  ;;  %p7864_p3 = scmp.lt.u32.totalorder %s7856_s1, %s9745_s5 }
 0xb36   : > { %p7858_p12 = pnand %p7857_p11, %p8080_p4 }
 0xb37   : > { %p7863_p2 = por %p7862_p1, %p7861_p0 }
 0xb38   : > { %p7859_p13 = pneg %p7858_p12 }
 0xb39   : > { %p7865_p5 = por %p7864_p3, %p7863_p2 }
 0xb3b   : > { %p7866_p6 = pnand %p7865_p5, %p7859_p13 }
 0xb3d   : > { %7869 = shalt.err (!%p7866_p6)
}
 0xb3e   : > { %7702 = dma.vmem_to_hbm [thread:$0]  (%p8080_p4), %s9747_s26, 128, %s9745_s5, %s7049_s20  }
 0xb3f PF: > { %s9844_s27 = sld [smem:[#allocation10_spill]]  ;;  %p7713_p7 = scmp.ge.s32.totalorder %s7924_s22, 2 }
 0xb41   : > { %p7707_p9 = pnand %p7713_p7, %p8087_p8 }
 0xb45   : > { %s7092_s4 = sand.u32 1, %s9844_s27  }
 0xb46   : > { %s7093_s24 = scalar_lea.sflag [#allocation5], %s7092_s4 }
 0xb47   : > { %7895 = dma.done.wait (!%p7707_p9), %s7093_s24, 128  }
 0xb48   : > { %7897 = vsyncadd (!%p7707_p9), %s7093_s24, 4294967168  ;;  %s7102_s1 = scalar_lea.sflag [#allocation7], %s7092_s4 }
 0xb49   : > { %7899 = dma.done.wait (!%p7707_p9), %s7102_s1, 16  }
 0xb4a   : > { %7901 = vsyncadd (!%p7707_p9), %s7102_s1, 4294967280  ;;  %s36_s22 = sadd.s32 1, %s7924_s22   ;;  %s9846_s3 = sld [smem:[#allocation11_spill]] }
 0xb4b   : > { %p33_p10 = scmp.ge.s32.totalorder %s36_s22, 4   ;;  %s9847_s20 = sld [smem:[#allocation15_spill]] }
 0xb4c   : > { %s9848_s21 = sld [smem:[#allocation12_spill]]  ;;  %s9849_s1 = sld [smem:[#allocation13_spill]] }
 0xb4d   : > { %s9850_s0 = smov %s7908_s30  ;;  %35 = sbr.rel (!%p33_p10) target bundleno = 14 (0xe), region = 151 }
 0xb50   : > { %s9851_s30 = smov %s9846_s3 }
 0xb54   :  { %7106 = vsyncpa [#allocation5], 1 }
 0xb55   :  { %7108 = vsyncpa [#allocation5 + $0x1], 1 }
 0xb56   :  { %7109 = vsyncpa [#allocation7], 1 }
 0xb57   :  { %7111 = vsyncpa [#allocation7 + $0x1], 1 }

</bundles_post_ra>
